<compile_context>
chip_gen: v7x
topology: tpu7x:2x2x1
jax: 0.10.0
libtpu: 0.0.40
codegen_flags: <defaults>
</compile_context>

<pallas_src>
import jax
import jax.numpy as jnp
from jax.experimental import pallas as pl
from jax.experimental.pallas import tpu as pltpu

DILATIONS = (6, 12, 18, 24)   # == padding_series, so spatial size is preserved


def _live_taps(H, W):
    """Taps whose shifted window intersects the image (static given H, W)."""
    taps = []
    for bi, d in enumerate(DILATIONS):
        for ky in range(3):
            dy = (ky - 1) * d
            if abs(dy) >= H:
                continue
            for kx in range(3):
                dx = (kx - 1) * d
                if abs(dx) >= W:
                    continue
                taps.append((bi, ky, kx, dy, dx))
    return taps


def _aspp_kernel(x_ref, w_ref, b_ref, o_ref, lhs_ref):
    # x_ref:   (NB, H, W, C)          input tile (NB batch images), orig dtype
    # w_ref:   (K_live*C, NCp) bf16   pre-concatenated live-tap weights
    # b_ref:   (1, NCp) f32           bias pre-summed over the four branches
    # o_ref:   (NB*H*W, NCp)          lane-dense logits
    # lhs_ref: (NB, H, W, K_live*C) bf16   im2col LHS scratch (lane-dense minor)
    NB, H, W, C = x_ref.shape
    Kc = lhs_ref.shape[-1]
    cdt = lhs_ref.dtype

    taps = _live_taps(H, W)   # same static order as the wrapper's weight concat
    for t, (_, _, _, dy, dx) in enumerate(taps):
        cs = t * C
        y0, y1 = max(0, -dy), min(H, H - dy)   # valid output rows for this tap
        x0, x1 = max(0, -dx), min(W, W - dx)   # valid output cols for this tap
        # Zero only the out-of-image border strips of this tap's K-slot; the
        # valid interior below is written exactly once (no double write).
        if y0 > 0:
            lhs_ref[:, :y0, :, cs:cs + C] = jnp.zeros((NB, y0, W, C), cdt)
        if y1 < H:
            lhs_ref[:, y1:, :, cs:cs + C] = jnp.zeros((NB, H - y1, W, C), cdt)
        if x0 > 0:
            lhs_ref[:, y0:y1, :x0, cs:cs + C] = jnp.zeros((NB, y1 - y0, x0, C), cdt)
        if x1 < W:
            lhs_ref[:, y0:y1, x1:, cs:cs + C] = jnp.zeros((NB, y1 - y0, W - x1, C), cdt)
        # Copy the shifted (valid) window straight from the input block into
        # the K-slot, casting to bf16 on the way.
        lhs_ref[:, y0:y1, x0:x1, cs:cs + C] = (
            x_ref[:, y0 + dy:y1 + dy, x0 + dx:x1 + dx, :].astype(cdt))

    # Single fused im2col matmul: (NB*H*W, Kc) x (Kc, NCp), f32 accumulation.
    lhs = lhs_ref[...].reshape(NB * H * W, Kc)
    acc = jnp.dot(lhs, w_ref[...], preferred_element_type=jnp.float32)
    o_ref[...] = (acc + b_ref[...]).astype(o_ref.dtype)


@jax.jit
def dec_final_classifier(x_nchw, weights, biases):
    """x_nchw: (N, C, H, W); weights: (4, 3, 3, C, NC) HWIO; biases: (4, NC)."""
    x = jnp.transpose(x_nchw, (0, 2, 3, 1))                   # NCHW -> NHWC
    N, H, W, C = x.shape
    NC = weights.shape[-1]
    NCp = ((NC + 127) // 128) * 128                           # lane-dense classes

    taps = _live_taps(H, W)
    Kc = len(taps) * C

    # Pad classes with zero weights, concatenate the live-tap weight slices
    # (same order as the kernel's tap loop) into one (Kc, NCp) bf16 RHS, and
    # pre-sum the biases over the four branches (kept f32 for the epilogue).
    w_p = jnp.pad(weights, ((0, 0),) * 4 + ((0, NCp - NC),))
    w_cat = jnp.concatenate(
        [w_p[bi, ky, kx] for (bi, ky, kx, _, _) in taps], axis=0
    ).astype(jnp.bfloat16)                                    # (Kc, NCp)
    b_sum = jnp.pad(jnp.sum(biases, axis=0), (0, NCp - NC)
                    ).reshape(1, NCp).astype(jnp.float32)

    # Fold as much of the batch as comfortably fits VMEM into one grid step
    # (M = NB*H*W): at small spatial sizes this kills per-step overhead and
    # fills the MXU rows; NB must divide N so every block is full.
    per_img = H * W * (Kc * 2 + C * x.dtype.itemsize + NCp * 4)
    NB = max(1, min(N, (4 * 1024 * 1024) // max(per_img, 1)))
    while N % NB:
        NB -= 1

    out = pl.pallas_call(
        _aspp_kernel,
        out_shape=jax.ShapeDtypeStruct((N * H * W, NCp), x.dtype),
        grid_spec=pltpu.PrefetchScalarGridSpec(
            num_scalar_prefetch=0,
            grid=(N // NB,),
            in_specs=[
                pl.BlockSpec((NB, H, W, C), lambda g: (g, 0, 0, 0)),
                pl.BlockSpec((Kc, NCp), lambda g: (0, 0)),
                pl.BlockSpec((1, NCp), lambda g: (0, 0)),
            ],
            out_specs=pl.BlockSpec((NB * H * W, NCp), lambda g: (g, 0)),
            scratch_shapes=[pltpu.VMEM((NB, H, W, Kc), jnp.bfloat16)],
        ),
        compiler_params=pltpu.CompilerParams(
            dimension_semantics=("parallel",),
            vmem_limit_bytes=32 * 1024 * 1024,
        ),
    )(x, w_cat, b_sum)

    out = out.reshape(N, H, W, NCp)[..., :NC]                 # drop class padding
    return jnp.transpose(out, (0, 3, 1, 2))                   # NHWC -> NCHW


def _reference(x_nchw, weights, biases):
    """Pure-JAX f32 reference via lax.conv_general_dilated (PyTorch semantics)."""
    x = jnp.transpose(x_nchw, (0, 2, 3, 1))
    out = None
    for i, d in enumerate(DILATIONS):
        o = jax.lax.conv_general_dilated(
            x, weights[i],
            window_strides=(1, 1),
            padding=[(d, d), (d, d)],
            rhs_dilation=(d, d),
            dimension_numbers=("NHWC", "HWIO", "NHWC"),
        ) + biases[i][None, None, None, :]
        out = o if out is None else out + o
    return jnp.transpose(out, (0, 3, 1, 2))


if __name__ == "__main__":
    # Small, module-consistent shapes: batch=2, inpdim=32, spatial=16, classes=8
    N, C, H, W = 2, 32, 16, 16
    NUM_CLASSES = 8

    key = jax.random.PRNGKey(0)
    kx, kw, kb = jax.random.split(key, 3)

    x = jax.random.normal(kx, (N, C, H, W), dtype=jnp.float32)
    # Conv weights: normal(0, 0.01) as in the PyTorch __init__; stored HWIO.
    weights = 0.01 * jax.random.normal(
        kw, (len(DILATIONS), 3, 3, C, NUM_CLASSES), dtype=jnp.float32)
    biases = 0.01 * jax.random.normal(
        kb, (len(DILATIONS), NUM_CLASSES), dtype=jnp.float32)

    out = dec_final_classifier(x, weights, biases)
    out = jax.block_until_ready(out)

    ref = _reference(x, weights, biases)
    assert out.shape == (N, NUM_CLASSES, H, W), out.shape
    # bf16 operands with f32 accumulation over K=len(live_taps)*C=640: expected
    # max abs error ~1e-3 at these scales (output std ~0.25); 2e-2 is generous.
    max_err = float(jnp.max(jnp.abs(out - ref)))
    assert max_err < 2e-2, max_err

    print("KERNEL_OK")
</pallas_src>

<mosaic_0001>
module attributes {stable_mosaic.version = 11 : i64} {
  func.func @_aspp_kernel(%arg0: i32, %arg1: memref<2x16x16x32xf32, #tpu.memory_space<vmem>>, %arg2: memref<640x128xbf16, #tpu.memory_space<vmem>>, %arg3: memref<1x128xf32, #tpu.memory_space<vmem>>, %arg4: memref<512x128xf32, #tpu.memory_space<vmem>>, %arg5: memref<2x16x16x640xbf16, #tpu.memory_space<vmem>>) attributes {dimension_semantics = [#tpu.dimension_semantics<parallel>], iteration_bounds = array<i64: 1>, scalar_prefetch = 0 : i64, scratch_operands = 1 : i64, tpu.core_type = #tpu.core_type<tc>, window_params = [{transform_indices = @transform_0, window_bounds = array<i64: 2, 16, 16, 32>}, {pipeline_mode = #tpu.pipeline_mode<synchronous>, transform_indices = @transform_1, window_bounds = array<i64: 640, 128>}, {pipeline_mode = #tpu.pipeline_mode<synchronous>, transform_indices = @transform_2, window_bounds = array<i64: 1, 128>}, {transform_indices = @transform_3, window_bounds = array<i64: 512, 128>}]} {
    %cst = arith.constant 0.000000e+00 : bf16
    %0 = vector.broadcast %cst : bf16 to vector<2x6x16x32xbf16>
    %c0 = arith.constant 0 : index
    %c0_0 = arith.constant 0 : index
    %c0_1 = arith.constant 0 : index
    %c0_2 = arith.constant 0 : index
    %1 = vector.load %arg5[%c0, %c0_0, %c0_1, %c0_2] : memref<2x16x16x640xbf16, #tpu.memory_space<vmem>>, vector<2x6x16x32xbf16>
    tpu.vector_store %arg5[%c0, %c0_0, %c0_1, %c0_2], %0 {strides = array<i32>} : memref<2x16x16x640xbf16, #tpu.memory_space<vmem>>, vector<2x6x16x32xbf16>,
    %cst_3 = arith.constant 0.000000e+00 : bf16
    %2 = vector.broadcast %cst_3 : bf16 to vector<2x10x6x32xbf16>
    %c0_4 = arith.constant 0 : index
    %c6 = arith.constant 6 : index
    %c0_5 = arith.constant 0 : index
    %c0_6 = arith.constant 0 : index
    %3 = vector.load %arg5[%c0_4, %c6, %c0_5, %c0_6] : memref<2x16x16x640xbf16, #tpu.memory_space<vmem>>, vector<2x10x6x32xbf16>
    tpu.vector_store %arg5[%c0_4, %c6, %c0_5, %c0_6], %2 {strides = array<i32>} : memref<2x16x16x640xbf16, #tpu.memory_space<vmem>>, vector<2x10x6x32xbf16>,
    %c0_7 = arith.constant 0 : index
    %c0_8 = arith.constant 0 : index
    %c0_9 = arith.constant 0 : index
    %c0_10 = arith.constant 0 : index
    %4 = vector.load %arg1[%c0_7, %c0_8, %c0_9, %c0_10] : memref<2x16x16x32xf32, #tpu.memory_space<vmem>>, vector<2x10x10x32xf32>
    %5 = arith.truncf %4 : vector<2x10x10x32xf32> to vector<2x10x10x32xbf16>
    %c0_11 = arith.constant 0 : index
    %c6_12 = arith.constant 6 : index
    %c6_13 = arith.constant 6 : index
    %c0_14 = arith.constant 0 : index
    %6 = vector.load %arg5[%c0_11, %c6_12, %c6_13, %c0_14] : memref<2x16x16x640xbf16, #tpu.memory_space<vmem>>, vector<2x10x10x32xbf16>
    tpu.vector_store %arg5[%c0_11, %c6_12, %c6_13, %c0_14], %5 {strides = array<i32>} : memref<2x16x16x640xbf16, #tpu.memory_space<vmem>>, vector<2x10x10x32xbf16>,
    %cst_15 = arith.constant 0.000000e+00 : bf16
    %7 = vector.broadcast %cst_15 : bf16 to vector<2x6x16x32xbf16>
    %c0_16 = arith.constant 0 : index
    %c0_17 = arith.constant 0 : index
    %c0_18 = arith.constant 0 : index
    %c32 = arith.constant 32 : index
    %8 = vector.load %arg5[%c0_16, %c0_17, %c0_18, %c32] : memref<2x16x16x640xbf16, #tpu.memory_space<vmem>>, vector<2x6x16x32xbf16>
    tpu.vector_store %arg5[%c0_16, %c0_17, %c0_18, %c32], %7 {strides = array<i32>} : memref<2x16x16x640xbf16, #tpu.memory_space<vmem>>, vector<2x6x16x32xbf16>,
    %c0_19 = arith.constant 0 : index
    %c0_20 = arith.constant 0 : index
    %c0_21 = arith.constant 0 : index
    %c0_22 = arith.constant 0 : index
    %9 = vector.load %arg1[%c0_19, %c0_20, %c0_21, %c0_22] : memref<2x16x16x32xf32, #tpu.memory_space<vmem>>, vector<2x10x16x32xf32>
    %10 = arith.truncf %9 : vector<2x10x16x32xf32> to vector<2x10x16x32xbf16>
    %c0_23 = arith.constant 0 : index
    %c6_24 = arith.constant 6 : index
    %c0_25 = arith.constant 0 : index
    %c32_26 = arith.constant 32 : index
    %11 = vector.load %arg5[%c0_23, %c6_24, %c0_25, %c32_26] : memref<2x16x16x640xbf16, #tpu.memory_space<vmem>>, vector<2x10x16x32xbf16>
    tpu.vector_store %arg5[%c0_23, %c6_24, %c0_25, %c32_26], %10 {strides = array<i32>} : memref<2x16x16x640xbf16, #tpu.memory_space<vmem>>, vector<2x10x16x32xbf16>,
    %cst_27 = arith.constant 0.000000e+00 : bf16
    %12 = vector.broadcast %cst_27 : bf16 to vector<2x6x16x32xbf16>
    %c0_28 = arith.constant 0 : index
    %c0_29 = arith.constant 0 : index
    %c0_30 = arith.constant 0 : index
    %c64 = arith.constant 64 : index
    %13 = vector.load %arg5[%c0_28, %c0_29, %c0_30, %c64] : memref<2x16x16x640xbf16, #tpu.memory_space<vmem>>, vector<2x6x16x32xbf16>
    tpu.vector_store %arg5[%c0_28, %c0_29, %c0_30, %c64], %12 {strides = array<i32>} : memref<2x16x16x640xbf16, #tpu.memory_space<vmem>>, vector<2x6x16x32xbf16>,
    %cst_31 = arith.constant 0.000000e+00 : bf16
    %14 = vector.broadcast %cst_31 : bf16 to vector<2x10x6x32xbf16>
    %c0_32 = arith.constant 0 : index
    %c6_33 = arith.constant 6 : index
    %c10 = arith.constant 10 : index
    %c64_34 = arith.constant 64 : index
    %15 = vector.load %arg5[%c0_32, %c6_33, %c10, %c64_34] : memref<2x16x16x640xbf16, #tpu.memory_space<vmem>>, vector<2x10x6x32xbf16>
    tpu.vector_store %arg5[%c0_32, %c6_33, %c10, %c64_34], %14 {strides = array<i32>} : memref<2x16x16x640xbf16, #tpu.memory_space<vmem>>, vector<2x10x6x32xbf16>,
    %c0_35 = arith.constant 0 : index
    %c0_36 = arith.constant 0 : index
    %c6_37 = arith.constant 6 : index
    %c0_38 = arith.constant 0 : index
    %16 = vector.load %arg1[%c0_35, %c0_36, %c6_37, %c0_38] : memref<2x16x16x32xf32, #tpu.memory_space<vmem>>, vector<2x10x10x32xf32>
    %17 = arith.truncf %16 : vector<2x10x10x32xf32> to vector<2x10x10x32xbf16>
    %c0_39 = arith.constant 0 : index
    %c6_40 = arith.constant 6 : index
    %c0_41 = arith.constant 0 : index
    %c64_42 = arith.constant 64 : index
    %18 = vector.load %arg5[%c0_39, %c6_40, %c0_41, %c64_42] : memref<2x16x16x640xbf16, #tpu.memory_space<vmem>>, vector<2x10x10x32xbf16>
    tpu.vector_store %arg5[%c0_39, %c6_40, %c0_41, %c64_42], %17 {strides = array<i32>} : memref<2x16x16x640xbf16, #tpu.memory_space<vmem>>, vector<2x10x10x32xbf16>,
    %cst_43 = arith.constant 0.000000e+00 : bf16
    %19 = vector.broadcast %cst_43 : bf16 to vector<2x16x6x32xbf16>
    %c0_44 = arith.constant 0 : index
    %c0_45 = arith.constant 0 : index
    %c0_46 = arith.constant 0 : index
    %c96 = arith.constant 96 : index
    %20 = vector.load %arg5[%c0_44, %c0_45, %c0_46, %c96] : memref<2x16x16x640xbf16, #tpu.memory_space<vmem>>, vector<2x16x6x32xbf16>
    tpu.vector_store %arg5[%c0_44, %c0_45, %c0_46, %c96], %19 {strides = array<i32>} : memref<2x16x16x640xbf16, #tpu.memory_space<vmem>>, vector<2x16x6x32xbf16>,
    %c0_47 = arith.constant 0 : index
    %c0_48 = arith.constant 0 : index
    %c0_49 = arith.constant 0 : index
    %c0_50 = arith.constant 0 : index
    %21 = vector.load %arg1[%c0_47, %c0_48, %c0_49, %c0_50] : memref<2x16x16x32xf32, #tpu.memory_space<vmem>>, vector<2x16x10x32xf32>
    %22 = arith.truncf %21 : vector<2x16x10x32xf32> to vector<2x16x10x32xbf16>
    %c0_51 = arith.constant 0 : index
    %c0_52 = arith.constant 0 : index
    %c6_53 = arith.constant 6 : index
    %c96_54 = arith.constant 96 : index
    %23 = vector.load %arg5[%c0_51, %c0_52, %c6_53, %c96_54] : memref<2x16x16x640xbf16, #tpu.memory_space<vmem>>, vector<2x16x10x32xbf16>
    tpu.vector_store %arg5[%c0_51, %c0_52, %c6_53, %c96_54], %22 {strides = array<i32>} : memref<2x16x16x640xbf16, #tpu.memory_space<vmem>>, vector<2x16x10x32xbf16>,
    %c0_55 = arith.constant 0 : index
    %c0_56 = arith.constant 0 : index
    %c0_57 = arith.constant 0 : index
    %c0_58 = arith.constant 0 : index
    %24 = vector.load %arg1[%c0_55, %c0_56, %c0_57, %c0_58] : memref<2x16x16x32xf32, #tpu.memory_space<vmem>>, vector<2x16x16x32xf32>
    %25 = arith.truncf %24 : vector<2x16x16x32xf32> to vector<2x16x16x32xbf16>
    %c0_59 = arith.constant 0 : index
    %c0_60 = arith.constant 0 : index
    %c0_61 = arith.constant 0 : index
    %c128 = arith.constant 128 : index
    %26 = vector.load %arg5[%c0_59, %c0_60, %c0_61, %c128] : memref<2x16x16x640xbf16, #tpu.memory_space<vmem>>, vector<2x16x16x32xbf16>
    tpu.vector_store %arg5[%c0_59, %c0_60, %c0_61, %c128], %25 {strides = array<i32>} : memref<2x16x16x640xbf16, #tpu.memory_space<vmem>>, vector<2x16x16x32xbf16>,
    %cst_62 = arith.constant 0.000000e+00 : bf16
    %27 = vector.broadcast %cst_62 : bf16 to vector<2x16x6x32xbf16>
    %c0_63 = arith.constant 0 : index
    %c0_64 = arith.constant 0 : index
    %c10_65 = arith.constant 10 : index
    %c160 = arith.constant 160 : index
    %28 = vector.load %arg5[%c0_63, %c0_64, %c10_65, %c160] : memref<2x16x16x640xbf16, #tpu.memory_space<vmem>>, vector<2x16x6x32xbf16>
    tpu.vector_store %arg5[%c0_63, %c0_64, %c10_65, %c160], %27 {strides = array<i32>} : memref<2x16x16x640xbf16, #tpu.memory_space<vmem>>, vector<2x16x6x32xbf16>,
    %c0_66 = arith.constant 0 : index
    %c0_67 = arith.constant 0 : index
    %c6_68 = arith.constant 6 : index
    %c0_69 = arith.constant 0 : index
    %29 = vector.load %arg1[%c0_66, %c0_67, %c6_68, %c0_69] : memref<2x16x16x32xf32, #tpu.memory_space<vmem>>, vector<2x16x10x32xf32>
    %30 = arith.truncf %29 : vector<2x16x10x32xf32> to vector<2x16x10x32xbf16>
    %c0_70 = arith.constant 0 : index
    %c0_71 = arith.constant 0 : index
    %c0_72 = arith.constant 0 : index
    %c160_73 = arith.constant 160 : index
    %31 = vector.load %arg5[%c0_70, %c0_71, %c0_72, %c160_73] : memref<2x16x16x640xbf16, #tpu.memory_space<vmem>>, vector<2x16x10x32xbf16>
    tpu.vector_store %arg5[%c0_70, %c0_71, %c0_72, %c160_73], %30 {strides = array<i32>} : memref<2x16x16x640xbf16, #tpu.memory_space<vmem>>, vector<2x16x10x32xbf16>,
    %cst_74 = arith.constant 0.000000e+00 : bf16
    %32 = vector.broadcast %cst_74 : bf16 to vector<2x6x16x32xbf16>
    %c0_75 = arith.constant 0 : index
    %c10_76 = arith.constant 10 : index
    %c0_77 = arith.constant 0 : index
    %c192 = arith.constant 192 : index
    %33 = vector.load %arg5[%c0_75, %c10_76, %c0_77, %c192] : memref<2x16x16x640xbf16, #tpu.memory_space<vmem>>, vector<2x6x16x32xbf16>
    tpu.vector_store %arg5[%c0_75, %c10_76, %c0_77, %c192], %32 {strides = array<i32>} : memref<2x16x16x640xbf16, #tpu.memory_space<vmem>>, vector<2x6x16x32xbf16>,
    %cst_78 = arith.constant 0.000000e+00 : bf16
    %34 = vector.broadcast %cst_78 : bf16 to vector<2x10x6x32xbf16>
    %c0_79 = arith.constant 0 : index
    %c0_80 = arith.constant 0 : index
    %c0_81 = arith.constant 0 : index
    %c192_82 = arith.constant 192 : index
    %35 = vector.load %arg5[%c0_79, %c0_80, %c0_81, %c192_82] : memref<2x16x16x640xbf16, #tpu.memory_space<vmem>>, vector<2x10x6x32xbf16>
    tpu.vector_store %arg5[%c0_79, %c0_80, %c0_81, %c192_82], %34 {strides = array<i32>} : memref<2x16x16x640xbf16, #tpu.memory_space<vmem>>, vector<2x10x6x32xbf16>,
    %c0_83 = arith.constant 0 : index
    %c6_84 = arith.constant 6 : index
    %c0_85 = arith.constant 0 : index
    %c0_86 = arith.constant 0 : index
    %36 = vector.load %arg1[%c0_83, %c6_84, %c0_85, %c0_86] : memref<2x16x16x32xf32, #tpu.memory_space<vmem>>, vector<2x10x10x32xf32>
    %37 = arith.truncf %36 : vector<2x10x10x32xf32> to vector<2x10x10x32xbf16>
    %c0_87 = arith.constant 0 : index
    %c0_88 = arith.constant 0 : index
    %c6_89 = arith.constant 6 : index
    %c192_90 = arith.constant 192 : index
    %38 = vector.load %arg5[%c0_87, %c0_88, %c6_89, %c192_90] : memref<2x16x16x640xbf16, #tpu.memory_space<vmem>>, vector<2x10x10x32xbf16>
    tpu.vector_store %arg5[%c0_87, %c0_88, %c6_89, %c192_90], %37 {strides = array<i32>} : memref<2x16x16x640xbf16, #tpu.memory_space<vmem>>, vector<2x10x10x32xbf16>,
    %cst_91 = arith.constant 0.000000e+00 : bf16
    %39 = vector.broadcast %cst_91 : bf16 to vector<2x6x16x32xbf16>
    %c0_92 = arith.constant 0 : index
    %c10_93 = arith.constant 10 : index
    %c0_94 = arith.constant 0 : index
    %c224 = arith.constant 224 : index
    %40 = vector.load %arg5[%c0_92, %c10_93, %c0_94, %c224] : memref<2x16x16x640xbf16, #tpu.memory_space<vmem>>, vector<2x6x16x32xbf16>
    tpu.vector_store %arg5[%c0_92, %c10_93, %c0_94, %c224], %39 {strides = array<i32>} : memref<2x16x16x640xbf16, #tpu.memory_space<vmem>>, vector<2x6x16x32xbf16>,
    %c0_95 = arith.constant 0 : index
    %c6_96 = arith.constant 6 : index
    %c0_97 = arith.constant 0 : index
    %c0_98 = arith.constant 0 : index
    %41 = vector.load %arg1[%c0_95, %c6_96, %c0_97, %c0_98] : memref<2x16x16x32xf32, #tpu.memory_space<vmem>>, vector<2x10x16x32xf32>
    %42 = arith.truncf %41 : vector<2x10x16x32xf32> to vector<2x10x16x32xbf16>
    %c0_99 = arith.constant 0 : index
    %c0_100 = arith.constant 0 : index
    %c0_101 = arith.constant 0 : index
    %c224_102 = arith.constant 224 : index
    %43 = vector.load %arg5[%c0_99, %c0_100, %c0_101, %c224_102] : memref<2x16x16x640xbf16, #tpu.memory_space<vmem>>, vector<2x10x16x32xbf16>
    tpu.vector_store %arg5[%c0_99, %c0_100, %c0_101, %c224_102], %42 {strides = array<i32>} : memref<2x16x16x640xbf16, #tpu.memory_space<vmem>>, vector<2x10x16x32xbf16>,
    %cst_103 = arith.constant 0.000000e+00 : bf16
    %44 = vector.broadcast %cst_103 : bf16 to vector<2x6x16x32xbf16>
    %c0_104 = arith.constant 0 : index
    %c10_105 = arith.constant 10 : index
    %c0_106 = arith.constant 0 : index
    %c256 = arith.constant 256 : index
    %45 = vector.load %arg5[%c0_104, %c10_105, %c0_106, %c256] : memref<2x16x16x640xbf16, #tpu.memory_space<vmem>>, vector<2x6x16x32xbf16>
    tpu.vector_store %arg5[%c0_104, %c10_105, %c0_106, %c256], %44 {strides = array<i32>} : memref<2x16x16x640xbf16, #tpu.memory_space<vmem>>, vector<2x6x16x32xbf16>,
    %cst_107 = arith.constant 0.000000e+00 : bf16
    %46 = vector.broadcast %cst_107 : bf16 to vector<2x10x6x32xbf16>
    %c0_108 = arith.constant 0 : index
    %c0_109 = arith.constant 0 : index
    %c10_110 = arith.constant 10 : index
    %c256_111 = arith.constant 256 : index
    %47 = vector.load %arg5[%c0_108, %c0_109, %c10_110, %c256_111] : memref<2x16x16x640xbf16, #tpu.memory_space<vmem>>, vector<2x10x6x32xbf16>
    tpu.vector_store %arg5[%c0_108, %c0_109, %c10_110, %c256_111], %46 {strides = array<i32>} : memref<2x16x16x640xbf16, #tpu.memory_space<vmem>>, vector<2x10x6x32xbf16>,
    %c0_112 = arith.constant 0 : index
    %c6_113 = arith.constant 6 : index
    %c6_114 = arith.constant 6 : index
    %c0_115 = arith.constant 0 : index
    %48 = vector.load %arg1[%c0_112, %c6_113, %c6_114, %c0_115] : memref<2x16x16x32xf32, #tpu.memory_space<vmem>>, vector<2x10x10x32xf32>
    %49 = arith.truncf %48 : vector<2x10x10x32xf32> to vector<2x10x10x32xbf16>
    %c0_116 = arith.constant 0 : index
    %c0_117 = arith.constant 0 : index
    %c0_118 = arith.constant 0 : index
    %c256_119 = arith.constant 256 : index
    %50 = vector.load %arg5[%c0_116, %c0_117, %c0_118, %c256_119] : memref<2x16x16x640xbf16, #tpu.memory_space<vmem>>, vector<2x10x10x32xbf16>
    tpu.vector_store %arg5[%c0_116, %c0_117, %c0_118, %c256_119], %49 {strides = array<i32>} : memref<2x16x16x640xbf16, #tpu.memory_space<vmem>>, vector<2x10x10x32xbf16>,
    %cst_120 = arith.constant 0.000000e+00 : bf16
    %51 = vector.broadcast %cst_120 : bf16 to vector<2x12x16x32xbf16>
    %c0_121 = arith.constant 0 : index
    %c0_122 = arith.constant 0 : index
    %c0_123 = arith.constant 0 : index
    %c288 = arith.constant 288 : index
    %52 = vector.load %arg5[%c0_121, %c0_122, %c0_123, %c288] : memref<2x16x16x640xbf16, #tpu.memory_space<vmem>>, vector<2x12x16x32xbf16>
    tpu.vector_store %arg5[%c0_121, %c0_122, %c0_123, %c288], %51 {strides = array<i32>} : memref<2x16x16x640xbf16, #tpu.memory_space<vmem>>, vector<2x12x16x32xbf16>,
    %cst_124 = arith.constant 0.000000e+00 : bf16
    %53 = vector.broadcast %cst_124 : bf16 to vector<2x4x12x32xbf16>
    %c0_125 = arith.constant 0 : index
    %c12 = arith.constant 12 : index
    %c0_126 = arith.constant 0 : index
    %c288_127 = arith.constant 288 : index
    %54 = vector.load %arg5[%c0_125, %c12, %c0_126, %c288_127] : memref<2x16x16x640xbf16, #tpu.memory_space<vmem>>, vector<2x4x12x32xbf16>
    tpu.vector_store %arg5[%c0_125, %c12, %c0_126, %c288_127], %53 {strides = array<i32>} : memref<2x16x16x640xbf16, #tpu.memory_space<vmem>>, vector<2x4x12x32xbf16>,
    %c0_128 = arith.constant 0 : index
    %c0_129 = arith.constant 0 : index
    %c0_130 = arith.constant 0 : index
    %c0_131 = arith.constant 0 : index
    %55 = vector.load %arg1[%c0_128, %c0_129, %c0_130, %c0_131] : memref<2x16x16x32xf32, #tpu.memory_space<vmem>>, vector<2x4x4x32xf32>
    %56 = arith.truncf %55 : vector<2x4x4x32xf32> to vector<2x4x4x32xbf16>
    %c0_132 = arith.constant 0 : index
    %c12_133 = arith.constant 12 : index
    %c12_134 = arith.constant 12 : index
    %c288_135 = arith.constant 288 : index
    %57 = vector.load %arg5[%c0_132, %c12_133, %c12_134, %c288_135] : memref<2x16x16x640xbf16, #tpu.memory_space<vmem>>, vector<2x4x4x32xbf16>
    tpu.vector_store %arg5[%c0_132, %c12_133, %c12_134, %c288_135], %56 {strides = array<i32>} : memref<2x16x16x640xbf16, #tpu.memory_space<vmem>>, vector<2x4x4x32xbf16>,
    %cst_136 = arith.constant 0.000000e+00 : bf16
    %58 = vector.broadcast %cst_136 : bf16 to vector<2x12x16x32xbf16>
    %c0_137 = arith.constant 0 : index
    %c0_138 = arith.constant 0 : index
    %c0_139 = arith.constant 0 : index
    %c320 = arith.constant 320 : index
    %59 = vector.load %arg5[%c0_137, %c0_138, %c0_139, %c320] : memref<2x16x16x640xbf16, #tpu.memory_space<vmem>>, vector<2x12x16x32xbf16>
    tpu.vector_store %arg5[%c0_137, %c0_138, %c0_139, %c320], %58 {strides = array<i32>} : memref<2x16x16x640xbf16, #tpu.memory_space<vmem>>, vector<2x12x16x32xbf16>,
    %c0_140 = arith.constant 0 : index
    %c0_141 = arith.constant 0 : index
    %c0_142 = arith.constant 0 : index
    %c0_143 = arith.constant 0 : index
    %60 = vector.load %arg1[%c0_140, %c0_141, %c0_142, %c0_143] : memref<2x16x16x32xf32, #tpu.memory_space<vmem>>, vector<2x4x16x32xf32>
    %61 = arith.truncf %60 : vector<2x4x16x32xf32> to vector<2x4x16x32xbf16>
    %c0_144 = arith.constant 0 : index
    %c12_145 = arith.constant 12 : index
    %c0_146 = arith.constant 0 : index
    %c320_147 = arith.constant 320 : index
    %62 = vector.load %arg5[%c0_144, %c12_145, %c0_146, %c320_147] : memref<2x16x16x640xbf16, #tpu.memory_space<vmem>>, vector<2x4x16x32xbf16>
    tpu.vector_store %arg5[%c0_144, %c12_145, %c0_146, %c320_147], %61 {strides = array<i32>} : memref<2x16x16x640xbf16, #tpu.memory_space<vmem>>, vector<2x4x16x32xbf16>,
    %cst_148 = arith.constant 0.000000e+00 : bf16
    %63 = vector.broadcast %cst_148 : bf16 to vector<2x12x16x32xbf16>
    %c0_149 = arith.constant 0 : index
    %c0_150 = arith.constant 0 : index
    %c0_151 = arith.constant 0 : index
    %c352 = arith.constant 352 : index
    %64 = vector.load %arg5[%c0_149, %c0_150, %c0_151, %c352] : memref<2x16x16x640xbf16, #tpu.memory_space<vmem>>, vector<2x12x16x32xbf16>
    tpu.vector_store %arg5[%c0_149, %c0_150, %c0_151, %c352], %63 {strides = array<i32>} : memref<2x16x16x640xbf16, #tpu.memory_space<vmem>>, vector<2x12x16x32xbf16>,
    %cst_152 = arith.constant 0.000000e+00 : bf16
    %65 = vector.broadcast %cst_152 : bf16 to vector<2x4x12x32xbf16>
    %c0_153 = arith.constant 0 : index
    %c12_154 = arith.constant 12 : index
    %c4 = arith.constant 4 : index
    %c352_155 = arith.constant 352 : index
    %66 = vector.load %arg5[%c0_153, %c12_154, %c4, %c352_155] : memref<2x16x16x640xbf16, #tpu.memory_space<vmem>>, vector<2x4x12x32xbf16>
    tpu.vector_store %arg5[%c0_153, %c12_154, %c4, %c352_155], %65 {strides = array<i32>} : memref<2x16x16x640xbf16, #tpu.memory_space<vmem>>, vector<2x4x12x32xbf16>,
    %c0_156 = arith.constant 0 : index
    %c0_157 = arith.constant 0 : index
    %c12_158 = arith.constant 12 : index
    %c0_159 = arith.constant 0 : index
    %67 = vector.load %arg1[%c0_156, %c0_157, %c12_158, %c0_159] : memref<2x16x16x32xf32, #tpu.memory_space<vmem>>, vector<2x4x4x32xf32>
    %68 = arith.truncf %67 : vector<2x4x4x32xf32> to vector<2x4x4x32xbf16>
    %c0_160 = arith.constant 0 : index
    %c12_161 = arith.constant 12 : index
    %c0_162 = arith.constant 0 : index
    %c352_163 = arith.constant 352 : index
    %69 = vector.load %arg5[%c0_160, %c12_161, %c0_162, %c352_163] : memref<2x16x16x640xbf16, #tpu.memory_space<vmem>>, vector<2x4x4x32xbf16>
    tpu.vector_store %arg5[%c0_160, %c12_161, %c0_162, %c352_163], %68 {strides = array<i32>} : memref<2x16x16x640xbf16, #tpu.memory_space<vmem>>, vector<2x4x4x32xbf16>,
    %cst_164 = arith.constant 0.000000e+00 : bf16
    %70 = vector.broadcast %cst_164 : bf16 to vector<2x16x12x32xbf16>
    %c0_165 = arith.constant 0 : index
    %c0_166 = arith.constant 0 : index
    %c0_167 = arith.constant 0 : index
    %c384 = arith.constant 384 : index
    %71 = vector.load %arg5[%c0_165, %c0_166, %c0_167, %c384] : memref<2x16x16x640xbf16, #tpu.memory_space<vmem>>, vector<2x16x12x32xbf16>
    tpu.vector_store %arg5[%c0_165, %c0_166, %c0_167, %c384], %70 {strides = array<i32>} : memref<2x16x16x640xbf16, #tpu.memory_space<vmem>>, vector<2x16x12x32xbf16>,
    %c0_168 = arith.constant 0 : index
    %c0_169 = arith.constant 0 : index
    %c0_170 = arith.constant 0 : index
    %c0_171 = arith.constant 0 : index
    %72 = vector.load %arg1[%c0_168, %c0_169, %c0_170, %c0_171] : memref<2x16x16x32xf32, #tpu.memory_space<vmem>>, vector<2x16x4x32xf32>
    %73 = arith.truncf %72 : vector<2x16x4x32xf32> to vector<2x16x4x32xbf16>
    %c0_172 = arith.constant 0 : index
    %c0_173 = arith.constant 0 : index
    %c12_174 = arith.constant 12 : index
    %c384_175 = arith.constant 384 : index
    %74 = vector.load %arg5[%c0_172, %c0_173, %c12_174, %c384_175] : memref<2x16x16x640xbf16, #tpu.memory_space<vmem>>, vector<2x16x4x32xbf16>
    tpu.vector_store %arg5[%c0_172, %c0_173, %c12_174, %c384_175], %73 {strides = array<i32>} : memref<2x16x16x640xbf16, #tpu.memory_space<vmem>>, vector<2x16x4x32xbf16>,
    %c0_176 = arith.constant 0 : index
    %c0_177 = arith.constant 0 : index
    %c0_178 = arith.constant 0 : index
    %c0_179 = arith.constant 0 : index
    %75 = vector.load %arg1[%c0_176, %c0_177, %c0_178, %c0_179] : memref<2x16x16x32xf32, #tpu.memory_space<vmem>>, vector<2x16x16x32xf32>
    %76 = arith.truncf %75 : vector<2x16x16x32xf32> to vector<2x16x16x32xbf16>
    %c0_180 = arith.constant 0 : index
    %c0_181 = arith.constant 0 : index
    %c0_182 = arith.constant 0 : index
    %c416 = arith.constant 416 : index
    %77 = vector.load %arg5[%c0_180, %c0_181, %c0_182, %c416] : memref<2x16x16x640xbf16, #tpu.memory_space<vmem>>, vector<2x16x16x32xbf16>
    tpu.vector_store %arg5[%c0_180, %c0_181, %c0_182, %c416], %76 {strides = array<i32>} : memref<2x16x16x640xbf16, #tpu.memory_space<vmem>>, vector<2x16x16x32xbf16>,
    %cst_183 = arith.constant 0.000000e+00 : bf16
    %78 = vector.broadcast %cst_183 : bf16 to vector<2x16x12x32xbf16>
    %c0_184 = arith.constant 0 : index
    %c0_185 = arith.constant 0 : index
    %c4_186 = arith.constant 4 : index
    %c448 = arith.constant 448 : index
    %79 = vector.load %arg5[%c0_184, %c0_185, %c4_186, %c448] : memref<2x16x16x640xbf16, #tpu.memory_space<vmem>>, vector<2x16x12x32xbf16>
    tpu.vector_store %arg5[%c0_184, %c0_185, %c4_186, %c448], %78 {strides = array<i32>} : memref<2x16x16x640xbf16, #tpu.memory_space<vmem>>, vector<2x16x12x32xbf16>,
    %c0_187 = arith.constant 0 : index
    %c0_188 = arith.constant 0 : index
    %c12_189 = arith.constant 12 : index
    %c0_190 = arith.constant 0 : index
    %80 = vector.load %arg1[%c0_187, %c0_188, %c12_189, %c0_190] : memref<2x16x16x32xf32, #tpu.memory_space<vmem>>, vector<2x16x4x32xf32>
    %81 = arith.truncf %80 : vector<2x16x4x32xf32> to vector<2x16x4x32xbf16>
    %c0_191 = arith.constant 0 : index
    %c0_192 = arith.constant 0 : index
    %c0_193 = arith.constant 0 : index
    %c448_194 = arith.constant 448 : index
    %82 = vector.load %arg5[%c0_191, %c0_192, %c0_193, %c448_194] : memref<2x16x16x640xbf16, #tpu.memory_space<vmem>>, vector<2x16x4x32xbf16>
    tpu.vector_store %arg5[%c0_191, %c0_192, %c0_193, %c448_194], %81 {strides = array<i32>} : memref<2x16x16x640xbf16, #tpu.memory_space<vmem>>, vector<2x16x4x32xbf16>,
    %cst_195 = arith.constant 0.000000e+00 : bf16
    %83 = vector.broadcast %cst_195 : bf16 to vector<2x12x16x32xbf16>
    %c0_196 = arith.constant 0 : index
    %c4_197 = arith.constant 4 : index
    %c0_198 = arith.constant 0 : index
    %c480 = arith.constant 480 : index
    %84 = vector.load %arg5[%c0_196, %c4_197, %c0_198, %c480] : memref<2x16x16x640xbf16, #tpu.memory_space<vmem>>, vector<2x12x16x32xbf16>
    tpu.vector_store %arg5[%c0_196, %c4_197, %c0_198, %c480], %83 {strides = array<i32>} : memref<2x16x16x640xbf16, #tpu.memory_space<vmem>>, vector<2x12x16x32xbf16>,
    %cst_199 = arith.constant 0.000000e+00 : bf16
    %85 = vector.broadcast %cst_199 : bf16 to vector<2x4x12x32xbf16>
    %c0_200 = arith.constant 0 : index
    %c0_201 = arith.constant 0 : index
    %c0_202 = arith.constant 0 : index
    %c480_203 = arith.constant 480 : index
    %86 = vector.load %arg5[%c0_200, %c0_201, %c0_202, %c480_203] : memref<2x16x16x640xbf16, #tpu.memory_space<vmem>>, vector<2x4x12x32xbf16>
    tpu.vector_store %arg5[%c0_200, %c0_201, %c0_202, %c480_203], %85 {strides = array<i32>} : memref<2x16x16x640xbf16, #tpu.memory_space<vmem>>, vector<2x4x12x32xbf16>,
    %c0_204 = arith.constant 0 : index
    %c12_205 = arith.constant 12 : index
    %c0_206 = arith.constant 0 : index
    %c0_207 = arith.constant 0 : index
    %87 = vector.load %arg1[%c0_204, %c12_205, %c0_206, %c0_207] : memref<2x16x16x32xf32, #tpu.memory_space<vmem>>, vector<2x4x4x32xf32>
    %88 = arith.truncf %87 : vector<2x4x4x32xf32> to vector<2x4x4x32xbf16>
    %c0_208 = arith.constant 0 : index
    %c0_209 = arith.constant 0 : index
    %c12_210 = arith.constant 12 : index
    %c480_211 = arith.constant 480 : index
    %89 = vector.load %arg5[%c0_208, %c0_209, %c12_210, %c480_211] : memref<2x16x16x640xbf16, #tpu.memory_space<vmem>>, vector<2x4x4x32xbf16>
    tpu.vector_store %arg5[%c0_208, %c0_209, %c12_210, %c480_211], %88 {strides = array<i32>} : memref<2x16x16x640xbf16, #tpu.memory_space<vmem>>, vector<2x4x4x32xbf16>,
    %cst_212 = arith.constant 0.000000e+00 : bf16
    %90 = vector.broadcast %cst_212 : bf16 to vector<2x12x16x32xbf16>
    %c0_213 = arith.constant 0 : index
    %c4_214 = arith.constant 4 : index
    %c0_215 = arith.constant 0 : index
    %c512 = arith.constant 512 : index
    %91 = vector.load %arg5[%c0_213, %c4_214, %c0_215, %c512] : memref<2x16x16x640xbf16, #tpu.memory_space<vmem>>, vector<2x12x16x32xbf16>
    tpu.vector_store %arg5[%c0_213, %c4_214, %c0_215, %c512], %90 {strides = array<i32>} : memref<2x16x16x640xbf16, #tpu.memory_space<vmem>>, vector<2x12x16x32xbf16>,
    %c0_216 = arith.constant 0 : index
    %c12_217 = arith.constant 12 : index
    %c0_218 = arith.constant 0 : index
    %c0_219 = arith.constant 0 : index
    %92 = vector.load %arg1[%c0_216, %c12_217, %c0_218, %c0_219] : memref<2x16x16x32xf32, #tpu.memory_space<vmem>>, vector<2x4x16x32xf32>
    %93 = arith.truncf %92 : vector<2x4x16x32xf32> to vector<2x4x16x32xbf16>
    %c0_220 = arith.constant 0 : index
    %c0_221 = arith.constant 0 : index
    %c0_222 = arith.constant 0 : index
    %c512_223 = arith.constant 512 : index
    %94 = vector.load %arg5[%c0_220, %c0_221, %c0_222, %c512_223] : memref<2x16x16x640xbf16, #tpu.memory_space<vmem>>, vector<2x4x16x32xbf16>
    tpu.vector_store %arg5[%c0_220, %c0_221, %c0_222, %c512_223], %93 {strides = array<i32>} : memref<2x16x16x640xbf16, #tpu.memory_space<vmem>>, vector<2x4x16x32xbf16>,
    %cst_224 = arith.constant 0.000000e+00 : bf16
    %95 = vector.broadcast %cst_224 : bf16 to vector<2x12x16x32xbf16>
    %c0_225 = arith.constant 0 : index
    %c4_226 = arith.constant 4 : index
    %c0_227 = arith.constant 0 : index
    %c544 = arith.constant 544 : index
    %96 = vector.load %arg5[%c0_225, %c4_226, %c0_227, %c544] : memref<2x16x16x640xbf16, #tpu.memory_space<vmem>>, vector<2x12x16x32xbf16>
    tpu.vector_store %arg5[%c0_225, %c4_226, %c0_227, %c544], %95 {strides = array<i32>} : memref<2x16x16x640xbf16, #tpu.memory_space<vmem>>, vector<2x12x16x32xbf16>,
    %cst_228 = arith.constant 0.000000e+00 : bf16
    %97 = vector.broadcast %cst_228 : bf16 to vector<2x4x12x32xbf16>
    %c0_229 = arith.constant 0 : index
    %c0_230 = arith.constant 0 : index
    %c4_231 = arith.constant 4 : index
    %c544_232 = arith.constant 544 : index
    %98 = vector.load %arg5[%c0_229, %c0_230, %c4_231, %c544_232] : memref<2x16x16x640xbf16, #tpu.memory_space<vmem>>, vector<2x4x12x32xbf16>
    tpu.vector_store %arg5[%c0_229, %c0_230, %c4_231, %c544_232], %97 {strides = array<i32>} : memref<2x16x16x640xbf16, #tpu.memory_space<vmem>>, vector<2x4x12x32xbf16>,
    %c0_233 = arith.constant 0 : index
    %c12_234 = arith.constant 12 : index
    %c12_235 = arith.constant 12 : index
    %c0_236 = arith.constant 0 : index
    %99 = vector.load %arg1[%c0_233, %c12_234, %c12_235, %c0_236] : memref<2x16x16x32xf32, #tpu.memory_space<vmem>>, vector<2x4x4x32xf32>
    %100 = arith.truncf %99 : vector<2x4x4x32xf32> to vector<2x4x4x32xbf16>
    %c0_237 = arith.constant 0 : index
    %c0_238 = arith.constant 0 : index
    %c0_239 = arith.constant 0 : index
    %c544_240 = arith.constant 544 : index
    %101 = vector.load %arg5[%c0_237, %c0_238, %c0_239, %c544_240] : memref<2x16x16x640xbf16, #tpu.memory_space<vmem>>, vector<2x4x4x32xbf16>
    tpu.vector_store %arg5[%c0_237, %c0_238, %c0_239, %c544_240], %100 {strides = array<i32>} : memref<2x16x16x640xbf16, #tpu.memory_space<vmem>>, vector<2x4x4x32xbf16>,
    %c0_241 = arith.constant 0 : index
    %c0_242 = arith.constant 0 : index
    %c0_243 = arith.constant 0 : index
    %c0_244 = arith.constant 0 : index
    %102 = vector.load %arg1[%c0_241, %c0_242, %c0_243, %c0_244] : memref<2x16x16x32xf32, #tpu.memory_space<vmem>>, vector<2x16x16x32xf32>
    %103 = arith.truncf %102 : vector<2x16x16x32xf32> to vector<2x16x16x32xbf16>
    %c0_245 = arith.constant 0 : index
    %c0_246 = arith.constant 0 : index
    %c0_247 = arith.constant 0 : index
    %c576 = arith.constant 576 : index
    %104 = vector.load %arg5[%c0_245, %c0_246, %c0_247, %c576] : memref<2x16x16x640xbf16, #tpu.memory_space<vmem>>, vector<2x16x16x32xbf16>
    tpu.vector_store %arg5[%c0_245, %c0_246, %c0_247, %c576], %103 {strides = array<i32>} : memref<2x16x16x640xbf16, #tpu.memory_space<vmem>>, vector<2x16x16x32xbf16>,
    %c0_248 = arith.constant 0 : index
    %c0_249 = arith.constant 0 : index
    %c0_250 = arith.constant 0 : index
    %c0_251 = arith.constant 0 : index
    %105 = vector.load %arg1[%c0_248, %c0_249, %c0_250, %c0_251] : memref<2x16x16x32xf32, #tpu.memory_space<vmem>>, vector<2x16x16x32xf32>
    %106 = arith.truncf %105 : vector<2x16x16x32xf32> to vector<2x16x16x32xbf16>
    %c0_252 = arith.constant 0 : index
    %c0_253 = arith.constant 0 : index
    %c0_254 = arith.constant 0 : index
    %c608 = arith.constant 608 : index
    %107 = vector.load %arg5[%c0_252, %c0_253, %c0_254, %c608] : memref<2x16x16x640xbf16, #tpu.memory_space<vmem>>, vector<2x16x16x32xbf16>
    tpu.vector_store %arg5[%c0_252, %c0_253, %c0_254, %c608], %106 {strides = array<i32>} : memref<2x16x16x640xbf16, #tpu.memory_space<vmem>>, vector<2x16x16x32xbf16>,
    %c0_255 = arith.constant 0 : index
    %c0_256 = arith.constant 0 : index
    %c0_257 = arith.constant 0 : index
    %c0_258 = arith.constant 0 : index
    %108 = vector.load %arg5[%c0_255, %c0_256, %c0_257, %c0_258] : memref<2x16x16x640xbf16, #tpu.memory_space<vmem>>, vector<2x16x16x640xbf16>
    %109 = vector.shape_cast %108 : vector<2x16x16x640xbf16> to vector<512x640xbf16>
    %c0_259 = arith.constant 0 : index
    %c0_260 = arith.constant 0 : index
    %110 = vector.load %arg2[%c0_259, %c0_260] : memref<640x128xbf16, #tpu.memory_space<vmem>>, vector<640x128xbf16>
    %cst_261 = arith.constant dense<0.000000e+00> : vector<512x128xf32>
    %111 = tpu.matmul %109, %110, %cst_261 {dimension_numbers = #tpu.dot_dimension_numbers<[1], [0], [0], [1], [0, 0, 1, 1], [], []>} : vector<512x640xbf16>, vector<640x128xbf16>, vector<512x128xf32> -> vector<512x128xf32>
    %c0_262 = arith.constant 0 : index
    %c0_263 = arith.constant 0 : index
    %112 = vector.load %arg3[%c0_262, %c0_263] : memref<1x128xf32, #tpu.memory_space<vmem>>, vector<1x128xf32>
    %113 = vector.broadcast %112 : vector<1x128xf32> to vector<512x128xf32>
    %114 = arith.addf %111, %113 : vector<512x128xf32>
    %c0_264 = arith.constant 0 : index
    %c0_265 = arith.constant 0 : index
    %115 = vector.load %arg4[%c0_264, %c0_265] : memref<512x128xf32, #tpu.memory_space<vmem>>, vector<512x128xf32>
    tpu.vector_store %arg4[%c0_264, %c0_265], %114 {strides = array<i32>} : memref<512x128xf32, #tpu.memory_space<vmem>>, vector<512x128xf32>,
    return
  }
  func.func @transform_0(%arg0: i32) -> (i32, i32, i32, i32) {
    %c0_i32 = arith.constant 0 : i32
    %c0_i32_0 = arith.constant 0 : i32
    %c0_i32_1 = arith.constant 0 : i32
    %c0_i32_2 = arith.constant 0 : i32
    return %arg0, %c0_i32, %c0_i32_0, %c0_i32_1 : i32, i32, i32, i32
  }
  func.func @transform_1(%arg0: i32) -> (i32, i32) {
    %c0_i32 = arith.constant 0 : i32
    %c0_i32_0 = arith.constant 0 : i32
    %c0_i32_1 = arith.constant 0 : i32
    return %c0_i32, %c0_i32_0 : i32, i32
  }
  func.func @transform_2(%arg0: i32) -> (i32, i32) {
    %c0_i32 = arith.constant 0 : i32
    %c0_i32_0 = arith.constant 0 : i32
    %c0_i32_1 = arith.constant 0 : i32
    return %c0_i32, %c0_i32_0 : i32, i32
  }
  func.func @transform_3(%arg0: i32) -> (i32, i32) {
    %c0_i32 = arith.constant 0 : i32
    %c0_i32_0 = arith.constant 0 : i32
    return %arg0, %c0_i32 : i32, i32
  }
}

</mosaic_0001>

<bundles_post_ra>
// kernel: dec_final_classifier.1
= control target key start
LH: loop header
LB: loop body
LE: loop exit
PB: predicated region body
PF: predicated region fallthrough
CT: control target
= control target key end

     0   :  { %vm29_vm0 = vcmask 256000   ;;  %v9995_v3 = vmov 0   ;;  %s5545_s28 = smov 32   ;;  %vm15_vm1 = vcmask 261120   ;;  %vm191_vm2 = vcmask 523520   ;;  %s5546_s6 = smov 64   ;;  %s9985_s0 = inlined_call_operand.vmem [shape: f32[2,16,16,32], index: 0, kind: input, shape index: {}]   ;;  %s9986_s1 = inlined_call_operand.vmem [shape: bf16[640,128], index: 1, kind: input, shape index: {}]   ;;  %s9987_s2 = inlined_call_operand.vmem [shape: f32[1,128], index: 2, kind: input, shape index: {}]   ;;  %s9988_s3 = inlined_call_operand.vmem [shape: f32[512,128], index: 3, kind: output, shape index: {}]  }
   0x1   :  { %v5571_v0 = vld [vmem:[%s9985_s0 + $0x20] sm:$0xff]  ;;  %v209_v1 = vld [vmem:[%s9985_s0 + $0x28] sm:$0xff]  ;;  %4064 = vmatprep.subr.bf16.mxu0 %v9995_v3  ;;  %5312 = vmatprep.subr.bf16.mxu1 %v9995_v3  ;;  %32 = vst.msk [vmem:[#allocation2 + $0x140] sm:$0x7] %vm29_vm0, %v9995_v3  ;;  %30 = vst.msk [vmem:[#allocation2 + $0xf0] sm:$0x7] %vm29_vm0, %v9995_v3 }
   0x2   :  { %v5579_v2 = vld [vmem:[%s9985_s0] sm:$0xff]  ;;  %31 = vst.msk [vmem:[#allocation2 + $0x118] sm:$0x7] %vm29_vm0, %v9995_v3  ;;  %33 = vst.msk [vmem:[#allocation2 + $0x168] sm:$0x7] %vm29_vm0, %v9995_v3  ;;  %v246_v4 = vpack.c.bf16 %v209_v1, %v5571_v0  ;;  %v205_v5 = vld [vmem:[%s9985_s0 + $0x8] sm:$0xff] }
   0x3   :  { %34 = vst.msk [vmem:[#allocation2 + $0x190] sm:$0x7] %vm29_vm0, %v9995_v3  ;;  %35 = vst.msk [vmem:[#allocation2 + $0x1b8] sm:$0x7] %vm29_vm0, %v9995_v3  ;;  %v5630_v6 = vld [vmem:[%s9985_s0 + $0x30] sm:$0xff]  ;;  %v211_v7 = vld [vmem:[%s9985_s0 + $0x38] sm:$0xff]  ;;  %v244_v8 = vpack.c.bf16 %v205_v5, %v5579_v2 }
   0x4   :  { %36 = vst.msk [vmem:[#allocation2 + $0x1e0] sm:$0x7] %vm29_vm0, %v9995_v3  ;;  %37 = vst.msk [vmem:[#allocation2 + $0x208] sm:$0x7] %vm29_vm0, %v9995_v3  ;;  %v5639_v9 = vld [vmem:[%s9985_s0 + $0x10] sm:$0xff]  ;;  %v207_v10 = vld [vmem:[%s9985_s0 + $0x18] sm:$0xff]  ;;  %288 = vrot.lane.b32.xlu1 %v246_v4, %s5545_s28  ;;  %v247_v11 = vpack.c.bf16 %v211_v7, %v5630_v6 }
   0x5   :  { %38 = vst.msk [vmem:[#allocation2 + $0x230] sm:$0x7] %vm29_vm0, %v9995_v3  ;;  %39 = vst.msk [vmem:[#allocation2 + $0x258] sm:$0x7] %vm29_vm0, %v9995_v3  ;;  %284 = vrot.lane.b32.xlu0 %v244_v8, %s5545_s28  ;;  %v245_v12 = vpack.c.bf16 %v207_v10, %v5639_v9  ;;  %v5651_v13 = vld [vmem:[%s9985_s0 + $0x50] sm:$0xff]  ;;  %v215_v14 = vld [vmem:[%s9985_s0 + $0x58] sm:$0xff] }
   0x6   :  { %40 = vst.msk [vmem:[#allocation2 + $0x370] sm:$0x7] %vm29_vm0, %v9995_v3  ;;  %41 = vst.msk [vmem:[#allocation2 + $0x398] sm:$0x7] %vm29_vm0, %v9995_v3  ;;  %v5659_v15 = vld [vmem:[%s9985_s0 + $0x40] sm:$0xff]  ;;  %v213_v16 = vld [vmem:[%s9985_s0 + $0x48] sm:$0xff]  ;;  %v249_v17 = vpack.c.bf16 %v215_v14, %v5651_v13 }
   0x7   :  { %42 = vst.msk [vmem:[#allocation2 + $0x3c0] sm:$0x7] %vm29_vm0, %v9995_v3  ;;  %43 = vst.msk [vmem:[#allocation2 + $0x3e8] sm:$0x7] %vm29_vm0, %v9995_v3  ;;  %v248_v18 = vpack.c.bf16 %v213_v16, %v5659_v15  ;;  %v5671_v19 = vld [vmem:[%s9985_s0 + $0x70] sm:$0xff]  ;;  %v219_v20 = vld [vmem:[%s9985_s0 + $0x78] sm:$0xff] }
   0x8   :  { %44 = vst.msk [vmem:[#allocation2 + $0x410] sm:$0x7] %vm29_vm0, %v9995_v3  ;;  %45 = vst.msk [vmem:[#allocation2 + $0x438] sm:$0x7] %vm29_vm0, %v9995_v3  ;;  %290 = vrot.lane.b32.xlu1 %v247_v11, %s5545_s28  ;;  %v5679_v21 = vld [vmem:[%s9985_s0 + $0x60] sm:$0xff]  ;;  %v217_v22 = vld [vmem:[%s9985_s0 + $0x68] sm:$0xff]  ;;  %v5686_v23 = vpack.c.bf16 %v219_v20, %v5671_v19 }
   0x9   :  { %46 = vst.msk [vmem:[#allocation2 + $0x460] sm:$0x7] %vm29_vm0, %v9995_v3  ;;  %47 = vst.msk [vmem:[#allocation2 + $0x488] sm:$0x7] %vm29_vm0, %v9995_v3  ;;  %286 = vrot.lane.b32.xlu0 %v245_v12, %s5545_s28  ;;  %v5690_v24 = vpack.c.bf16 %v217_v22, %v5679_v21  ;;  %v5695_v25 = vld [vmem:[%s9985_s0 + $0x90] sm:$0xff]  ;;  %v5700_v26 = vld [vmem:[%s9985_s0 + $0x98] sm:$0xff] }
   0xa   :  { %48 = vst.msk [vmem:[#allocation2 + $0x4b0] sm:$0x7] %vm29_vm0, %v9995_v3  ;;  %49 = vst.msk [vmem:[#allocation2 + $0x4d8] sm:$0x7] %vm29_vm0, %v9995_v3  ;;  %v5705_v27 = vld [vmem:[%s9985_s0 + $0x80] sm:$0xff]  ;;  %v5710_v28 = vld [vmem:[%s9985_s0 + $0x88] sm:$0xff]  ;;  %v5893_v29 = vpack.c.bf16 %v5700_v26, %v5695_v25 }
   0xb   :  { %977 = vst.msk [vmem:[#allocation2 + $0x8] sm:$0xff] %vm15_vm1, %v244_v8  ;;  %16 = vst.msk [vmem:[#allocation2] sm:$0xff] %vm15_vm1, %v9995_v3  ;;  %vm1009_vm3 = vcmask 523525   ;;  %v5899_v30 = vpack.c.bf16 %v5710_v28, %v5705_v27  ;;  %v5904_v31 = vld [vmem:[%s9985_s0 + $0x110] sm:$0xff]  ;;  %v227_v32 = vld [vmem:[%s9985_s0 + $0x118] sm:$0xff]  ;;  %vm9991_vm4 = vcmask 785920  }
   0xc   :  { %294 = vrot.lane.b32.xlu1 %v249_v17, %s5545_s28  ;;  %17 = vst.msk [vmem:[#allocation2 + $0x28] sm:$0xff] %vm15_vm1, %v9995_v3  ;;  %18 = vst.msk [vmem:[#allocation2 + $0x50] sm:$0xff] %vm15_vm1, %v9995_v3  ;;  %v5914_v33 = vld [vmem:[%s9985_s0 + $0x100] sm:$0xff]  ;;  %v225_v34 = vld [vmem:[%s9985_s0 + $0x108] sm:$0xff]  ;;  %v255_v35 = vpack.c.bf16 %v227_v32, %v5904_v31  ;;  %vm9990_vm5 = vcmask 1043200   ;;  %vm1515_vm6 = vcmask 1048320  }
   0xd   :  { %292 = vrot.lane.b32.xlu0 %v248_v18, %s5545_s28  ;;  %19 = vst.msk [vmem:[#allocation2 + $0x78] sm:$0xff] %vm15_vm1, %v9995_v3  ;;  %20 = vst.msk [vmem:[#allocation2 + $0xa0] sm:$0xff] %vm15_vm1, %v9995_v3  ;;  %v254_v36 = vpack.c.bf16 %v225_v34, %v5914_v33  ;;  %v1042_v37 = vld [vmem:[%s9985_s0 + $0x6] sm:$0xff]  ;;  %v1043_v38 = vld [vmem:[%s9985_s0 + $0xe] sm:$0x3]  ;;  %s5547_s19 = smov 96  }
   0xe   :  { %21 = vst.msk [vmem:[#allocation2 + $0xc8] sm:$0xff] %vm15_vm1, %v9995_v3  ;;  %22 = vst.msk [vmem:[#allocation2 + $0x280] sm:$0xff] %vm15_vm1, %v9995_v3  ;;  %v5000_v39 = vld [vmem:[%s9985_s0 + $0x68] sm:$0x3]  ;;  %v5937_v40 = vld [vmem:[%s9985_s0 + $0x120] sm:$0xff]  ;;  %v1106_v42 = vpack.c.bf16 %v1043_v38, %v1042_v37  ;;  %vm170_vm7 = vcmask 261123  }
   0xf   :  { %23 = vst.msk [vmem:[#allocation2 + $0x2a8] sm:$0xff] %vm15_vm1, %v9995_v3  ;;  %24 = vst.msk [vmem:[#allocation2 + $0x2d0] sm:$0xff] %vm15_vm1, %v9995_v3  ;;  %v229_v41 = vld [vmem:[%s9985_s0 + $0x128] sm:$0xff]  ;;  %v1374_v43 = vpack.c.bf16 %v5000_v39, %v5679_v21  ;;  %v5955_v47 = vld [vmem:[%s9985_s0 + $0xe0] sm:$0xff]  ;;  %vm9989_vm8 = vcmask 785925   ;;  %vm2079_vm9 = vcmask 259072  }
  0x10   :  { %25 = vst.msk [vmem:[#allocation2 + $0x2f8] sm:$0xff] %vm15_vm1, %v9995_v3  ;;  %26 = vst.msk [vmem:[#allocation2 + $0x320] sm:$0xff] %vm15_vm1, %v9995_v3  ;;  %298 = vrot.lane.b32.xlu1 %v5686_v23, %s5545_s28  ;;  %v256_v44 = vpack.c.bf16 %v229_v41, %v5937_v40  ;;  %v1058_v45 = vld [vmem:[%s9985_s0 + $0x86] sm:$0xff]  ;;  %v1059_v46 = vld [vmem:[%s9985_s0 + $0x8e] sm:$0x3]  ;;  %vm2272_vm10 = vcmask 261126  }
  0x11   :  { %27 = vst.msk [vmem:[#allocation2 + $0x348] sm:$0xff] %vm15_vm1, %v9995_v3  ;;  %1688 = vst.msk [vmem:[#allocation2 + $0x1a0] sm:$0xff] %vm15_vm1, %v9995_v3  ;;  %296 = vrot.lane.b32.xlu0 %v5690_v24, %s5545_s28  ;;  %v5016_v48 = vld [vmem:[%s9985_s0 + $0xe8] sm:$0x3]  ;;  %v5492_v49 = vld [vmem:[%s9986_s1] sm:$0xff]   ;;  %v1414_v50 = vrot.slane %v1374_v43, 5  ;;  %v1114_v52 = vpack.c.bf16 %v1059_v46, %v1058_v45 }
  0x12   :  { %1689 = vst.msk [vmem:[#allocation2 + $0x1c8] sm:$0xff] %vm15_vm1, %v9995_v3  ;;  %1690 = vst.msk [vmem:[#allocation2 + $0x1f0] sm:$0xff] %vm15_vm1, %v9995_v3  ;;  %v593_v51 = vld [vmem:[%s9985_s0 + $0x8] sm:$0x3]  ;;  %v1382_v53 = vpack.c.bf16 %v5016_v48, %v5955_v47  ;;  %4065 = vmatpush1.bf16.msra.mxu0 %v5492_v49  ;;  %5328 = vmatpush1.bf16.msra.mxu1 %v5492_v49  ;;  %v5494_v59 = vld [vmem:[%s9986_s1 + $0x10] sm:$0xff]   ;;  %vm1266_vm11 = vcmask 520448  }
  0x13   :  { %1691 = vst.msk [vmem:[#allocation2 + $0x218] sm:$0xff] %vm15_vm1, %v9995_v3  ;;  %1692 = vst.msk [vmem:[#allocation2 + $0x240] sm:$0xff] %vm15_vm1, %v9995_v3  ;;  %v5493_v54 = vld [vmem:[%s9986_s1 + $0x8] sm:$0xff]   ;;  %4066 = vmatprep.subr.bf16.mxu0 %v9995_v3  ;;  %5313 = vmatprep.subr.bf16.mxu1 %v9995_v3  ;;  %v656_v55 = vpack.c.bf16 %v593_v51, %v5579_v2  ;;  %v5495_v10 = vld [vmem:[%s9986_s1 + $0x18] sm:$0xff]   ;;  %vm1312_vm12 = vcmask 780800   ;;  %vm1494_vm13 = vcmask 785923  }
  0x14   :  { %1693 = vst.msk [vmem:[#allocation2 + $0x268] sm:$0xff] %vm15_vm1, %v9995_v3  ;;  %1694 = vst.msk [vmem:[#allocation2 + $0x420] sm:$0xff] %vm15_vm1, %v9995_v3  ;;  %302 = vrot.lane.b32.xlu1 %v5893_v29, %s5545_s28  ;;  %v1422_v56 = vrot.slane %v1382_v53, 5  ;;  %v6044_v57 = vld [vmem:[%s9985_s0 + $0x26] sm:$0xff]  ;;  %v403_v60 = vld [vmem:[%s9985_s0 + $0x2e] sm:$0x3] }
  0x15   :  { %1695 = vst.msk [vmem:[#allocation2 + $0x448] sm:$0xff] %vm15_vm1, %v9995_v3  ;;  %1696 = vst.msk [vmem:[#allocation2 + $0x470] sm:$0xff] %vm15_vm1, %v9995_v3  ;;  %300 = vrot.lane.b32.xlu0 %v5899_v30, %s5545_s28  ;;  %v609_v58 = vld [vmem:[%s9985_s0 + $0x88] sm:$0x3]  ;;  %v720_v63 = vrot.slane %v656_v55, 5  ;;  %v440_v8 = vpack.c.bf16 %v403_v60, %v6044_v57  ;;  %v6079_v11 = vld [vmem:[%s9985_s0 + $0x96] sm:$0xff] }
  0x16   :  { %1697 = vst.msk [vmem:[#allocation2 + $0x498] sm:$0xff] %vm15_vm1, %v9995_v3  ;;  %1698 = vst.msk [vmem:[#allocation2 + $0x4c0] sm:$0xff] %vm15_vm1, %v9995_v3  ;;  %4067 = vmatpush1.bf16.msra.mxu0 %v5493_v54  ;;  %5329 = vmatpush1.bf16.msra.mxu1 %v5493_v54  ;;  %v55_v61 = vld [vmem:[%s9985_s0 + $0x28] sm:$0x3]  ;;  %v664_v1 = vpack.c.bf16 %v609_v58, %v5705_v27  ;;  %v1061_v12 = vld [vmem:[%s9985_s0 + $0x9e] sm:$0x3] }
  0x17   :  { %1699 = vst.msk [vmem:[#allocation2 + $0x4e8] sm:$0xff] %vm15_vm1, %v9995_v3  ;;  %2919 = vst.msk [vmem:[#allocation2 + $0xc0] sm:$0xff] %vm15_vm1, %v9995_v3  ;;  %4068 = vmatprep.subr.bf16.mxu0 %v9995_v3  ;;  %5314 = vmatprep.subr.bf16.mxu1 %v9995_v3  ;;  %v51_v62 = vld [vmem:[%s9985_s0 + $0x8] sm:$0x3]  ;;  %v92_v5 = vpack.c.bf16 %v55_v61, %v5571_v0  ;;  %v57_v16 = vld [vmem:[%s9985_s0 + $0x38] sm:$0x3] }
  0x18   :  { %2920 = vst.msk [vmem:[#allocation2 + $0xe8] sm:$0xff] %vm15_vm1, %v9995_v3  ;;  %2921 = vst.msk [vmem:[#allocation2 + $0x110] sm:$0xff] %vm15_vm1, %v9995_v3  ;;  %306 = vrot.lane.b32.xlu1 %v255_v35, %s5545_s28  ;;  %v5056_v4 = vld [vmem:[%s9985_s0 + $0xe8] sm:$0xff]  ;;  %v90_v7 = vpack.c.bf16 %v51_v62, %v5579_v2  ;;  %v53_v17 = vld [vmem:[%s9985_s0 + $0x18] sm:$0x3]  ;;  %v728_v28 = vrot.slane %v664_v1, 5 }
  0x19   :  { %2922 = vst.msk [vmem:[#allocation2 + $0x138] sm:$0xff] %vm15_vm1, %v9995_v3  ;;  %2923 = vst.msk [vmem:[#allocation2 + $0x160] sm:$0xff] %vm15_vm1, %v9995_v3  ;;  %304 = vrot.lane.b32.xlu0 %v254_v36, %s5545_s28  ;;  %v132_v2 = vrot.slane %v92_v5, 5  ;;  %v6094_v18 = vld [vmem:[%s9985_s0 + $0xf0] sm:$0xff]  ;;  %v5018_v20 = vld [vmem:[%s9985_s0 + $0xf8] sm:$0x3]  ;;  %v91_v26 = vpack.c.bf16 %v53_v17, %v5639_v9  ;;  %v1576_v34 = vpack.c.bf16 %v5056_v4, %v5955_v47 }
  0x1a   :  { %2924 = vst.msk [vmem:[#allocation2 + $0x188] sm:$0xff] %vm15_vm1, %v9995_v3  ;;  %2925 = vst.msk [vmem:[#allocation2 + $0x1b0] sm:$0xff] %vm15_vm1, %v9995_v3  ;;  %4069 = vmatpush1.bf16.msra.mxu0 %v5494_v59  ;;  %5330 = vmatpush1.bf16.msra.mxu1 %v5494_v59  ;;  %v130_v14 = vrot.slane %v90_v7, 5  ;;  %v5002_v22 = vld [vmem:[%s9985_s0 + $0x78] sm:$0x3]  ;;  %v5496_v32 = vld [vmem:[%s9986_s1 + $0x20] sm:$0xff]   ;;  %v1383_v45 = vpack.c.bf16 %v5018_v20, %v6094_v18 }
  0x1b   :  { %2926 = vst.msk [vmem:[#allocation2 + $0x1d8] sm:$0xff] %vm15_vm1, %v9995_v3  ;;  %2927 = vst.msk [vmem:[#allocation2 + $0x200] sm:$0xff] %vm15_vm1, %v9995_v3  ;;  %4070 = vmatprep.subr.bf16.mxu0 %v9995_v3  ;;  %5315 = vmatprep.subr.bf16.mxu1 %v9995_v3  ;;  %v131_v36 = vrot.slane %v91_v26, 5  ;;  %v61_v37 = vld [vmem:[%s9985_s0 + $0x58] sm:$0x3]  ;;  %v5497_v51 = vld [vmem:[%s9986_s1 + $0x28] sm:$0xff]  }
  0x1c   :  { %2928 = vst.msk [vmem:[#allocation2 + $0x228] sm:$0xff] %vm15_vm1, %v9995_v3  ;;  %2929 = vst.msk [vmem:[#allocation2 + $0x250] sm:$0xff] %vm15_vm1, %v9995_v3  ;;  %1170 = vrot.lane.b32.xlu1 %v1106_v42, %s5545_s28  ;;  %v59_v38 = vld [vmem:[%s9985_s0 + $0x48] sm:$0x3]  ;;  %v1044_v39 = vld [vmem:[%s9985_s0 + $0x16] sm:$0xff]  ;;  %v95_v42 = vpack.c.bf16 %v61_v37, %v5651_v13  ;;  %v1375_v13 = vpack.c.bf16 %v5002_v22, %v5671_v19  ;;  %v1423_v55 = vrot.slane %v1383_v45, 5 }
  0x1d   :  { %2930 = vst.msk [vmem:[#allocation2 + $0x278] sm:$0xff] %vm15_vm1, %v9995_v3  ;;  %2931 = vst.msk [vmem:[#allocation2 + $0x340] sm:$0xff] %vm15_vm1, %v9995_v3  ;;  %308 = vrot.lane.b32.xlu0 %v256_v44, %s5545_s28  ;;  %v1045_v41 = vld [vmem:[%s9985_s0 + $0x1e] sm:$0x3]  ;;  %v94_v43 = vpack.c.bf16 %v59_v38, %v5659_v15  ;;  %v1115_v44 = vpack.c.bf16 %v1061_v12, %v6079_v11  ;;  %v65_v46 = vld [vmem:[%s9985_s0 + $0x78] sm:$0x3] }
  0x1e   :  { %2932 = vst.msk [vmem:[#allocation2 + $0x368] sm:$0xff] %vm15_vm1, %v9995_v3  ;;  %2933 = vst.msk [vmem:[#allocation2 + $0x390] sm:$0xff] %vm15_vm1, %v9995_v3  ;;  %4071 = vmatpush1.bf16.msra.mxu0 %v5495_v10  ;;  %5331 = vmatpush1.bf16.msra.mxu1 %v5495_v10  ;;  %v135_v47 = vrot.slane %v95_v42, 5  ;;  %v97_v48 = vpack.c.bf16 %v65_v46, %v5671_v19  ;;  %v63_v49 = vld [vmem:[%s9985_s0 + $0x68] sm:$0x3]  ;;  %v1415_v61 = vrot.slane %v1375_v13, 5 }
  0x1f   :  { %2934 = vst.msk [vmem:[#allocation2 + $0x3b8] sm:$0xff] %vm15_vm1, %v9995_v3  ;;  %2935 = vst.msk [vmem:[#allocation2 + $0x3e0] sm:$0xff] %vm15_vm1, %v9995_v3  ;;  %4072 = vmatprep.subr.bf16.mxu0 %v9995_v3  ;;  %5316 = vmatprep.subr.bf16.mxu1 %v9995_v3  ;;  %v134_v15 = vrot.slane %v94_v43, 5  ;;  %v69_v53 = vld [vmem:[%s9985_s0 + $0x98] sm:$0x3]  ;;  %v5498_v62 = vld [vmem:[%s9986_s1 + $0x30] sm:$0xff]  }
  0x20   :  { %2936 = vst.msk [vmem:[#allocation2 + $0x408] sm:$0xff] %vm15_vm1, %v9995_v3  ;;  %2937 = vst.msk [vmem:[#allocation2 + $0x430] sm:$0xff] %vm15_vm1, %v9995_v3  ;;  %1434 = vrot.lane.b32.xlu1 %v1414_v50, %s5546_s6  ;;  %v1107_v50 = vpack.c.bf16 %v1045_v41, %v1044_v39  ;;  %v137_v19 = vrot.slane %v97_v48, 5  ;;  %v67_v54 = vld [vmem:[%s9985_s0 + $0x88] sm:$0x3]  ;;  %v99_v59 = vpack.c.bf16 %v69_v53, %v5695_v25  ;;  %v5058_v12 = vld [vmem:[%s9985_s0 + $0xf8] sm:$0xff] }
  0x21   :  { %2938 = vst.msk [vmem:[#allocation2 + $0x458] sm:$0xff] %vm15_vm1, %v9995_v3  ;;  %2939 = vst.msk [vmem:[#allocation2 + $0x480] sm:$0xff] %vm15_vm1, %v9995_v3  ;;  %1186 = vrot.lane.b32.xlu0 %v1114_v52, %s5545_s28  ;;  %v96_v52 = vpack.c.bf16 %v63_v49, %v5679_v21  ;;  %v6159_v21 = vld [vmem:[%s9985_s0 + $0x36] sm:$0xff]  ;;  %v98_v60 = vpack.c.bf16 %v67_v54, %v5705_v27  ;;  %v71_v5 = vld [vmem:[%s9985_s0 + $0x108] sm:$0x3]  ;;  %vm1700_vm14 = vcmask 261125  }
  0x22   :  { %2940 = vst.msk [vmem:[#allocation2 + $0x4a8] sm:$0xff] %vm15_vm1, %v9995_v3  ;;  %2941 = vst.msk [vmem:[#allocation2 + $0x4d0] sm:$0xff] %vm15_vm1, %v9995_v3  ;;  %4073 = vmatpush1.bf16.msra.mxu0 %v5496_v32  ;;  %5332 = vmatpush1.bf16.msra.mxu1 %v5496_v32  ;;  %v73_v4 = vld [vmem:[%s9985_s0 + $0x118] sm:$0x3]  ;;  %v100_v10 = vpack.c.bf16 %v71_v5, %v5914_v33  ;;  %v898_v22 = vld [vmem:[%s9985_s0 + $0x88] sm:$0xff]  ;;  %vm9992_vm15 = vcmask 258048  }
  0x23   :  { %2942 = vst.msk [vmem:[#allocation2 + $0x4f8] sm:$0xff] %vm15_vm1, %v9995_v3  ;;  %4074 = vmatprep.subr.bf16.mxu0 %v9995_v3  ;;  %5317 = vmatprep.subr.bf16.mxu1 %v9995_v3  ;;  %v136_v58 = vrot.slane %v96_v52, 5  ;;  %v138_v1 = vrot.slane %v98_v60, 5  ;;  %v595_v7 = vld [vmem:[%s9985_s0 + $0x18] sm:$0x3]  ;;  %v5501_v38 = vld [vmem:[%s9986_s1 + $0x48] sm:$0xff]  }
  0x24   :  { %192 = vst.msk [vmem:[#allocation2] sm:$0xff] %vm191_vm2, %v9995_v3  ;;  %193 = vst.msk [vmem:[#allocation2 + $0x28] sm:$0xff] %vm191_vm2, %v9995_v3  ;;  %1608 = vrot.lane.b32.xlu1 %v5690_v24, %s5547_s19  ;;  %v93_v24 = vpack.c.bf16 %v57_v16, %v5630_v6  ;;  %v657_v33 = vpack.c.bf16 %v595_v7, %v5639_v9  ;;  %v611_v16 = vld [vmem:[%s9985_s0 + $0x98] sm:$0x3]  ;;  %v897_v9 = vld [vmem:[%s9985_s0 + $0x80] sm:$0xff]  ;;  %vm848_vm0 = vcmask 1048323  }
  0x25   :  { %194 = vst.msk [vmem:[#allocation2 + $0x50] sm:$0xff] %vm191_vm2, %v9995_v3  ;;  %195 = vst.msk [vmem:[#allocation2 + $0x78] sm:$0xff] %vm191_vm2, %v9995_v3  ;;  %1450 = vrot.lane.b32.xlu0 %v1422_v56, %s5546_s6  ;;  %v405_v56 = vld [vmem:[%s9985_s0 + $0x3e] sm:$0x3]  ;;  %v953_v26 = vpack.c.bf16 %v898_v22, %v897_v9  ;;  %v1047_v32 = vld [vmem:[%s9985_s0 + $0x2e] sm:$0x3] }
  0x26   :  { %196 = vst.msk [vmem:[#allocation2 + $0xa0] sm:$0xff] %vm191_vm2, %v9995_v3  ;;  %197 = vst.msk [vmem:[#allocation2 + $0xc8] sm:$0xff] %vm191_vm2, %v9995_v3  ;;  %v133_v35 = vrot.slane %v93_v24, 5  ;;  %4075 = vmatpush1.bf16.msra.mxu0 %v5497_v51  ;;  %5333 = vmatpush1.bf16.msra.mxu1 %v5497_v51  ;;  %v441_v11 = vpack.c.bf16 %v405_v56, %v6159_v21  ;;  %v5499_v17 = vld [vmem:[%s9986_s1 + $0x38] sm:$0xff]   ;;  %v1062_v39 = vld [vmem:[%s9985_s0 + $0xa6] sm:$0xff] }
  0x27   :  { %198 = vst.msk [vmem:[#allocation2 + $0x280] sm:$0xff] %vm191_vm2, %v9995_v3  ;;  %199 = vst.msk [vmem:[#allocation2 + $0x2a8] sm:$0xff] %vm191_vm2, %v9995_v3  ;;  %4076 = vmatprep.subr.bf16.mxu0 %v9995_v3  ;;  %5318 = vmatprep.subr.bf16.mxu1 %v9995_v3  ;;  %v1063_v41 = vld [vmem:[%s9985_s0 + $0xae] sm:$0x3]  ;;  %v899_v42 = vld [vmem:[%s9985_s0 + $0x90] sm:$0xff] }
  0x28   :  { %200 = vst.msk [vmem:[#allocation2 + $0x2d0] sm:$0xff] %vm191_vm2, %v9995_v3  ;;  %201 = vst.msk [vmem:[#allocation2 + $0x2f8] sm:$0xff] %vm191_vm2, %v9995_v3  ;;  %752 = vrot.lane.b32.xlu1 %v720_v63, %s5547_s19  ;;  %v139_v63 = vrot.slane %v99_v59, 5  ;;  %v883_v45 = vld [vmem:[%s9985_s0 + $0x10] sm:$0xff]  ;;  %v884_v46 = vld [vmem:[%s9985_s0 + $0x18] sm:$0xff]  ;;  %v1116_v13 = vpack.c.bf16 %v1063_v41, %v1062_v39 }
  0x29   :  { %202 = vst.msk [vmem:[#allocation2 + $0x320] sm:$0xff] %vm191_vm2, %v9995_v3  ;;  %203 = vst.msk [vmem:[#allocation2 + $0x348] sm:$0xff] %vm191_vm2, %v9995_v3  ;;  %482 = vrot.lane.b32.xlu0 %v440_v8, %s5546_s6  ;;  %v101_v8 = vpack.c.bf16 %v73_v4, %v5904_v31  ;;  %v75_v31 = vld [vmem:[%s9985_s0 + $0x128] sm:$0x3]  ;;  %v5502_v48 = vld [vmem:[%s9986_s1 + $0x50] sm:$0xff]  }
  0x2a   :  { %1812 = vst.msk [vmem:[#allocation2 + $0x1a0] sm:$0xff] %vm191_vm2, %v9995_v3  ;;  %1813 = vst.msk [vmem:[#allocation2 + $0x1c8] sm:$0xff] %vm191_vm2, %v9995_v3  ;;  %4077 = vmatpush1.bf16.msra.mxu0 %v5498_v62  ;;  %v102_v20 = vpack.c.bf16 %v75_v31, %v5937_v40  ;;  %5334 = vmatpush1.bf16.msra.mxu1 %v5498_v62  ;;  %v1577_v40 = vpack.c.bf16 %v5058_v12, %v6094_v18  ;;  %v597_v51 = vld [vmem:[%s9985_s0 + $0x28] sm:$0x3]  ;;  %v885_v53 = vld [vmem:[%s9985_s0 + $0x20] sm:$0xff] }
  0x2b   :  { %1824 = vst.msk [vmem:[#allocation2 + $0x420] sm:$0xff] %vm191_vm2, %v9995_v3  ;;  %1825 = vst.msk [vmem:[#allocation2 + $0x448] sm:$0xff] %vm191_vm2, %v9995_v3  ;;  %4078 = vmatprep.subr.bf16.mxu0 %v9995_v3  ;;  %5319 = vmatprep.subr.bf16.mxu1 %v9995_v3  ;;  %v886_v54 = vld [vmem:[%s9985_s0 + $0x28] sm:$0xff]  ;;  %v5503_v56 = vld [vmem:[%s9986_s1 + $0x58] sm:$0xff]  }
  0x2c   :  { %2975 = vst.msk [vmem:[#allocation2 + $0xc0] sm:$0xff] %vm191_vm2, %v9995_v3  ;;  %2976 = vst.msk [vmem:[#allocation2 + $0xe8] sm:$0xff] %vm191_vm2, %v9995_v3  ;;  %768 = vrot.lane.b32.xlu1 %v728_v28, %s5547_s19  ;;  %v142_v24 = vrot.slane %v102_v20, 5  ;;  %v721_v28 = vrot.slane %v657_v33, 5  ;;  %v901_v59 = vld [vmem:[%s9985_s0 + $0xa0] sm:$0xff]  ;;  %v902_v60 = vld [vmem:[%s9985_s0 + $0xa8] sm:$0xff] }
  0x2d   :  { %2977 = vst.msk [vmem:[#allocation2 + $0x110] sm:$0xff] %vm191_vm2, %v9995_v3  ;;  %2978 = vst.msk [vmem:[#allocation2 + $0x138] sm:$0xff] %vm191_vm2, %v9995_v3  ;;  %1624 = vrot.lane.b32.xlu0 %v1576_v34, %s5547_s19  ;;  %v665_v34 = vpack.c.bf16 %v611_v16, %v5695_v25  ;;  %v1064_v62 = vld [vmem:[%s9985_s0 + $0xb6] sm:$0xff]  ;;  %v5504_v5 = vld [vmem:[%s9986_s1 + $0x60] sm:$0xff]  }
  0x2e   :  { %2979 = vst.msk [vmem:[#allocation2 + $0x160] sm:$0xff] %vm191_vm2, %v9995_v3  ;;  %2980 = vst.msk [vmem:[#allocation2 + $0x188] sm:$0xff] %vm191_vm2, %v9995_v3  ;;  %4079 = vmatpush1.bf16.msra.mxu0 %v5499_v17  ;;  %5335 = vmatpush1.bf16.msra.mxu1 %v5499_v17  ;;  %v903_v7 = vld [vmem:[%s9985_s0 + $0xb0] sm:$0xff]  ;;  %v888_v12 = vld [vmem:[%s9985_s0 + $0x38] sm:$0xff] }
  0x2f   :  { %2981 = vst.msk [vmem:[#allocation2 + $0x1b0] sm:$0xff] %vm191_vm2, %v9995_v3  ;;  %2982 = vst.msk [vmem:[#allocation2 + $0x1d8] sm:$0xff] %vm191_vm2, %v9995_v3  ;;  %4080 = vmatprep.subr.bf16.mxu0 %v9995_v3  ;;  %5320 = vmatprep.subr.bf16.mxu1 %v9995_v3  ;;  %v729_v37 = vrot.slane %v665_v34, 5  ;;  %v599_v31 = vld [vmem:[%s9985_s0 + $0x38] sm:$0x3]  ;;  %v5505_v17 = vld [vmem:[%s9986_s1 + $0x68] sm:$0xff]  }
  0x30   :  { %2983 = vst.msk [vmem:[#allocation2 + $0x200] sm:$0xff] %vm191_vm2, %v9995_v3  ;;  %2984 = vst.msk [vmem:[#allocation2 + $0x228] sm:$0xff] %vm191_vm2, %v9995_v3  ;;  %1188 = vrot.lane.b32.xlu1 %v1115_v44, %s5545_s28  ;;  %v900_v44 = vld [vmem:[%s9985_s0 + $0x98] sm:$0xff]  ;;  %v889_v20 = vld [vmem:[%s9985_s0 + $0x40] sm:$0xff] }
  0x31   :  { %2985 = vst.msk [vmem:[#allocation2 + $0x250] sm:$0xff] %vm191_vm2, %v9995_v3  ;;  %2986 = vst.msk [vmem:[#allocation2 + $0x278] sm:$0xff] %vm191_vm2, %v9995_v3  ;;  %1172 = vrot.lane.b32.xlu0 %v1107_v50, %s5545_s28  ;;  %v954_v49 = vpack.c.bf16 %v900_v44, %v899_v42  ;;  %v6284_v50 = vpack.c.bf16 %v884_v46, %v883_v45  ;;  %v6392_v9 = vld [vmem:[%s9985_s0 + $0xb0] sm:$0xff]  ;;  %v615_v22 = vld [vmem:[%s9985_s0 + $0xb8] sm:$0x3] }
  0x32   :  { %2987 = vst.msk [vmem:[#allocation2 + $0x340] sm:$0xff] %vm191_vm2, %v9995_v3  ;;  %2988 = vst.msk [vmem:[#allocation2 + $0x368] sm:$0xff] %vm191_vm2, %v9995_v3  ;;  %v6417_v34 = vld [vmem:[%s9985_s0 + $0x56] sm:$0xff]  ;;  %v1066_v42 = vld [vmem:[%s9985_s0 + $0xc6] sm:$0xff] }
  0x33   :  { %2989 = vst.msk [vmem:[#allocation2 + $0x390] sm:$0xff] %vm191_vm2, %v9995_v3  ;;  %2990 = vst.msk [vmem:[#allocation2 + $0x3b8] sm:$0xff] %vm191_vm2, %v9995_v3  ;;  %v2316_v44 = vld [vmem:[%s9985_s0 + $0x58] sm:$0xff]  ;;  %v6463_v45 = vld [vmem:[%s9985_s0 + $0x66] sm:$0xff] }
  0x34   :  { %2991 = vst.msk [vmem:[#allocation2 + $0x3e0] sm:$0xff] %vm191_vm2, %v9995_v3  ;;  %2992 = vst.msk [vmem:[#allocation2 + $0x408] sm:$0xff] %vm191_vm2, %v9995_v3  ;;  %1452 = vrot.lane.b32.xlu1 %v1423_v55, %s5546_s6  ;;  %v658_v55 = vpack.c.bf16 %v597_v51, %v5571_v0  ;;  %v955_v0 = vpack.c.bf16 %v902_v60, %v901_v59  ;;  %v411_v46 = vld [vmem:[%s9985_s0 + $0x6e] sm:$0x3]  ;;  %v5532_v60 = vld [vmem:[%s9985_s0 + $0x40] sm:$0xff] }
  0x35   :  { %2993 = vst.msk [vmem:[#allocation2 + $0x430] sm:$0xff] %vm191_vm2, %v9995_v3  ;;  %2994 = vst.msk [vmem:[#allocation2 + $0x458] sm:$0xff] %vm191_vm2, %v9995_v3  ;;  %1436 = vrot.lane.b32.xlu0 %v1415_v61, %s5546_s6 }
  0x36   :  { %2995 = vst.msk [vmem:[#allocation2 + $0x480] sm:$0xff] %vm191_vm2, %v9995_v3  ;;  %2996 = vst.msk [vmem:[#allocation2 + $0x4a8] sm:$0xff] %vm191_vm2, %v9995_v3  ;;  %v722_v4 = vrot.slane %v658_v55, 5 }
  0x37   :  { %2997 = vst.msk [vmem:[#allocation2 + $0x4d0] sm:$0xff] %vm191_vm2, %v9995_v3  ;;  %2998 = vst.msk [vmem:[#allocation2 + $0x4f8] sm:$0xff] %vm191_vm2, %v9995_v3 }
  0x38   :  { %1010 = vst.msk [vmem:[#allocation2 + $0x8] sm:$0xe0] %vm1009_vm3, %v9995_v3  ;;  %484 = vrot.lane.b32.xlu1 %v441_v11, %s5546_s6  ;;  %v887_v11 = vld [vmem:[%s9985_s0 + $0x30] sm:$0xff] }
  0x39   :  { %365 = vst.msk [vmem:[#allocation2] sm:$0xff] %vm9991_vm4, %v9995_v3  ;;  %366 = vst.msk [vmem:[#allocation2 + $0x28] sm:$0xff] %vm9991_vm4, %v9995_v3  ;;  %1610 = vrot.lane.b32.xlu0 %v5686_v23, %s5547_s19  ;;  %v1108_v23 = vpack.c.bf16 %v1047_v32, %v6044_v57  ;;  %v407_v57 = vld [vmem:[%s9985_s0 + $0x4e] sm:$0x3]  ;;  %v5506_v32 = vld [vmem:[%s9986_s1 + $0x70] sm:$0xff]  }
  0x3a   :  { %367 = vst.msk [vmem:[#allocation2 + $0x50] sm:$0xff] %vm9991_vm4, %v9995_v3  ;;  %368 = vst.msk [vmem:[#allocation2 + $0x78] sm:$0xff] %vm9991_vm4, %v9995_v3 }
  0x3b   :  { %369 = vst.msk [vmem:[#allocation2 + $0xa0] sm:$0xff] %vm9991_vm4, %v9995_v3  ;;  %370 = vst.msk [vmem:[#allocation2 + $0xc8] sm:$0xff] %vm9991_vm4, %v9995_v3 }
  0x3c   :  { %371 = vst.msk [vmem:[#allocation2 + $0x280] sm:$0xff] %vm9991_vm4, %v9995_v3  ;;  %372 = vst.msk [vmem:[#allocation2 + $0x2a8] sm:$0xff] %vm9991_vm4, %v9995_v3  ;;  %1626 = vrot.lane.b32.xlu1 %v1577_v40, %s5547_s19  ;;  %v906_v40 = vld [vmem:[%s9985_s0 + $0xc8] sm:$0xff] }
  0x3d   :  { %373 = vst.msk [vmem:[#allocation2 + $0x2d0] sm:$0xff] %vm9991_vm4, %v9995_v3  ;;  %374 = vst.msk [vmem:[#allocation2 + $0x2f8] sm:$0xff] %vm9991_vm4, %v9995_v3  ;;  %754 = vrot.lane.b32.xlu0 %v721_v28, %s5547_s19 }
  0x3e   :  { %375 = vst.msk [vmem:[#allocation2 + $0x320] sm:$0xff] %vm9991_vm4, %v9995_v3  ;;  %376 = vst.msk [vmem:[#allocation2 + $0x348] sm:$0xff] %vm9991_vm4, %v9995_v3 }
  0x3f   :  { %1911 = vst.msk [vmem:[#allocation2 + $0x1a0] sm:$0xff] %vm9991_vm4, %v9995_v3  ;;  %1912 = vst.msk [vmem:[#allocation2 + $0x1c8] sm:$0xff] %vm9991_vm4, %v9995_v3 }
  0x40   :  { %1923 = vst.msk [vmem:[#allocation2 + $0x420] sm:$0xff] %vm9991_vm4, %v9995_v3  ;;  %1924 = vst.msk [vmem:[#allocation2 + $0x448] sm:$0xff] %vm9991_vm4, %v9995_v3  ;;  %1174 = vrot.lane.b32.xlu1 %v1108_v23, %s5545_s28 }
  0x41   :  { %560 = vst.msk [vmem:[#allocation2] sm:$0x7] %vm9990_vm5, %v9995_v3  ;;  %561 = vst.msk [vmem:[#allocation2 + $0x28] sm:$0x7] %vm9990_vm5, %v9995_v3  ;;  %770 = vrot.lane.b32.xlu0 %v729_v37, %s5547_s19  ;;  %v5008_v37 = vld [vmem:[%s9985_s0 + $0xa8] sm:$0x3] }
  0x42   :  { %562 = vst.msk [vmem:[#allocation2 + $0x50] sm:$0x7] %vm9990_vm5, %v9995_v3  ;;  %563 = vst.msk [vmem:[#allocation2 + $0x78] sm:$0x7] %vm9990_vm5, %v9995_v3 }
  0x43   :  { %564 = vst.msk [vmem:[#allocation2 + $0xa0] sm:$0x7] %vm9990_vm5, %v9995_v3  ;;  %565 = vst.msk [vmem:[#allocation2 + $0xc8] sm:$0x7] %vm9990_vm5, %v9995_v3 }
  0x44   :  { %576 = vst.msk [vmem:[#allocation2 + $0x280] sm:$0x7] %vm9990_vm5, %v9995_v3  ;;  %577 = vst.msk [vmem:[#allocation2 + $0x2a8] sm:$0x7] %vm9990_vm5, %v9995_v3 }
  0x45   :  { %578 = vst.msk [vmem:[#allocation2 + $0x2d0] sm:$0x7] %vm9990_vm5, %v9995_v3  ;;  %579 = vst.msk [vmem:[#allocation2 + $0x2f8] sm:$0x7] %vm9990_vm5, %v9995_v3  ;;  %1190 = vrot.lane.b32.xlu0 %v1116_v13, %s5545_s28  ;;  %v6471_v13 = vld [vmem:[%s9985_s0 + $0xc0] sm:$0xff] }
  0x46   :  { %580 = vst.msk [vmem:[#allocation2 + $0x320] sm:$0x7] %vm9990_vm5, %v9995_v3  ;;  %581 = vst.msk [vmem:[#allocation2 + $0x348] sm:$0x7] %vm9990_vm5, %v9995_v3 }
  0x47   :  { %1999 = vst.msk [vmem:[#allocation2 + $0x1a0] sm:$0xff] %vm1515_vm6, %v9995_v3  ;;  %2000 = vst.msk [vmem:[#allocation2 + $0x1c8] sm:$0xff] %vm1515_vm6, %v9995_v3 }
  0x48   :  { %2011 = vst.msk [vmem:[#allocation2 + $0x420] sm:$0xff] %vm1515_vm6, %v9995_v3  ;;  %2012 = vst.msk [vmem:[#allocation2 + $0x448] sm:$0xff] %vm1515_vm6, %v9995_v3 }
  0x49   :  { %173 = vst.msk [vmem:[#allocation2 + $0x140] sm:$0xf8] %vm170_vm7, %v132_v2  ;;  %171 = vst.msk [vmem:[#allocation2 + $0xf0] sm:$0xf8] %vm170_vm7, %v130_v14  ;;  %v141_v2 = vrot.slane %v101_v8, 5  ;;  %v140_v14 = vrot.slane %v100_v10, 5  ;;  %1612 = vrot.lane.b32.xlu0 %v5899_v30, %s5547_s19 }
  0x4a   :  { %174 = vst.msk [vmem:[#allocation2 + $0x168] sm:$0xf8] %vm170_vm7, %v133_v35  ;;  %172 = vst.msk [vmem:[#allocation2 + $0x118] sm:$0xf8] %vm170_vm7, %v131_v36  ;;  %v5004_v35 = vld [vmem:[%s9985_s0 + $0x88] sm:$0x3] }
  0x4b   :  { %176 = vst.msk [vmem:[#allocation2 + $0x1b8] sm:$0xf8] %vm170_vm7, %v135_v47  ;;  %175 = vst.msk [vmem:[#allocation2 + $0x190] sm:$0xf8] %vm170_vm7, %v134_v15  ;;  %v5500_v36 = vld [vmem:[%s9986_s1 + $0x40] sm:$0xff]   ;;  %v1376_v18 = vpack.c.bf16 %v5004_v35, %v5705_v27  ;;  %v904_v8 = vld [vmem:[%s9985_s0 + $0xb8] sm:$0xff] }
  0x4c   :  { %178 = vst.msk [vmem:[#allocation2 + $0x208] sm:$0xf8] %vm170_vm7, %v137_v19  ;;  %177 = vst.msk [vmem:[#allocation2 + $0x1e0] sm:$0xf8] %vm170_vm7, %v136_v58  ;;  %4081 = vmatpush1.bf16.msra.mxu0 %v5500_v36  ;;  %5336 = vmatpush1.bf16.msra.mxu1 %v5500_v36  ;;  %v6253_v27 = vld [vmem:[%s9985_s0 + $0x46] sm:$0xff]  ;;  %v6312_v58 = vpack.c.bf16 %v886_v54, %v885_v53  ;;  %v956_v10 = vpack.c.bf16 %v904_v8, %v903_v7  ;;  %v907_v53 = vld [vmem:[%s9985_s0 + $0xd0] sm:$0xff] }
  0x4d   :  { %180 = vst.msk [vmem:[#allocation2 + $0x258] sm:$0xf8] %vm170_vm7, %v139_v63  ;;  %179 = vst.msk [vmem:[#allocation2 + $0x230] sm:$0xf8] %vm170_vm7, %v138_v1  ;;  %4082 = vmatprep.subr.bf16.mxu0 %v9995_v3  ;;  %5321 = vmatprep.subr.bf16.mxu1 %v9995_v3  ;;  %v1416_v43 = vrot.slane %v1376_v18, 5  ;;  %v6276_v47 = vld [vmem:[%s9985_s0 + $0xa0] sm:$0xff]  ;;  %v442_v52 = vpack.c.bf16 %v407_v57, %v6253_v27  ;;  %v667_v18 = vpack.c.bf16 %v615_v22, %v6392_v9 }
  0x4e   :  { %182 = vst.msk [vmem:[#allocation2 + $0x398] sm:$0xf8] %vm170_vm7, %v141_v2  ;;  %181 = vst.msk [vmem:[#allocation2 + $0x370] sm:$0xf8] %vm170_vm7, %v140_v14  ;;  %v613_v15 = vld [vmem:[%s9985_s0 + $0xa8] sm:$0x3]  ;;  %v6361_v2 = vpack.c.bf16 %v888_v12, %v887_v11  ;;  %756 = vrot.lane.b32.xlu0 %v722_v4, %s5547_s19  ;;  %v1378_v57 = vpack.c.bf16 %v5008_v37, %v6276_v47 }
  0x4f   :  { %183 = vst.msk [vmem:[#allocation2 + $0x3c0] sm:$0xf8] %vm170_vm7, %v142_v24  ;;  %1438 = vrot.lane.b32.xlu1 %v1416_v43, %s5546_s6  ;;  %v666_v19 = vpack.c.bf16 %v613_v15, %v6276_v47  ;;  %v1065_v63 = vld [vmem:[%s9985_s0 + $0xbe] sm:$0x3]  ;;  %v5006_v30 = vld [vmem:[%s9985_s0 + $0x98] sm:$0x3]  ;;  %v659_v24 = vpack.c.bf16 %v599_v31, %v5630_v6 }
  0x50   :  { %985 = vst.msk [vmem:[#allocation2 + $0x148] sm:$0xff] %vm15_vm1, %v953_v26  ;;  %4083 = vmatpush1.bf16.msra.mxu0 %v5501_v38  ;;  %5337 = vmatpush1.bf16.msra.mxu1 %v5501_v38  ;;  %986 = vst.msk [vmem:[#allocation2 + $0x170] sm:$0xff] %vm15_vm1, %v954_v49  ;;  %v1049_v1 = vld [vmem:[%s9985_s0 + $0x3e] sm:$0x3]  ;;  %v1117_v14 = vpack.c.bf16 %v1065_v63, %v1064_v62  ;;  %v1377_v16 = vpack.c.bf16 %v5006_v30, %v5695_v25  ;;  %v905_v26 = vld [vmem:[%s9985_s0 + $0xc0] sm:$0xff]  ;;  %v731_v41 = vrot.slane %v667_v18, 5 }
  0x51   :  { %1018 = vst.msk [vmem:[#allocation2 + $0x148] sm:$0xe0] %vm1009_vm3, %v9995_v3  ;;  %4084 = vmatprep.subr.bf16.mxu0 %v9995_v3  ;;  %5322 = vmatprep.subr.bf16.mxu1 %v9995_v3  ;;  %1019 = vst.msk [vmem:[#allocation2 + $0x170] sm:$0xe0] %vm1009_vm3, %v9995_v3  ;;  %v730_v61 = vrot.slane %v666_v19, 5  ;;  %v1109_v33 = vpack.c.bf16 %v1049_v1, %v6159_v21  ;;  %v890_v21 = vld [vmem:[%s9985_s0 + $0x48] sm:$0xff]  ;;  %v957_v6 = vpack.c.bf16 %v906_v40, %v905_v26 }
  0x52   :  { %978 = vst.msk [vmem:[#allocation2 + $0x30] sm:$0xff] %vm15_vm1, %v6284_v50  ;;  %979 = vst.msk [vmem:[#allocation2 + $0x58] sm:$0xff] %vm15_vm1, %v6312_v58  ;;  %v6387_v25 = vpack.c.bf16 %v890_v21, %v889_v20  ;;  %v1417_v28 = vrot.slane %v1377_v16, 5  ;;  %v409_v35 = vld [vmem:[%s9985_s0 + $0x5e] sm:$0x3]  ;;  %v723_v23 = vrot.slane %v659_v24, 5 }
  0x53   :  { %1011 = vst.msk [vmem:[#allocation2 + $0x30] sm:$0xe0] %vm1009_vm3, %v9995_v3  ;;  %486 = vrot.lane.b32.xlu1 %v442_v52, %s5546_s6  ;;  %1012 = vst.msk [vmem:[#allocation2 + $0x58] sm:$0xe0] %vm1009_vm3, %v9995_v3  ;;  %1176 = vrot.lane.b32.xlu0 %v1109_v33, %s5545_s28  ;;  %v1051_v36 = vld [vmem:[%s9985_s0 + $0x4e] sm:$0x3]  ;;  %v443_v39 = vpack.c.bf16 %v409_v35, %v6417_v34 }
  0x54   :  { %4085 = vmatpush1.bf16.msra.mxu0 %v5502_v48  ;;  %5338 = vmatpush1.bf16.msra.mxu1 %v5502_v48  ;;  %987 = vst.msk [vmem:[#allocation2 + $0x198] sm:$0xff] %vm15_vm1, %v955_v0  ;;  %988 = vst.msk [vmem:[#allocation2 + $0x1c0] sm:$0xff] %vm15_vm1, %v956_v10  ;;  %v5507_v38 = vld [vmem:[%s9986_s1 + $0x78] sm:$0xff]   ;;  %v1067_v43 = vld [vmem:[%s9985_s0 + $0xce] sm:$0x3]  ;;  %v1418_v51 = vrot.slane %v1378_v57, 5 }
  0x55   :  { %4086 = vmatprep.subr.bf16.mxu0 %v9995_v3  ;;  %5323 = vmatprep.subr.bf16.mxu1 %v9995_v3  ;;  %1020 = vst.msk [vmem:[#allocation2 + $0x198] sm:$0xe0] %vm1009_vm3, %v9995_v3  ;;  %1021 = vst.msk [vmem:[#allocation2 + $0x1c0] sm:$0xe0] %vm1009_vm3, %v9995_v3  ;;  %v617_v15 = vld [vmem:[%s9985_s0 + $0xc8] sm:$0x3]  ;;  %v1118_v19 = vpack.c.bf16 %v1067_v43, %v1066_v42 }
  0x56   :  { %980 = vst.msk [vmem:[#allocation2 + $0x80] sm:$0xff] %vm15_vm1, %v6361_v2  ;;  %981 = vst.msk [vmem:[#allocation2 + $0xa8] sm:$0xff] %vm15_vm1, %v6387_v25  ;;  %v601_v48 = vld [vmem:[%s9985_s0 + $0x48] sm:$0x3]  ;;  %v6485_v52 = vld [vmem:[%s9985_s0 + $0xd8] sm:$0xff]  ;;  %v668_v59 = vpack.c.bf16 %v617_v15, %v6471_v13 }
  0x57   :  { %772 = vrot.lane.b32.xlu1 %v730_v61, %s5547_s19  ;;  %1013 = vst.msk [vmem:[#allocation2 + $0x80] sm:$0xe0] %vm1009_vm3, %v9995_v3  ;;  %1014 = vst.msk [vmem:[#allocation2 + $0xa8] sm:$0xe0] %vm1009_vm3, %v9995_v3  ;;  %1440 = vrot.lane.b32.xlu0 %v1417_v28, %s5546_s6  ;;  %v5048_v54 = vld [vmem:[%s9985_s0 + $0xa8] sm:$0xff]  ;;  %v958_v55 = vpack.c.bf16 %v6485_v52, %v907_v53  ;;  %v660_v0 = vpack.c.bf16 %v601_v48, %v5532_v60  ;;  %v1068_v62 = vld [vmem:[%s9985_s0 + $0xd6] sm:$0xff] }
  0x58   :  { %4087 = vmatpush1.bf16.msra.mxu0 %v5503_v56  ;;  %5339 = vmatpush1.bf16.msra.mxu1 %v5503_v56  ;;  %989 = vst.msk [vmem:[#allocation2 + $0x1e8] sm:$0xff] %vm15_vm1, %v957_v6  ;;  %v444_v56 = vpack.c.bf16 %v411_v46, %v6463_v45  ;;  %v1572_v61 = vpack.c.bf16 %v5048_v54, %v6276_v47  ;;  %v1069_v63 = vld [vmem:[%s9985_s0 + $0xde] sm:$0x3]  ;;  %v732_v1 = vrot.slane %v668_v59, 5  ;;  %v5010_v47 = vld [vmem:[%s9985_s0 + $0xb8] sm:$0x3] }
  0x59   :  { %4088 = vmatprep.subr.bf16.mxu0 %v9995_v3  ;;  %5324 = vmatprep.subr.bf16.mxu1 %v9995_v3  ;;  %1022 = vst.msk [vmem:[#allocation2 + $0x1e8] sm:$0xe0] %vm1009_vm3, %v9995_v3  ;;  %v724_v4 = vrot.slane %v660_v0, 5  ;;  %v2317_v7 = vld [vmem:[%s9985_s0 + $0x60] sm:$0xff]  ;;  %v2318_v8 = vld [vmem:[%s9985_s0 + $0x68] sm:$0xff]  ;;  %v1119_v10 = vpack.c.bf16 %v1069_v63, %v1068_v62  ;;  %v5050_v12 = vld [vmem:[%s9985_s0 + $0xb8] sm:$0xff] }
  0x5a   :  { %990 = vst.msk [vmem:[#allocation2 + $0x210] sm:$0xff] %vm15_vm1, %v958_v55  ;;  %v6530_v30 = vpack.c.bf16 %v2318_v8, %v2317_v7  ;;  %v603_v31 = vld [vmem:[%s9985_s0 + $0x58] sm:$0x3]  ;;  %v1573_v33 = vpack.c.bf16 %v5050_v12, %v6392_v9  ;;  %v5533_v16 = vld [vmem:[%s9985_s0 + $0x50] sm:$0xff]  ;;  %v909_v20 = vld [vmem:[%s9985_s0 + $0xe0] sm:$0xff] }
  0x5b   :  { %1192 = vrot.lane.b32.xlu1 %v1117_v14, %s5545_s28  ;;  %488 = vrot.lane.b32.xlu0 %v443_v39, %s5546_s6  ;;  %1023 = vst.msk [vmem:[#allocation2 + $0x210] sm:$0xe0] %vm1009_vm3, %v9995_v3  ;;  %v1379_v14 = vpack.c.bf16 %v5010_v47, %v6392_v9  ;;  %v910_v21 = vld [vmem:[%s9985_s0 + $0xe8] sm:$0xff]  ;;  %v6561_v9 = vld [vmem:[%s9985_s0 + $0x76] sm:$0xff] }
  0x5c   :  { %4089 = vmatpush1.bf16.msra.mxu0 %v5504_v5  ;;  %5340 = vmatpush1.bf16.msra.mxu1 %v5504_v5  ;;  %v1053_v5 = vld [vmem:[%s9985_s0 + $0x5e] sm:$0x3]  ;;  %983 = vst.msk [vmem:[#allocation2 + $0xf8] sm:$0xff] %vm15_vm1, %v6530_v30  ;;  %v959_v24 = vpack.c.bf16 %v910_v21, %v909_v20  ;;  %v6569_v40 = vld [vmem:[%s9985_s0 + $0xd0] sm:$0xff]  ;;  %v619_v28 = vld [vmem:[%s9985_s0 + $0xd8] sm:$0x3] }
  0x5d   :  { %4090 = vmatprep.subr.bf16.mxu0 %v9995_v3  ;;  %5325 = vmatprep.subr.bf16.mxu1 %v9995_v3  ;;  %v1111_v11 = vpack.c.bf16 %v1053_v5, %v6417_v34  ;;  %1016 = vst.msk [vmem:[#allocation2 + $0xf8] sm:$0xe0] %vm1009_vm3, %v9995_v3  ;;  %v1419_v22 = vrot.slane %v1379_v14, 5  ;;  %v413_v26 = vld [vmem:[%s9985_s0 + $0x7e] sm:$0x3]  ;;  %v669_v35 = vpack.c.bf16 %v619_v28, %v6569_v40  ;;  %v1070_v39 = vld [vmem:[%s9985_s0 + $0xe6] sm:$0xff] }
  0x5e   :  { %991 = vst.msk [vmem:[#allocation2 + $0x238] sm:$0xff] %vm15_vm1, %v959_v24  ;;  %v445_v6 = vpack.c.bf16 %v413_v26, %v6561_v9  ;;  %v1055_v34 = vld [vmem:[%s9985_s0 + $0x6e] sm:$0x3]  ;;  %v2320_v42 = vld [vmem:[%s9985_s0 + $0x78] sm:$0xff]  ;;  %v605_v46 = vld [vmem:[%s9985_s0 + $0x68] sm:$0x3] }
  0x5f   :  { %1614 = vrot.lane.b32.xlu1 %v5893_v29, %s5547_s19  ;;  %v1110_v29 = vpack.c.bf16 %v1051_v36, %v6253_v27  ;;  %v2315_v27 = vld [vmem:[%s9985_s0 + $0x50] sm:$0xff]  ;;  %774 = vrot.lane.b32.xlu0 %v731_v41, %s5547_s19  ;;  %1024 = vst.msk [vmem:[#allocation2 + $0x238] sm:$0xe0] %vm1009_vm3, %v9995_v3  ;;  %v5012_v36 = vld [vmem:[%s9985_s0 + $0xc8] sm:$0x3]  ;;  %v733_v37 = vrot.slane %v669_v35, 5 }
  0x60   :  { %4091 = vmatpush1.bf16.msra.mxu0 %v5505_v17  ;;  %5341 = vmatpush1.bf16.msra.mxu1 %v5505_v17  ;;  %v6479_v49 = vpack.c.bf16 %v2316_v44, %v2315_v27  ;;  %v661_v17 = vpack.c.bf16 %v603_v31, %v5533_v16  ;;  %v1380_v18 = vpack.c.bf16 %v5012_v36, %v6471_v13  ;;  %v2319_v41 = vld [vmem:[%s9985_s0 + $0x70] sm:$0xff]  ;;  %v399_v48 = vld [vmem:[%s9985_s0 + $0xe] sm:$0x3]  ;;  %v5534_v53 = vld [vmem:[%s9985_s0 + $0x60] sm:$0xff] }
  0x61   :  { %4092 = vmatprep.subr.bf16.mxu0 %v9995_v3  ;;  %5326 = vmatprep.subr.bf16.mxu1 %v9995_v3  ;;  %v6608_v27 = vpack.c.bf16 %v2320_v42, %v2319_v41  ;;  %v662_v54 = vpack.c.bf16 %v605_v46, %v5534_v53  ;;  %v911_v55 = vld [vmem:[%s9985_s0 + $0xf0] sm:$0xff]  ;;  %v621_v62 = vld [vmem:[%s9985_s0 + $0xe8] sm:$0x3]  ;;  %v1057_v47 = vld [vmem:[%s9985_s0 + $0x7e] sm:$0x3] }
  0x62   :  { %982 = vst.msk [vmem:[#allocation2 + $0xd0] sm:$0xff] %vm15_vm1, %v6479_v49  ;;  %v1420_v43 = vrot.slane %v1380_v18, 5  ;;  %v5537_v7 = vld [vmem:[%s9985_s0 + $0xe0] sm:$0xff]  ;;  %v1113_v14 = vpack.c.bf16 %v1057_v47, %v6561_v9  ;;  %v6694_v20 = vld [vmem:[%s9985_s0 + $0xfe] sm:$0x3]  ;;  %v6712_v28 = vld [vmem:[%s9985_s0 + $0x70] sm:$0xff]  ;;  %v1575_v18 = vpack.c.bf16 %v6485_v52, %v6569_v40 }
  0x63   :  { %758 = vrot.lane.b32.xlu1 %v723_v23, %s5547_s19  ;;  %1015 = vst.msk [vmem:[#allocation2 + $0xd0] sm:$0xe0] %vm1009_vm3, %v9995_v3  ;;  %1194 = vrot.lane.b32.xlu0 %v1118_v19, %s5545_s28  ;;  %v1112_v23 = vpack.c.bf16 %v1055_v34, %v6463_v45  ;;  %v5052_v45 = vld [vmem:[%s9985_s0 + $0xc8] sm:$0xff]  ;;  %v670_v8 = vpack.c.bf16 %v621_v62, %v5537_v7  ;;  %v6722_v34 = vld [vmem:[%s9985_s0 + $0x16] sm:$0xff] }
  0x64   :  { %4093 = vmatpush1.bf16.msra.mxu0 %v5506_v32  ;;  %5342 = vmatpush1.bf16.msra.mxu1 %v5506_v32  ;;  %v725_v32 = vrot.slane %v661_v17, 5  ;;  %984 = vst.msk [vmem:[#allocation2 + $0x120] sm:$0xff] %vm15_vm1, %v6608_v27  ;;  %v1574_v19 = vpack.c.bf16 %v5052_v45, %v6471_v13  ;;  %v5535_v13 = vld [vmem:[%s9985_s0 + $0x6] sm:$0xff]  ;;  %v6689_v17 = vld [vmem:[%s9985_s0 + $0xf6] sm:$0xff]  ;;  %v6727_v35 = vld [vmem:[%s9985_s0 + $0x1e] sm:$0x3] }
  0x65   :  { %4094 = vmatprep.subr.bf16.mxu0 %v9995_v3  ;;  %5327 = vmatprep.subr.bf16.mxu1 %v9995_v3  ;;  %1017 = vst.msk [vmem:[#allocation2 + $0x120] sm:$0xe0] %vm1009_vm3, %v9995_v3  ;;  %v438_v59 = vpack.c.bf16 %v399_v48, %v5535_v13  ;;  %v1121_v26 = vpack.c.bf16 %v6694_v20, %v6689_v17  ;;  %v622_v42 = vld [vmem:[%s9985_s0 + $0xf0] sm:$0xff]  ;;  %v5079_v45 = vld [vmem:[%s9985_s0 + $0x66] sm:$0xff]  ;;  %v5080_v46 = vld [vmem:[%s9985_s0 + $0x6e] sm:$0x3] }
  0x66   :  { %2080 = vst.msk [vmem:[#allocation2 + $0x18] sm:$0x3f] %vm2079_vm9, %v9995_v3  ;;  %2081 = vst.msk [vmem:[#allocation2 + $0x40] sm:$0x3f] %vm2079_vm9, %v9995_v3  ;;  %v439_v52 = vpack.c.bf16 %v6727_v35, %v6722_v34  ;;  %v1761_v48 = vpack.c.bf16 %v5080_v46, %v5079_v45  ;;  %v2306_v53 = vld [vmem:[%s9985_s0 + $0x8] sm:$0xff]  ;;  %v5081_v35 = vld [vmem:[%s9985_s0 + $0x76] sm:$0xff] }
  0x67   :  { %1178 = vrot.lane.b32.xlu1 %v1110_v29, %s5545_s28  ;;  %1616 = vrot.lane.b32.xlu0 %v1572_v61, %s5547_s19  ;;  %v1071_v29 = vld [vmem:[%s9985_s0 + $0xee] sm:$0x3]  ;;  %2082 = vst.msk [vmem:[#allocation2 + $0x68] sm:$0x3f] %vm2079_vm9, %v9995_v3  ;;  %2083 = vst.msk [vmem:[#allocation2 + $0x90] sm:$0x3f] %vm2079_vm9, %v9995_v3 }
  0x68   :  { %4095 = vmatpush1.bf16.msra.mxu0 %v5507_v38  ;;  %5343 = vmatpush1.bf16.msra.mxu1 %v5507_v38  ;;  %v1120_v44 = vpack.c.bf16 %v1071_v29, %v1070_v39  ;;  %v415_v61 = vld [vmem:[%s9985_s0 + $0x8e] sm:$0x3]  ;;  %2084 = vst.msk [vmem:[#allocation2 + $0xb8] sm:$0x3f] %vm2079_vm9, %v9995_v3  ;;  %2085 = vst.msk [vmem:[#allocation2 + $0xe0] sm:$0x3f] %vm2079_vm9, %v9995_v3 }
  0x69   :  { %4353 = vmatprep.subr.bf16.mxu0 %v9995_v3  ;;  %2086 = vst.msk [vmem:[#allocation2 + $0x108] sm:$0x3f] %vm2079_vm9, %v9995_v3  ;;  %2087 = vst.msk [vmem:[#allocation2 + $0x130] sm:$0x3f] %vm2079_vm9, %v9995_v3  ;;  %v914_v39 = vld [vmem:[%s9985_s0 + $0x108] sm:$0xff] }
  0x6a   :  { %2088 = vst.msk [vmem:[#allocation2 + $0x158] sm:$0x3f] %vm2079_vm9, %v9995_v3  ;;  %2089 = vst.msk [vmem:[#allocation2 + $0x180] sm:$0x3f] %vm2079_vm9, %v9995_v3  ;;  %v5119_v62 = vld [vmem:[%s9985_s0 + $0xc0] sm:$0xf] }
  0x6b   :  { %1442 = vrot.lane.b32.xlu1 %v1418_v51, %s5546_s6  ;;  %760 = vrot.lane.b32.xlu0 %v724_v4, %s5547_s19  ;;  %v5536_v4 = vld [vmem:[%s9985_s0 + $0x86] sm:$0xff]  ;;  %2090 = vst.msk [vmem:[#allocation2 + $0x1a8] sm:$0x3f] %vm2079_vm9, %v9995_v3  ;;  %2091 = vst.msk [vmem:[#allocation2 + $0x1d0] sm:$0x3f] %vm2079_vm9, %v9995_v3 }
  0x6c   :  { %v446_v5 = vpack.c.bf16 %v415_v61, %v5536_v4  ;;  %2092 = vst.msk [vmem:[#allocation2 + $0x1f8] sm:$0x3f] %vm2079_vm9, %v9995_v3  ;;  %2093 = vst.msk [vmem:[#allocation2 + $0x220] sm:$0x3f] %vm2079_vm9, %v9995_v3  ;;  %v1075_v61 = vld [vmem:[%s9985_s0 + $0x10e] sm:$0x3] }
  0x6d   :  { %2094 = vst.msk [vmem:[#allocation2 + $0x248] sm:$0x3f] %vm2079_vm9, %v9995_v3  ;;  %2095 = vst.msk [vmem:[#allocation2 + $0x270] sm:$0x3f] %vm2079_vm9, %v9995_v3  ;;  %v5020_v4 = vld [vmem:[%s9985_s0 + $0x168] sm:$0x3] }
  0x6e   :  { %2096 = vst.msk [vmem:[#allocation2 + $0x298] sm:$0x3f] %vm2079_vm9, %v9995_v3  ;;  %2097 = vst.msk [vmem:[#allocation2 + $0x2c0] sm:$0x3f] %vm2079_vm9, %v9995_v3 }
  0x6f   :  { %490 = vrot.lane.b32.xlu1 %v444_v56, %s5546_s6  ;;  %1180 = vrot.lane.b32.xlu0 %v1111_v11, %s5545_s28  ;;  %v912_v56 = vld [vmem:[%s9985_s0 + $0xf8] sm:$0xff]  ;;  %2098 = vst.msk [vmem:[#allocation2 + $0x2e8] sm:$0x3f] %vm2079_vm9, %v9995_v3  ;;  %2099 = vst.msk [vmem:[#allocation2 + $0x310] sm:$0x3f] %vm2079_vm9, %v9995_v3 }
  0x70   :  { %v960_v60 = vpack.c.bf16 %v912_v56, %v911_v55  ;;  %2100 = vst.msk [vmem:[#allocation2 + $0x338] sm:$0x3f] %vm2079_vm9, %v9995_v3  ;;  %2101 = vst.msk [vmem:[#allocation2 + $0x360] sm:$0x3f] %vm2079_vm9, %v9995_v3 }
  0x71   :  { %2102 = vst.msk [vmem:[#allocation2 + $0x388] sm:$0x3f] %vm2079_vm9, %v9995_v3  ;;  %2103 = vst.msk [vmem:[#allocation2 + $0x3b0] sm:$0x3f] %vm2079_vm9, %v9995_v3 }
  0x72   :  { %992 = vst.msk [vmem:[#allocation2 + $0x260] sm:$0xff] %vm15_vm1, %v960_v60 }
  0x73   :  { %776 = vrot.lane.b32.xlu1 %v732_v1, %s5547_s19  ;;  %1444 = vrot.lane.b32.xlu0 %v1419_v22, %s5546_s6  ;;  %v726_v1 = vrot.slane %v662_v54, 5  ;;  %1025 = vst.msk [vmem:[#allocation2 + $0x260] sm:$0xe0] %vm1009_vm3, %v9995_v3  ;;  %v2112_v22 = vld [vmem:[%s9985_s0] sm:$0xf] }
  0x74   :  { %v2144_v24 = vpack.c.bf16 %v2112_v22, %v2112_v22  ;;  %2104 = vst.msk [vmem:[#allocation2 + $0x3d8] sm:$0x3f] %vm2079_vm9, %v9995_v3  ;;  %2105 = vst.msk [vmem:[#allocation2 + $0x400] sm:$0x3f] %vm2079_vm9, %v9995_v3 }
  0x75   :  { %2106 = vst.msk [vmem:[#allocation2 + $0x428] sm:$0x3f] %vm2079_vm9, %v9995_v3  ;;  %2107 = vst.msk [vmem:[#allocation2 + $0x450] sm:$0x3f] %vm2079_vm9, %v9995_v3 }
  0x76   :  { %v289_v38 = vpop.permute.xlu1 %288  ;;  %v2208_v36 = vrot.slane %v2144_v24, 2  ;;  %2108 = vst.msk [vmem:[#allocation2 + $0x478] sm:$0x3f] %vm2079_vm9, %v9995_v3  ;;  %2109 = vst.msk [vmem:[#allocation2 + $0x4a0] sm:$0x3f] %vm2079_vm9, %v9995_v3 }
  0x77   :  { %1196 = vrot.lane.b32.xlu1 %v1119_v10, %s5545_s28  ;;  %492 = vrot.lane.b32.xlu0 %v445_v6, %s5546_s6  ;;  %346 = vst.msk [vmem:[#allocation2 + $0x140] sm:$0xff] %vm191_vm2, %v289_v38  ;;  %v285_v57 = vpop.permute.xlu0 %284  ;;  %v5014_v10 = vld [vmem:[%s9985_s0 + $0xd8] sm:$0x3]  ;;  %v913_v38 = vld [vmem:[%s9985_s0 + $0x100] sm:$0xff] }
  0x78   :  { %380 = vst.msk [vmem:[#allocation2 + $0x140] sm:$0xe0] %vm9989_vm8, %v9995_v3  ;;  %v1381_v31 = vpack.c.bf16 %v5014_v10, %v6569_v40  ;;  %v416_v40 = vld [vmem:[%s9985_s0 + $0x96] sm:$0xff]  ;;  %v961_v29 = vpack.c.bf16 %v914_v39, %v913_v38  ;;  %v2862_v10 = vpack.c.bf16 %v5119_v62, %v5119_v62 }
  0x79   :  { %344 = vst.msk [vmem:[#allocation2 + $0xf0] sm:$0xff] %vm191_vm2, %v285_v57  ;;  %v417_v57 = vld [vmem:[%s9985_s0 + $0x9e] sm:$0x3] }
  0x7a   :  { %378 = vst.msk [vmem:[#allocation2 + $0xf0] sm:$0xe0] %vm9989_vm8, %v9995_v3  ;;  %v291_v15 = vpop.permute.xlu1 %290  ;;  %v1421_v9 = vrot.slane %v1381_v31, 5  ;;  %v625_v31 = vld [vmem:[%s9985_s0 + $0x108] sm:$0x3]  ;;  %v5062_v62 = vld [vmem:[%s9985_s0 + $0x178] sm:$0xff] }
  0x7b   :  { %1618 = vrot.lane.b32.xlu1 %v1573_v33, %s5547_s19  ;;  %778 = vrot.lane.b32.xlu0 %v733_v37, %s5547_s19  ;;  %347 = vst.msk [vmem:[#allocation2 + $0x168] sm:$0xff] %vm191_vm2, %v291_v15  ;;  %v287_v51 = vpop.permute.xlu0 %286  ;;  %v734_v33 = vrot.slane %v670_v8, 5 }
  0x7c   :  { %381 = vst.msk [vmem:[#allocation2 + $0x168] sm:$0xe0] %vm9989_vm8, %v9995_v3 }
  0x7d   :  { %345 = vst.msk [vmem:[#allocation2 + $0x118] sm:$0xff] %vm191_vm2, %v287_v51  ;;  %v447_v51 = vpack.c.bf16 %v417_v57, %v416_v40  ;;  %v6983_v40 = vld [vmem:[%s9985_s0 + $0x170] sm:$0xff] }
  0x7e   :  { %379 = vst.msk [vmem:[#allocation2 + $0x118] sm:$0xe0] %vm9989_vm8, %v9995_v3  ;;  %v295_v0 = vpop.permute.xlu1 %294 }
  0x7f   :  { %762 = vrot.lane.b32.xlu1 %v725_v32, %s5547_s19  ;;  %1198 = vrot.lane.b32.xlu0 %v1120_v44, %s5545_s28  ;;  %349 = vst.msk [vmem:[#allocation2 + $0x1b8] sm:$0xff] %vm191_vm2, %v295_v0  ;;  %v293_v63 = vpop.permute.xlu0 %292  ;;  %v6717_v32 = vld [vmem:[%s9985_s0 + $0x78] sm:$0x3]  ;;  %v6904_v0 = vld [vmem:[%s9985_s0 + $0x106] sm:$0xff] }
  0x80   :  { %383 = vst.msk [vmem:[#allocation2 + $0x1b8] sm:$0xe0] %vm9989_vm8, %v9995_v3  ;;  %v663_v37 = vpack.c.bf16 %v6717_v32, %v6712_v28 }
  0x81   :  { %348 = vst.msk [vmem:[#allocation2 + $0x190] sm:$0xff] %vm191_vm2, %v293_v63 }
  0x82   :  { %382 = vst.msk [vmem:[#allocation2 + $0x190] sm:$0xe0] %vm9989_vm8, %v9995_v3  ;;  %v299_v11 = vpop.permute.xlu1 %298  ;;  %v727_v15 = vrot.slane %v663_v37, 5  ;;  %v5508_v37 = vld [vmem:[%s9986_s1 + $0x80] sm:$0xff]  }
  0x83   :  { %1182 = vrot.lane.b32.xlu1 %v1112_v23, %s5545_s28  ;;  %478 = vrot.lane.b32.xlu0 %v438_v59, %s5546_s6  ;;  %351 = vst.msk [vmem:[#allocation2 + $0x208] sm:$0xff] %vm191_vm2, %v299_v11  ;;  %v297_v12 = vpop.permute.xlu0 %296  ;;  %v2594_v59 = vld [vmem:[%s9985_s0 + $0xc] sm:$0xf]  ;;  %v624_v11 = vld [vmem:[%s9985_s0 + $0x100] sm:$0xff] }
  0x84   :  { %385 = vst.msk [vmem:[#allocation2 + $0x208] sm:$0xe0] %vm9989_vm8, %v9995_v3  ;;  %v2626_v8 = vpack.c.bf16 %v2594_v59, %v2594_v59  ;;  %v672_v24 = vpack.c.bf16 %v625_v31, %v624_v11  ;;  %v917_v59 = vld [vmem:[%s9985_s0 + $0x120] sm:$0xff]  ;;  %v5084_v11 = vld [vmem:[%s9985_s0 + $0x8e] sm:$0x3] }
  0x85   :  { %350 = vst.msk [vmem:[#allocation2 + $0x1e0] sm:$0xff] %vm191_vm2, %v297_v12  ;;  %v1122_v12 = vpack.c.bf16 %v1075_v61, %v6904_v0 }
  0x86   :  { %384 = vst.msk [vmem:[#allocation2 + $0x1e0] sm:$0xe0] %vm9989_vm8, %v9995_v3  ;;  %v303_v16 = vpop.permute.xlu1 %302 }
  0x87   :  { %1446 = vrot.lane.b32.xlu1 %v1420_v43, %s5546_s6  ;;  %494 = vrot.lane.b32.xlu0 %v446_v5, %s5546_s6  ;;  %353 = vst.msk [vmem:[#allocation2 + $0x258] sm:$0xff] %vm191_vm2, %v303_v16  ;;  %v301_v21 = vpop.permute.xlu0 %300  ;;  %v623_v43 = vld [vmem:[%s9985_s0 + $0xf8] sm:$0x3]  ;;  %v2113_v5 = vld [vmem:[%s9985_s0 + $0x10] sm:$0xf] }
  0x88   :  { %387 = vst.msk [vmem:[#allocation2 + $0x258] sm:$0xe0] %vm9989_vm8, %v9995_v3  ;;  %v671_v54 = vpack.c.bf16 %v623_v43, %v622_v42  ;;  %v2145_v7 = vpack.c.bf16 %v2113_v5, %v2113_v5  ;;  %v916_v16 = vld [vmem:[%s9985_s0 + $0x118] sm:$0xff]  ;;  %v2114_v43 = vld [vmem:[%s9985_s0 + $0x20] sm:$0xf] }
  0x89   :  { %352 = vst.msk [vmem:[#allocation2 + $0x230] sm:$0xff] %vm191_vm2, %v301_v21  ;;  %v2146_v46 = vpack.c.bf16 %v2114_v43, %v2114_v43 }
  0x8a   :  { %386 = vst.msk [vmem:[#allocation2 + $0x230] sm:$0xe0] %vm9989_vm8, %v9995_v3  ;;  %v307_v6 = vpop.permute.xlu1 %306  ;;  %v735_v60 = vrot.slane %v671_v54, 5  ;;  %v2209_v17 = vrot.slane %v2145_v7, 2  ;;  %v627_v7 = vld [vmem:[%s9985_s0 + $0x118] sm:$0x3] }
  0x8b   :  { %1620 = vrot.lane.b32.xlu1 %v1574_v19, %s5547_s19  ;;  %780 = vrot.lane.b32.xlu0 %v734_v33, %s5547_s19  ;;  %2110 = vst.msk [vmem:[#allocation2 + $0x4c8] sm:$0x3f] %vm2079_vm9, %v9995_v3  ;;  %2111 = vst.msk [vmem:[#allocation2 + $0x4f0] sm:$0x3f] %vm2079_vm9, %v9995_v3  ;;  %v305_v23 = vpop.permute.xlu0 %304  ;;  %v2305_v19 = vld [vmem:[%s9985_s0] sm:$0xff]  ;;  %vm538_vm9 = vcmask 782848  }
  0x8c   :  { %355 = vst.msk [vmem:[#allocation2 + $0x398] sm:$0xff] %vm191_vm2, %v307_v6  ;;  %354 = vst.msk [vmem:[#allocation2 + $0x370] sm:$0xff] %vm191_vm2, %v305_v23  ;;  %v2369_v13 = vpack.c.bf16 %v2306_v53, %v2305_v19  ;;  %v915_v33 = vld [vmem:[%s9985_s0 + $0x110] sm:$0xff]  ;;  %v5060_v6 = vld [vmem:[%s9985_s0 + $0x168] sm:$0xff]  ;;  %v736_v23 = vrot.slane %v672_v24, 5  ;;  %v2210_v54 = vrot.slane %v2146_v46, 2 }
  0x8d   :  { %389 = vst.msk [vmem:[#allocation2 + $0x398] sm:$0xe0] %vm9989_vm8, %v9995_v3  ;;  %388 = vst.msk [vmem:[#allocation2 + $0x370] sm:$0xe0] %vm9989_vm8, %v9995_v3  ;;  %v962_v21 = vpack.c.bf16 %v916_v16, %v915_v33  ;;  %v5120_v19 = vld [vmem:[%s9985_s0 + $0xd0] sm:$0xf] }
  0x8e   :  { %2273 = vst.msk [vmem:[#allocation2 + $0x18] sm:$0xc0] %vm2272_vm10, %v2208_v36  ;;  %v1171_v41 = vpop.permute.xlu1 %1170  ;;  %2274 = vst.msk [vmem:[#allocation2 + $0x40] sm:$0xc0] %vm2272_vm10, %v2209_v17  ;;  %v5082_v36 = vld [vmem:[%s9985_s0 + $0x7e] sm:$0x3] }
  0x8f   :  { %764 = vrot.lane.b32.xlu1 %v726_v1, %s5547_s19  ;;  %1200 = vrot.lane.b32.xlu0 %v1121_v26, %s5545_s28  ;;  %1267 = vst.msk [vmem:[#allocation2 + $0x8] sm:$0x1f] %vm1266_vm11, %v1171_v41  ;;  %v309_v44 = vpop.permute.xlu0 %308  ;;  %v6917_v1 = vld [vmem:[%s9985_s0 + $0x160] sm:$0xff]  ;;  %v1762_v38 = vpack.c.bf16 %v5082_v36, %v5081_v35  ;;  %v5509_v53 = vld [vmem:[%s9986_s1 + $0x88] sm:$0xff]  }
  0x90   :  { %993 = vst.msk [vmem:[#allocation2 + $0x288] sm:$0xff] %vm15_vm1, %v961_v29  ;;  %994 = vst.msk [vmem:[#allocation2 + $0x2b0] sm:$0xff] %vm15_vm1, %v962_v21  ;;  %v1578_v39 = vpack.c.bf16 %v5060_v6, %v6917_v1  ;;  %v5022_v29 = vld [vmem:[%s9985_s0 + $0x178] sm:$0x3]  ;;  %v2596_v21 = vld [vmem:[%s9985_s0 + $0x2c] sm:$0xf] }
  0x91   :  { %1313 = vst.msk [vmem:[#allocation2 + $0x8] sm:$0x7] %vm1312_vm12, %v9995_v3  ;;  %v1385_v45 = vpack.c.bf16 %v5022_v29, %v6983_v40  ;;  %v5511_v17 = vld [vmem:[%s9986_s1 + $0x98] sm:$0xff]   ;;  %v1079_v24 = vld [vmem:[%s9985_s0 + $0x12e] sm:$0x3] }
  0x92   :  { %356 = vst.msk [vmem:[#allocation2 + $0x3c0] sm:$0xff] %vm191_vm2, %v309_v44  ;;  %v1435_v55 = vpop.permute.xlu1 %1434  ;;  %v5024_v6 = vld [vmem:[%s9985_s0 + $0x188] sm:$0x3]  ;;  %v2115_v35 = vld [vmem:[%s9985_s0 + $0x30] sm:$0xf] }
  0x93   :  { %1184 = vrot.lane.b32.xlu1 %v1113_v14, %s5545_s28  ;;  %1026 = vst.msk [vmem:[#allocation2 + $0x288] sm:$0xe0] %vm1009_vm3, %v9995_v3  ;;  %480 = vrot.lane.b32.xlu0 %v439_v52, %s5546_s6  ;;  %v1187_v56 = vpop.permute.xlu0 %1186  ;;  %v1384_v14 = vpack.c.bf16 %v5020_v4, %v6917_v1  ;;  %1027 = vst.msk [vmem:[#allocation2 + $0x2b0] sm:$0xe0] %vm1009_vm3, %v9995_v3  ;;  %v1077_v52 = vld [vmem:[%s9985_s0 + $0x11e] sm:$0x3] }
  0x94   :  { %390 = vst.msk [vmem:[#allocation2 + $0x3c0] sm:$0xe0] %vm9989_vm8, %v9995_v3  ;;  %v5513_v46 = vld [vmem:[%s9986_s1 + $0xa8] sm:$0xff]   ;;  %vm2786_vm8 = vcmask 779776  }
  0x95   :  { %1701 = vst.msk [vmem:[#allocation2 + $0x10] sm:$0xe0] %vm1700_vm14, %v9995_v3  ;;  %1702 = vst.msk [vmem:[#allocation2 + $0x38] sm:$0xe0] %vm1700_vm14, %v9995_v3  ;;  %v1424_v26 = vrot.slane %v1384_v14, 5 }
  0x96   :  { %1703 = vst.msk [vmem:[#allocation2 + $0x60] sm:$0xe0] %vm1700_vm14, %v9995_v3  ;;  %1704 = vst.msk [vmem:[#allocation2 + $0x88] sm:$0xe0] %vm1700_vm14, %v9995_v3  ;;  %v1609_v63 = vpop.permute.xlu1 %1608 }
  0x97   :  { %1448 = vrot.lane.b32.xlu1 %v1421_v9, %s5546_s6  ;;  %1705 = vst.msk [vmem:[#allocation2 + $0xb0] sm:$0xe0] %vm1700_vm14, %v9995_v3  ;;  %1706 = vst.msk [vmem:[#allocation2 + $0xd8] sm:$0xe0] %vm1700_vm14, %v9995_v3  ;;  %496 = vrot.lane.b32.xlu0 %v447_v51, %s5546_s6  ;;  %v1451_v47 = vpop.permute.xlu0 %1450  ;;  %v2878_v9 = vrot.slane %v2862_v10, 2  ;;  %v5083_v10 = vld [vmem:[%s9985_s0 + $0x86] sm:$0xff] }
  0x98   :  { %1707 = vst.msk [vmem:[#allocation2 + $0x100] sm:$0xe0] %vm1700_vm14, %v9995_v3  ;;  %1708 = vst.msk [vmem:[#allocation2 + $0x128] sm:$0xe0] %vm1700_vm14, %v9995_v3  ;;  %v1763_v14 = vpack.c.bf16 %v5084_v11, %v5083_v10  ;;  %v5515_v11 = vld [vmem:[%s9986_s1 + $0xb8] sm:$0xff]  }
  0x99   :  { %1709 = vst.msk [vmem:[#allocation2 + $0x150] sm:$0xe0] %vm1700_vm14, %v9995_v3  ;;  %1710 = vst.msk [vmem:[#allocation2 + $0x178] sm:$0xe0] %vm1700_vm14, %v9995_v3 }
  0x9a   :  { %1711 = vst.msk [vmem:[#allocation2 + $0x290] sm:$0xe0] %vm1700_vm14, %v9995_v3  ;;  %1712 = vst.msk [vmem:[#allocation2 + $0x2b8] sm:$0xe0] %vm1700_vm14, %v9995_v3  ;;  %v753_v20 = vpop.permute.xlu1 %752 }
  0x9b   :  { %1622 = vrot.lane.b32.xlu1 %v1575_v18, %s5547_s19  ;;  %1713 = vst.msk [vmem:[#allocation2 + $0x2e0] sm:$0xe0] %vm1700_vm14, %v9995_v3  ;;  %1714 = vst.msk [vmem:[#allocation2 + $0x308] sm:$0xe0] %vm1700_vm14, %v9995_v3  ;;  %782 = vrot.lane.b32.xlu0 %v735_v60, %s5547_s19  ;;  %v483_v22 = vpop.permute.xlu0 %482  ;;  %v6970_v18 = vld [vmem:[%s9985_s0 + $0x116] sm:$0xff]  ;;  %v918_v60 = vld [vmem:[%s9985_s0 + $0x128] sm:$0xff] }
  0x9c   :  { %1715 = vst.msk [vmem:[#allocation2 + $0x330] sm:$0xe0] %vm1700_vm14, %v9995_v3  ;;  %1716 = vst.msk [vmem:[#allocation2 + $0x358] sm:$0xe0] %vm1700_vm14, %v9995_v3  ;;  %v1123_v44 = vpack.c.bf16 %v1077_v52, %v6970_v18  ;;  %v963_v4 = vpack.c.bf16 %v918_v60, %v917_v59  ;;  %v628_v52 = vld [vmem:[%s9985_s0 + $0x120] sm:$0xff] }
  0x9d   :  { %1717 = vst.msk [vmem:[#allocation2 + $0x380] sm:$0xe0] %vm1700_vm14, %v9995_v3  ;;  %1718 = vst.msk [vmem:[#allocation2 + $0x3a8] sm:$0xe0] %vm1700_vm14, %v9995_v3 }
  0x9e   :  { %1719 = vst.msk [vmem:[#allocation2 + $0x3d0] sm:$0xe0] %vm1700_vm14, %v9995_v3  ;;  %1720 = vst.msk [vmem:[#allocation2 + $0x3f8] sm:$0xe0] %vm1700_vm14, %v9995_v3  ;;  %v769_v28 = vpop.permute.xlu1 %768  ;;  %vm2561_vm14 = vcmask 785922  }
  0x9f   :  { %1495 = vst.msk [vmem:[#allocation2 + $0x8] sm:$0xf8] %vm1494_vm13, %v1435_v55  ;;  %766 = vrot.lane.b32.xlu1 %v727_v15, %s5547_s19  ;;  %1202 = vrot.lane.b32.xlu0 %v1122_v12, %s5545_s28  ;;  %v1625_v34 = vpop.permute.xlu0 %1624  ;;  %v2595_v15 = vld [vmem:[%s9985_s0 + $0x1c] sm:$0xf]  ;;  %v1579_v12 = vpack.c.bf16 %v5062_v62, %v6983_v40 }
  0xa0   :  { %1782 = vst.msk [vmem:[#allocation2 + $0x10] sm:$0x1f] %vm9992_vm15, %v1761_v48  ;;  %1783 = vst.msk [vmem:[#allocation2 + $0x38] sm:$0x1f] %vm9992_vm15, %v1762_v38  ;;  %v2627_v61 = vpack.c.bf16 %v2595_v15, %v2595_v15  ;;  %v2628_v38 = vpack.c.bf16 %v2596_v21, %v2596_v21 }
  0xa1   :  { %1275 = vst.msk [vmem:[#allocation2 + $0x148] sm:$0x1f] %vm1266_vm11, %v1187_v56 }
  0xa2   :  { %1802 = vst.msk [vmem:[#allocation2 + $0x10] sm:$0xff] %vm191_vm2, %v9995_v3  ;;  %v1189_v41 = vpop.permute.xlu1 %1188  ;;  %1803 = vst.msk [vmem:[#allocation2 + $0x38] sm:$0xff] %vm191_vm2, %v9995_v3 }
  0xa3   :  { %1321 = vst.msk [vmem:[#allocation2 + $0x148] sm:$0x7] %vm1312_vm12, %v9995_v3  ;;  %2433 = vrot.lane.b32.xlu1 %v2369_v13, %s5545_s28  ;;  %1454 = vrot.lane.b32.xlu0 %v1424_v26, %s5546_s6  ;;  %v1173_v42 = vpop.permute.xlu0 %1172  ;;  %v1425_v13 = vrot.slane %v1385_v45, 5  ;;  %v5121_v26 = vld [vmem:[%s9985_s0 + $0xe0] sm:$0xf] }
  0xa4   :  { %1901 = vst.msk [vmem:[#allocation2 + $0x10] sm:$0xff] %vm9991_vm4, %v9995_v3  ;;  %1902 = vst.msk [vmem:[#allocation2 + $0x38] sm:$0xff] %vm9991_vm4, %v9995_v3 }
  0xa5   :  { %1989 = vst.msk [vmem:[#allocation2 + $0x10] sm:$0xff] %vm1515_vm6, %v9995_v3  ;;  %1668 = vst.msk [vmem:[#allocation2 + $0x8] sm:$0xff] %vm1515_vm6, %v1609_v63  ;;  %v2863_v63 = vpack.c.bf16 %v5120_v19, %v5120_v19 }
  0xa6   :  { %1503 = vst.msk [vmem:[#allocation2 + $0x148] sm:$0xf8] %vm1494_vm13, %v1451_v47  ;;  %v1453_v48 = vpop.permute.xlu1 %1452  ;;  %v626_v47 = vld [vmem:[%s9985_s0 + $0x110] sm:$0xff] }
  0xa7   :  { %849 = vst.msk [vmem:[#allocation2] sm:$0xf8] %vm848_vm0, %v753_v20  ;;  %2690 = vrot.lane.b32.xlu1 %v2626_v8, %s5546_s6  ;;  %1628 = vrot.lane.b32.xlu0 %v1578_v39, %s5547_s19  ;;  %v1437_v55 = vpop.permute.xlu0 %1436  ;;  %v2879_v31 = vrot.slane %v2863_v63, 2  ;;  %v673_v33 = vpack.c.bf16 %v627_v7, %v626_v47  ;;  %v2864_v39 = vpack.c.bf16 %v5121_v26, %v5121_v26  ;;  %v1080_v63 = vld [vmem:[%s9985_s0 + $0x136] sm:$0xff]  ;;  %v1081_v47 = vld [vmem:[%s9985_s0 + $0x13e] sm:$0x3] }
  0xa8   :  { %541 = vst.msk [vmem:[#allocation2 + $0x140] sm:$0x1f] %vm538_vm9, %v483_v22  ;;  %v7075_v22 = vld [vmem:[%s9985_s0 + $0x126] sm:$0xff]  ;;  %v7175_v7 = vld [vmem:[%s9985_s0 + $0x190] sm:$0xff] }
  0xa9   :  { %568 = vst.msk [vmem:[#allocation2 + $0x140] sm:$0x7] %vm9990_vm5, %v9995_v3  ;;  %v1124_v29 = vpack.c.bf16 %v1079_v24, %v7075_v22  ;;  %v2880_v19 = vrot.slane %v2864_v39, 2  ;;  %v5516_v24 = vld [vmem:[%s9986_s1 + $0xc0] sm:$0xff]  }
  0xaa   :  { %857 = vst.msk [vmem:[#allocation2 + $0x140] sm:$0xf8] %vm848_vm0, %v769_v28  ;;  %v485_v5 = vpop.permute.xlu1 %484  ;;  %v7089_v28 = vld [vmem:[%s9985_s0 + $0x180] sm:$0xff] }
  0xab   :  { %1676 = vst.msk [vmem:[#allocation2 + $0x148] sm:$0xff] %vm1515_vm6, %v1625_v34  ;;  %2886 = vrot.lane.b32.xlu1 %v2878_v9, %s5547_s19  ;;  %1990 = vst.msk [vmem:[#allocation2 + $0x38] sm:$0xff] %vm1515_vm6, %v9995_v3  ;;  %2435 = vrot.lane.b32.xlu0 %v6284_v50, %s5545_s28  ;;  %v5510_v50 = vld [vmem:[%s9986_s1 + $0x90] sm:$0xff]   ;;  %v1611_v8 = vpop.permute.xlu0 %1610  ;;  %v737_v9 = vrot.slane %v673_v33, 5  ;;  %v5512_v34 = vld [vmem:[%s9986_s1 + $0xa0] sm:$0xff]  }
  0xac   :  { %v3578_v32 = vld [vmem:[#allocation2 + $0x8] sm:$0xff]  ;;  %1276 = vst.msk [vmem:[#allocation2 + $0x170] sm:$0x1f] %vm1266_vm11, %v1189_v41  ;;  %1268 = vst.msk [vmem:[#allocation2 + $0x30] sm:$0x1f] %vm1266_vm11, %v1173_v42  ;;  %v1386_v41 = vpack.c.bf16 %v5024_v6, %v7089_v28  ;;  %v7126_v42 = vld [vmem:[%s9985_s0 + $0x130] sm:$0xff] }
  0xad   :  { %4096 = vmatprep.mubr.bf16.mxu0 %v3578_v32  ;;  %1322 = vst.msk [vmem:[#allocation2 + $0x170] sm:$0x7] %vm1312_vm12, %v9995_v3  ;;  %1314 = vst.msk [vmem:[#allocation2 + $0x30] sm:$0x7] %vm1312_vm12, %v9995_v3  ;;  %v5087_v39 = vld [vmem:[%s9985_s0 + $0xa6] sm:$0xff] }
  0xae   :  { %v3577_v57 = vld [vmem:[#allocation2] sm:$0xff]  ;;  %1504 = vst.msk [vmem:[#allocation2 + $0x170] sm:$0xf8] %vm1494_vm13, %v1453_v48  ;;  %1496 = vst.msk [vmem:[#allocation2 + $0x30] sm:$0xf8] %vm1494_vm13, %v1437_v55  ;;  %v1627_v16 = vpop.permute.xlu1 %1626 }
  0xaf   :  { %4097 = vmatmul.mubr.bf16.vlgmr.msra.gmra.mrb[0].mxu0 %v3577_v57  ;;  %784 = vrot.lane.b32.xlu1 %v736_v23, %s5547_s19  ;;  %2275 = vst.msk [vmem:[#allocation2 + $0x68] sm:$0xc0] %vm2272_vm10, %v2210_v54  ;;  %v755_v20 = vpop.permute.xlu0 %754  ;;  %v629_v57 = vld [vmem:[%s9985_s0 + $0x128] sm:$0x3]  ;;  %v1426_v54 = vrot.slane %v1386_v41, 5  ;;  %v5066_v41 = vld [vmem:[%s9985_s0 + $0x198] sm:$0xff] }
  0xb0   :  { %4354 = vmatpush1.bf16.msra.mxu0 %v5508_v37  ;;  %542 = vst.msk [vmem:[#allocation2 + $0x168] sm:$0x1f] %vm538_vm9, %v485_v5  ;;  %2692 = vrot.lane.b32.xlu0 %v2627_v61, %s5546_s6  ;;  %v2147_v37 = vpack.c.bf16 %v2115_v35, %v2115_v35  ;;  %v5085_v61 = vld [vmem:[%s9985_s0 + $0x96] sm:$0xff]  ;;  %v7216_v35 = vld [vmem:[%s9985_s0 + $0x148] sm:$0xff] }
  0xb1   :  { %4355 = vmatprep.subr.bf16.mxu0 %v9995_v3  ;;  %v3617_v51 = vld [vmem:[#allocation2 + $0x140] sm:$0xff]  ;;  %995 = vst.msk [vmem:[#allocation2 + $0x2d8] sm:$0xff] %vm15_vm1, %v963_v4  ;;  %v5086_v4 = vld [vmem:[%s9985_s0 + $0x9e] sm:$0x3] }
  0xb2   :  { %v3618_v56 = vld [vmem:[#allocation2 + $0x148] sm:$0xff]  ;;  %569 = vst.msk [vmem:[#allocation2 + $0x168] sm:$0x7] %vm9990_vm5, %v9995_v3  ;;  %v1175_v32 = vpop.permute.xlu1 %1174  ;;  %v2211_v43 = vrot.slane %v2147_v37, 2 }
  0xb3   :  { %4160 = vmatprep.mubr.bf16.mxu1 %v3618_v56  ;;  %1204 = vrot.lane.b32.xlu1 %v1123_v44, %s5545_s28  ;;  %1669 = vst.msk [vmem:[#allocation2 + $0x30] sm:$0xff] %vm1515_vm6, %v1611_v8  ;;  %1677 = vst.msk [vmem:[#allocation2 + $0x170] sm:$0xff] %vm1515_vm6, %v1627_v16  ;;  %v771_v36 = vpop.permute.xlu0 %770  ;;  %v5064_v56 = vld [vmem:[%s9985_s0 + $0x188] sm:$0xff]  ;;  %v1764_v8 = vpack.c.bf16 %v5086_v4, %v5085_v61 }
  0xb4   :  { %4161 = vmatmul.mubr.bf16.vlgmr.msra.gmra.mrb[0].mxu1 %v3617_v51  ;;  %4356 = vmatpush1.bf16.msra.mxu0 %v5509_v53  ;;  %1028 = vst.msk [vmem:[#allocation2 + $0x2d8] sm:$0xe0] %vm1009_vm3, %v9995_v3  ;;  %v674_v53 = vpack.c.bf16 %v629_v57, %v628_v52  ;;  %v1580_v5 = vpack.c.bf16 %v5064_v56, %v7089_v28  ;;  %v5088_v52 = vld [vmem:[%s9985_s0 + $0xae] sm:$0x3] }
  0xb5   :  { %4357 = vmatprep.subr.bf16.mxu0 %v9995_v3  ;;  %1784 = vst.msk [vmem:[#allocation2 + $0x60] sm:$0x1f] %vm9992_vm15, %v1763_v14  ;;  %2888 = vrot.lane.b32.xlu0 %v2879_v31, %s5547_s19  ;;  %v2116_v14 = vld [vmem:[%s9985_s0 + $0x40] sm:$0xf]  ;;  %1785 = vst.msk [vmem:[#allocation2 + $0x88] sm:$0x1f] %vm9992_vm15, %v1764_v8  ;;  %v1125_v31 = vpack.c.bf16 %v1081_v47, %v1080_v63 }
  0xb6   :  { %1804 = vst.msk [vmem:[#allocation2 + $0x60] sm:$0xff] %vm191_vm2, %v9995_v3  ;;  %v738_v62 = vrot.slane %v674_v53, 5  ;;  %v2148_v16 = vpack.c.bf16 %v2116_v14, %v2116_v14  ;;  %1805 = vst.msk [vmem:[#allocation2 + $0x88] sm:$0xff] %vm191_vm2, %v9995_v3  ;;  %v1581_v53 = vpack.c.bf16 %v5066_v41, %v7175_v7  ;;  %v2598_v4 = vld [vmem:[%s9985_s0 + $0x4c] sm:$0xf] }
  0xb7   :  { %1456 = vrot.lane.b32.xlu1 %v1425_v13, %s5546_s6  ;;  %850 = vst.msk [vmem:[#allocation2 + $0x28] sm:$0xf8] %vm848_vm0, %v755_v20  ;;  %858 = vst.msk [vmem:[#allocation2 + $0x168] sm:$0xf8] %vm848_vm0, %v771_v36  ;;  %v1191_v48 = vpop.permute.xlu0 %1190  ;;  %v5514_v13 = vld [vmem:[%s9986_s1 + $0xb0] sm:$0xff]   ;;  %v237_v36 = vld [vmem:[%s9985_s0 + $0x168] sm:$0xff] }
  0xb8   :  { %4358 = vmatpush1.bf16.msra.mxu0 %v5510_v50  ;;  %1903 = vst.msk [vmem:[#allocation2 + $0x60] sm:$0xff] %vm9991_vm4, %v9995_v3  ;;  %v5026_v50 = vld [vmem:[%s9985_s0 + $0x198] sm:$0x3]  ;;  %v2597_v20 = vld [vmem:[%s9985_s0 + $0x3c] sm:$0xf]  ;;  %1904 = vst.msk [vmem:[#allocation2 + $0x88] sm:$0xff] %vm9991_vm4, %v9995_v3 }
  0xb9   :  { %4359 = vmatprep.subr.bf16.mxu0 %v9995_v3  ;;  %1991 = vst.msk [vmem:[#allocation2 + $0x60] sm:$0xff] %vm1515_vm6, %v9995_v3  ;;  %786 = vrot.lane.b32.xlu0 %v737_v9, %s5547_s19  ;;  %v1387_v33 = vpack.c.bf16 %v5026_v50, %v7175_v7  ;;  %v5122_v9 = vld [vmem:[%s9985_s0 + $0xf0] sm:$0xf]  ;;  %v2212_v26 = vrot.slane %v2148_v16, 2  ;;  %1992 = vst.msk [vmem:[#allocation2 + $0x88] sm:$0xff] %vm1515_vm6, %v9995_v3  ;;  %v7307_v50 = vld [vmem:[%s9985_s0 + $0x1a0] sm:$0xff]  ;;  %v2630_v16 = vpack.c.bf16 %v2598_v4, %v2598_v4 }
  0xba   :  { %1269 = vst.msk [vmem:[#allocation2 + $0x58] sm:$0x1f] %vm1266_vm11, %v1175_v32  ;;  %v3583_v23 = vld [vmem:[#allocation2 + $0x30] sm:$0xff]  ;;  %1277 = vst.msk [vmem:[#allocation2 + $0x198] sm:$0x1f] %vm1266_vm11, %v1191_v48  ;;  %v236_v32 = vld [vmem:[%s9985_s0 + $0x160] sm:$0xff]  ;;  %v2865_v57 = vpack.c.bf16 %v5122_v9, %v5122_v9 }
  0xbb   :  { %1630 = vrot.lane.b32.xlu1 %v1579_v12, %s5547_s19  ;;  %1315 = vst.msk [vmem:[#allocation2 + $0x58] sm:$0x7] %vm1312_vm12, %v9995_v3  ;;  %4104 = vmatprep.mubr.bf16.mxu0 %v3583_v23  ;;  %v3623_v45 = vld [vmem:[#allocation2 + $0x170] sm:$0xff]  ;;  %v1613_v59 = vpop.permute.xlu0 %1612  ;;  %v1427_v23 = vrot.slane %v1387_v33, 5  ;;  %v7226_v37 = vpack.c.bf16 %v237_v36, %v236_v32  ;;  %v5517_v48 = vld [vmem:[%s9986_s1 + $0xc8] sm:$0xff]  }
  0xbc   :  { %4360 = vmatpush1.bf16.msra.mxu0 %v5511_v17  ;;  %4168 = vmatprep.mubr.bf16.mxu1 %v3623_v45  ;;  %2276 = vst.msk [vmem:[#allocation2 + $0x90] sm:$0xc0] %vm2272_vm10, %v2211_v43  ;;  %2277 = vst.msk [vmem:[#allocation2 + $0xb8] sm:$0xc0] %vm2272_vm10, %v2212_v26  ;;  %v7251_v43 = vld [vmem:[%s9985_s0 + $0x130] sm:$0xff]  ;;  %v1765_v45 = vpack.c.bf16 %v5088_v52, %v5087_v39  ;;  %v5068_v14 = vld [vmem:[%s9985_s0 + $0x1a8] sm:$0xff] }
  0xbd   :  { %4361 = vmatprep.subr.bf16.mxu0 %v9995_v3  ;;  %1300 = vst.msk [vmem:[#allocation2 + $0x198] sm:$0xff] %vm9991_vm4, %v9995_v3  ;;  %1206 = vrot.lane.b32.xlu0 %v1124_v29, %s5545_s28  ;;  %v2629_v29 = vpack.c.bf16 %v2597_v20, %v2597_v20  ;;  %v1083_v47 = vld [vmem:[%s9985_s0 + $0x14e] sm:$0x3]  ;;  %v5028_v8 = vld [vmem:[%s9985_s0 + $0x1a8] sm:$0x3]  ;;  %v7339_v20 = vld [vmem:[%s9985_s0 + $0x150] sm:$0xff] }
  0xbe   :  { %v3582_v51 = vld [vmem:[#allocation2 + $0x28] sm:$0xff]  ;;  %1516 = vst.msk [vmem:[#allocation2 + $0x198] sm:$0xff] %vm1515_vm6, %v9995_v3  ;;  %v1388_v9 = vpack.c.bf16 %v5028_v8, %v7307_v50  ;;  %v5520_v26 = vld [vmem:[%s9986_s1 + $0xe0] sm:$0xff]   ;;  %v239_v39 = vld [vmem:[%s9985_s0 + $0x178] sm:$0xff] }
  0xbf   :  { %2437 = vrot.lane.b32.xlu1 %v6312_v58, %s5545_s28  ;;  %v7121_v58 = vld [vmem:[%s9985_s0 + $0x138] sm:$0xff]  ;;  %4105 = vmatmul.mubr.bf16.gmra.mrb[4].mxu0 %v3582_v51  ;;  %v3622_v60 = vld [vmem:[#allocation2 + $0x168] sm:$0xff]  ;;  %999 = vst.msk [vmem:[#allocation2 + $0x378] sm:$0xff] %vm15_vm1, %v7226_v37 }
  0xc0   :  { %4362 = vmatpush1.bf16.msra.mxu0 %v5512_v34  ;;  %v964_v15 = vpack.c.bf16 %v7121_v58, %v7126_v42  ;;  %4169 = vmatmul.mubr.bf16.gmra.mrb[4].mxu1 %v3622_v60  ;;  %v757_v12 = vpop.permute.xlu0 %756  ;;  %1786 = vst.msk [vmem:[#allocation2 + $0xb0] sm:$0x1f] %vm9992_vm15, %v1765_v45  ;;  %v2117_v60 = vld [vmem:[%s9985_s0 + $0x50] sm:$0xf]  ;;  %v5070_v8 = vld [vmem:[%s9985_s0 + $0x1b8] sm:$0xff] }
  0xc1   :  { %v1439_v44 = vpop.permute.xlu1 %1438  ;;  %4363 = vmatprep.subr.bf16.mxu0 %v9995_v3  ;;  %1458 = vrot.lane.b32.xlu0 %v1426_v54, %s5546_s6  ;;  %851 = vst.msk [vmem:[#allocation2 + $0x50] sm:$0xf8] %vm848_vm0, %v757_v12  ;;  %v2881_v54 = vrot.slane %v2865_v57, 2  ;;  %v1582_v57 = vpack.c.bf16 %v5068_v14, %v7307_v50  ;;  %v635_v14 = vld [vmem:[%s9985_s0 + $0x158] sm:$0x3] }
  0xc2   :  { %1497 = vst.msk [vmem:[#allocation2 + $0x58] sm:$0xf8] %vm1494_vm13, %v1439_v44 }
  0xc3   :  { %2694 = vrot.lane.b32.xlu1 %v2628_v38, %s5546_s6  ;;  %996 = vst.msk [vmem:[#allocation2 + $0x300] sm:$0xff] %vm15_vm1, %v964_v15  ;;  %v7231_v38 = vld [vmem:[%s9985_s0 + $0x140] sm:$0xff] }
  0xc4   :  { %1029 = vst.msk [vmem:[#allocation2 + $0x300] sm:$0xe0] %vm1009_vm3, %v9995_v3  ;;  %4364 = vmatpush1.bf16.msra.mxu0 %v5513_v46  ;;  %v965_v44 = vpack.c.bf16 %v7216_v35, %v7231_v38  ;;  %1032 = vst.msk [vmem:[#allocation2 + $0x378] sm:$0xe0] %vm1009_vm3, %v9995_v3 }
  0xc5   :  { %v487_v55 = vpop.permute.xlu1 %486  ;;  %4365 = vmatprep.subr.bf16.mxu0 %v9995_v3  ;;  %1670 = vst.msk [vmem:[#allocation2 + $0x58] sm:$0xff] %vm1515_vm6, %v1613_v59  ;;  %1632 = vrot.lane.b32.xlu0 %v1580_v5, %s5547_s19  ;;  %v3628_v17 = vld [vmem:[#allocation2 + $0x198] sm:$0xff]  ;;  %v1177_v6 = vpop.permute.xlu0 %1176  ;;  %v1082_v5 = vld [vmem:[%s9985_s0 + $0x146] sm:$0xff] }
  0xc6   :  { %543 = vst.msk [vmem:[#allocation2 + $0x190] sm:$0x1f] %vm538_vm9, %v487_v55  ;;  %4176 = vmatprep.mubr.bf16.mxu1 %v3628_v17  ;;  %v7333_v17 = vld [vmem:[%s9985_s0 + $0x140] sm:$0xff] }
  0xc7   :  { %570 = vst.msk [vmem:[#allocation2 + $0x190] sm:$0x7] %vm9990_vm5, %v9995_v3  ;;  %2890 = vrot.lane.b32.xlu1 %v2880_v19, %s5547_s19 }
  0xc8   :  { %4366 = vmatpush1.bf16.msra.mxu0 %v5514_v13  ;;  %1270 = vst.msk [vmem:[#allocation2 + $0x80] sm:$0x1f] %vm1266_vm11, %v1177_v6  ;;  %v3587_v19 = vld [vmem:[#allocation2 + $0x50] sm:$0xff]  ;;  %v5090_v6 = vld [vmem:[%s9985_s0 + $0xbe] sm:$0x3] }
  0xc9   :  { %v773_v10 = vpop.permute.xlu1 %772  ;;  %4367 = vmatprep.subr.bf16.mxu0 %v9995_v3  ;;  %1316 = vst.msk [vmem:[#allocation2 + $0x80] sm:$0x7] %vm1312_vm12, %v9995_v3  ;;  %2439 = vrot.lane.b32.xlu0 %v6361_v2, %s5545_s28  ;;  %v631_v2 = vld [vmem:[%s9985_s0 + $0x138] sm:$0x3]  ;;  %v1441_v51 = vpop.permute.xlu0 %1440  ;;  %v5518_v13 = vld [vmem:[%s9986_s1 + $0xd0] sm:$0xff]  }
  0xca   :  { %859 = vst.msk [vmem:[#allocation2 + $0x190] sm:$0xf8] %vm848_vm0, %v773_v10  ;;  %v675_v55 = vpack.c.bf16 %v631_v2, %v7251_v43  ;;  %v5519_v10 = vld [vmem:[%s9986_s1 + $0xd8] sm:$0xff]  }
  0xcb   :  { %788 = vrot.lane.b32.xlu1 %v738_v62, %s5547_s19  ;;  %997 = vst.msk [vmem:[#allocation2 + $0x328] sm:$0xff] %vm15_vm1, %v965_v44  ;;  %v2149_v62 = vpack.c.bf16 %v2117_v60, %v2117_v60  ;;  %v1428_v44 = vrot.slane %v1388_v9, 5  ;;  %v5030_v60 = vld [vmem:[%s9985_s0 + $0x1b8] sm:$0x3] }
  0xcc   :  { %4368 = vmatpush1.bf16.msra.mxu0 %v5515_v11  ;;  %v3588_v34 = vld [vmem:[#allocation2 + $0x58] sm:$0xff]  ;;  %1498 = vst.msk [vmem:[#allocation2 + $0x80] sm:$0xf8] %vm1494_vm13, %v1441_v51  ;;  %v739_v63 = vrot.slane %v675_v55, 5  ;;  %v2118_v51 = vld [vmem:[%s9985_s0 + $0x60] sm:$0xf] }
  0xcd   :  { %v1193_v21 = vpop.permute.xlu1 %1192  ;;  %4369 = vmatprep.subr.bf16.mxu0 %v9995_v3  ;;  %4112 = vmatprep.mubr.bf16.mxu0 %v3588_v34  ;;  %1030 = vst.msk [vmem:[#allocation2 + $0x328] sm:$0xe0] %vm1009_vm3, %v9995_v3  ;;  %v489_v59 = vpop.permute.xlu0 %488  ;;  %v2213_v11 = vrot.slane %v2149_v62, 2  ;;  %v1084_v55 = vld [vmem:[%s9985_s0 + $0x156] sm:$0xff] }
  0xce   :  { %1278 = vst.msk [vmem:[#allocation2 + $0x1c0] sm:$0x1f] %vm1266_vm11, %v1193_v21  ;;  %4113 = vmatmul.mubr.bf16.gmra.mrb[8].mxu0 %v3587_v19  ;;  %2696 = vrot.lane.b32.xlu0 %v2629_v29, %s5546_s6  ;;  %v5089_v21 = vld [vmem:[%s9985_s0 + $0xb6] sm:$0xff]  ;;  %v2150_v19 = vpack.c.bf16 %v2118_v51, %v2118_v51 }
  0xcf   :  { %1301 = vst.msk [vmem:[#allocation2 + $0x1c0] sm:$0xff] %vm9991_vm4, %v9995_v3  ;;  %1208 = vrot.lane.b32.xlu1 %v1125_v31, %s5545_s28  ;;  %v7323_v31 = vld [vmem:[%s9985_s0 + $0x158] sm:$0xff]  ;;  %v1766_v52 = vpack.c.bf16 %v5090_v6, %v5089_v21 }
  0xd0   :  { %1517 = vst.msk [vmem:[#allocation2 + $0x1c0] sm:$0xff] %vm1515_vm6, %v9995_v3  ;;  %4370 = vmatpush1.bf16.msra.mxu0 %v5516_v24  ;;  %v633_v24 = vld [vmem:[%s9985_s0 + $0x148] sm:$0x3]  ;;  %v966_v32 = vpack.c.bf16 %v7323_v31, %v7339_v20  ;;  %v2214_v62 = vrot.slane %v2150_v19, 2 }
  0xd1   :  { %v1615_v46 = vpop.permute.xlu1 %1614  ;;  %v3627_v15 = vld [vmem:[#allocation2 + $0x190] sm:$0xff]  ;;  %4371 = vmatprep.subr.bf16.mxu0 %v9995_v3  ;;  %1806 = vst.msk [vmem:[#allocation2 + $0xb0] sm:$0xff] %vm191_vm2, %v9995_v3  ;;  %v775_v12 = vpop.permute.xlu0 %774  ;;  %v676_v45 = vpack.c.bf16 %v633_v24, %v7333_v17 }
  0xd2   :  { %4177 = vmatmul.mubr.bf16.gmra.mrb[8].mxu1 %v3627_v15  ;;  %1671 = vst.msk [vmem:[#allocation2 + $0x80] sm:$0xff] %vm1515_vm6, %v1615_v46  ;;  %2892 = vrot.lane.b32.xlu0 %v2881_v54, %s5547_s19  ;;  %v5521_v15 = vld [vmem:[%s9986_s1 + $0xe8] sm:$0xff]   ;;  %v2599_v54 = vld [vmem:[%s9985_s0 + $0x5c] sm:$0xf] }
  0xd3   :  { %1460 = vrot.lane.b32.xlu1 %v1427_v23, %s5546_s6  ;;  %1905 = vst.msk [vmem:[#allocation2 + $0xb0] sm:$0xff] %vm9991_vm4, %v9995_v3  ;;  %v238_v23 = vld [vmem:[%s9985_s0 + $0x170] sm:$0xff]  ;;  %v2631_v4 = vpack.c.bf16 %v2599_v54, %v2599_v54 }
  0xd4   :  { %4372 = vmatpush1.bf16.msra.mxu0 %v5517_v48  ;;  %1993 = vst.msk [vmem:[#allocation2 + $0xb0] sm:$0xff] %vm1515_vm6, %v9995_v3  ;;  %v7366_v41 = vpack.c.bf16 %v239_v39, %v238_v23  ;;  %v2600_v23 = vld [vmem:[%s9985_s0 + $0x6c] sm:$0xf] }
  0xd5   :  { %v759_v56 = vpop.permute.xlu1 %758  ;;  %4373 = vmatprep.subr.bf16.mxu0 %v9995_v3  ;;  %544 = vst.msk [vmem:[#allocation2 + $0x1b8] sm:$0x1f] %vm538_vm9, %v489_v59  ;;  %v1195_v29 = vpop.permute.xlu0 %1194  ;;  %v5069_v59 = vld [vmem:[%s9985_s0 + $0x1b0] sm:$0xff]  ;;  %v1086_v39 = vld [vmem:[%s9985_s0 + $0x166] sm:$0xff] }
  0xd6   :  { %852 = vst.msk [vmem:[#allocation2 + $0x78] sm:$0xf8] %vm848_vm0, %v759_v56  ;;  %860 = vst.msk [vmem:[#allocation2 + $0x1b8] sm:$0xf8] %vm848_vm0, %v775_v12  ;;  %790 = vrot.lane.b32.xlu0 %v739_v63, %s5547_s19  ;;  %v1085_v56 = vld [vmem:[%s9985_s0 + $0x15e] sm:$0x3] }
  0xd7   :  { %1634 = vrot.lane.b32.xlu1 %v1581_v53, %s5547_s19  ;;  %v3633_v61 = vld [vmem:[#allocation2 + $0x1c0] sm:$0xff]  ;;  %571 = vst.msk [vmem:[#allocation2 + $0x1b8] sm:$0x7] %vm9990_vm5, %v9995_v3  ;;  %v740_v53 = vrot.slane %v676_v45, 5  ;;  %v7440_v12 = vld [vmem:[%s9985_s0 + $0x150] sm:$0xff] }
  0xd8   :  { %4184 = vmatprep.mubr.bf16.mxu1 %v3633_v61  ;;  %4374 = vmatpush1.bf16.msra.mxu0 %v5518_v13  ;;  %2278 = vst.msk [vmem:[#allocation2 + $0xe0] sm:$0xc0] %vm2272_vm10, %v2213_v11  ;;  %v5522_v61 = vld [vmem:[%s9986_s1 + $0xf0] sm:$0xff]   ;;  %2279 = vst.msk [vmem:[#allocation2 + $0x108] sm:$0xc0] %vm2272_vm10, %v2214_v62  ;;  %v677_v24 = vpack.c.bf16 %v635_v14, %v7440_v12  ;;  %v240_v45 = vld [vmem:[%s9985_s0 + $0x180] sm:$0xff] }
  0xd9   :  { %v1179_v7 = vpop.permute.xlu1 %1178  ;;  %4375 = vmatprep.subr.bf16.mxu0 %v9995_v3  ;;  %v3593_v33 = vld [vmem:[#allocation2 + $0x80] sm:$0xff]  ;;  %998 = vst.msk [vmem:[#allocation2 + $0x350] sm:$0xff] %vm15_vm1, %v966_v32  ;;  %1000 = vst.msk [vmem:[#allocation2 + $0x3a0] sm:$0xff] %vm15_vm1, %v7366_v41  ;;  %v1617_v2 = vpop.permute.xlu0 %1616  ;;  %v1089_v14 = vld [vmem:[%s9985_s0 + $0x17e] sm:$0x3] }
  0xda   :  { %1271 = vst.msk [vmem:[#allocation2 + $0xa8] sm:$0x1f] %vm1266_vm11, %v1179_v7  ;;  %4120 = vmatprep.mubr.bf16.mxu0 %v3593_v33  ;;  %1279 = vst.msk [vmem:[#allocation2 + $0x1e8] sm:$0x1f] %vm1266_vm11, %v1195_v29  ;;  %v1127_v7 = vpack.c.bf16 %v1085_v56, %v1084_v55  ;;  %v5523_v33 = vld [vmem:[%s9986_s1 + $0xf8] sm:$0xff]  }
  0xdb   :  { %1317 = vst.msk [vmem:[#allocation2 + $0xa8] sm:$0x7] %vm1312_vm12, %v9995_v3  ;;  %2441 = vrot.lane.b32.xlu1 %v6387_v25, %s5545_s28  ;;  %v1126_v25 = vpack.c.bf16 %v1083_v47, %v1082_v5  ;;  %v5091_v5 = vld [vmem:[%s9985_s0 + $0xc6] sm:$0xff]  ;;  %v5092_v47 = vld [vmem:[%s9985_s0 + $0xce] sm:$0x3] }
  0xdc   :  { %4376 = vmatpush1.bf16.msra.mxu0 %v5519_v10  ;;  %1031 = vst.msk [vmem:[#allocation2 + $0x350] sm:$0xe0] %vm1009_vm3, %v9995_v3  ;;  %1033 = vst.msk [vmem:[#allocation2 + $0x3a0] sm:$0xe0] %vm1009_vm3, %v9995_v3  ;;  %v1767_v10 = vpack.c.bf16 %v5092_v47, %v5091_v5  ;;  %v419_v55 = vld [vmem:[%s9985_s0 + $0x10e] sm:$0x3] }
  0xdd   :  { %v1443_v34 = vpop.permute.xlu1 %1442  ;;  %v3592_v36 = vld [vmem:[#allocation2 + $0x78] sm:$0xff]  ;;  %4377 = vmatprep.subr.bf16.mxu0 %v9995_v3  ;;  %1787 = vst.msk [vmem:[#allocation2 + $0xd8] sm:$0x1f] %vm9992_vm15, %v1766_v52  ;;  %1210 = vrot.lane.b32.xlu0 %v1126_v25, %s5545_s28  ;;  %v761_v63 = vpop.permute.xlu0 %760  ;;  %v1583_v25 = vpack.c.bf16 %v5070_v8, %v5069_v59  ;;  %v1087_v52 = vld [vmem:[%s9985_s0 + $0x16e] sm:$0x3]  ;;  %v448_v62 = vpack.c.bf16 %v419_v55, %v6904_v0 }
  0xde   :  { %1499 = vst.msk [vmem:[#allocation2 + $0xa8] sm:$0xf8] %vm1494_vm13, %v1443_v34  ;;  %4121 = vmatmul.mubr.bf16.gmra.mrb[12].mxu0 %v3592_v36  ;;  %v3632_v48 = vld [vmem:[#allocation2 + $0x1b8] sm:$0xff]  ;;  %v741_v36 = vrot.slane %v677_v24, 5  ;;  %v1128_v54 = vpack.c.bf16 %v1087_v52, %v1086_v39  ;;  %v5072_v0 = vld [vmem:[%s9985_s0 + $0x1c8] sm:$0xff] }
  0xdf   :  { %2698 = vrot.lane.b32.xlu1 %v2630_v16, %s5546_s6  ;;  %1302 = vst.msk [vmem:[#allocation2 + $0x1e8] sm:$0xff] %vm9991_vm4, %v9995_v3  ;;  %4185 = vmatmul.mubr.bf16.gmra.mrb[12].mxu1 %v3632_v48  ;;  %v2632_v48 = vpack.c.bf16 %v2600_v23, %v2600_v23  ;;  %v5093_v5 = vld [vmem:[%s9985_s0 + $0xd6] sm:$0xff]  ;;  %v5094_v47 = vld [vmem:[%s9985_s0 + $0xde] sm:$0x3]  ;;  %v2120_v24 = vld [vmem:[%s9985_s0 + $0x80] sm:$0xf] }
  0xe0   :  { %1807 = vst.msk [vmem:[#allocation2 + $0xd8] sm:$0xff] %vm191_vm2, %v9995_v3  ;;  %4378 = vmatpush1.bf16.msra.mxu0 %v5520_v26 }
  0xe1   :  { %1518 = vst.msk [vmem:[#allocation2 + $0x1e8] sm:$0xff] %vm1515_vm6, %v9995_v3  ;;  %v491_v46 = vpop.permute.xlu1 %490  ;;  %4379 = vmatprep.subr.bf16.mxu0 %v9995_v3  ;;  %1672 = vst.msk [vmem:[#allocation2 + $0xa8] sm:$0xff] %vm1515_vm6, %v1617_v2  ;;  %1462 = vrot.lane.b32.xlu0 %v1428_v44, %s5546_s6  ;;  %v1181_v16 = vpop.permute.xlu0 %1180  ;;  %v5032_v44 = vld [vmem:[%s9985_s0 + $0x1c8] sm:$0x3]  ;;  %v2119_v2 = vld [vmem:[%s9985_s0 + $0x70] sm:$0xf] }
  0xe2   :  { %1906 = vst.msk [vmem:[#allocation2 + $0xd8] sm:$0xff] %vm9991_vm4, %v9995_v3 }
  0xe3   :  { %545 = vst.msk [vmem:[#allocation2 + $0x1e0] sm:$0x1f] %vm538_vm9, %v491_v46  ;;  %1636 = vrot.lane.b32.xlu1 %v1582_v57, %s5547_s19  ;;  %v7483_v57 = vld [vmem:[%s9985_s0 + $0x1c0] sm:$0xff] }
  0xe4   :  { %1994 = vst.msk [vmem:[#allocation2 + $0xd8] sm:$0xff] %vm1515_vm6, %v9995_v3  ;;  %4380 = vmatpush1.bf16.msra.mxu0 %v5521_v15  ;;  %v241_v15 = vld [vmem:[%s9985_s0 + $0x188] sm:$0xff]  ;;  %v1390_v56 = vpack.c.bf16 %v5032_v44, %v7483_v57 }
  0xe5   :  { %572 = vst.msk [vmem:[#allocation2 + $0x1e0] sm:$0x7] %vm9990_vm5, %v9995_v3  ;;  %v777_v13 = vpop.permute.xlu1 %776  ;;  %4381 = vmatprep.subr.bf16.mxu0 %v9995_v3  ;;  %792 = vrot.lane.b32.xlu0 %v740_v53, %s5547_s19  ;;  %v1445_v6 = vpop.permute.xlu0 %1444  ;;  %v7501_v19 = vpack.c.bf16 %v241_v15, %v240_v45  ;;  %v2151_v53 = vpack.c.bf16 %v2119_v2, %v2119_v2  ;;  %v5074_v45 = vld [vmem:[%s9985_s0 + $0x1d8] sm:$0xff] }
  0xe6   :  { %861 = vst.msk [vmem:[#allocation2 + $0x1e0] sm:$0xf8] %vm848_vm0, %v777_v13  ;;  %853 = vst.msk [vmem:[#allocation2 + $0xa0] sm:$0xf8] %vm848_vm0, %v761_v63 }
  0xe7   :  { %2443 = vrot.lane.b32.xlu1 %v6479_v49, %s5545_s28  ;;  %v1389_v49 = vpack.c.bf16 %v5030_v60, %v5069_v59  ;;  %1788 = vst.msk [vmem:[#allocation2 + $0x100] sm:$0x1f] %vm9992_vm15, %v1767_v10  ;;  %v2215_v59 = vrot.slane %v2151_v53, 2  ;;  %v1088_v10 = vld [vmem:[%s9985_s0 + $0x176] sm:$0xff] }
  0xe8   :  { %v3638_v50 = vld [vmem:[#allocation2 + $0x1e8] sm:$0xff]  ;;  %4382 = vmatpush1.bf16.msra.mxu0 %v5522_v61  ;;  %1272 = vst.msk [vmem:[#allocation2 + $0xd0] sm:$0x1f] %vm1266_vm11, %v1181_v16  ;;  %v5034_v16 = vld [vmem:[%s9985_s0 + $0x1d8] sm:$0x3] }
  0xe9   :  { %v1197_v11 = vpop.permute.xlu1 %1196  ;;  %4192 = vmatprep.mubr.bf16.mxu1 %v3638_v50  ;;  %v3598_v21 = vld [vmem:[#allocation2 + $0xa8] sm:$0xff]  ;;  %4383 = vmatprep.subr.bf16.mxu0 %v9995_v3  ;;  %1808 = vst.msk [vmem:[#allocation2 + $0x100] sm:$0xff] %vm191_vm2, %v9995_v3  ;;  %v1429_v9 = vrot.slane %v1389_v49, 5  ;;  %v493_v46 = vpop.permute.xlu0 %492  ;;  %v639_v53 = vld [vmem:[%s9985_s0 + $0x178] sm:$0x3] }
  0xea   :  { %1280 = vst.msk [vmem:[#allocation2 + $0x210] sm:$0x1f] %vm1266_vm11, %v1197_v11  ;;  %4128 = vmatprep.mubr.bf16.mxu0 %v3598_v21  ;;  %1212 = vrot.lane.b32.xlu0 %v1127_v7, %s5545_s28  ;;  %v1584_v11 = vpack.c.bf16 %v5072_v0, %v7483_v57  ;;  %v5096_v57 = vld [vmem:[%s9985_s0 + $0xee] sm:$0x3] }
  0xeb   :  { %1303 = vst.msk [vmem:[#allocation2 + $0x210] sm:$0xff] %vm9991_vm4, %v9995_v3  ;;  %2700 = vrot.lane.b32.xlu1 %v2631_v4, %s5546_s6  ;;  %1907 = vst.msk [vmem:[#allocation2 + $0x100] sm:$0xff] %vm9991_vm4, %v9995_v3  ;;  %v1430_v4 = vrot.slane %v1390_v56, 5  ;;  %v2321_v56 = vld [vmem:[%s9985_s0 + $0x80] sm:$0xff] }
  0xec   :  { %1519 = vst.msk [vmem:[#allocation2 + $0x210] sm:$0xff] %vm1515_vm6, %v9995_v3  ;;  %4384 = vmatpush1.bf16.msra.mxu0 %v5523_v33  ;;  %1995 = vst.msk [vmem:[#allocation2 + $0x100] sm:$0xff] %vm1515_vm6, %v9995_v3  ;;  %v7552_v33 = vld [vmem:[%s9985_s0 + $0x1d0] sm:$0xff] }
  0xed   :  { %1318 = vst.msk [vmem:[#allocation2 + $0xd0] sm:$0x7] %vm1312_vm12, %v9995_v3  ;;  %v1619_v26 = vpop.permute.xlu1 %1618  ;;  %v3637_v32 = vld [vmem:[#allocation2 + $0x1e0] sm:$0xff]  ;;  %v779_v60 = vpop.permute.xlu0 %778 }
  0xee   :  { %v3597_v34 = vld [vmem:[#allocation2 + $0xa0] sm:$0xff]  ;;  %4193 = vmatmul.mubr.bf16.gmra.mrb[16].mxu1 %v3637_v32  ;;  %1500 = vst.msk [vmem:[#allocation2 + $0xd0] sm:$0xf8] %vm1494_vm13, %v1445_v6  ;;  %1464 = vrot.lane.b32.xlu0 %v1429_v9, %s5546_s6  ;;  %v1391_v32 = vpack.c.bf16 %v5034_v16, %v7552_v33  ;;  %v2152_v6 = vpack.c.bf16 %v2120_v24, %v2120_v24  ;;  %v243_v16 = vld [vmem:[%s9985_s0 + $0x198] sm:$0xff] }
  0xef   :  { %4129 = vmatmul.mubr.bf16.gmra.mrb[16].mxu0 %v3597_v34  ;;  %1638 = vrot.lane.b32.xlu1 %v1583_v25, %s5547_s19  ;;  %1673 = vst.msk [vmem:[#allocation2 + $0xd0] sm:$0xff] %vm1515_vm6, %v1619_v26  ;;  %v1129_v26 = vpack.c.bf16 %v1089_v14, %v1088_v10 }
  0xf0   :  { %546 = vst.msk [vmem:[#allocation2 + $0x208] sm:$0x1f] %vm538_vm9, %v493_v46  ;;  %v2216_v23 = vrot.slane %v2152_v6, 2  ;;  %v1431_v52 = vrot.slane %v1391_v32, 5  ;;  %v77_v32 = vld [vmem:[%s9985_s0 + $0x138] sm:$0x3] }
  0xf1   :  { %v763_v29 = vpop.permute.xlu1 %762  ;;  %573 = vst.msk [vmem:[#allocation2 + $0x208] sm:$0x7] %vm9990_vm5, %v9995_v3  ;;  %v1199_v8 = vpop.permute.xlu0 %1198 }
  0xf2   :  { %854 = vst.msk [vmem:[#allocation2 + $0xc8] sm:$0xf8] %vm848_vm0, %v763_v29  ;;  %794 = vrot.lane.b32.xlu0 %v741_v36, %s5547_s19  ;;  %862 = vst.msk [vmem:[#allocation2 + $0x208] sm:$0xf8] %vm848_vm0, %v779_v60  ;;  %v2601_v36 = vld [vmem:[%s9985_s0 + $0x7c] sm:$0xf] }
  0xf3   :  { %2445 = vrot.lane.b32.xlu1 %v6530_v30, %s5545_s28  ;;  %v3643_v51 = vld [vmem:[#allocation2 + $0x210] sm:$0xff]  ;;  %v637_v30 = vld [vmem:[%s9985_s0 + $0x168] sm:$0x3]  ;;  %1001 = vst.msk [vmem:[#allocation2 + $0x3c8] sm:$0xff] %vm15_vm1, %v7501_v19  ;;  %v2633_v44 = vpack.c.bf16 %v2601_v36, %v2601_v36  ;;  %v103_v36 = vpack.c.bf16 %v77_v32, %v7126_v42  ;;  %v5078_v32 = vld [vmem:[%s9985_s0 + $0x1f8] sm:$0xff] }
  0xf4   :  { %4200 = vmatprep.mubr.bf16.mxu1 %v3643_v51  ;;  %1034 = vst.msk [vmem:[#allocation2 + $0x3c8] sm:$0xe0] %vm1009_vm3, %v9995_v3  ;;  %v678_v63 = vpack.c.bf16 %v637_v30, %v6917_v1  ;;  %v1768_v1 = vpack.c.bf16 %v5094_v47, %v5093_v5  ;;  %v5095_v29 = vld [vmem:[%s9985_s0 + $0xe6] sm:$0xff]  ;;  %v421_v51 = vld [vmem:[%s9985_s0 + $0x11e] sm:$0x3] }
  0xf5   :  { %v1183_v13 = vpop.permute.xlu1 %1182  ;;  %2280 = vst.msk [vmem:[#allocation2 + $0x130] sm:$0xc0] %vm2272_vm10, %v2215_v59  ;;  %v479_v25 = vpop.permute.xlu0 %478  ;;  %2281 = vst.msk [vmem:[#allocation2 + $0x158] sm:$0xc0] %vm2272_vm10, %v2216_v23  ;;  %v1769_v15 = vpack.c.bf16 %v5096_v57, %v5095_v29  ;;  %v449_v55 = vpack.c.bf16 %v421_v51, %v6970_v18  ;;  %v2322_v30 = vld [vmem:[%s9985_s0 + $0x88] sm:$0xff]  ;;  %v7643_v47 = vld [vmem:[%s9985_s0 + $0x1e0] sm:$0xff] }
  0xf6   :  { %1273 = vst.msk [vmem:[#allocation2 + $0xf8] sm:$0x1f] %vm1266_vm11, %v1183_v13  ;;  %v3603_v61 = vld [vmem:[#allocation2 + $0xd0] sm:$0xff]  ;;  %1214 = vrot.lane.b32.xlu0 %v1128_v54, %s5545_s28  ;;  %1281 = vst.msk [vmem:[#allocation2 + $0x238] sm:$0x1f] %vm1266_vm11, %v1199_v8  ;;  %v742_v49 = vrot.slane %v678_v63, 5  ;;  %v1585_v54 = vpack.c.bf16 %v5074_v45, %v7552_v33  ;;  %v679_v13 = vpack.c.bf16 %v639_v53, %v6983_v40 }
  0xf7   :  { %1319 = vst.msk [vmem:[#allocation2 + $0xf8] sm:$0x7] %vm1312_vm12, %v9995_v3  ;;  %2702 = vrot.lane.b32.xlu1 %v2632_v48, %s5546_s6  ;;  %4136 = vmatprep.mubr.bf16.mxu0 %v3603_v61  ;;  %v2377_v61 = vpack.c.bf16 %v2322_v30, %v2321_v56  ;;  %v1090_v63 = vld [vmem:[%s9985_s0 + $0x186] sm:$0xff]  ;;  %v1091_v5 = vld [vmem:[%s9985_s0 + $0x18e] sm:$0x3]  ;;  %v5097_v23 = vld [vmem:[%s9985_s0 + $0xf6] sm:$0xff] }
  0xf8   :  { %1789 = vst.msk [vmem:[#allocation2 + $0x128] sm:$0x1f] %vm9992_vm15, %v1768_v1  ;;  %1790 = vst.msk [vmem:[#allocation2 + $0x150] sm:$0x1f] %vm9992_vm15, %v1769_v15  ;;  %v743_v40 = vrot.slane %v679_v13, 5  ;;  %v5076_v57 = vld [vmem:[%s9985_s0 + $0x1e8] sm:$0xff] }
  0xf9   :  { %v1447_v7 = vpop.permute.xlu1 %1446  ;;  %v3602_v50 = vld [vmem:[#allocation2 + $0xc8] sm:$0xff]  ;;  %1304 = vst.msk [vmem:[#allocation2 + $0x238] sm:$0xff] %vm9991_vm4, %v9995_v3  ;;  %v495_v39 = vpop.permute.xlu0 %494  ;;  %v2121_v1 = vld [vmem:[%s9985_s0 + $0x90] sm:$0xf]  ;;  %v1586_v15 = vpack.c.bf16 %v5076_v57, %v7643_v47  ;;  %v2603_v13 = vld [vmem:[%s9985_s0 + $0x9c] sm:$0xf] }
  0xfa   :  { %1501 = vst.msk [vmem:[#allocation2 + $0xf8] sm:$0xf8] %vm1494_vm13, %v1447_v7  ;;  %4137 = vmatmul.mubr.bf16.gmra.mrb[20].mxu0 %v3602_v50  ;;  %1466 = vrot.lane.b32.xlu0 %v1430_v4, %s5546_s6  ;;  %v3642_v9 = vld [vmem:[#allocation2 + $0x208] sm:$0xff]  ;;  %v2153_v10 = vpack.c.bf16 %v2121_v1, %v2121_v1 }
  0xfb   :  { %498 = vrot.lane.b32.xlu1 %v448_v62, %s5546_s6  ;;  %1809 = vst.msk [vmem:[#allocation2 + $0x128] sm:$0xff] %vm191_vm2, %v9995_v3  ;;  %4201 = vmatmul.mubr.bf16.gmra.mrb[20].mxu1 %v3642_v9  ;;  %1810 = vst.msk [vmem:[#allocation2 + $0x150] sm:$0xff] %vm191_vm2, %v9995_v3  ;;  %v2602_v62 = vld [vmem:[%s9985_s0 + $0x8c] sm:$0xf]  ;;  %v5036_v7 = vld [vmem:[%s9985_s0 + $0x1e8] sm:$0x3] }
  0xfc   :  { %1520 = vst.msk [vmem:[#allocation2 + $0x238] sm:$0xff] %vm1515_vm6, %v9995_v3  ;;  %v2634_v8 = vpack.c.bf16 %v2602_v62, %v2602_v62  ;;  %v1392_v14 = vpack.c.bf16 %v5036_v7, %v7643_v47  ;;  %v641_v33 = vld [vmem:[%s9985_s0 + $0x188] sm:$0x3]  ;;  %v2217_v24 = vrot.slane %v2153_v10, 2  ;;  %v425_v47 = vld [vmem:[%s9985_s0 + $0x13e] sm:$0x3] }
  0xfd   :  { %v1621_v21 = vpop.permute.xlu1 %1620  ;;  %1908 = vst.msk [vmem:[#allocation2 + $0x128] sm:$0xff] %vm9991_vm4, %v9995_v3  ;;  %1909 = vst.msk [vmem:[#allocation2 + $0x150] sm:$0xff] %vm9991_vm4, %v9995_v3  ;;  %v7758_v7 = vld [vmem:[%s9985_s0 + $0x190] sm:$0xff]  ;;  %v934_v1 = vld [vmem:[%s9985_s0 + $0x1a8] sm:$0xff] }
  0xfe   :  { %1674 = vst.msk [vmem:[#allocation2 + $0xf8] sm:$0xff] %vm1515_vm6, %v1621_v21  ;;  %1996 = vst.msk [vmem:[#allocation2 + $0x128] sm:$0xff] %vm1515_vm6, %v9995_v3  ;;  %1640 = vrot.lane.b32.xlu0 %v1584_v11, %s5547_s19  ;;  %v1130_v11 = vpack.c.bf16 %v1091_v5, %v1090_v63  ;;  %v931_v21 = vld [vmem:[%s9985_s0 + $0x190] sm:$0xff] }
  0xff   :  { %539 = vst.msk [vmem:[#allocation2 + $0xf0] sm:$0x1f] %vm538_vm9, %v479_v25  ;;  %796 = vrot.lane.b32.xlu1 %v742_v49, %s5547_s19  ;;  %547 = vst.msk [vmem:[#allocation2 + $0x230] sm:$0x1f] %vm538_vm9, %v495_v39  ;;  %v423_v49 = vld [vmem:[%s9985_s0 + $0x12e] sm:$0x3]  ;;  %v970_v9 = vpack.c.bf16 %v243_v16, %v931_v21 }
 0x100   :  { %566 = vst.msk [vmem:[#allocation2 + $0xf0] sm:$0x7] %vm9990_vm5, %v9995_v3  ;;  %574 = vst.msk [vmem:[#allocation2 + $0x230] sm:$0x7] %vm9990_vm5, %v9995_v3  ;;  %v450_v6 = vpack.c.bf16 %v423_v49, %v7075_v22  ;;  %v5098_v39 = vld [vmem:[%s9985_s0 + $0xfe] sm:$0x3] }
 0x101   :  { %v765_v34 = vpop.permute.xlu1 %764  ;;  %1997 = vst.msk [vmem:[#allocation2 + $0x150] sm:$0xff] %vm1515_vm6, %v9995_v3  ;;  %v1432_v22 = vrot.slane %v1392_v14, 5  ;;  %v1770_v42 = vpack.c.bf16 %v5098_v39, %v5097_v23  ;;  %v424_v5 = vld [vmem:[%s9985_s0 + $0x136] sm:$0xff]  ;;  %v79_v14 = vld [vmem:[%s9985_s0 + $0x148] sm:$0x3] }
 0x102   :  { %855 = vst.msk [vmem:[#allocation2 + $0xf0] sm:$0xf8] %vm848_vm0, %v765_v34  ;;  %2447 = vrot.lane.b32.xlu0 %v6608_v27, %s5545_s28  ;;  %v781_v27 = vpop.permute.xlu0 %780  ;;  %v680_v34 = vpack.c.bf16 %v641_v33, %v7089_v28  ;;  %v451_v33 = vpack.c.bf16 %v425_v47, %v424_v5  ;;  %v104_v21 = vpack.c.bf16 %v79_v14, %v7231_v38  ;;  %v1094_v23 = vld [vmem:[%s9985_s0 + $0x1a6] sm:$0xff]  ;;  %v1095_v39 = vld [vmem:[%s9985_s0 + $0x1ae] sm:$0x3]  ;;  %v3584_v5 = vld [vmem:[#allocation2 + $0x38] sm:$0xff] }
 0x103   :  { %1216 = vrot.lane.b32.xlu1 %v1129_v26, %s5545_s28  ;;  %v3648_v46 = vld [vmem:[#allocation2 + $0x238] sm:$0xff]  ;;  %863 = vst.msk [vmem:[#allocation2 + $0x230] sm:$0xf8] %vm848_vm0, %v781_v27  ;;  %v2323_v27 = vld [vmem:[%s9985_s0 + $0x90] sm:$0xff] }
 0x104   :  { %4208 = vmatprep.mubr.bf16.mxu1 %v3648_v46  ;;  %1002 = vst.msk [vmem:[#allocation2 + $0x3f0] sm:$0xff] %vm15_vm1, %v970_v9  ;;  %v744_v46 = vrot.slane %v680_v34, 5  ;;  %v3579_v9 = vld [vmem:[#allocation2 + $0x10] sm:$0xff] }
 0x105   :  { %v1185_v2 = vpop.permute.xlu1 %1184  ;;  %v3608_v48 = vld [vmem:[#allocation2 + $0xf8] sm:$0xff]  ;;  %2282 = vst.msk [vmem:[#allocation2 + $0x180] sm:$0xc0] %vm2272_vm10, %v2217_v24  ;;  %v646_v14 = vld [vmem:[%s9985_s0 + $0x1b0] sm:$0xff] }
 0x106   :  { %1274 = vst.msk [vmem:[#allocation2 + $0x120] sm:$0x1f] %vm1266_vm11, %v1185_v2  ;;  %4144 = vmatprep.mubr.bf16.mxu0 %v3608_v48  ;;  %2704 = vrot.lane.b32.xlu0 %v2633_v44, %s5546_s6  ;;  %v1201_v18 = vpop.permute.xlu0 %1200  ;;  %v143_v44 = vrot.slane %v103_v36, 5  ;;  %v1092_v2 = vld [vmem:[%s9985_s0 + $0x196] sm:$0xff]  ;;  %v1093_v48 = vld [vmem:[%s9985_s0 + $0x19e] sm:$0x3] }
 0x107   :  { %1320 = vst.msk [vmem:[#allocation2 + $0x120] sm:$0x7] %vm1312_vm12, %v9995_v3  ;;  %1468 = vrot.lane.b32.xlu1 %v1431_v52, %s5546_s6  ;;  %v1131_v56 = vpack.c.bf16 %v1093_v48, %v1092_v2  ;;  %v645_v48 = vld [vmem:[%s9985_s0 + $0x1a8] sm:$0x3]  ;;  %v1096_v47 = vld [vmem:[%s9985_s0 + $0x1b6] sm:$0xff] }
 0x108   :  { %1282 = vst.msk [vmem:[#allocation2 + $0x260] sm:$0x1f] %vm1266_vm11, %v1201_v18  ;;  %v5038_v18 = vld [vmem:[%s9985_s0 + $0x1f8] sm:$0x3] }
 0x109   :  { %v1449_v59 = vpop.permute.xlu1 %1448  ;;  %v3607_v60 = vld [vmem:[#allocation2 + $0xf0] sm:$0xff]  ;;  %1305 = vst.msk [vmem:[#allocation2 + $0x260] sm:$0xff] %vm9991_vm4, %v9995_v3 }
 0x10a   :  { %1502 = vst.msk [vmem:[#allocation2 + $0x120] sm:$0xf8] %vm1494_vm13, %v1449_v59  ;;  %4145 = vmatmul.mubr.bf16.gmra.mrb[24].mxu0 %v3607_v60  ;;  %500 = vrot.lane.b32.xlu0 %v449_v55, %s5546_s6  ;;  %v481_v50 = vpop.permute.xlu0 %480  ;;  %v3647_v0 = vld [vmem:[#allocation2 + $0x230] sm:$0xff] }
 0x10b   :  { %1642 = vrot.lane.b32.xlu1 %v1585_v54, %s5547_s19  ;;  %1521 = vst.msk [vmem:[#allocation2 + $0x260] sm:$0xff] %vm1515_vm6, %v9995_v3  ;;  %4209 = vmatmul.mubr.bf16.gmra.mrb[24].mxu1 %v3647_v0  ;;  %v2324_v54 = vld [vmem:[%s9985_s0 + $0x98] sm:$0xff]  ;;  %v7736_v60 = vld [vmem:[%s9985_s0 + $0x1f0] sm:$0xff] }
 0x10c   :  { %540 = vst.msk [vmem:[#allocation2 + $0x118] sm:$0x1f] %vm538_vm9, %v481_v50  ;;  %v2378_v30 = vpack.c.bf16 %v2324_v54, %v2323_v27  ;;  %v2635_v50 = vpack.c.bf16 %v2603_v13, %v2603_v13  ;;  %v1393_v0 = vpack.c.bf16 %v5038_v18, %v7736_v60  ;;  %v1587_v36 = vpack.c.bf16 %v5078_v32, %v7736_v60  ;;  %v81_v13 = vld [vmem:[%s9985_s0 + $0x158] sm:$0x3] }
 0x10d   :  { %v1623_v4 = vpop.permute.xlu1 %1622  ;;  %567 = vst.msk [vmem:[#allocation2 + $0x118] sm:$0x7] %vm9990_vm5, %v9995_v3  ;;  %v105_v18 = vpack.c.bf16 %v81_v13, %v7339_v20 }
 0x10e   :  { %1675 = vst.msk [vmem:[#allocation2 + $0x120] sm:$0xff] %vm1515_vm6, %v1623_v4  ;;  %798 = vrot.lane.b32.xlu0 %v743_v40, %s5547_s19  ;;  %v497_v26 = vpop.permute.xlu0 %496  ;;  %v257_v4 = vpack.c.bf16 %v7121_v58, %v7251_v43  ;;  %v643_v58 = vld [vmem:[%s9985_s0 + $0x198] sm:$0x3]  ;;  %v933_v43 = vld [vmem:[%s9985_s0 + $0x1a0] sm:$0xff] }
 0x10f   :  { %2449 = vrot.lane.b32.xlu1 %v2377_v61, %s5545_s28  ;;  %548 = vst.msk [vmem:[#allocation2 + $0x258] sm:$0x1f] %vm538_vm9, %v497_v26  ;;  %v2122_v61 = vld [vmem:[%s9985_s0 + $0xa0] sm:$0xf]  ;;  %v971_v10 = vpack.c.bf16 %v934_v1, %v933_v43  ;;  %v681_v16 = vpack.c.bf16 %v643_v58, %v7758_v7  ;;  %v2327_v43 = vld [vmem:[%s9985_s0 + $0xb0] sm:$0xff]  ;;  %v2328_v1 = vld [vmem:[%s9985_s0 + $0xb8] sm:$0xff] }
 0x110   :  { %575 = vst.msk [vmem:[#allocation2 + $0x258] sm:$0x7] %vm9990_vm5, %v9995_v3  ;;  %vm9994_vm5 = vcmask 1046272   ;;  %v2154_v63 = vpack.c.bf16 %v2122_v61, %v2122_v61 }
 0x111   :  { %v767_v25 = vpop.permute.xlu1 %766  ;;  %1035 = vst.msk [vmem:[#allocation2 + $0x3f0] sm:$0xe0] %vm1009_vm3, %v9995_v3  ;;  %v745_v38 = vrot.slane %v681_v16, 5  ;;  %v2380_v16 = vpack.c.bf16 %v2328_v1, %v2327_v43  ;;  %v939_v43 = vld [vmem:[%s9985_s0 + $0x1d0] sm:$0xff]  ;;  %v940_v1 = vld [vmem:[%s9985_s0 + $0x1d8] sm:$0xff] }
 0x112   :  { %856 = vst.msk [vmem:[#allocation2 + $0x118] sm:$0xf8] %vm848_vm0, %v767_v25  ;;  %1218 = vrot.lane.b32.xlu0 %v1130_v11, %s5545_s28  ;;  %v3653_v28 = vld [vmem:[#allocation2 + $0x260] sm:$0xff]  ;;  %v783_v45 = vpop.permute.xlu0 %782  ;;  %v1433_v25 = vrot.slane %v1393_v0, 5 }
 0x113   :  { %2706 = vrot.lane.b32.xlu1 %v2634_v8, %s5546_s6  ;;  %4216 = vmatprep.mubr.bf16.mxu1 %v3653_v28  ;;  %1791 = vst.msk [vmem:[#allocation2 + $0x178] sm:$0x1f] %vm9992_vm15, %v1770_v42  ;;  %v2218_v8 = vrot.slane %v2154_v63, 2  ;;  %vm1827_vm15 = vcmask 521472  }
 0x114   :  { %864 = vst.msk [vmem:[#allocation2 + $0x258] sm:$0xf8] %vm848_vm0, %v783_v45 }
 0x115   :  { %v2434_v52 = vpop.permute.xlu1 %2433  ;;  %v3613_v29 = vld [vmem:[#allocation2 + $0x120] sm:$0xff]  ;;  %184 = vst.msk [vmem:[#allocation2 + $0x3e8] sm:$0xf8] %vm170_vm7, %v143_v44 }
 0x116   :  { %2529 = vst.msk [vmem:[#allocation2 + $0x18] sm:$0xff] %vm191_vm2, %v2434_v52  ;;  %4152 = vmatprep.mubr.bf16.mxu0 %v3613_v29  ;;  %1811 = vst.msk [vmem:[#allocation2 + $0x178] sm:$0xff] %vm191_vm2, %v9995_v3  ;;  %1470 = vrot.lane.b32.xlu0 %v1432_v22, %s5546_s6  ;;  %v1203_v55 = vpop.permute.xlu0 %1202  ;;  %v2325_v22 = vld [vmem:[%s9985_s0 + $0xa0] sm:$0xff]  ;;  %v2326_v52 = vld [vmem:[%s9985_s0 + $0xa8] sm:$0xff] }
 0x117   :  { %502 = vrot.lane.b32.xlu1 %v450_v6, %s5546_s6  ;;  %2562 = vst.msk [vmem:[#allocation2 + $0x18] sm:$0xfc] %vm2561_vm14, %v9995_v3  ;;  %v144_v6 = vrot.slane %v104_v21, 5  ;;  %v2123_v29 = vld [vmem:[%s9985_s0 + $0xb0] sm:$0xf]  ;;  %v2379_v2 = vpack.c.bf16 %v2326_v52, %v2325_v22 }
 0x118   :  { %1910 = vst.msk [vmem:[#allocation2 + $0x178] sm:$0xff] %vm9991_vm4, %v9995_v3  ;;  %vm9993_vm4 = vcmask 1048326   ;;  %v2155_v45 = vpack.c.bf16 %v2123_v29, %v2123_v29  ;;  %v647_v21 = vld [vmem:[%s9985_s0 + $0x1b8] sm:$0x3]  ;;  %v83_v52 = vld [vmem:[%s9985_s0 + $0x168] sm:$0x3] }
 0x119   :  { %v2691_v51 = vpop.permute.xlu1 %2690  ;;  %v3612_v53 = vld [vmem:[#allocation2 + $0x118] sm:$0xff]  ;;  %1998 = vst.msk [vmem:[#allocation2 + $0x178] sm:$0xff] %vm1515_vm6, %v9995_v3 }
 0x11a   :  { %2787 = vst.msk [vmem:[#allocation2 + $0x18] sm:$0x3] %vm2786_vm8, %v2691_v51  ;;  %4153 = vmatmul.mubr.bf16.gmra.mrb[28].mxu0 %v3612_v53  ;;  %1644 = vrot.lane.b32.xlu0 %v1586_v15, %s5547_s19  ;;  %v1455_v40 = vpop.permute.xlu0 %1454  ;;  %v644_v15 = vld [vmem:[%s9985_s0 + $0x1a0] sm:$0xff]  ;;  %v935_v51 = vld [vmem:[%s9985_s0 + $0x1b0] sm:$0xff]  ;;  %v936_v53 = vld [vmem:[%s9985_s0 + $0x1b8] sm:$0xff]  ;;  %v2219_v27 = vrot.slane %v2155_v45, 2 }
 0x11b   :  { %1283 = vst.msk [vmem:[#allocation2 + $0x288] sm:$0x1f] %vm1266_vm11, %v1203_v55  ;;  %800 = vrot.lane.b32.xlu1 %v744_v46, %s5547_s19  ;;  %v3652_v62 = vld [vmem:[#allocation2 + $0x258] sm:$0xff]  ;;  %v1132_v46 = vpack.c.bf16 %v1095_v39, %v1094_v23  ;;  %v2604_v55 = vld [vmem:[%s9985_s0 + $0xac] sm:$0xf]  ;;  %v682_v60 = vpack.c.bf16 %v645_v48, %v644_v15  ;;  %v683_v23 = vpack.c.bf16 %v647_v21, %v646_v14  ;;  %v2329_v48 = vld [vmem:[%s9985_s0 + $0xc0] sm:$0xff] }
 0x11c   :  { %2845 = vst.msk [vmem:[#allocation2 + $0x18] sm:$0x3f] %vm9994_vm5, %v9995_v3  ;;  %4217 = vmatmul.mubr.bf16.gmra.mrb[28].mxu1 %v3652_v62  ;;  %v2636_v61 = vpack.c.bf16 %v2604_v55, %v2604_v55  ;;  %v426_v62 = vld [vmem:[%s9985_s0 + $0x146] sm:$0xff]  ;;  %v431_v14 = vld [vmem:[%s9985_s0 + $0x16e] sm:$0x3] }
 0x11d   :  { %1323 = vst.msk [vmem:[#allocation2 + $0x288] sm:$0x7] %vm1312_vm12, %v9995_v3  ;;  %v2887_v59 = vpop.permute.xlu1 %2886  ;;  %v746_v20 = vrot.slane %v682_v60, 5  ;;  %v747_v29 = vrot.slane %v683_v23, 5  ;;  %v1098_v15 = vld [vmem:[%s9985_s0 + $0x1c6] sm:$0xff] }
 0x11e   :  { %2911 = vst.msk [vmem:[#allocation2 + $0x18] sm:$0xc0] %vm9993_vm4, %v2887_v59  ;;  %2451 = vrot.lane.b32.xlu0 %v2378_v30, %s5545_s28  ;;  %v1629_v11 = vpop.permute.xlu0 %1628  ;;  %v258_v59 = vpack.c.bf16 %v7216_v35, %v7333_v17  ;;  %v427_v35 = vld [vmem:[%s9985_s0 + $0x14e] sm:$0x3]  ;;  %v145_v17 = vrot.slane %v105_v18, 5 }
 0x11f   :  { %1505 = vst.msk [vmem:[#allocation2 + $0x288] sm:$0xf8] %vm1494_vm13, %v1455_v40  ;;  %1220 = vrot.lane.b32.xlu1 %v1131_v56, %s5545_s28  ;;  %v972_v56 = vpack.c.bf16 %v936_v53, %v935_v51 }
 0x120   :  { %2283 = vst.msk [vmem:[#allocation2 + $0x1a8] sm:$0xc0] %vm2272_vm10, %v2218_v8  ;;  %2284 = vst.msk [vmem:[#allocation2 + $0x1d0] sm:$0xc0] %vm2272_vm10, %v2219_v27  ;;  %v2330_v27 = vld [vmem:[%s9985_s0 + $0xc8] sm:$0xff] }
 0x121   :  { %v785_v49 = vpop.permute.xlu1 %784  ;;  %1678 = vst.msk [vmem:[#allocation2 + $0x288] sm:$0xff] %vm1515_vm6, %v1629_v11  ;;  %v2381_v13 = vpack.c.bf16 %v2330_v27, %v2329_v48  ;;  %v5525_v48 = vld [vmem:[%s9986_s1 + $0x108] sm:$0xff]   ;;  %v2607_v27 = vld [vmem:[%s9985_s0 + $0xdc] sm:$0xf] }
 0x122   :  { %865 = vst.msk [vmem:[#allocation2 + $0x280] sm:$0xf8] %vm848_vm0, %v785_v49  ;;  %2708 = vrot.lane.b32.xlu0 %v2635_v50, %s5546_s6  ;;  %v2436_v34 = vpop.permute.xlu0 %2435  ;;  %v1097_v50 = vld [vmem:[%s9985_s0 + $0x1be] sm:$0x3] }
 0x123   :  { %310 = vrot.lane.b32.xlu1 %v257_v4, %s5545_s28  ;;  %1003 = vst.msk [vmem:[#allocation2 + $0x418] sm:$0xff] %vm15_vm1, %v971_v10  ;;  %1004 = vst.msk [vmem:[#allocation2 + $0x440] sm:$0xff] %vm15_vm1, %v972_v56  ;;  %v452_v4 = vpack.c.bf16 %v427_v35, %v426_v62  ;;  %v2124_v10 = vld [vmem:[%s9985_s0 + $0xc0] sm:$0xf]  ;;  %v1133_v11 = vpack.c.bf16 %v1097_v50, %v1096_v47 }
 0x124   :  { %1036 = vst.msk [vmem:[#allocation2 + $0x418] sm:$0xe0] %vm1009_vm3, %v9995_v3  ;;  %1037 = vst.msk [vmem:[#allocation2 + $0x440] sm:$0xe0] %vm1009_vm3, %v9995_v3 }
 0x125   :  { %v1205_v24 = vpop.permute.xlu1 %1204  ;;  %v3580_v26 = vld [vmem:[#allocation2 + $0x18] sm:$0xff]  ;;  %2530 = vst.msk [vmem:[#allocation2 + $0x40] sm:$0xff] %vm191_vm2, %v2436_v34 }
 0x126   :  { %1284 = vst.msk [vmem:[#allocation2 + $0x2b0] sm:$0x1f] %vm1266_vm11, %v1205_v24  ;;  %4385 = vmatprep.mubr.bf16.mxu0 %v3580_v26  ;;  %1472 = vrot.lane.b32.xlu0 %v1433_v25, %s5546_s6  ;;  %v2693_v57 = vpop.permute.xlu0 %2692  ;;  %v937_v25 = vld [vmem:[%s9985_s0 + $0x1c0] sm:$0xff]  ;;  %v2605_v26 = vld [vmem:[%s9985_s0 + $0xbc] sm:$0xf] }
 0x127   :  { %1324 = vst.msk [vmem:[#allocation2 + $0x2b0] sm:$0x7] %vm1312_vm12, %v9995_v3  ;;  %504 = vrot.lane.b32.xlu1 %v451_v33, %s5546_s6  ;;  %4386 = vmatmul.mubr.bf16.vlgmr.msra.gmra.mrb[0].mxu0 %v3579_v9  ;;  %v2156_v33 = vpack.c.bf16 %v2124_v10, %v2124_v10  ;;  %v938_v9 = vld [vmem:[%s9985_s0 + $0x1c8] sm:$0xff]  ;;  %v2637_v39 = vpack.c.bf16 %v2605_v26, %v2605_v26 }
 0x128   :  { %185 = vst.msk [vmem:[#allocation2 + $0x410] sm:$0xf8] %vm170_vm7, %v144_v6  ;;  %v3658_v44 = vld [vmem:[#allocation2 + $0x288] sm:$0xff]  ;;  %186 = vst.msk [vmem:[#allocation2 + $0x438] sm:$0xf8] %vm170_vm7, %v145_v17  ;;  %v973_v32 = vpack.c.bf16 %v938_v9, %v937_v25  ;;  %v974_v10 = vpack.c.bf16 %v940_v1, %v939_v43  ;;  %v84_v25 = vld [vmem:[%s9985_s0 + $0x170] sm:$0xff] }
 0x129   :  { %2563 = vst.msk [vmem:[#allocation2 + $0x40] sm:$0xfc] %vm2561_vm14, %v9995_v3  ;;  %v1457_v28 = vpop.permute.xlu1 %1456  ;;  %v3657_v42 = vld [vmem:[#allocation2 + $0x280] sm:$0xff]  ;;  %4224 = vmatprep.mubr.bf16.mxu1 %v3658_v44  ;;  %v2220_v6 = vrot.slane %v2156_v33, 2  ;;  %v2125_v17 = vld [vmem:[%s9985_s0 + $0xd0] sm:$0xf] }
 0x12a   :  { %1506 = vst.msk [vmem:[#allocation2 + $0x2b0] sm:$0xf8] %vm1494_vm13, %v1457_v28  ;;  %1646 = vrot.lane.b32.xlu0 %v1587_v36, %s5547_s19  ;;  %4225 = vmatmul.mubr.bf16.gmra.mrb[32].mxu1 %v3657_v42  ;;  %v2889_v30 = vpop.permute.xlu0 %2888  ;;  %v259_v36 = vpack.c.bf16 %v7323_v31, %v7440_v12  ;;  %v428_v28 = vld [vmem:[%s9985_s0 + $0x156] sm:$0xff]  ;;  %v429_v31 = vld [vmem:[%s9985_s0 + $0x15e] sm:$0x3]  ;;  %v82_v12 = vld [vmem:[%s9985_s0 + $0x160] sm:$0xff] }
 0x12b   :  { %2788 = vst.msk [vmem:[#allocation2 + $0x40] sm:$0x3] %vm2786_vm8, %v2693_v57  ;;  %802 = vrot.lane.b32.xlu1 %v745_v38, %s5547_s19  ;;  %v3589_v57 = vld [vmem:[#allocation2 + $0x60] sm:$0xff]  ;;  %v106_v45 = vpack.c.bf16 %v83_v52, %v82_v12  ;;  %v85_v9 = vld [vmem:[%s9985_s0 + $0x178] sm:$0x3] }
 0x12c   :  { %2846 = vst.msk [vmem:[#allocation2 + $0x40] sm:$0x3f] %vm9994_vm5, %v9995_v3  ;;  %v5524_v44 = vld [vmem:[%s9986_s1 + $0x100] sm:$0xff]   ;;  %v107_v26 = vpack.c.bf16 %v85_v9, %v84_v25  ;;  %v1103_v9 = vld [vmem:[%s9985_s0 + $0x1ee] sm:$0x3] }
 0x12d   :  { %v1631_v54 = vpop.permute.xlu1 %1630  ;;  %2912 = vst.msk [vmem:[#allocation2 + $0x40] sm:$0xc0] %vm9993_vm4, %v2889_v30  ;;  %5232 = vmatprep.subr.bf16.mxu1 %v5524_v44  ;;  %v146_v55 = vrot.slane %v106_v45, 5  ;;  %v648_v33 = vld [vmem:[%s9985_s0 + $0x1c0] sm:$0xff] }
 0x12e   :  { %1679 = vst.msk [vmem:[#allocation2 + $0x2b0] sm:$0xff] %vm1515_vm6, %v1631_v54  ;;  %2453 = vrot.lane.b32.xlu0 %v2379_v2, %s5545_s28  ;;  %v787_v63 = vpop.permute.xlu0 %786  ;;  %v1099_v2 = vld [vmem:[%s9985_s0 + $0x1ce] sm:$0x3]  ;;  %v1836_v54 = vld [vmem:[%s9985_s0] sm:$0xf]  ;;  %5233 = vmatpush3.bf16.msra.mxu1 %v5524_v44  ;;  %v1102_v25 = vld [vmem:[%s9985_s0 + $0x1e6] sm:$0xff] }
 0x12f   :  { %1222 = vrot.lane.b32.xlu1 %v1132_v46, %s5545_s28  ;;  %866 = vst.msk [vmem:[#allocation2 + $0x2a8] sm:$0xf8] %vm848_vm0, %v787_v63  ;;  %v453_v46 = vpack.c.bf16 %v429_v31, %v428_v28  ;;  %v1134_v30 = vpack.c.bf16 %v1099_v2, %v1098_v15  ;;  %v1844_v60 = vpack.c.bf16 %v1836_v54, %v1836_v54  ;;  %v147_v28 = vrot.slane %v107_v26, 5  ;;  %v1101_v44 = vld [vmem:[%s9985_s0 + $0x1de] sm:$0x3] }
 0x130   :  { %1005 = vst.msk [vmem:[#allocation2 + $0x468] sm:$0xff] %vm15_vm1, %v973_v32  ;;  %1006 = vst.msk [vmem:[#allocation2 + $0x490] sm:$0xff] %vm15_vm1, %v974_v10  ;;  %5234 = vmatprep.subr.bf16.mxu1 %v5525_v48 }
 0x131   :  { %v2438_v40 = vpop.permute.xlu1 %2437  ;;  %2285 = vst.msk [vmem:[#allocation2 + $0x1f8] sm:$0xc0] %vm2272_vm10, %v2220_v6  ;;  %v1860_v63 = vrot.slane %v1844_v60, 2  ;;  %v2331_v6 = vld [vmem:[%s9985_s0 + $0xd0] sm:$0xff] }
 0x132   :  { %2531 = vst.msk [vmem:[#allocation2 + $0x68] sm:$0xff] %vm191_vm2, %v2438_v40  ;;  %2710 = vrot.lane.b32.xlu0 %v2636_v61, %s5546_s6  ;;  %v1207_v8 = vpop.permute.xlu0 %1206  ;;  %5235 = vmatpush3.bf16.msra.mxu1 %v5525_v48 }
 0x133   :  { %2564 = vst.msk [vmem:[#allocation2 + $0x68] sm:$0xfc] %vm2561_vm14, %v9995_v3  ;;  %312 = vrot.lane.b32.xlu1 %v258_v59, %s5545_s28  ;;  %v2606_v59 = vld [vmem:[%s9985_s0 + $0xcc] sm:$0xf] }
 0x134   :  { %v3585_v49 = vld [vmem:[#allocation2 + $0x40] sm:$0xff]  ;;  %1285 = vst.msk [vmem:[#allocation2 + $0x2d8] sm:$0x1f] %vm1266_vm11, %v1207_v8  ;;  %v2638_v35 = vpack.c.bf16 %v2606_v59, %v2606_v59  ;;  %v2022_v8 = vld [vmem:[%s9985_s0 + $0xc] sm:$0xf]  ;;  %v650_v59 = vld [vmem:[%s9985_s0 + $0x1d0] sm:$0xff] }
 0x135   :  { %v2695_v0 = vpop.permute.xlu1 %2694  ;;  %v3663_v58 = vld [vmem:[#allocation2 + $0x2b0] sm:$0xff]  ;;  %4393 = vmatprep.mubr.bf16.mxu0 %v3585_v49  ;;  %1325 = vst.msk [vmem:[#allocation2 + $0x2d8] sm:$0x7] %vm1312_vm12, %v9995_v3  ;;  %v430_v49 = vld [vmem:[%s9985_s0 + $0x166] sm:$0xff] }
 0x136   :  { %2789 = vst.msk [vmem:[#allocation2 + $0x68] sm:$0x3] %vm2786_vm8, %v2695_v0  ;;  %4232 = vmatprep.mubr.bf16.mxu1 %v3663_v58  ;;  %506 = vrot.lane.b32.xlu0 %v452_v4, %s5546_s6  ;;  %v1459_v34 = vpop.permute.xlu0 %1458  ;;  %v3662_v38 = vld [vmem:[#allocation2 + $0x2a8] sm:$0xff]  ;;  %v454_v32 = vpack.c.bf16 %v431_v14, %v430_v49 }
 0x137   :  { %2847 = vst.msk [vmem:[#allocation2 + $0x68] sm:$0x3f] %vm9994_vm5, %v9995_v3  ;;  %804 = vrot.lane.b32.xlu1 %v746_v20, %s5547_s19  ;;  %4394 = vmatmul.mubr.bf16.gmra.mrb[4].mxu0 %v3584_v5  ;;  %v1925_v20 = vld [vmem:[%s9985_s0] sm:$0xff]  ;;  %v1926_v4 = vld [vmem:[%s9985_s0 + $0x8] sm:$0xff]  ;;  %v2157_v5 = vpack.c.bf16 %v2125_v17, %v2125_v17  ;;  %v1927_v17 = vld [vmem:[%s9985_s0 + $0x10] sm:$0xff] }
 0x138   :  { %1507 = vst.msk [vmem:[#allocation2 + $0x2d8] sm:$0xf8] %vm1494_vm13, %v1459_v34  ;;  %4233 = vmatmul.mubr.bf16.gmra.mrb[36].mxu1 %v3662_v38  ;;  %v7980_v58 = vpack.c.bf16 %v1926_v4, %v1925_v20  ;;  %v2332_v34 = vld [vmem:[%s9985_s0 + $0xd8] sm:$0xff]  ;;  %v87_v49 = vld [vmem:[%s9985_s0 + $0x188] sm:$0x3] }
 0x139   :  { %v2891_v24 = vpop.permute.xlu1 %2890  ;;  %1038 = vst.msk [vmem:[#allocation2 + $0x468] sm:$0xe0] %vm1009_vm3, %v9995_v3  ;;  %v2221_v0 = vrot.slane %v2157_v5, 2  ;;  %1039 = vst.msk [vmem:[#allocation2 + $0x490] sm:$0xe0] %vm1009_vm3, %v9995_v3  ;;  %v2382_v12 = vpack.c.bf16 %v2332_v34, %v2331_v6  ;;  %v2334_v6 = vld [vmem:[%s9985_s0 + $0xe8] sm:$0xff] }
 0x13a   :  { %2913 = vst.msk [vmem:[#allocation2 + $0x68] sm:$0xc0] %vm9993_vm4, %v2891_v24  ;;  %2455 = vrot.lane.b32.xlu0 %v2380_v16, %s5545_s28  ;;  %v1633_v42 = vpop.permute.xlu0 %1632  ;;  %v649_v16 = vld [vmem:[%s9985_s0 + $0x1c8] sm:$0x3]  ;;  %v2030_v24 = vpack.c.bf16 %v2022_v8, %v2022_v8  ;;  %v86_v8 = vld [vmem:[%s9985_s0 + $0x180] sm:$0xff] }
 0x13b   :  { %1224 = vrot.lane.b32.xlu1 %v1133_v11, %s5545_s28  ;;  %1680 = vst.msk [vmem:[#allocation2 + $0x2d8] sm:$0xff] %vm1515_vm6, %v1633_v42  ;;  %v684_v38 = vpack.c.bf16 %v649_v16, %v648_v33  ;;  %v108_v14 = vpack.c.bf16 %v87_v49, %v86_v8  ;;  %v1838_v34 = vld [vmem:[%s9985_s0 + $0x20] sm:$0xf]  ;;  %v2335_v8 = vld [vmem:[%s9985_s0 + $0xf0] sm:$0xff]  ;;  %v2336_v49 = vld [vmem:[%s9985_s0 + $0xf8] sm:$0xff] }
 0x13c   :  { %1828 = vst.msk [vmem:[#allocation2 + $0x1f0] sm:$0x3f] %vm1827_vm15, %v9995_v3  ;;  %1829 = vst.msk [vmem:[#allocation2 + $0x218] sm:$0x3f] %vm1827_vm15, %v9995_v3 }
 0x13d   :  { %v789_v22 = vpop.permute.xlu1 %788  ;;  %1830 = vst.msk [vmem:[#allocation2 + $0x240] sm:$0x3f] %vm1827_vm15, %v9995_v3  ;;  %1831 = vst.msk [vmem:[#allocation2 + $0x268] sm:$0x3f] %vm1827_vm15, %v9995_v3  ;;  %v748_v52 = vrot.slane %v684_v38, 5 }
 0x13e   :  { %867 = vst.msk [vmem:[#allocation2 + $0x2d0] sm:$0xf8] %vm848_vm0, %v789_v22  ;;  %2712 = vrot.lane.b32.xlu0 %v2637_v39, %s5546_s6  ;;  %v2440_v56 = vpop.permute.xlu0 %2439  ;;  %v3594_v22 = vld [vmem:[#allocation2 + $0x88] sm:$0xff] }
 0x13f   :  { %314 = vrot.lane.b32.xlu1 %v259_v36, %s5545_s28  ;;  %1832 = vst.msk [vmem:[#allocation2 + $0x470] sm:$0x3f] %vm1827_vm15, %v9995_v3  ;;  %1833 = vst.msk [vmem:[#allocation2 + $0x498] sm:$0x3f] %vm1827_vm15, %v9995_v3  ;;  %v1837_v36 = vld [vmem:[%s9985_s0 + $0x10] sm:$0xf] }
 0x140   :  { %1834 = vst.msk [vmem:[#allocation2 + $0x4c0] sm:$0x3f] %vm1827_vm15, %v9995_v3  ;;  %1835 = vst.msk [vmem:[#allocation2 + $0x4e8] sm:$0x3f] %vm1827_vm15, %v9995_v3  ;;  %v1845_v42 = vpack.c.bf16 %v1837_v36, %v1837_v36  ;;  %vm9997_vm15 = vcmask 1043200  }
 0x141   :  { %v1209_v51 = vpop.permute.xlu1 %1208  ;;  %v3590_v53 = vld [vmem:[#allocation2 + $0x68] sm:$0xff]  ;;  %2532 = vst.msk [vmem:[#allocation2 + $0x90] sm:$0xff] %vm191_vm2, %v2440_v56  ;;  %v2126_v56 = vld [vmem:[%s9985_s0 + $0xe0] sm:$0xf] }
 0x142   :  { %1286 = vst.msk [vmem:[#allocation2 + $0x300] sm:$0x1f] %vm1266_vm11, %v1209_v51  ;;  %4401 = vmatprep.mubr.bf16.mxu0 %v3590_v53  ;;  %508 = vrot.lane.b32.xlu0 %v453_v46, %s5546_s6  ;;  %v2697_v40 = vpop.permute.xlu0 %2696  ;;  %v3668_v62 = vld [vmem:[#allocation2 + $0x2d8] sm:$0xff]  ;;  %v1861_v15 = vrot.slane %v1845_v42, 2  ;;  %v3599_v53 = vld [vmem:[#allocation2 + $0xb0] sm:$0xff]  ;;  %v2158_v60 = vpack.c.bf16 %v2126_v56, %v2126_v56  ;;  %v3089_v42 = vld [vmem:[%s9985_s0 + $0xc0] sm:$0xff] }
 0x143   :  { %1326 = vst.msk [vmem:[#allocation2 + $0x300] sm:$0x7] %vm1312_vm12, %v9995_v3  ;;  %806 = vrot.lane.b32.xlu1 %v747_v29, %s5547_s19  ;;  %4402 = vmatmul.mubr.bf16.gmra.mrb[8].mxu0 %v3589_v57  ;;  %v1100_v57 = vld [vmem:[%s9985_s0 + $0x1d6] sm:$0xff] }
 0x144   :  { %187 = vst.msk [vmem:[#allocation2 + $0x460] sm:$0xf8] %vm170_vm7, %v146_v55  ;;  %4240 = vmatprep.mubr.bf16.mxu1 %v3668_v62  ;;  %188 = vst.msk [vmem:[#allocation2 + $0x488] sm:$0xf8] %vm170_vm7, %v147_v28  ;;  %v1135_v2 = vpack.c.bf16 %v1101_v44, %v1100_v57  ;;  %v942_v62 = vld [vmem:[%s9985_s0 + $0x1e8] sm:$0xff]  ;;  %v2222_v4 = vrot.slane %v2158_v60, 2  ;;  %v1846_v28 = vpack.c.bf16 %v1838_v34, %v1838_v34 }
 0x145   :  { %2565 = vst.msk [vmem:[#allocation2 + $0x90] sm:$0xfc] %vm2561_vm14, %v9995_v3  ;;  %v1461_v18 = vpop.permute.xlu1 %1460  ;;  %v3667_v61 = vld [vmem:[#allocation2 + $0x2d0] sm:$0xff]  ;;  %v3090_v57 = vld [vmem:[%s9985_s0 + $0xc8] sm:$0xff]  ;;  %v944_v60 = vld [vmem:[%s9985_s0 + $0x1f8] sm:$0xff] }
 0x146   :  { %1508 = vst.msk [vmem:[#allocation2 + $0x300] sm:$0xf8] %vm1494_vm13, %v1461_v18  ;;  %2457 = vrot.lane.b32.xlu0 %v2381_v13, %s5545_s28  ;;  %4241 = vmatmul.mubr.bf16.gmra.mrb[40].mxu1 %v3667_v61  ;;  %v2893_v50 = vpop.permute.xlu0 %2892  ;;  %v433_v13 = vld [vmem:[%s9985_s0 + $0x17e] sm:$0x3]  ;;  %v2639_v18 = vpack.c.bf16 %v2607_v27, %v2607_v27  ;;  %v651_v61 = vld [vmem:[%s9985_s0 + $0x1d8] sm:$0x3] }
 0x147   :  { %2790 = vst.msk [vmem:[#allocation2 + $0x90] sm:$0x3] %vm2786_vm8, %v2697_v40  ;;  %1226 = vrot.lane.b32.xlu1 %v1134_v30, %s5545_s28  ;;  %v432_v30 = vld [vmem:[%s9985_s0 + $0x176] sm:$0xff]  ;;  %v941_v40 = vld [vmem:[%s9985_s0 + $0x1e0] sm:$0xff]  ;;  %v2127_v44 = vld [vmem:[%s9985_s0 + $0xf0] sm:$0xf] }
 0x148   :  { %2848 = vst.msk [vmem:[#allocation2 + $0x90] sm:$0x3f] %vm9994_vm5, %v9995_v3  ;;  %v975_v20 = vpack.c.bf16 %v942_v62, %v941_v40  ;;  %v1862_v48 = vrot.slane %v1846_v28, 2  ;;  %v434_v40 = vld [vmem:[%s9985_s0 + $0x186] sm:$0xff]  ;;  %vm10018_vm5 = vcmask 785925  }
 0x149   :  { %v1635_v47 = vpop.permute.xlu1 %1634  ;;  %2914 = vst.msk [vmem:[#allocation2 + $0x90] sm:$0xc0] %vm9993_vm4, %v2893_v50  ;;  %v455_v50 = vpack.c.bf16 %v433_v13, %v432_v30  ;;  %v5526_v13 = vld [vmem:[%s9986_s1 + $0x110] sm:$0xff]   ;;  %vm10013_vm4 = vcmask 785925  }
 0x14a   :  { %1681 = vst.msk [vmem:[#allocation2 + $0x300] sm:$0xff] %vm1515_vm6, %v1635_v47  ;;  %1868 = vrot.lane.b32.xlu0 %v1860_v63, %s5545_s28  ;;  %v791_v21 = vpop.permute.xlu0 %790  ;;  %v1928_v63 = vld [vmem:[%s9985_s0 + $0x18] sm:$0xff]  ;;  %5236 = vmatprep.subr.bf16.mxu1 %v5526_v13 }
 0x14b   :  { %2714 = vrot.lane.b32.xlu1 %v2638_v35, %s5546_s6  ;;  %2286 = vst.msk [vmem:[#allocation2 + $0x220] sm:$0xc0] %vm2272_vm10, %v2221_v0  ;;  %v685_v0 = vpack.c.bf16 %v651_v61, %v650_v59  ;;  %2287 = vst.msk [vmem:[#allocation2 + $0x248] sm:$0xc0] %vm2272_vm10, %v2222_v4  ;;  %v8100_v43 = vpack.c.bf16 %v1928_v63, %v1927_v17  ;;  %v943_v59 = vld [vmem:[%s9985_s0 + $0x1f0] sm:$0xff]  ;;  %v652_v63 = vld [vmem:[%s9985_s0 + $0x1e0] sm:$0xff]  ;;  %5237 = vmatpush3.bf16.msra.mxu1 %v5526_v13 }
 0x14c   :  { %868 = vst.msk [vmem:[#allocation2 + $0x2f8] sm:$0xf8] %vm848_vm0, %v791_v21  ;;  %v3604_v21 = vld [vmem:[#allocation2 + $0xd8] sm:$0xff]  ;;  %v2024_v61 = vld [vmem:[%s9985_s0 + $0x2c] sm:$0xf]  ;;  %v976_v62 = vpack.c.bf16 %v944_v60, %v943_v59 }
 0x14d   :  { %v2442_v11 = vpop.permute.xlu1 %2441  ;;  %1007 = vst.msk [vmem:[#allocation2 + $0x4b8] sm:$0xff] %vm15_vm1, %v975_v20  ;;  %v749_v33 = vrot.slane %v685_v0, 5  ;;  %v435_v17 = vld [vmem:[%s9985_s0 + $0x18e] sm:$0x3]  ;;  %v653_v20 = vld [vmem:[%s9985_s0 + $0x1e8] sm:$0x3]  ;;  %v2032_v0 = vpack.c.bf16 %v2024_v61, %v2024_v61 }
 0x14e   :  { %2533 = vst.msk [vmem:[#allocation2 + $0xb8] sm:$0xff] %vm191_vm2, %v2442_v11  ;;  %316 = vrot.lane.b32.xlu0 %v7226_v37, %s5545_s28  ;;  %v3614_v59 = vld [vmem:[#allocation2 + $0x128] sm:$0xff] }
 0x14f   :  { %2566 = vst.msk [vmem:[#allocation2 + $0xb8] sm:$0xfc] %vm2561_vm14, %v9995_v3  ;;  %1957 = vrot.lane.b32.xlu1 %v7980_v58, %s5546_s6  ;;  %v1211_v37 = vpop.permute.xlu0 %1210 }
 0x150   :  { %v3595_v31 = vld [vmem:[#allocation2 + $0x90] sm:$0xff]  ;;  %1287 = vst.msk [vmem:[#allocation2 + $0x328] sm:$0x1f] %vm1266_vm11, %v1211_v37 }
 0x151   :  { %v2699_v23 = vpop.permute.xlu1 %2698  ;;  %v3673_v39 = vld [vmem:[#allocation2 + $0x300] sm:$0xff]  ;;  %4409 = vmatprep.mubr.bf16.mxu0 %v3595_v31  ;;  %1327 = vst.msk [vmem:[#allocation2 + $0x328] sm:$0x7] %vm1312_vm12, %v9995_v3  ;;  %v3091_v31 = vld [vmem:[%s9985_s0 + $0xd0] sm:$0xff] }
 0x152   :  { %2791 = vst.msk [vmem:[#allocation2 + $0xb8] sm:$0x3] %vm2786_vm8, %v2699_v23  ;;  %4248 = vmatprep.mubr.bf16.mxu1 %v3673_v39  ;;  %510 = vrot.lane.b32.xlu0 %v454_v32, %s5546_s6  ;;  %v2333_v32 = vld [vmem:[%s9985_s0 + $0xe0] sm:$0xff]  ;;  %v1136_v23 = vpack.c.bf16 %v1103_v9, %v1102_v25 }
 0x153   :  { %2820 = vst.msk [vmem:[#allocation2 + $0xb8] sm:$0xff] %vm1515_vm6, %v9995_v3  ;;  %2046 = vrot.lane.b32.xlu1 %v2030_v24, %s5547_s19  ;;  %4410 = vmatmul.mubr.bf16.gmra.mrb[12].mxu0 %v3594_v22  ;;  %v1463_v45 = vpop.permute.xlu0 %1462  ;;  %v3672_v46 = vld [vmem:[#allocation2 + $0x2f8] sm:$0xff]  ;;  %v148_v24 = vrot.slane %v108_v14, 5  ;;  %v2383_v39 = vpack.c.bf16 %v2334_v6, %v2333_v32  ;;  %v2608_v22 = vld [vmem:[%s9985_s0 + $0xec] sm:$0xf] }
 0x154   :  { %1509 = vst.msk [vmem:[#allocation2 + $0x328] sm:$0xf8] %vm1494_vm13, %v1463_v45  ;;  %4249 = vmatmul.mubr.bf16.gmra.mrb[44].mxu1 %v3672_v46  ;;  %v2640_v46 = vpack.c.bf16 %v2608_v22, %v2608_v22 }
 0x155   :  { %v1637_v29 = vpop.permute.xlu1 %1636  ;;  %1040 = vst.msk [vmem:[#allocation2 + $0x4b8] sm:$0xe0] %vm1009_vm3, %v9995_v3 }
 0x156   :  { %1682 = vst.msk [vmem:[#allocation2 + $0x328] sm:$0xff] %vm1515_vm6, %v1637_v29  ;;  %808 = vrot.lane.b32.xlu0 %v748_v52, %s5547_s19 }
 0x157   :  { %2459 = vrot.lane.b32.xlu1 %v2382_v12, %s5545_s28  ;;  %v793_v54 = vpop.permute.xlu0 %792  ;;  %189 = vst.msk [vmem:[#allocation2 + $0x4b0] sm:$0xf8] %vm170_vm7, %v148_v24  ;;  %v3092_v12 = vld [vmem:[%s9985_s0 + $0xd8] sm:$0xff]  ;;  %v3094_v24 = vld [vmem:[%s9985_s0 + $0xe8] sm:$0xff] }
 0x158   :  { %869 = vst.msk [vmem:[#allocation2 + $0x320] sm:$0xf8] %vm848_vm0, %v793_v54  ;;  %v8153_v29 = vpack.c.bf16 %v3092_v12, %v3091_v31 }
 0x159   :  { %v2444_v51 = vpop.permute.xlu1 %2443  ;;  %1008 = vst.msk [vmem:[#allocation2 + $0x4e0] sm:$0xff] %vm15_vm1, %v976_v62  ;;  %v5100_v62 = vld [vmem:[%s9985_s0 + $0x16e] sm:$0x3] }
 0x15a   :  { %2534 = vst.msk [vmem:[#allocation2 + $0xe0] sm:$0xff] %vm191_vm2, %v2444_v51  ;;  %v3600_v55 = vld [vmem:[#allocation2 + $0xb8] sm:$0xff]  ;;  %1228 = vrot.lane.b32.xlu0 %v1135_v2, %s5545_s28  ;;  %v2159_v2 = vpack.c.bf16 %v2127_v44, %v2127_v44  ;;  %v1929_v51 = vld [vmem:[%s9985_s0 + $0x20] sm:$0xff] }
 0x15b   :  { %2567 = vst.msk [vmem:[#allocation2 + $0xe0] sm:$0xfc] %vm2561_vm14, %v9995_v3  ;;  %1870 = vrot.lane.b32.xlu1 %v1861_v15, %s5545_s28  ;;  %4417 = vmatprep.mubr.bf16.mxu0 %v3600_v55  ;;  %v8165_v15 = vpack.c.bf16 %v3090_v57, %v3089_v42  ;;  %v2609_v42 = vld [vmem:[%s9985_s0 + $0xfc] sm:$0xf] }
 0x15c   :  { %4418 = vmatmul.mubr.bf16.gmra.mrb[16].mxu0 %v3599_v53  ;;  %v1213_v5 = vpop.permute.xlu0 %1212  ;;  %v1930_v53 = vld [vmem:[%s9985_s0 + $0x28] sm:$0xff]  ;;  %2968 = vst.msk [vmem:[#allocation2 + $0x48] sm:$0xff] %vm15_vm1, %v8153_v29  ;;  %v2223_v54 = vrot.slane %v2159_v2, 2  ;;  %v436_v2 = vld [vmem:[%s9985_s0 + $0x196] sm:$0xff] }
 0x15d   :  { %v2701_v35 = vpop.permute.xlu1 %2700  ;;  %1288 = vst.msk [vmem:[#allocation2 + $0x350] sm:$0x1f] %vm1266_vm11, %v1213_v5  ;;  %v3678_v47 = vld [vmem:[#allocation2 + $0x328] sm:$0xff]  ;;  %v8185_v30 = vpack.c.bf16 %v1930_v53, %v1929_v51  ;;  %v437_v51 = vld [vmem:[%s9985_s0 + $0x19e] sm:$0x3]  ;;  %v654_v53 = vld [vmem:[%s9985_s0 + $0x1f0] sm:$0xff] }
 0x15e   :  { %2792 = vst.msk [vmem:[#allocation2 + $0xe0] sm:$0x3] %vm2786_vm8, %v2701_v35  ;;  %2716 = vrot.lane.b32.xlu0 %v2639_v18, %s5546_s6  ;;  %4256 = vmatprep.mubr.bf16.mxu1 %v3678_v47  ;;  %v3609_v18 = vld [vmem:[#allocation2 + $0x100] sm:$0xff]  ;;  %v88_v47 = vld [vmem:[%s9985_s0 + $0x190] sm:$0xff] }
 0x15f   :  { %2821 = vst.msk [vmem:[#allocation2 + $0xe0] sm:$0xff] %vm1515_vm6, %v9995_v3  ;;  %318 = vrot.lane.b32.xlu1 %v7366_v41, %s5545_s28  ;;  %v2023_v41 = vld [vmem:[%s9985_s0 + $0x1c] sm:$0xf]  ;;  %v3677_v11 = vld [vmem:[#allocation2 + $0x320] sm:$0xff] }
 0x160   :  { %1328 = vst.msk [vmem:[#allocation2 + $0x350] sm:$0x7] %vm1312_vm12, %v9995_v3  ;;  %v1465_v10 = vpop.permute.xlu0 %1464  ;;  %4257 = vmatmul.mubr.bf16.gmra.mrb[48].mxu1 %v3677_v11  ;;  %v2031_v16 = vpack.c.bf16 %v2023_v41, %v2023_v41  ;;  %v456_v41 = vpack.c.bf16 %v435_v17, %v434_v40  ;;  %v1839_v11 = vld [vmem:[%s9985_s0 + $0x30] sm:$0xf]  ;;  %v5099_v40 = vld [vmem:[%s9985_s0 + $0x166] sm:$0xff] }
 0x161   :  { %v1639_v1 = vpop.permute.xlu1 %1638  ;;  %1510 = vst.msk [vmem:[#allocation2 + $0x350] sm:$0xf8] %vm1494_vm13, %v1465_v10  ;;  %v686_v10 = vpack.c.bf16 %v653_v20, %v652_v63  ;;  %v1847_v32 = vpack.c.bf16 %v1839_v11, %v1839_v11  ;;  %v1771_v17 = vpack.c.bf16 %v5100_v62, %v5099_v40 }
 0x162   :  { %1683 = vst.msk [vmem:[#allocation2 + $0x350] sm:$0xff] %vm1515_vm6, %v1639_v1  ;;  %1959 = vrot.lane.b32.xlu0 %v8100_v43, %s5546_s6 }
 0x163   :  { %512 = vrot.lane.b32.xlu1 %v455_v50, %s5546_s6  ;;  %2967 = vst.msk [vmem:[#allocation2 + $0x20] sm:$0xff] %vm15_vm1, %v8165_v15  ;;  %v89_v50 = vld [vmem:[%s9985_s0 + $0x198] sm:$0x3]  ;;  %v750_v34 = vrot.slane %v686_v10, 5 }
 0x164   :  { %v795_v38 = vpop.permute.xlu0 %794  ;;  %2288 = vst.msk [vmem:[#allocation2 + $0x270] sm:$0xc0] %vm2272_vm10, %v2223_v54  ;;  %v109_v1 = vpack.c.bf16 %v89_v50, %v88_v47 }
 0x165   :  { %v2446_v26 = vpop.permute.xlu1 %2445  ;;  %870 = vst.msk [vmem:[#allocation2 + $0x348] sm:$0xf8] %vm848_vm0, %v795_v38 }
 0x166   :  { %2535 = vst.msk [vmem:[#allocation2 + $0x108] sm:$0xff] %vm191_vm2, %v2446_v26  ;;  %v3605_v36 = vld [vmem:[#allocation2 + $0xe0] sm:$0xff]  ;;  %2048 = vrot.lane.b32.xlu0 %v2031_v16, %s5547_s19  ;;  %v3096_v16 = vld [vmem:[%s9985_s0 + $0xf8] sm:$0xff]  ;;  %v2384_v26 = vpack.c.bf16 %v2336_v49, %v2335_v8  ;;  %v2610_v8 = vld [vmem:[%s9985_s0 + $0x10c] sm:$0xf] }
 0x167   :  { %2568 = vst.msk [vmem:[#allocation2 + $0x108] sm:$0xfc] %vm2561_vm14, %v9995_v3  ;;  %810 = vrot.lane.b32.xlu1 %v749_v33, %s5547_s19  ;;  %4425 = vmatprep.mubr.bf16.mxu0 %v3605_v36  ;;  %v149_v33 = vrot.slane %v109_v1, 5  ;;  %v5123_v49 = vld [vmem:[%s9985_s0 + $0x1c0] sm:$0xf] }
 0x168   :  { %4426 = vmatmul.mubr.bf16.gmra.mrb[20].mxu0 %v3604_v21  ;;  %v1215_v52 = vpop.permute.xlu0 %1214  ;;  %1041 = vst.msk [vmem:[#allocation2 + $0x4e0] sm:$0xe0] %vm1009_vm3, %v9995_v3  ;;  %v3093_v21 = vld [vmem:[%s9985_s0 + $0xe0] sm:$0xff]  ;;  %vm9998_vm3 = vmmov %vm9997_vm15 }
 0x169   :  { %v2703_v37 = vpop.permute.xlu1 %2702  ;;  %1289 = vst.msk [vmem:[#allocation2 + $0x378] sm:$0x1f] %vm1266_vm11, %v1215_v52  ;;  %v3683_v45 = vld [vmem:[#allocation2 + $0x350] sm:$0xff]  ;;  %v8257_v6 = vpack.c.bf16 %v3094_v24, %v3093_v21  ;;  %v2128_v52 = vld [vmem:[%s9985_s0 + $0x100] sm:$0xf]  ;;  %v2642_v24 = vpack.c.bf16 %v2610_v8, %v2610_v8 }
 0x16a   :  { %2793 = vst.msk [vmem:[#allocation2 + $0x108] sm:$0x3] %vm2786_vm8, %v2703_v37  ;;  %2461 = vrot.lane.b32.xlu0 %v2383_v39, %s5545_s28  ;;  %4264 = vmatprep.mubr.bf16.mxu1 %v3683_v45  ;;  %v1105_v39 = vld [vmem:[%s9985_s0 + $0x1fe] sm:$0x3]  ;;  %v1863_v37 = vrot.slane %v1847_v32, 2  ;;  %v2160_v44 = vpack.c.bf16 %v2128_v52, %v2128_v52 }
 0x16b   :  { %2822 = vst.msk [vmem:[#allocation2 + $0x108] sm:$0xff] %vm1515_vm6, %v9995_v3  ;;  %1230 = vrot.lane.b32.xlu1 %v1136_v23, %s5545_s28  ;;  %v1104_v23 = vld [vmem:[%s9985_s0 + $0x1f6] sm:$0xff] }
 0x16c   :  { %1329 = vst.msk [vmem:[#allocation2 + $0x378] sm:$0x7] %vm1312_vm12, %v9995_v3  ;;  %v1467_v55 = vpop.permute.xlu0 %1466  ;;  %v3682_v56 = vld [vmem:[#allocation2 + $0x348] sm:$0xff]  ;;  %v1137_v31 = vpack.c.bf16 %v1105_v39, %v1104_v23  ;;  %v5538_v45 = vld [vmem:[%s9985_s0 + $0x198] sm:$0xff] }
 0x16d   :  { %v499_v27 = vpop.permute.xlu1 %498  ;;  %1511 = vst.msk [vmem:[#allocation2 + $0x378] sm:$0xf8] %vm1494_vm13, %v1467_v55  ;;  %4265 = vmatmul.mubr.bf16.gmra.mrb[52].mxu1 %v3682_v56  ;;  %v1931_v55 = vld [vmem:[%s9985_s0 + $0x30] sm:$0xff]  ;;  %v1932_v56 = vld [vmem:[%s9985_s0 + $0x38] sm:$0xff] }
 0x16e   :  { %549 = vst.msk [vmem:[#allocation2 + $0x370] sm:$0x1f] %vm538_vm9, %v499_v27  ;;  %1872 = vrot.lane.b32.xlu0 %v1862_v48, %s5545_s28  ;;  %v2641_v48 = vpack.c.bf16 %v2609_v42, %v2609_v42  ;;  %v2224_v27 = vrot.slane %v2160_v44, 2  ;;  %v5144_v52 = vld [vmem:[%s9985_s0 + $0xdc] sm:$0xf] }
 0x16f   :  { %582 = vst.msk [vmem:[#allocation2 + $0x370] sm:$0x7] %vm9997_vm15, %v9995_v3  ;;  %2718 = vrot.lane.b32.xlu1 %v2640_v46, %s5546_s6  ;;  %v263_v46 = vpack.c.bf16 %v5538_v45, %v7758_v7  ;;  %v655_v7 = vld [vmem:[%s9985_s0 + $0x1f8] sm:$0x3]  ;;  %vm9999_vm15 = vcmask 258048   ;;  %v5530_v45 = vld [vmem:[%s9986_s1 + $0x130] sm:$0xff]  }
 0x170   :  { %v1641_v4 = vpop.permute.xlu0 %1640  ;;  %190 = vst.msk [vmem:[#allocation2 + $0x4d8] sm:$0xf8] %vm170_vm7, %v149_v33  ;;  %v687_v61 = vpack.c.bf16 %v655_v7, %v654_v53  ;;  %vm2999_vm7 = vcmask 523522   ;;  %v2338_v33 = vld [vmem:[%s9985_s0 + $0x108] sm:$0xff]  ;;  %v5531_v7 = vld [vmem:[%s9986_s1 + $0x138] sm:$0xff]  }
 0x171   :  { %v797_v35 = vpop.permute.xlu1 %796  ;;  %1684 = vst.msk [vmem:[#allocation2 + $0x378] sm:$0xff] %vm1515_vm6, %v1641_v4  ;;  %v2025_v4 = vld [vmem:[%s9985_s0 + $0x3c] sm:$0xf] }
 0x172   :  { %871 = vst.msk [vmem:[#allocation2 + $0x370] sm:$0xf8] %vm848_vm0, %v797_v35  ;;  %v3610_v5 = vld [vmem:[#allocation2 + $0x108] sm:$0xff]  ;;  %320 = vrot.lane.b32.xlu0 %v7501_v19, %s5545_s28  ;;  %v3095_v19 = vld [vmem:[%s9985_s0 + $0xf0] sm:$0xff]  ;;  %v8325_v35 = vpack.c.bf16 %v1932_v56, %v1931_v55  ;;  %v2340_v56 = vld [vmem:[%s9985_s0 + $0x118] sm:$0xff] }
 0x173   :  { %1961 = vrot.lane.b32.xlu1 %v8185_v30, %s5546_s6  ;;  %4433 = vmatprep.mubr.bf16.mxu0 %v3610_v5  ;;  %v8247_v9 = vpack.c.bf16 %v3096_v16, %v3095_v19  ;;  %2969 = vst.msk [vmem:[#allocation2 + $0x70] sm:$0xff] %vm15_vm1, %v8257_v6  ;;  %v5527_v5 = vld [vmem:[%s9986_s1 + $0x118] sm:$0xff]   ;;  %v5528_v19 = vld [vmem:[%s9986_s1 + $0x120] sm:$0xff]   ;;  %v2339_v55 = vld [vmem:[%s9985_s0 + $0x110] sm:$0xff] }
 0x174   :  { %4434 = vmatmul.mubr.bf16.gmra.mrb[24].mxu0 %v3609_v18  ;;  %v2448_v25 = vpop.permute.xlu0 %2447  ;;  %2289 = vst.msk [vmem:[#allocation2 + $0x298] sm:$0xc0] %vm2272_vm10, %v2224_v27  ;;  %v457_v18 = vpack.c.bf16 %v437_v51, %v436_v2  ;;  %5238 = vmatprep.subr.bf16.mxu1 %v5527_v5  ;;  %v5101_v27 = vld [vmem:[%s9985_s0 + $0x176] sm:$0xff]  ;;  %v2386_v40 = vpack.c.bf16 %v2340_v56, %v2339_v55 }
 0x175   :  { %v1217_v14 = vpop.permute.xlu1 %1216  ;;  %2536 = vst.msk [vmem:[#allocation2 + $0x130] sm:$0xff] %vm191_vm2, %v2448_v25  ;;  %5239 = vmatpush3.bf16.msra.mxu1 %v5527_v5  ;;  %v5146_v8 = vld [vmem:[%s9985_s0 + $0xfc] sm:$0xf] }
 0x176   :  { %1290 = vst.msk [vmem:[#allocation2 + $0x3a0] sm:$0x1f] %vm1266_vm11, %v1217_v14  ;;  %514 = vrot.lane.b32.xlu0 %v456_v41, %s5546_s6  ;;  %v2033_v41 = vpack.c.bf16 %v2025_v4, %v2025_v4  ;;  %v2337_v14 = vld [vmem:[%s9985_s0 + $0x100] sm:$0xff]  ;;  %5240 = vmatprep.subr.bf16.mxu1 %v5528_v19  ;;  %v5124_v4 = vld [vmem:[%s9985_s0 + $0x1d0] sm:$0xf] }
 0x177   :  { %1330 = vst.msk [vmem:[#allocation2 + $0x3a0] sm:$0x7] %vm1312_vm12, %v9995_v3  ;;  %2050 = vrot.lane.b32.xlu1 %v2032_v0, %s5547_s19  ;;  %v751_v0 = vrot.slane %v687_v61, 5  ;;  %v2385_v32 = vpack.c.bf16 %v2338_v33, %v2337_v14  ;;  %v2130_v33 = vld [vmem:[%s9985_s0 + $0x120] sm:$0xf] }
 0x178   :  { %2569 = vst.msk [vmem:[#allocation2 + $0x130] sm:$0xfc] %vm2561_vm14, %v9995_v3  ;;  %v2705_v22 = vpop.permute.xlu0 %2704  ;;  %v3688_v28 = vld [vmem:[#allocation2 + $0x378] sm:$0xff] }
 0x179   :  { %2970 = vst.msk [vmem:[#allocation2 + $0x98] sm:$0xff] %vm15_vm1, %v8247_v9  ;;  %v1469_v38 = vpop.permute.xlu1 %1468  ;;  %v3687_v36 = vld [vmem:[#allocation2 + $0x370] sm:$0xff]  ;;  %4272 = vmatprep.mubr.bf16.mxu1 %v3688_v28  ;;  %5241 = vmatpush3.bf16.msra.mxu1 %v5528_v19  ;;  %v2162_v19 = vpack.c.bf16 %v2130_v33, %v2130_v33 }
 0x17a   :  { %1512 = vst.msk [vmem:[#allocation2 + $0x3a0] sm:$0xf8] %vm1494_vm13, %v1469_v38  ;;  %812 = vrot.lane.b32.xlu0 %v750_v34, %s5547_s19  ;;  %4273 = vmatmul.mubr.bf16.gmra.mrb[56].mxu1 %v3687_v36  ;;  %v3619_v38 = vld [vmem:[#allocation2 + $0x150] sm:$0xff]  ;;  %v5143_v36 = vld [vmem:[%s9985_s0 + $0xcc] sm:$0xf] }
 0x17b   :  { %2794 = vst.msk [vmem:[#allocation2 + $0x130] sm:$0x3] %vm2786_vm8, %v2705_v22  ;;  %2463 = vrot.lane.b32.xlu1 %v2384_v26, %s5545_s28  ;;  %v2866_v26 = vpack.c.bf16 %v5123_v49, %v5123_v49  ;;  %v5529_v22 = vld [vmem:[%s9986_s1 + $0x128] sm:$0xff]   ;;  %v2867_v49 = vpack.c.bf16 %v5124_v4, %v5124_v4  ;;  %v2343_v33 = vld [vmem:[%s9985_s0 + $0x130] sm:$0xff] }
 0x17c   :  { %2823 = vst.msk [vmem:[#allocation2 + $0x130] sm:$0xff] %vm1515_vm6, %v9995_v3  ;;  %v501_v57 = vpop.permute.xlu0 %500  ;;  %5242 = vmatprep.subr.bf16.mxu1 %v5529_v22 }
 0x17d   :  { %v1643_v12 = vpop.permute.xlu1 %1642  ;;  %550 = vst.msk [vmem:[#allocation2 + $0x398] sm:$0x1f] %vm538_vm9, %v501_v57  ;;  %v2882_v28 = vrot.slane %v2866_v26, 2  ;;  %5243 = vmatpush3.bf16.msra.mxu1 %v5529_v22  ;;  %v2226_v26 = vrot.slane %v2162_v19, 2  ;;  %v5126_v19 = vld [vmem:[%s9985_s0 + $0x1f0] sm:$0xf] }
 0x17e   :  { %1685 = vst.msk [vmem:[#allocation2 + $0x3a0] sm:$0xff] %vm1515_vm6, %v1643_v12  ;;  %1232 = vrot.lane.b32.xlu0 %v1137_v31, %s5545_s28  ;;  %v3016_v31 = vpack.c.bf16 %v5143_v36, %v5143_v36  ;;  %5244 = vmatprep.subr.bf16.mxu1 %v5530_v45 }
 0x17f   :  { %1874 = vrot.lane.b32.xlu1 %v1863_v37, %s5545_s28  ;;  %583 = vst.msk [vmem:[#allocation2 + $0x398] sm:$0x7] %vm9998_vm3, %v9995_v3  ;;  %vm10000_vm3 = vcmask 785920   ;;  %v2129_v37 = vld [vmem:[%s9985_s0 + $0x110] sm:$0xf] }
 0x180   :  { %v799_v13 = vpop.permute.xlu0 %798  ;;  %1792 = vst.msk [vmem:[#allocation2 + $0x290] sm:$0x1f] %vm9999_vm15, %v1771_v17  ;;  %vm10001_vm15 = vcmask 1043200   ;;  %v2161_v12 = vpack.c.bf16 %v2129_v37, %v2129_v37  ;;  %v5145_v17 = vld [vmem:[%s9985_s0 + $0xec] sm:$0xf] }
 0x181   :  { %v2450_v54 = vpop.permute.xlu1 %2449  ;;  %872 = vst.msk [vmem:[#allocation2 + $0x398] sm:$0xf8] %vm848_vm0, %v799_v13  ;;  %5245 = vmatpush3.bf16.msra.mxu1 %v5530_v45  ;;  %v5125_v45 = vld [vmem:[%s9985_s0 + $0x1e0] sm:$0xf] }
 0x182   :  { %2537 = vst.msk [vmem:[#allocation2 + $0x158] sm:$0xff] %vm191_vm2, %v2450_v54  ;;  %2720 = vrot.lane.b32.xlu0 %v2641_v48, %s5546_s6  ;;  %1814 = vst.msk [vmem:[#allocation2 + $0x290] sm:$0xff] %vm191_vm2, %v9995_v3  ;;  %v2225_v44 = vrot.slane %v2161_v12, 2  ;;  %v5102_v54 = vld [vmem:[%s9985_s0 + $0x17e] sm:$0x3]  ;;  %5246 = vmatprep.subr.bf16.mxu1 %v5531_v7 }
 0x183   :  { %2570 = vst.msk [vmem:[#allocation2 + $0x158] sm:$0xfc] %vm2561_vm14, %v9995_v3  ;;  %322 = vrot.lane.b32.xlu1 %v263_v46, %s5545_s28  ;;  %v3615_v60 = vld [vmem:[#allocation2 + $0x130] sm:$0xff]  ;;  %v3017_v46 = vpack.c.bf16 %v5144_v52, %v5144_v52  ;;  %v1772_v13 = vpack.c.bf16 %v5102_v54, %v5101_v27  ;;  %v3074_v27 = vld [vmem:[%s9985_s0 + $0x48] sm:$0xff]  ;;  %v2868_v54 = vpack.c.bf16 %v5125_v45, %v5125_v45 }
 0x184   :  { %4441 = vmatprep.mubr.bf16.mxu0 %v3615_v60  ;;  %v1219_v47 = vpop.permute.xlu0 %1218  ;;  %3000 = vst.msk [vmem:[#allocation2 + $0x20] sm:$0xfc] %vm2999_vm7, %v9995_v3  ;;  %3001 = vst.msk [vmem:[#allocation2 + $0x48] sm:$0xfc] %vm2999_vm7, %v9995_v3 }
 0x185   :  { %4442 = vmatmul.mubr.bf16.gmra.mrb[28].mxu0 %v3614_v59  ;;  %v2707_v63 = vpop.permute.xlu1 %2706  ;;  %v3693_v20 = vld [vmem:[#allocation2 + $0x3a0] sm:$0xff]  ;;  %1291 = vst.msk [vmem:[#allocation2 + $0x3c8] sm:$0x1f] %vm1266_vm11, %v1219_v47  ;;  %5247 = vmatpush3.bf16.msra.mxu1 %v5531_v7  ;;  %v3624_v47 = vld [vmem:[#allocation2 + $0x178] sm:$0xff] }
 0x186   :  { %2795 = vst.msk [vmem:[#allocation2 + $0x158] sm:$0x3] %vm2786_vm8, %v2707_v63  ;;  %4280 = vmatprep.mubr.bf16.mxu1 %v3693_v20  ;;  %1963 = vrot.lane.b32.xlu0 %v8325_v35, %s5546_s6 }
 0x187   :  { %2824 = vst.msk [vmem:[#allocation2 + $0x158] sm:$0xff] %vm1515_vm6, %v9995_v3  ;;  %v8338_v50 = vpop.f32.mrb[0].mxu1  ;;  %516 = vrot.lane.b32.xlu1 %v457_v18, %s5546_s6 }
 0x188   :  { %3002 = vst.msk [vmem:[#allocation2 + $0x70] sm:$0xfc] %vm2999_vm7, %v9995_v3  ;;  %3003 = vst.msk [vmem:[#allocation2 + $0x98] sm:$0xfc] %vm2999_vm7, %v9995_v3  ;;  %v4164_v1 = vpop.f32.mrb[1].mxu1  ;;  %v1471_v16 = vpop.permute.xlu0 %1470  ;;  %v3692_v25 = vld [vmem:[#allocation2 + $0x398] sm:$0xff] }
 0x189   :  { %1331 = vst.msk [vmem:[#allocation2 + $0x3c8] sm:$0x7] %vm1312_vm12, %v9995_v3  ;;  %v8363_v10 = vpop.f32.mrb[2].mxu1  ;;  %v503_v11 = vpop.permute.xlu1 %502  ;;  %4281 = vmatmul.mubr.bf16.gmra.mrb[60].mxu1 %v3692_v25  ;;  %v3018_v1 = vpack.c.bf16 %v5145_v17, %v5145_v17 }
 0x18a   :  { %1913 = vst.msk [vmem:[#allocation2 + $0x290] sm:$0xff] %vm10000_vm3, %v9995_v3  ;;  %v4167_v21 = vpop.f32.mrb[3].mxu1  ;;  %2052 = vrot.lane.b32.xlu0 %v2033_v41, %s5547_s19  ;;  %vm10003_vm3 = vcmask 258048  }
 0x18b   :  { %2001 = vst.msk [vmem:[#allocation2 + $0x290] sm:$0xff] %vm1515_vm6, %v9995_v3  ;;  %814 = vrot.lane.b32.xlu1 %v751_v0, %s5547_s19 }
 0x18c   :  { %551 = vst.msk [vmem:[#allocation2 + $0x3c0] sm:$0x1f] %vm538_vm9, %v503_v11  ;;  %v1645_v23 = vpop.permute.xlu0 %1644 }
 0x18d   :  { %584 = vst.msk [vmem:[#allocation2 + $0x3c0] sm:$0x7] %vm10001_vm15, %v9995_v3  ;;  %v801_v34 = vpop.permute.xlu1 %800 }
 0x18e   :  { %1513 = vst.msk [vmem:[#allocation2 + $0x3c8] sm:$0xf8] %vm1494_vm13, %v1471_v16  ;;  %v3620_v39 = vld [vmem:[#allocation2 + $0x158] sm:$0xff]  ;;  %2465 = vrot.lane.b32.xlu0 %v2385_v32, %s5545_s28  ;;  %v2883_v16 = vrot.slane %v2867_v49, 2 }
 0x18f   :  { %873 = vst.msk [vmem:[#allocation2 + $0x3c0] sm:$0xf8] %vm848_vm0, %v801_v34  ;;  %2722 = vrot.lane.b32.xlu1 %v2642_v24, %s5546_s6  ;;  %4449 = vmatprep.mubr.bf16.mxu0 %v3620_v39  ;;  %v5104_v39 = vld [vmem:[%s9985_s0 + $0x18e] sm:$0x3] }
 0x190   :  { %1686 = vst.msk [vmem:[#allocation2 + $0x3c8] sm:$0xff] %vm1515_vm6, %v1645_v23  ;;  %4450 = vmatmul.mubr.bf16.gmra.mrb[32].mxu0 %v3619_v38  ;;  %v2452_v57 = vpop.permute.xlu0 %2451  ;;  %v5103_v23 = vld [vmem:[%s9985_s0 + $0x186] sm:$0xff] }
 0x191   :  { %v1221_v42 = vpop.permute.xlu1 %1220  ;;  %2538 = vst.msk [vmem:[#allocation2 + $0x180] sm:$0xff] %vm191_vm2, %v2452_v57  ;;  %v2341_v57 = vld [vmem:[%s9985_s0 + $0x120] sm:$0xff] }
 0x192   :  { %1292 = vst.msk [vmem:[#allocation2 + $0x3f0] sm:$0x1f] %vm1266_vm11, %v1221_v42  ;;  %3032 = vrot.lane.b32.xlu0 %v3016_v31, %s5545_s28  ;;  %v2612_v42 = vld [vmem:[%s9985_s0 + $0x12c] sm:$0xf] }
 0x193   :  { %1332 = vst.msk [vmem:[#allocation2 + $0x3f0] sm:$0x7] %vm1312_vm12, %v9995_v3  ;;  %2894 = vrot.lane.b32.xlu1 %v2882_v28, %s5547_s19  ;;  %vm10002_vm12 = vcmask 785925   ;;  %v8435_v18 = vpop.f32.mrb[4].mxu1  ;;  %v1773_v28 = vpack.c.bf16 %v5104_v39, %v5103_v23  ;;  %v2613_v39 = vld [vmem:[%s9985_s0 + $0x13c] sm:$0xf] }
 0x194   :  { %2571 = vst.msk [vmem:[#allocation2 + $0x180] sm:$0xfc] %vm2561_vm14, %v9995_v3  ;;  %v2709_v51 = vpop.permute.xlu0 %2708  ;;  %v4172_v61 = vpop.f32.mrb[5].mxu1 }
 0x195   :  { %2290 = vst.msk [vmem:[#allocation2 + $0x2c0] sm:$0xc0] %vm2272_vm10, %v2225_v44  ;;  %v311_v2 = vpop.permute.xlu1 %310  ;;  %v8447_v62 = vpop.f32.mrb[6].mxu1  ;;  %2291 = vst.msk [vmem:[#allocation2 + $0x2e8] sm:$0xc0] %vm2272_vm10, %v2226_v26  ;;  %v2342_v44 = vld [vmem:[%s9985_s0 + $0x128] sm:$0xff] }
 0x196   :  { %v3697_v48 = vld [vmem:[#allocation2 + $0x3c0] sm:$0xff]  ;;  %357 = vst.msk [vmem:[#allocation2 + $0x3e8] sm:$0xff] %vm191_vm2, %v311_v2  ;;  %3034 = vrot.lane.b32.xlu0 %v3017_v46, %s5545_s28  ;;  %v4175_v63 = vpop.f32.mrb[7].mxu1  ;;  %v2387_v7 = vpack.c.bf16 %v2342_v44, %v2341_v57  ;;  %v2884_v61 = vrot.slane %v2868_v54, 2  ;;  %v3634_v26 = vld [vmem:[#allocation2 + $0x1c8] sm:$0xff]  ;;  %v3080_v57 = vld [vmem:[%s9985_s0 + $0x78] sm:$0xff] }
 0x197   :  { %v3698_v53 = vld [vmem:[#allocation2 + $0x3c8] sm:$0xff]  ;;  %391 = vst.msk [vmem:[#allocation2 + $0x3e8] sm:$0xe0] %vm10002_vm12, %v9995_v3  ;;  %3193 = vrot.lane.b32.xlu1 %v7980_v58, %s5546_s6  ;;  %vm10004_vm12 = vcmask 785920   ;;  %v3629_v2 = vld [vmem:[#allocation2 + $0x1a0] sm:$0xff]  ;;  %v3075_v63 = vld [vmem:[%s9985_s0 + $0x50] sm:$0xff] }
 0x198   :  { %2796 = vst.msk [vmem:[#allocation2 + $0x180] sm:$0x3] %vm2786_vm8, %v2709_v51  ;;  %4288 = vmatprep.mubr.bf16.mxu1 %v3698_v53  ;;  %v1473_v60 = vpop.permute.xlu0 %1472  ;;  %v2644_v51 = vpack.c.bf16 %v2612_v42, %v2612_v42  ;;  %v2131_v53 = vld [vmem:[%s9985_s0 + $0x130] sm:$0xf]  ;;  %v2645_v42 = vpack.c.bf16 %v2613_v39, %v2613_v39  ;;  %v3077_v44 = vld [vmem:[%s9985_s0 + $0x60] sm:$0xff] }
 0x199   :  { %2825 = vst.msk [vmem:[#allocation2 + $0x180] sm:$0xff] %vm1515_vm6, %v9995_v3  ;;  %4289 = vmatmul.mubr.bf16.gmra.mrb[64].mxu1 %v3697_v48  ;;  %v505_v59 = vpop.permute.xlu1 %504  ;;  %v2163_v55 = vpack.c.bf16 %v2131_v53, %v2131_v53  ;;  %v5108_v53 = vld [vmem:[%s9985_s0 + $0x1ae] sm:$0x3] }
 0x19a   :  { %552 = vst.msk [vmem:[#allocation2 + $0x3e8] sm:$0x1f] %vm538_vm9, %v505_v59  ;;  %3195 = vrot.lane.b32.xlu0 %v8100_v43, %s5546_s6 }
 0x19b   :  { %1793 = vst.msk [vmem:[#allocation2 + $0x2b8] sm:$0x1f] %vm10003_vm3, %v1772_v13  ;;  %3449 = vrot.lane.b32.xlu1 %v7980_v58, %s5547_s19  ;;  %v2611_v58 = vld [vmem:[%s9985_s0 + $0x11c] sm:$0xf]  ;;  %vm10006_vm3 = vcmask 785925   ;;  %v2227_v59 = vrot.slane %v2163_v55, 2 }
 0x19c   :  { %585 = vst.msk [vmem:[#allocation2 + $0x3e8] sm:$0x7] %vm10001_vm15, %v9995_v3  ;;  %v1647_v5 = vpop.permute.xlu0 %1646  ;;  %v2643_v41 = vpack.c.bf16 %v2611_v58, %v2611_v58  ;;  %vm10007_vm15 = vcmask 258048   ;;  %v5106_v58 = vld [vmem:[%s9985_s0 + $0x19e] sm:$0x3] }
 0x19d   :  { %1514 = vst.msk [vmem:[#allocation2 + $0x3f0] sm:$0xf8] %vm1494_vm13, %v1473_v60  ;;  %v803_v20 = vpop.permute.xlu1 %802  ;;  %vm10005_vm13 = vmmov %vm10004_vm12 }
 0x19e   :  { %1815 = vst.msk [vmem:[#allocation2 + $0x2b8] sm:$0xff] %vm191_vm2, %v9995_v3  ;;  %3451 = vrot.lane.b32.xlu0 %v8100_v43, %s5547_s19  ;;  %v3019_v43 = vpack.c.bf16 %v5146_v8, %v5146_v8 }
 0x19f   :  { %1914 = vst.msk [vmem:[#allocation2 + $0x2b8] sm:$0xff] %vm10004_vm12, %v9995_v3  ;;  %2467 = vrot.lane.b32.xlu1 %v2386_v40, %s5545_s28  ;;  %vm10008_vm12 = vcmask 1043200   ;;  %v5105_v40 = vld [vmem:[%s9985_s0 + $0x196] sm:$0xff] }
 0x1a0   :  { %2002 = vst.msk [vmem:[#allocation2 + $0x2b8] sm:$0xff] %vm1515_vm6, %v9995_v3  ;;  %1687 = vst.msk [vmem:[#allocation2 + $0x3f0] sm:$0xff] %vm1515_vm6, %v1647_v5  ;;  %v3625_v0 = vld [vmem:[#allocation2 + $0x180] sm:$0xff]  ;;  %v2454_v14 = vpop.permute.xlu0 %2453 }
 0x1a1   :  { %874 = vst.msk [vmem:[#allocation2 + $0x3e8] sm:$0xf8] %vm848_vm0, %v803_v20  ;;  %4457 = vmatprep.mubr.bf16.mxu0 %v3625_v0  ;;  %v1223_v11 = vpop.permute.xlu1 %1222  ;;  %v3076_v20 = vld [vmem:[%s9985_s0 + $0x58] sm:$0xff]  ;;  %v2362_v0 = vld [vmem:[%s9985_s0 + $0x1c8] sm:$0xff] }
 0x1a2   :  { %4458 = vmatmul.mubr.bf16.gmra.mrb[36].mxu0 %v3624_v47  ;;  %1293 = vst.msk [vmem:[#allocation2 + $0x418] sm:$0x1f] %vm1266_vm11, %v1223_v11  ;;  %2724 = vrot.lane.b32.xlu0 %v2643_v41, %s5546_s6  ;;  %v2361_v47 = vld [vmem:[%s9985_s0 + $0x1c0] sm:$0xff] }
 0x1a3   :  { %1306 = vst.msk [vmem:[#allocation2 + $0x418] sm:$0xff] %vm10005_vm13, %v9995_v3  ;;  %3036 = vrot.lane.b32.xlu1 %v3018_v1, %s5545_s28  ;;  %v1774_v1 = vpack.c.bf16 %v5106_v58, %v5105_v40  ;;  %v8581_v49 = vpack.c.bf16 %v2362_v0, %v2361_v47  ;;  %v2363_v40 = vld [vmem:[%s9985_s0 + $0x1d0] sm:$0xff]  ;;  %v2346_v47 = vld [vmem:[%s9985_s0 + $0x148] sm:$0xff] }
 0x1a4   :  { %2539 = vst.msk [vmem:[#allocation2 + $0x1a8] sm:$0xff] %vm191_vm2, %v2454_v14  ;;  %v2711_v32 = vpop.permute.xlu0 %2710  ;;  %v3134_v14 = vpack.c.bf16 %v3076_v20, %v3075_v63  ;;  %v2614_v20 = vld [vmem:[%s9985_s0 + $0x14c] sm:$0xf] }
 0x1a5   :  { %1522 = vst.msk [vmem:[#allocation2 + $0x418] sm:$0xff] %vm1515_vm6, %v9995_v3  ;;  %v313_v21 = vpop.permute.xlu1 %312  ;;  %v8483_v25 = vpop.f32.mrb[8].mxu1 }
 0x1a6   :  { %2572 = vst.msk [vmem:[#allocation2 + $0x1a8] sm:$0xfc] %vm2561_vm14, %v9995_v3  ;;  %v4180_v34 = vpop.f32.mrb[9].mxu1  ;;  %2896 = vrot.lane.b32.xlu0 %v2883_v16, %s5547_s19 }
 0x1a7   :  { %358 = vst.msk [vmem:[#allocation2 + $0x410] sm:$0xff] %vm191_vm2, %v313_v21  ;;  %v3703_v38 = vld [vmem:[#allocation2 + $0x3f0] sm:$0xff]  ;;  %3038 = vrot.lane.b32.xlu1 %v3019_v43, %s5545_s28  ;;  %v8490_v36 = vpop.f32.mrb[10].mxu1  ;;  %v2344_v43 = vld [vmem:[%s9985_s0 + $0x138] sm:$0xff] }
 0x1a8   :  { %v3702_v24 = vld [vmem:[#allocation2 + $0x3e8] sm:$0xff]  ;;  %392 = vst.msk [vmem:[#allocation2 + $0x410] sm:$0xe0] %vm10006_vm3, %v9995_v3  ;;  %4296 = vmatprep.mubr.bf16.mxu1 %v3703_v38  ;;  %v4183_v22 = vpop.f32.mrb[11].mxu1  ;;  %v507_v31 = vpop.permute.xlu0 %506  ;;  %vm10009_vm3 = vmmov %vm10005_vm13  ;;  %v8612_v34 = vpack.c.bf16 %v2344_v43, %v2343_v33  ;;  %v2869_v38 = vpack.c.bf16 %v5126_v19, %v5126_v19  ;;  %v3084_v43 = vld [vmem:[%s9985_s0 + $0x98] sm:$0xff] }
 0x1a9   :  { %2797 = vst.msk [vmem:[#allocation2 + $0x1a8] sm:$0x3] %vm2786_vm8, %v2711_v32  ;;  %4297 = vmatmul.mubr.bf16.gmra.mrb[68].mxu1 %v3702_v24  ;;  %v805_v37 = vpop.permute.xlu1 %804  ;;  %v3081_v19 = vld [vmem:[%s9985_s0 + $0x80] sm:$0xff] }
 0x1aa   :  { %2826 = vst.msk [vmem:[#allocation2 + $0x1a8] sm:$0xff] %vm1515_vm6, %v9995_v3  ;;  %3197 = vrot.lane.b32.xlu0 %v8185_v30, %s5546_s6 }
 0x1ab   :  { %1794 = vst.msk [vmem:[#allocation2 + $0x2e0] sm:$0x1f] %vm10007_vm15, %v1773_v28  ;;  %3199 = vrot.lane.b32.xlu1 %v8325_v35, %s5546_s6  ;;  %vm10010_vm15 = vcmask 785925   ;;  %v2132_v28 = vld [vmem:[%s9985_s0 + $0x140] sm:$0xf] }
 0x1ac   :  { %553 = vst.msk [vmem:[#allocation2 + $0x410] sm:$0x1f] %vm538_vm9, %v507_v31  ;;  %v3708_v12 = vld [vmem:[#allocation2 + $0x418] sm:$0xff]  ;;  %v2456_v46 = vpop.permute.xlu0 %2455  ;;  %v2885_v31 = vrot.slane %v2869_v38, 2 }
 0x1ad   :  { %1816 = vst.msk [vmem:[#allocation2 + $0x2e0] sm:$0xff] %vm191_vm2, %v9995_v3  ;;  %4304 = vmatprep.mubr.bf16.mxu1 %v3708_v12  ;;  %v1225_v52 = vpop.permute.xlu1 %1224  ;;  %2540 = vst.msk [vmem:[#allocation2 + $0x1d0] sm:$0xff] %vm191_vm2, %v2456_v46  ;;  %v2164_v12 = vpack.c.bf16 %v2132_v28, %v2132_v28  ;;  %v5110_v38 = vld [vmem:[%s9985_s0 + $0x1be] sm:$0x3] }
 0x1ae   :  { %586 = vst.msk [vmem:[#allocation2 + $0x410] sm:$0x7] %vm10008_vm12, %v9995_v3  ;;  %3453 = vrot.lane.b32.xlu0 %v8185_v30, %s5547_s19 }
 0x1af   :  { %875 = vst.msk [vmem:[#allocation2 + $0x410] sm:$0xf8] %vm848_vm0, %v805_v37  ;;  %3455 = vrot.lane.b32.xlu1 %v8325_v35, %s5547_s19  ;;  %v3073_v35 = vld [vmem:[%s9985_s0 + $0x40] sm:$0xff] }
 0x1b0   :  { %1915 = vst.msk [vmem:[#allocation2 + $0x2e0] sm:$0xff] %vm10005_vm13, %v9995_v3  ;;  %v2713_v13 = vpop.permute.xlu0 %2712  ;;  %v3133_v60 = vpack.c.bf16 %v3074_v27, %v3073_v35  ;;  %vm10011_vm13 = vcmask 258048  }
 0x1b1   :  { %2003 = vst.msk [vmem:[#allocation2 + $0x2e0] sm:$0xff] %vm1515_vm6, %v9995_v3  ;;  %v3630_v48 = vld [vmem:[#allocation2 + $0x1a8] sm:$0xff]  ;;  %v315_v56 = vpop.permute.xlu1 %314 }
 0x1b2   :  { %1294 = vst.msk [vmem:[#allocation2 + $0x440] sm:$0x1f] %vm1266_vm11, %v1225_v52  ;;  %4465 = vmatprep.mubr.bf16.mxu0 %v3630_v48  ;;  %2469 = vrot.lane.b32.xlu0 %v2387_v7, %s5545_s28  ;;  %v8571_v5 = vpop.f32.mrb[12].mxu1  ;;  %v3079_v52 = vld [vmem:[%s9985_s0 + $0x70] sm:$0xff]  ;;  %v2228_v48 = vrot.slane %v2164_v12, 2 }
 0x1b3   :  { %1307 = vst.msk [vmem:[#allocation2 + $0x440] sm:$0xff] %vm10009_vm3, %v9995_v3  ;;  %4466 = vmatmul.mubr.bf16.gmra.mrb[40].mxu0 %v3629_v2  ;;  %2726 = vrot.lane.b32.xlu1 %v2644_v51, %s5546_s6  ;;  %v4188_v41 = vpop.f32.mrb[13].mxu1  ;;  %v3078_v2 = vld [vmem:[%s9985_s0 + $0x68] sm:$0xff]  ;;  %v3136_v55 = vpack.c.bf16 %v3080_v57, %v3079_v52 }
 0x1b4   :  { %1523 = vst.msk [vmem:[#allocation2 + $0x440] sm:$0xff] %vm1515_vm6, %v9995_v3  ;;  %v509_v4 = vpop.permute.xlu0 %508  ;;  %v8587_v11 = vpop.f32.mrb[14].mxu1  ;;  %v5107_v51 = vld [vmem:[%s9985_s0 + $0x1a6] sm:$0xff]  ;;  %v2646_v41 = vpack.c.bf16 %v2614_v20, %v2614_v20  ;;  %v5112_v20 = vld [vmem:[%s9985_s0 + $0x1ce] sm:$0x3] }
 0x1b5   :  { %2573 = vst.msk [vmem:[#allocation2 + $0x1d0] sm:$0xfc] %vm2561_vm14, %v9995_v3  ;;  %v807_v17 = vpop.permute.xlu1 %806  ;;  %v4191_v16 = vpop.f32.mrb[15].mxu1  ;;  %v1775_v27 = vpack.c.bf16 %v5108_v53, %v5107_v51  ;;  %v2348_v51 = vld [vmem:[%s9985_s0 + $0x158] sm:$0xff] }
 0x1b6   :  { %359 = vst.msk [vmem:[#allocation2 + $0x438] sm:$0xff] %vm191_vm2, %v315_v56  ;;  %v3707_v30 = vld [vmem:[#allocation2 + $0x410] sm:$0xff]  ;;  %2898 = vrot.lane.b32.xlu0 %v2884_v61, %s5547_s19  ;;  %v3082_v16 = vld [vmem:[%s9985_s0 + $0x88] sm:$0xff] }
 0x1b7   :  { %393 = vst.msk [vmem:[#allocation2 + $0x438] sm:$0xe0] %vm10010_vm15, %v9995_v3  ;;  %4305 = vmatmul.mubr.bf16.gmra.mrb[72].mxu1 %v3707_v30  ;;  %3201 = vrot.lane.b32.xlu1 %v3133_v60, %s5546_s6  ;;  %vm10012_vm15 = vmmov %vm10009_vm3  ;;  %v3137_v28 = vpack.c.bf16 %v3082_v16, %v3081_v19  ;;  %v2616_v16 = vld [vmem:[%s9985_s0 + $0x16c] sm:$0xf] }
 0x1b8   :  { %2798 = vst.msk [vmem:[#allocation2 + $0x1d0] sm:$0x3] %vm2786_vm8, %v2713_v13  ;;  %v2458_v24 = vpop.permute.xlu0 %2457 }
 0x1b9   :  { %2827 = vst.msk [vmem:[#allocation2 + $0x1d0] sm:$0xff] %vm1515_vm6, %v9995_v3  ;;  %v1227_v21 = vpop.permute.xlu1 %1226 }
 0x1ba   :  { %2292 = vst.msk [vmem:[#allocation2 + $0x310] sm:$0xc0] %vm2272_vm10, %v2227_v59  ;;  %3203 = vrot.lane.b32.xlu0 %v3134_v14, %s5546_s6  ;;  %2293 = vst.msk [vmem:[#allocation2 + $0x338] sm:$0xc0] %vm2272_vm10, %v2228_v48  ;;  %v3135_v59 = vpack.c.bf16 %v3078_v2, %v3077_v44  ;;  %v2615_v44 = vld [vmem:[%s9985_s0 + $0x15c] sm:$0xf] }
 0x1bb   :  { %554 = vst.msk [vmem:[#allocation2 + $0x438] sm:$0x1f] %vm538_vm9, %v509_v4  ;;  %v3713_v8 = vld [vmem:[#allocation2 + $0x440] sm:$0xff]  ;;  %3457 = vrot.lane.b32.xlu1 %v3133_v60, %s5547_s19  ;;  %v2347_v48 = vld [vmem:[%s9985_s0 + $0x150] sm:$0xff] }
 0x1bc   :  { %587 = vst.msk [vmem:[#allocation2 + $0x438] sm:$0x7] %vm10008_vm12, %v9995_v3  ;;  %4312 = vmatprep.mubr.bf16.mxu1 %v3713_v8  ;;  %vm1892_vm12 = vcmask 523526   ;;  %v1869_v22 = vpop.permute.xlu0 %1868  ;;  %v2345_v4 = vld [vmem:[%s9985_s0 + $0x140] sm:$0xff]  ;;  %v3083_v8 = vld [vmem:[%s9985_s0 + $0x90] sm:$0xff] }
 0x1bd   :  { %876 = vst.msk [vmem:[#allocation2 + $0x438] sm:$0xf8] %vm848_vm0, %v807_v17  ;;  %v2715_v23 = vpop.permute.xlu1 %2714  ;;  %v2364_v17 = vld [vmem:[%s9985_s0 + $0x1d8] sm:$0xff]  ;;  %v8711_v33 = vpack.c.bf16 %v2346_v47, %v2345_v4  ;;  %v2365_v4 = vld [vmem:[%s9985_s0 + $0x1e0] sm:$0xff]  ;;  %v2366_v47 = vld [vmem:[%s9985_s0 + $0x1e8] sm:$0xff] }
 0x1be   :  { %1795 = vst.msk [vmem:[#allocation2 + $0x308] sm:$0x1f] %vm10011_vm13, %v1774_v1  ;;  %3459 = vrot.lane.b32.xlu0 %v3134_v14, %s5547_s19  ;;  %vm2013_vm13 = vcmask 1048322   ;;  %v8679_v63 = vpack.c.bf16 %v2364_v17, %v2363_v40  ;;  %v2133_v1 = vld [vmem:[%s9985_s0 + $0x150] sm:$0xf]  ;;  %v5111_v17 = vld [vmem:[%s9985_s0 + $0x1c6] sm:$0xff] }
 0x1bf   :  { %1817 = vst.msk [vmem:[#allocation2 + $0x308] sm:$0xff] %vm191_vm2, %v9995_v3  ;;  %2541 = vst.msk [vmem:[#allocation2 + $0x1f8] sm:$0xff] %vm191_vm2, %v2458_v24  ;;  %2471 = vrot.lane.b32.xlu1 %v8612_v34, %s5545_s28  ;;  %v2165_v14 = vpack.c.bf16 %v2133_v1, %v2133_v1 }
 0x1c0   :  { %2971 = vst.msk [vmem:[#allocation2 + $0x2a0] sm:$0xff] %vm15_vm1, %v8581_v49  ;;  %v3635_v32 = vld [vmem:[#allocation2 + $0x1d0] sm:$0xff]  ;;  %v317_v7 = vpop.permute.xlu0 %316  ;;  %2972 = vst.msk [vmem:[#allocation2 + $0x2c8] sm:$0xff] %vm15_vm1, %v8679_v63 }
 0x1c1   :  { %1295 = vst.msk [vmem:[#allocation2 + $0x468] sm:$0x1f] %vm1266_vm11, %v1227_v21  ;;  %4473 = vmatprep.mubr.bf16.mxu0 %v3635_v32  ;;  %v1958_v45 = vpop.permute.xlu1 %1957  ;;  %v8643_v46 = vpop.f32.mrb[16].mxu1  ;;  %v5109_v32 = vld [vmem:[%s9985_s0 + $0x1b6] sm:$0xff] }
 0x1c2   :  { %1916 = vst.msk [vmem:[#allocation2 + $0x308] sm:$0xff] %vm10009_vm3, %v9995_v3  ;;  %4474 = vmatmul.mubr.bf16.gmra.mrb[44].mxu0 %v3634_v26  ;;  %v4196_v35 = vpop.f32.mrb[17].mxu1  ;;  %2728 = vrot.lane.b32.xlu0 %v2645_v42, %s5546_s6  ;;  %v2229_v26 = vrot.slane %v2165_v14, 2  ;;  %v1776_v39 = vpack.c.bf16 %v5110_v38, %v5109_v32 }
 0x1c3   :  { %3004 = vst.msk [vmem:[#allocation2 + $0x2a0] sm:$0xfc] %vm2999_vm7, %v9995_v3  ;;  %2900 = vrot.lane.b32.xlu1 %v2885_v31, %s5547_s19  ;;  %v8659_v54 = vpop.f32.mrb[18].mxu1  ;;  %3005 = vst.msk [vmem:[#allocation2 + $0x2c8] sm:$0xfc] %vm2999_vm7, %v9995_v3  ;;  %v2647_v35 = vpack.c.bf16 %v2615_v44, %v2615_v44 }
 0x1c4   :  { %1308 = vst.msk [vmem:[#allocation2 + $0x468] sm:$0xff] %vm10012_vm15, %v9995_v3  ;;  %v3712_v37 = vld [vmem:[#allocation2 + $0x438] sm:$0xff]  ;;  %vm2070_vm15 = vcmask 1042176   ;;  %v4199_v13 = vpop.f32.mrb[19].mxu1  ;;  %v511_v60 = vpop.permute.xlu0 %510 }
 0x1c5   :  { %2004 = vst.msk [vmem:[#allocation2 + $0x308] sm:$0xff] %vm1515_vm6, %v9995_v3  ;;  %1524 = vst.msk [vmem:[#allocation2 + $0x468] sm:$0xff] %vm1515_vm6, %v9995_v3  ;;  %4313 = vmatmul.mubr.bf16.gmra.mrb[76].mxu1 %v3712_v37  ;;  %v2047_v30 = vpop.permute.xlu1 %2046  ;;  %v3088_v13 = vld [vmem:[%s9985_s0 + $0xb8] sm:$0xff] }
 0x1c6   :  { %2574 = vst.msk [vmem:[#allocation2 + $0x1f8] sm:$0xfc] %vm2561_vm14, %v9995_v3  ;;  %3205 = vrot.lane.b32.xlu0 %v3135_v59, %s5546_s6 }
 0x1c7   :  { %2799 = vst.msk [vmem:[#allocation2 + $0x1f8] sm:$0x3] %vm2786_vm8, %v2715_v23  ;;  %3207 = vrot.lane.b32.xlu1 %v3136_v55, %s5546_s6 }
 0x1c8   :  { %2828 = vst.msk [vmem:[#allocation2 + $0x1f8] sm:$0xff] %vm1515_vm6, %v9995_v3  ;;  %v809_v0 = vpop.permute.xlu0 %808 }
 0x1c9   :  { %1893 = vst.msk [vmem:[#allocation2 + $0x1f0] sm:$0xc0] %vm1892_vm12, %v1869_v22  ;;  %v2460_v58 = vpop.permute.xlu1 %2459  ;;  %v3138_v22 = vpack.c.bf16 %v3084_v43, %v3083_v8  ;;  %v8807_v8 = vpack.c.bf16 %v2366_v47, %v2365_v4 }
 0x1ca   :  { %1981 = vst.msk [vmem:[#allocation2 + $0x1f0] sm:$0xff] %vm10009_vm3, %v1958_v45  ;;  %vm10014_vm3 = vcmask 258048   ;;  %3461 = vrot.lane.b32.xlu0 %v3135_v59, %s5547_s19  ;;  %v3085_v59 = vld [vmem:[%s9985_s0 + $0xa0] sm:$0xff] }
 0x1cb   :  { %2014 = vst.msk [vmem:[#allocation2 + $0x1f0] sm:$0xfc] %vm2013_vm13, %v9995_v3  ;;  %3463 = vrot.lane.b32.xlu1 %v3136_v55, %s5547_s19 }
 0x1cc   :  { %360 = vst.msk [vmem:[#allocation2 + $0x460] sm:$0xff] %vm191_vm2, %v317_v7  ;;  %v3718_v56 = vld [vmem:[#allocation2 + $0x468] sm:$0xff]  ;;  %2542 = vst.msk [vmem:[#allocation2 + $0x220] sm:$0xff] %vm191_vm2, %v2460_v58  ;;  %v1229_v23 = vpop.permute.xlu0 %1228  ;;  %v2134_v7 = vld [vmem:[%s9985_s0 + $0x160] sm:$0xf] }
 0x1cd   :  { %394 = vst.msk [vmem:[#allocation2 + $0x460] sm:$0xe0] %vm10013_vm4, %v9995_v3  ;;  %4320 = vmatprep.mubr.bf16.mxu1 %v3718_v56  ;;  %vm10015_vm4 = vcmask 785920   ;;  %v1871_v21 = vpop.permute.xlu1 %1870  ;;  %v2166_v55 = vpack.c.bf16 %v2134_v7, %v2134_v7  ;;  %v8780_v56 = vpack.c.bf16 %v2348_v51, %v2347_v48  ;;  %v5113_v48 = vld [vmem:[%s9985_s0 + $0x1d6] sm:$0xff]  ;;  %v5114_v51 = vld [vmem:[%s9985_s0 + $0x1de] sm:$0x3] }
 0x1ce   :  { %1796 = vst.msk [vmem:[#allocation2 + $0x330] sm:$0x1f] %vm10014_vm3, %v1775_v27  ;;  %vm10016_vm3 = vcmask 1043200   ;;  %2473 = vrot.lane.b32.xlu0 %v8711_v33, %s5545_s28  ;;  %v8742_v12 = vpop.f32.mrb[20].mxu1  ;;  %v3087_v27 = vld [vmem:[%s9985_s0 + $0xb0] sm:$0xff]  ;;  %v1778_v7 = vpack.c.bf16 %v5114_v51, %v5113_v48 }
 0x1cf   :  { %1818 = vst.msk [vmem:[#allocation2 + $0x330] sm:$0xff] %vm191_vm2, %v9995_v3  ;;  %v3640_v61 = vld [vmem:[#allocation2 + $0x1f8] sm:$0xff]  ;;  %2730 = vrot.lane.b32.xlu1 %v2646_v41, %s5546_s6  ;;  %v4204_v52 = vpop.f32.mrb[21].mxu1  ;;  %v2230_v40 = vrot.slane %v2166_v55, 2  ;;  %v3140_v1 = vpack.c.bf16 %v3088_v13, %v3087_v27 }
 0x1d0   :  { %2071 = vst.msk [vmem:[#allocation2 + $0x1f0] sm:$0x3] %vm2070_vm15, %v2047_v30  ;;  %4481 = vmatprep.mubr.bf16.mxu0 %v3640_v61  ;;  %v2717_v31 = vpop.permute.xlu0 %2716  ;;  %v8755_v57 = vpop.f32.mrb[22].mxu1  ;;  %v3086_v61 = vld [vmem:[%s9985_s0 + $0xa8] sm:$0xff] }
 0x1d1   :  { %1917 = vst.msk [vmem:[#allocation2 + $0x330] sm:$0xff] %vm10015_vm4, %v9995_v3  ;;  %v319_v37 = vpop.permute.xlu1 %318  ;;  %v4207_v45 = vpop.f32.mrb[23].mxu1  ;;  %v3139_v14 = vpack.c.bf16 %v3086_v61, %v3085_v59  ;;  %v2367_v59 = vld [vmem:[%s9985_s0 + $0x1f0] sm:$0xff] }
 0x1d2   :  { %555 = vst.msk [vmem:[#allocation2 + $0x460] sm:$0x1f] %vm538_vm9, %v511_v60  ;;  %3209 = vrot.lane.b32.xlu0 %v3137_v28, %s5546_s6 }
 0x1d3   :  { %2005 = vst.msk [vmem:[#allocation2 + $0x330] sm:$0xff] %vm1515_vm6, %v9995_v3  ;;  %3211 = vrot.lane.b32.xlu1 %v3138_v22, %s5546_s6 }
 0x1d4   :  { %588 = vst.msk [vmem:[#allocation2 + $0x460] sm:$0x7] %vm10016_vm3, %v9995_v3  ;;  %vm10017_vm3 = vcmask 258048   ;;  %v1960_v53 = vpop.permute.xlu0 %1959 }
 0x1d5   :  { %2575 = vst.msk [vmem:[#allocation2 + $0x220] sm:$0xfc] %vm2561_vm14, %v9995_v3  ;;  %v513_v2 = vpop.permute.xlu1 %512 }
 0x1d6   :  { %877 = vst.msk [vmem:[#allocation2 + $0x460] sm:$0xf8] %vm848_vm0, %v809_v0  ;;  %3465 = vrot.lane.b32.xlu0 %v3137_v28, %s5547_s19  ;;  %v1777_v0 = vpack.c.bf16 %v5112_v20, %v5111_v17  ;;  %v2648_v28 = vpack.c.bf16 %v2616_v16, %v2616_v16  ;;  %v8901_v17 = vld [vmem:[%s9985_s0 + $0x178] sm:$0xff] }
 0x1d7   :  { %v3639_v24 = vld [vmem:[#allocation2 + $0x1f0] sm:$0xff]  ;;  %1894 = vst.msk [vmem:[#allocation2 + $0x218] sm:$0xc0] %vm1892_vm12, %v1871_v21  ;;  %3467 = vrot.lane.b32.xlu1 %v3138_v22, %s5547_s19 }
 0x1d8   :  { %4482 = vmatmul.mubr.bf16.gmra.mrb[48].mxu0 %v3639_v24  ;;  %1296 = vst.msk [vmem:[#allocation2 + $0x490] sm:$0x1f] %vm1266_vm11, %v1229_v23  ;;  %v2049_v58 = vpop.permute.xlu0 %2048 }
 0x1d9   :  { %2294 = vst.msk [vmem:[#allocation2 + $0x360] sm:$0xc0] %vm2272_vm10, %v2229_v26  ;;  %v811_v60 = vpop.permute.xlu1 %810  ;;  %2295 = vst.msk [vmem:[#allocation2 + $0x388] sm:$0xc0] %vm2272_vm10, %v2230_v40  ;;  %v8838_v26 = vld [vmem:[%s9985_s0 + $0x168] sm:$0xff] }
 0x1da   :  { %1309 = vst.msk [vmem:[#allocation2 + $0x490] sm:$0xff] %vm10015_vm4, %v9995_v3  ;;  %2475 = vrot.lane.b32.xlu0 %v8780_v56, %s5545_s28 }
 0x1db   :  { %1797 = vst.msk [vmem:[#allocation2 + $0x358] sm:$0x1f] %vm10017_vm3, %v1776_v39  ;;  %vm10020_vm3 = vmmov %vm10015_vm4  ;;  %2732 = vrot.lane.b32.xlu1 %v2647_v35, %s5546_s6  ;;  %v2135_v39 = vld [vmem:[%s9985_s0 + $0x170] sm:$0xf] }
 0x1dc   :  { %1525 = vst.msk [vmem:[#allocation2 + $0x490] sm:$0xff] %vm1515_vm6, %v9995_v3  ;;  %v2462_v19 = vpop.permute.xlu0 %2461 }
 0x1dd   :  { %1819 = vst.msk [vmem:[#allocation2 + $0x358] sm:$0xff] %vm191_vm2, %v9995_v3  ;;  %361 = vst.msk [vmem:[#allocation2 + $0x488] sm:$0xff] %vm191_vm2, %v319_v37  ;;  %v3717_v42 = vld [vmem:[#allocation2 + $0x460] sm:$0xff]  ;;  %v1231_v43 = vpop.permute.xlu1 %1230  ;;  %v2167_v37 = vpack.c.bf16 %v2135_v39, %v2135_v39 }
 0x1de   :  { %1918 = vst.msk [vmem:[#allocation2 + $0x358] sm:$0xff] %vm10015_vm4, %v9995_v3  ;;  %4321 = vmatmul.mubr.bf16.gmra.mrb[80].mxu1 %v3717_v42  ;;  %vm10021_vm4 = vcmask 258048   ;;  %3213 = vrot.lane.b32.xlu0 %v3139_v14, %s5546_s6  ;;  %v8841_v38 = vpop.f32.mrb[24].mxu1  ;;  %v5539_v42 = vld [vmem:[%s9985_s0 + $0x160] sm:$0xff] }
 0x1df   :  { %395 = vst.msk [vmem:[#allocation2 + $0x488] sm:$0xe0] %vm10018_vm5, %v9995_v3  ;;  %vm10019_vm5 = vcmask 1043200   ;;  %3215 = vrot.lane.b32.xlu1 %v3140_v1, %s5546_s6  ;;  %v4212_v22 = vpop.f32.mrb[25].mxu1  ;;  %v2391_v52 = vpack.c.bf16 %v8838_v26, %v5539_v42 }
 0x1e0   :  { %2800 = vst.msk [vmem:[#allocation2 + $0x220] sm:$0x3] %vm2786_vm8, %v2717_v31  ;;  %v1873_v32 = vpop.permute.xlu0 %1872  ;;  %v8851_v31 = vpop.f32.mrb[26].mxu1 }
 0x1e1   :  { %2006 = vst.msk [vmem:[#allocation2 + $0x358] sm:$0xff] %vm1515_vm6, %v9995_v3  ;;  %2829 = vst.msk [vmem:[#allocation2 + $0x220] sm:$0xff] %vm1515_vm6, %v9995_v3  ;;  %v2719_v21 = vpop.permute.xlu1 %2718  ;;  %v4215_v44 = vpop.f32.mrb[27].mxu1 }
 0x1e2   :  { %556 = vst.msk [vmem:[#allocation2 + $0x488] sm:$0x1f] %vm538_vm9, %v513_v2  ;;  %3469 = vrot.lane.b32.xlu0 %v3139_v14, %s5547_s19  ;;  %v2231_v2 = vrot.slane %v2167_v37, 2  ;;  %v2618_v37 = vld [vmem:[%s9985_s0 + $0x18c] sm:$0xf] }
 0x1e3   :  { %589 = vst.msk [vmem:[#allocation2 + $0x488] sm:$0x7] %vm10019_vm5, %v9995_v3  ;;  %v3723_v30 = vld [vmem:[#allocation2 + $0x490] sm:$0xff]  ;;  %vm10022_vm5 = vmmov %vm10020_vm3  ;;  %3471 = vrot.lane.b32.xlu1 %v3140_v1, %s5547_s19  ;;  %v2650_v48 = vpack.c.bf16 %v2618_v37, %v2618_v37 }
 0x1e4   :  { %1982 = vst.msk [vmem:[#allocation2 + $0x218] sm:$0xff] %vm10020_vm3, %v1960_v53  ;;  %4328 = vmatprep.mubr.bf16.mxu1 %v3723_v30  ;;  %v321_v53 = vpop.permute.xlu0 %320  ;;  %v2368_v30 = vld [vmem:[%s9985_s0 + $0x1f8] sm:$0xff] }
 0x1e5   :  { %2015 = vst.msk [vmem:[#allocation2 + $0x218] sm:$0xfc] %vm2013_vm13, %v9995_v3  ;;  %v1962_v45 = vpop.permute.xlu1 %1961  ;;  %v8896_v61 = vpack.c.bf16 %v2368_v30, %v2367_v59  ;;  %v2137_v59 = vld [vmem:[%s9985_s0 + $0x190] sm:$0xf] }
 0x1e6   :  { %878 = vst.msk [vmem:[#allocation2 + $0x488] sm:$0xf8] %vm848_vm0, %v811_v60  ;;  %2477 = vrot.lane.b32.xlu0 %v2391_v52, %s5545_s28  ;;  %v2617_v60 = vld [vmem:[%s9985_s0 + $0x17c] sm:$0xf]  ;;  %v8964_v52 = vld [vmem:[%s9985_s0 + $0x188] sm:$0xff] }
 0x1e7   :  { %2072 = vst.msk [vmem:[#allocation2 + $0x218] sm:$0x3] %vm2070_vm15, %v2049_v58  ;;  %2734 = vrot.lane.b32.xlu1 %v2648_v28, %s5546_s6  ;;  %v2136_v58 = vld [vmem:[%s9985_s0 + $0x180] sm:$0xf]  ;;  %v2649_v4 = vpack.c.bf16 %v2617_v60, %v2617_v60 }
 0x1e8   :  { %v3645_v41 = vld [vmem:[#allocation2 + $0x220] sm:$0xff]  ;;  %1798 = vst.msk [vmem:[#allocation2 + $0x380] sm:$0x1f] %vm10021_vm4, %v1777_v0  ;;  %vm10023_vm4 = vmmov %vm10020_vm3  ;;  %v515_v55 = vpop.permute.xlu0 %514  ;;  %v2168_v47 = vpack.c.bf16 %v2136_v58, %v2136_v58  ;;  %v5540_v0 = vld [vmem:[%s9985_s0 + $0x170] sm:$0xff] }
 0x1e9   :  { %4489 = vmatprep.mubr.bf16.mxu0 %v3645_v41  ;;  %1820 = vst.msk [vmem:[#allocation2 + $0x380] sm:$0xff] %vm191_vm2, %v9995_v3  ;;  %2543 = vst.msk [vmem:[#allocation2 + $0x248] sm:$0xff] %vm191_vm2, %v2462_v19  ;;  %v2051_v27 = vpop.permute.xlu1 %2050  ;;  %v2392_v1 = vpack.c.bf16 %v8901_v17, %v5540_v0  ;;  %v5116_v19 = vld [vmem:[%s9985_s0 + $0x1ee] sm:$0x3]  ;;  %v3100_v0 = vld [vmem:[%s9985_s0 + $0x118] sm:$0xff] }
 0x1ea   :  { %2973 = vst.msk [vmem:[#allocation2 + $0x2f0] sm:$0xff] %vm15_vm1, %v8807_v8  ;;  %3217 = vrot.lane.b32.xlu0 %v8165_v15, %s5546_s6  ;;  %2974 = vst.msk [vmem:[#allocation2 + $0x318] sm:$0xff] %vm15_vm1, %v8896_v61 }
 0x1eb   :  { %1297 = vst.msk [vmem:[#allocation2 + $0x4b8] sm:$0x1f] %vm1266_vm11, %v1231_v43  ;;  %3219 = vrot.lane.b32.xlu1 %v8153_v29, %s5546_s6  ;;  %v2232_v43 = vrot.slane %v2168_v47, 2  ;;  %vm10027_vm1 = vmmov %vm10023_vm4  ;;  %v3099_v47 = vld [vmem:[%s9985_s0 + $0x110] sm:$0xff] }
 0x1ec   :  { %1919 = vst.msk [vmem:[#allocation2 + $0x380] sm:$0xff] %vm10022_vm5, %v9995_v3  ;;  %vm10024_vm5 = vcmask 785925   ;;  %v813_v20 = vpop.permute.xlu0 %812 }
 0x1ed   :  { %3006 = vst.msk [vmem:[#allocation2 + $0x2f0] sm:$0xfc] %vm2999_vm7, %v9995_v3  ;;  %v3722_v24 = vld [vmem:[#allocation2 + $0x488] sm:$0xff]  ;;  %v2464_v40 = vpop.permute.xlu1 %2463  ;;  %3007 = vst.msk [vmem:[#allocation2 + $0x318] sm:$0xfc] %vm2999_vm7, %v9995_v3 }
 0x1ee   :  { %1310 = vst.msk [vmem:[#allocation2 + $0x4b8] sm:$0xff] %vm10020_vm3, %v9995_v3  ;;  %4329 = vmatmul.mubr.bf16.gmra.mrb[84].mxu1 %v3722_v24  ;;  %v3644_v23 = vld [vmem:[#allocation2 + $0x218] sm:$0xff]  ;;  %vm10025_vm3 = vcmask 258048   ;;  %3473 = vrot.lane.b32.xlu0 %v8165_v15, %s5547_s19 }
 0x1ef   :  { %2007 = vst.msk [vmem:[#allocation2 + $0x380] sm:$0xff] %vm1515_vm6, %v9995_v3  ;;  %1526 = vst.msk [vmem:[#allocation2 + $0x4b8] sm:$0xff] %vm1515_vm6, %v9995_v3  ;;  %4490 = vmatmul.mubr.bf16.gmra.mrb[52].mxu0 %v3644_v23  ;;  %3475 = vrot.lane.b32.xlu1 %v8153_v29, %s5547_s19  ;;  %v5115_v29 = vld [vmem:[%s9985_s0 + $0x1e6] sm:$0xff]  ;;  %v8929_v16 = vpop.f32.mrb[28].mxu1 }
 0x1f0   :  { %2576 = vst.msk [vmem:[#allocation2 + $0x248] sm:$0xfc] %vm2561_vm14, %v9995_v3  ;;  %v1233_v15 = vpop.permute.xlu0 %1232  ;;  %v4220_v24 = vpop.f32.mrb[29].mxu1  ;;  %vm10028_vm7 = vmmov %vm10025_vm3 }
 0x1f1   :  { %2801 = vst.msk [vmem:[#allocation2 + $0x248] sm:$0x3] %vm2786_vm8, %v2719_v21  ;;  %v1875_v41 = vpop.permute.xlu1 %1874  ;;  %v1779_v21 = vpack.c.bf16 %v5116_v19, %v5115_v29  ;;  %v5117_v19 = vld [vmem:[%s9985_s0 + $0x1f6] sm:$0xff] }
 0x1f2   :  { %2830 = vst.msk [vmem:[#allocation2 + $0x248] sm:$0xff] %vm1515_vm6, %v9995_v3  ;;  %2479 = vrot.lane.b32.xlu0 %v2392_v1, %s5545_s28  ;;  %v3097_v1 = vld [vmem:[%s9985_s0 + $0x100] sm:$0xff] }
 0x1f3   :  { %1895 = vst.msk [vmem:[#allocation2 + $0x240] sm:$0xc0] %vm1892_vm12, %v1873_v32  ;;  %1896 = vst.msk [vmem:[#allocation2 + $0x268] sm:$0xc0] %vm1892_vm12, %v1875_v41  ;;  %2736 = vrot.lane.b32.xlu1 %v2649_v4, %s5546_s6  ;;  %v8937_v32 = vpop.f32.mrb[30].mxu1 }
 0x1f4   :  { %1983 = vst.msk [vmem:[#allocation2 + $0x240] sm:$0xff] %vm10023_vm4, %v1962_v45  ;;  %v4223_v23 = vpop.f32.mrb[31].mxu1  ;;  %v2721_v22 = vpop.permute.xlu0 %2720 }
 0x1f5   :  { %2016 = vst.msk [vmem:[#allocation2 + $0x240] sm:$0xfc] %vm2013_vm13, %v9995_v3  ;;  %v323_v39 = vpop.permute.xlu1 %322 }
 0x1f6   :  { %362 = vst.msk [vmem:[#allocation2 + $0x4b0] sm:$0xff] %vm191_vm2, %v321_v53  ;;  %v3728_v35 = vld [vmem:[#allocation2 + $0x4b8] sm:$0xff]  ;;  %2544 = vst.msk [vmem:[#allocation2 + $0x270] sm:$0xff] %vm191_vm2, %v2464_v40  ;;  %3221 = vrot.lane.b32.xlu0 %v8257_v6, %s5546_s6  ;;  %v5541_v53 = vld [vmem:[%s9985_s0 + $0x180] sm:$0xff] }
 0x1f7   :  { %2296 = vst.msk [vmem:[#allocation2 + $0x3b0] sm:$0xc0] %vm2272_vm10, %v2231_v2  ;;  %4336 = vmatprep.mubr.bf16.mxu1 %v3728_v35  ;;  %2297 = vst.msk [vmem:[#allocation2 + $0x3d8] sm:$0xc0] %vm2272_vm10, %v2232_v43  ;;  %3223 = vrot.lane.b32.xlu1 %v8247_v9, %s5546_s6  ;;  %v3098_v43 = vld [vmem:[%s9985_s0 + $0x108] sm:$0xff] }
 0x1f8   :  { %396 = vst.msk [vmem:[#allocation2 + $0x4b0] sm:$0xe0] %vm10024_vm5, %v9995_v3  ;;  %vm10026_vm5 = vcmask 1043200   ;;  %v1964_v44 = vpop.permute.xlu0 %1963 }
 0x1f9   :  { %1799 = vst.msk [vmem:[#allocation2 + $0x3a8] sm:$0x1f] %vm10025_vm3, %v1778_v7  ;;  %v3650_v13 = vld [vmem:[#allocation2 + $0x248] sm:$0xff]  ;;  %vm10030_vm3 = vcmask 785925   ;;  %v517_v42 = vpop.permute.xlu1 %516  ;;  %v8984_v7 = vpack.c.bf16 %v8964_v52, %v5541_v53  ;;  %v2356_v53 = vld [vmem:[%s9985_s0 + $0x198] sm:$0xff] }
 0x1fa   :  { %1821 = vst.msk [vmem:[#allocation2 + $0x3a8] sm:$0xff] %vm191_vm2, %v9995_v3  ;;  %4497 = vmatprep.mubr.bf16.mxu0 %v3650_v13  ;;  %363 = vst.msk [vmem:[#allocation2 + $0x4d8] sm:$0xff] %vm191_vm2, %v323_v39  ;;  %v8967_v45 = vpop.f32.mrb[0].mxu0  ;;  %3477 = vrot.lane.b32.xlu0 %v8257_v6, %s5547_s19  ;;  %v5147_v6 = vld [vmem:[%s9985_s0 + $0x1cc] sm:$0xf]  ;;  %v9024_v39 = vpack.c.bf16 %v3100_v0, %v3099_v47 }
 0x1fb   :  { %2073 = vst.msk [vmem:[#allocation2 + $0x240] sm:$0x3] %vm2070_vm15, %v2051_v27  ;;  %3479 = vrot.lane.b32.xlu1 %v8247_v9, %s5547_s19  ;;  %v4389_v2 = vpop.f32.mrb[1].mxu0  ;;  %v5148_v9 = vld [vmem:[%s9985_s0 + $0x1dc] sm:$0xf]  ;;  %v3020_v4 = vpack.c.bf16 %v5147_v6, %v5147_v6  ;;  %v5542_v6 = vld [vmem:[%s9985_s0 + $0x190] sm:$0xff] }
 0x1fc   :  { %1920 = vst.msk [vmem:[#allocation2 + $0x3a8] sm:$0xff] %vm10023_vm4, %v9995_v3  ;;  %vm10031_vm4 = vmmov %vm10026_vm5  ;;  %v8978_v51 = vpop.f32.mrb[2].mxu0  ;;  %v2053_v13 = vpop.permute.xlu0 %2052  ;;  %v3021_v60 = vpack.c.bf16 %v5148_v9, %v5148_v9  ;;  %v2619_v2 = vld [vmem:[%s9985_s0 + $0x19c] sm:$0xf] }
 0x1fd   :  { %557 = vst.msk [vmem:[#allocation2 + $0x4b0] sm:$0x1f] %vm538_vm9, %v515_v55  ;;  %558 = vst.msk [vmem:[#allocation2 + $0x4d8] sm:$0x1f] %vm538_vm9, %v517_v42  ;;  %v815_v27 = vpop.permute.xlu1 %814  ;;  %v4392_v55 = vpop.f32.mrb[3].mxu0 }
 0x1fe   :  { %2008 = vst.msk [vmem:[#allocation2 + $0x3a8] sm:$0xff] %vm1515_vm6, %v9995_v3  ;;  %v8997_v30 = vpop.f32.mrb[32].mxu1  ;;  %2481 = vrot.lane.b32.xlu0 %v8984_v7, %s5545_s28  ;;  %vm10033_vm9 = vmmov %vm10028_vm7 }
 0x1ff   :  { %590 = vst.msk [vmem:[#allocation2 + $0x4b0] sm:$0x7] %vm10026_vm5, %v9995_v3  ;;  %vm10032_vm5 = vmmov %vm10027_vm1  ;;  %2738 = vrot.lane.b32.xlu1 %v2650_v48, %s5546_s6  ;;  %v4228_v58 = vpop.f32.mrb[33].mxu1 }
 0x200   :  { %2577 = vst.msk [vmem:[#allocation2 + $0x270] sm:$0xfc] %vm2561_vm14, %v9995_v3  ;;  %v9011_v41 = vpop.f32.mrb[34].mxu1 }
 0x201   :  { %879 = vst.msk [vmem:[#allocation2 + $0x4b0] sm:$0xf8] %vm848_vm0, %v813_v20  ;;  %v2169_v20 = vpack.c.bf16 %v2137_v59, %v2137_v59  ;;  %v4231_v24 = vpop.f32.mrb[35].mxu1  ;;  %v3659_v59 = vld [vmem:[#allocation2 + $0x290] sm:$0xff] }
 0x202   :  { %v3649_v14 = vld [vmem:[#allocation2 + $0x240] sm:$0xff]  ;;  %1298 = vst.msk [vmem:[#allocation2 + $0x4e0] sm:$0x1f] %vm1266_vm11, %v1233_v15  ;;  %vm10029_vm11 = vmmov %vm10027_vm1  ;;  %v5118_v15 = vld [vmem:[%s9985_s0 + $0x1fe] sm:$0x3]  ;;  %3040 = vrot.lane.b32.xlu0 %v3020_v4, %s5545_s28 }
 0x203   :  { %4498 = vmatmul.mubr.bf16.gmra.mrb[56].mxu0 %v3649_v14  ;;  %1311 = vst.msk [vmem:[#allocation2 + $0x4e0] sm:$0xff] %vm10027_vm1, %v9995_v3  ;;  %v2723_v14 = vpop.permute.xlu1 %2722  ;;  %v2233_v29 = vrot.slane %v2169_v20, 2  ;;  %v1780_v23 = vpack.c.bf16 %v5118_v15, %v5117_v19  ;;  %3042 = vrot.lane.b32.xlu1 %v3021_v60, %s5545_s28  ;;  %vm10034_vm1 = vcmask 1046272   ;;  %v5150_v60 = vld [vmem:[%s9985_s0 + $0x1fc] sm:$0xf] }
 0x204   :  { %1800 = vst.msk [vmem:[#allocation2 + $0x3d0] sm:$0x1f] %vm10028_vm7, %v1779_v21  ;;  %v2466_v21 = vpop.permute.xlu0 %2465  ;;  %vm10035_vm7 = vcmask 1048326   ;;  %v5149_v4 = vld [vmem:[%s9985_s0 + $0x1ec] sm:$0xf] }
 0x205   :  { %1527 = vst.msk [vmem:[#allocation2 + $0x4e0] sm:$0xff] %vm1515_vm6, %v9995_v3 }
 0x206   :  { %1822 = vst.msk [vmem:[#allocation2 + $0x3d0] sm:$0xff] %vm191_vm2, %v9995_v3  ;;  %2545 = vst.msk [vmem:[#allocation2 + $0x298] sm:$0xff] %vm191_vm2, %v2466_v21  ;;  %v3022_v21 = vpack.c.bf16 %v5149_v4, %v5149_v4 }
 0x207   :  { %1921 = vst.msk [vmem:[#allocation2 + $0x3d0] sm:$0xff] %vm10029_vm11, %v9995_v3  ;;  %vm10036_vm11 = vmmov %vm10032_vm5  ;;  %3227 = vrot.lane.b32.xlu1 %v9024_v39, %s5546_s6 }
 0x208   :  { %v3727_v28 = vld [vmem:[#allocation2 + $0x4b0] sm:$0xff]  ;;  %397 = vst.msk [vmem:[#allocation2 + $0x4d8] sm:$0xe0] %vm10030_vm3, %v9995_v3  ;;  %v3033_v42 = vpop.permute.xlu0 %3032  ;;  %vm10037_vm3 = vmmov %vm10032_vm5 }
 0x209   :  { %2802 = vst.msk [vmem:[#allocation2 + $0x270] sm:$0x3] %vm2786_vm8, %v2721_v22  ;;  %4337 = vmatmul.mubr.bf16.gmra.mrb[88].mxu1 %v3727_v28  ;;  %2803 = vst.msk [vmem:[#allocation2 + $0x298] sm:$0x3] %vm2786_vm8, %v2723_v14  ;;  %v9031_v22 = vpack.c.bf16 %v3098_v43, %v3097_v1  ;;  %v2895_v28 = vpop.permute.xlu1 %2894  ;;  %v2138_v1 = vld [vmem:[%s9985_s0 + $0x1a0] sm:$0xf] }
 0x20a   :  { %2009 = vst.msk [vmem:[#allocation2 + $0x3d0] sm:$0xff] %vm1515_vm6, %v9995_v3  ;;  %2831 = vst.msk [vmem:[#allocation2 + $0x270] sm:$0xff] %vm1515_vm6, %v9995_v3  ;;  %v2170_v19 = vpack.c.bf16 %v2138_v1, %v2138_v1  ;;  %v2358_v1 = vld [vmem:[%s9985_s0 + $0x1a8] sm:$0xff] }
 0x20b   :  { %591 = vst.msk [vmem:[#allocation2 + $0x4d8] sm:$0x7] %vm10031_vm4, %v9995_v3  ;;  %3225 = vrot.lane.b32.xlu0 %v9031_v22, %s5546_s6  ;;  %3483 = vrot.lane.b32.xlu1 %v9024_v39, %s5547_s19  ;;  %v9076_v0 = vpop.f32.mrb[36].mxu1  ;;  %vm10038_vm4 = vmmov %vm10037_vm3 }
 0x20c   :  { %1984 = vst.msk [vmem:[#allocation2 + $0x268] sm:$0xff] %vm10032_vm5, %v1964_v44  ;;  %v3733_v35 = vld [vmem:[#allocation2 + $0x4e0] sm:$0xff]  ;;  %v3035_v9 = vpop.permute.xlu0 %3034  ;;  %v4236_v43 = vpop.f32.mrb[37].mxu1  ;;  %vm10039_vm5 = vmmov %vm10034_vm1 }
 0x20d   :  { %2017 = vst.msk [vmem:[#allocation2 + $0x268] sm:$0xfc] %vm2013_vm13, %v9995_v3  ;;  %4344 = vmatprep.mubr.bf16.mxu1 %v3733_v35  ;;  %v3194_v48 = vpop.permute.xlu1 %3193  ;;  %v9056_v35 = vpop.f32.mrb[4].mxu0 }
 0x20e   :  { %880 = vst.msk [vmem:[#allocation2 + $0x4d8] sm:$0xf8] %vm848_vm0, %v815_v27  ;;  %vm3056_vm0 = vcmask 517376   ;;  %v2651_v27 = vpack.c.bf16 %v2619_v2, %v2619_v2  ;;  %v4397_v55 = vpop.f32.mrb[5].mxu0  ;;  %v9085_v15 = vpop.f32.mrb[38].mxu1 }
 0x20f   :  { %2074 = vst.msk [vmem:[#allocation2 + $0x268] sm:$0x3] %vm2070_vm15, %v2053_v13  ;;  %3481 = vrot.lane.b32.xlu0 %v9031_v22, %s5547_s19  ;;  %v9065_v13 = vpack.c.bf16 %v2356_v53, %v5542_v6  ;;  %v4239_v24 = vpop.f32.mrb[39].mxu1  ;;  %v3360_v53 = vld [vmem:[%s9985_s0 + $0x138] sm:$0xff] }
 0x210   :  { %2298 = vst.msk [vmem:[#allocation2 + $0x400] sm:$0xc0] %vm2272_vm10, %v2233_v29  ;;  %v3196_v47 = vpop.permute.xlu0 %3195  ;;  %2740 = vrot.lane.b32.xlu1 %v2651_v27, %s5546_s6  ;;  %v3023_v29 = vpack.c.bf16 %v5150_v60, %v5150_v60 }
 0x211   :  { %v3655_v40 = vld [vmem:[#allocation2 + $0x270] sm:$0xff]  ;;  %2578 = vst.msk [vmem:[#allocation2 + $0x298] sm:$0xfc] %vm2561_vm14, %v9995_v3  ;;  %v3450_v20 = vpop.permute.xlu1 %3449 }
 0x212   :  { %4505 = vmatprep.mubr.bf16.mxu0 %v3655_v40  ;;  %1801 = vst.msk [vmem:[#allocation2 + $0x3f8] sm:$0x1f] %vm10033_vm9, %v1780_v23  ;;  %v9070_v40 = vpop.f32.mrb[6].mxu0  ;;  %vm10040_vm9 = vmmov %vm10035_vm7 }
 0x213   :  { %2849 = vst.msk [vmem:[#allocation2 + $0x298] sm:$0x3f] %vm10034_vm1, %v9995_v3  ;;  %v4400_v14 = vpop.f32.mrb[7].mxu0  ;;  %2483 = vrot.lane.b32.xlu0 %v9065_v13, %s5545_s28  ;;  %vm10041_vm1 = vmmov %vm10037_vm3 }
 0x214   :  { %1823 = vst.msk [vmem:[#allocation2 + $0x3f8] sm:$0xff] %vm191_vm2, %v9995_v3  ;;  %3046 = vrot.lane.b32.xlu1 %v3023_v29, %s5545_s28  ;;  %v2139_v29 = vld [vmem:[%s9985_s0 + $0x1b0] sm:$0xf] }
 0x215   :  { %v3732_v37 = vld [vmem:[#allocation2 + $0x4d8] sm:$0xff]  ;;  %2915 = vst.msk [vmem:[#allocation2 + $0x298] sm:$0xc0] %vm10035_vm7, %v2895_v28  ;;  %v2468_v23 = vpop.permute.xlu1 %2467  ;;  %v3101_v28 = vld [vmem:[%s9985_s0 + $0x120] sm:$0xff]  ;;  %v2171_v24 = vpack.c.bf16 %v2139_v29, %v2139_v29  ;;  %vm10042_vm7 = vmmov %vm10041_vm1 }
 0x216   :  { %4345 = vmatmul.mubr.bf16.gmra.mrb[92].mxu1 %v3732_v37  ;;  %v3654_v44 = vld [vmem:[#allocation2 + $0x268] sm:$0xff]  ;;  %1922 = vst.msk [vmem:[#allocation2 + $0x3f8] sm:$0xff] %vm10036_vm11, %v9995_v3  ;;  %v9109_v6 = vpop.f32.mrb[8].mxu0  ;;  %vm10043_vm11 = vmmov %vm10039_vm5 }
 0x217   :  { %3057 = vst.msk [vmem:[#allocation2 + $0x20] sm:$0x3] %vm3056_vm0, %v3033_v42  ;;  %4506 = vmatmul.mubr.bf16.gmra.mrb[60].mxu0 %v3654_v44  ;;  %3058 = vst.msk [vmem:[#allocation2 + $0x48] sm:$0x3] %vm3056_vm0, %v3035_v9  ;;  %v3102_v37 = vld [vmem:[%s9985_s0 + $0x128] sm:$0xff]  ;;  %v2234_v42 = vrot.slane %v2170_v19, 2  ;;  %v3452_v44 = vpop.permute.xlu0 %3451  ;;  %3044 = vrot.lane.b32.xlu0 %v3022_v21, %s5545_s28 }
 0x218   :  { %2010 = vst.msk [vmem:[#allocation2 + $0x3f8] sm:$0xff] %vm1515_vm6, %v9995_v3  ;;  %v9100_v2 = vpack.c.bf16 %v3102_v37, %v3101_v28  ;;  %3231 = vrot.lane.b32.xlu1 %v8612_v34, %s5546_s6  ;;  %v2357_v34 = vld [vmem:[%s9985_s0 + $0x1a0] sm:$0xff] }
 0x219   :  { %3289 = vst.msk [vmem:[#allocation2 + $0x20] sm:$0xff] %vm10037_vm3, %v3194_v48  ;;  %v3359_v48 = vld [vmem:[%s9985_s0 + $0x130] sm:$0xff]  ;;  %v3037_v9 = vpop.permute.xlu1 %3036  ;;  %v9136_v19 = vpop.f32.mrb[40].mxu1  ;;  %v9142_v28 = vpack.c.bf16 %v2358_v1, %v2357_v34  ;;  %v2360_v34 = vld [vmem:[%s9985_s0 + $0x1b8] sm:$0xff]  ;;  %vm10044_vm3 = vmmov %vm10041_vm1 }
 0x21a   :  { %3545 = vst.msk [vmem:[#allocation2 + $0x20] sm:$0xff] %vm1515_vm6, %v3450_v20  ;;  %v9114_v60 = vpack.c.bf16 %v3360_v53, %v3359_v48 }
 0x21b   :  { %3290 = vst.msk [vmem:[#allocation2 + $0x48] sm:$0xff] %vm10038_vm4, %v3196_v47  ;;  %v2725_v55 = vpop.permute.xlu0 %2724  ;;  %3229 = vrot.lane.b32.xlu0 %v9100_v2, %s5546_s6  ;;  %vm10045_vm4 = vmmov %vm10040_vm9 }
 0x21c   :  { %v3660_v58 = vld [vmem:[#allocation2 + $0x298] sm:$0xff]  ;;  %2546 = vst.msk [vmem:[#allocation2 + $0x2c0] sm:$0xff] %vm191_vm2, %v2468_v23  ;;  %3487 = vrot.lane.b32.xlu1 %v9114_v60, %s5547_s19  ;;  %v4244_v23 = vpop.f32.mrb[41].mxu1 }
 0x21d   :  { %4513 = vmatprep.mubr.bf16.mxu0 %v3660_v58  ;;  %2579 = vst.msk [vmem:[#allocation2 + $0x2c0] sm:$0xfc] %vm2561_vm14, %v9995_v3  ;;  %v2620_v58 = vld [vmem:[%s9985_s0 + $0x1ac] sm:$0xf]  ;;  %v3039_v4 = vpop.permute.xlu1 %3038  ;;  %v9144_v37 = vpop.f32.mrb[42].mxu1 }
 0x21e   :  { %3546 = vst.msk [vmem:[#allocation2 + $0x48] sm:$0xff] %vm1515_vm6, %v3452_v44  ;;  %v2652_v21 = vpack.c.bf16 %v2620_v58, %v2620_v58  ;;  %v2235_v44 = vrot.slane %v2171_v24, 2  ;;  %v4247_v53 = vpop.f32.mrb[43].mxu1  ;;  %v2621_v58 = vld [vmem:[%s9985_s0 + $0x1bc] sm:$0xf] }
 0x21f   :  { %4514 = vmatmul.mubr.bf16.gmra.mrb[64].mxu0 %v3659_v59  ;;  %2299 = vst.msk [vmem:[#allocation2 + $0x428] sm:$0xc0] %vm2272_vm10, %v2234_v42  ;;  %v4405_v59 = vpop.f32.mrb[9].mxu0  ;;  %v2897_v14 = vpop.permute.xlu0 %2896  ;;  %3485 = vrot.lane.b32.xlu0 %v9100_v2, %s5547_s19  ;;  %v2653_v29 = vpack.c.bf16 %v2621_v58, %v2621_v58  ;;  %v3109_v53 = vld [vmem:[%s9985_s0 + $0x160] sm:$0xff] }
 0x220   :  { %3059 = vst.msk [vmem:[#allocation2 + $0x70] sm:$0x3] %vm3056_vm0, %v3037_v9  ;;  %v9120_v20 = vpop.f32.mrb[10].mxu0  ;;  %3060 = vst.msk [vmem:[#allocation2 + $0x98] sm:$0x3] %vm3056_vm0, %v3039_v4  ;;  %2742 = vrot.lane.b32.xlu1 %v2652_v21, %s5546_s6 }
 0x221   :  { %v3581_v27 = vld [vmem:[#allocation2 + $0x20] sm:$0xff]  ;;  %2804 = vst.msk [vmem:[#allocation2 + $0x2c0] sm:$0x3] %vm2786_vm8, %v2725_v55  ;;  %v4408_v47 = vpop.f32.mrb[11].mxu0  ;;  %v3200_v42 = vpop.permute.xlu1 %3199 }
 0x222   :  { %5248 = vmatprep.mubr.bf16.mxu1 %v3581_v27  ;;  %2850 = vst.msk [vmem:[#allocation2 + $0x2c0] sm:$0x3f] %vm10039_vm5, %v9995_v3  ;;  %v3664_v27 = vld [vmem:[#allocation2 + $0x2b8] sm:$0xff]  ;;  %v2359_v47 = vld [vmem:[%s9985_s0 + $0x1b0] sm:$0xff]  ;;  %vm10046_vm5 = vmmov %vm10041_vm1 }
 0x223   :  { %2916 = vst.msk [vmem:[#allocation2 + $0x2c0] sm:$0xc0] %vm10040_vm9, %v2897_v14  ;;  %v3198_v48 = vpop.permute.xlu0 %3197  ;;  %2485 = vrot.lane.b32.xlu0 %v9142_v28, %s5545_s28  ;;  %v2140_v14 = vld [vmem:[%s9985_s0 + $0x1c0] sm:$0xf]  ;;  %v9180_v23 = vpack.c.bf16 %v2360_v34, %v2359_v47  ;;  %v3151_v34 = vpack.c.bf16 %v8838_v26, %v3109_v53  ;;  %vm10047_vm9 = vmmov %vm10045_vm4 }
 0x224   :  { %3292 = vst.msk [vmem:[#allocation2 + $0x98] sm:$0xff] %vm10041_vm1, %v3200_v42  ;;  %3235 = vrot.lane.b32.xlu1 %v8780_v56, %s5546_s6  ;;  %v2172_v21 = vpack.c.bf16 %v2140_v14, %v2140_v14  ;;  %v3111_v42 = vld [vmem:[%s9985_s0 + $0x170] sm:$0xff]  ;;  %vm10048_vm1 = vmmov %vm10043_vm11 }
 0x225   :  { %v3586_v43 = vld [vmem:[#allocation2 + $0x48] sm:$0xff]  ;;  %3291 = vst.msk [vmem:[#allocation2 + $0x70] sm:$0xff] %vm10042_vm7, %v3198_v48  ;;  %v3456_v9 = vpop.permute.xlu1 %3455  ;;  %vm10049_vm7 = vmmov %vm10044_vm3 }
 0x226   :  { %5249 = vmatmul.mubr.bf16.vlgmr.msra.gmra.mrb[96].mxu1 %v3586_v43  ;;  %2300 = vst.msk [vmem:[#allocation2 + $0x450] sm:$0xc0] %vm2272_vm10, %v2235_v44  ;;  %v9171_v43 = vpop.f32.mrb[12].mxu0 }
 0x227   :  { %3548 = vst.msk [vmem:[#allocation2 + $0x98] sm:$0xff] %vm1515_vm6, %v3456_v9  ;;  %v3454_v55 = vpop.permute.xlu0 %3453  ;;  %3233 = vrot.lane.b32.xlu0 %v8711_v33, %s5546_s6  ;;  %v4413_v24 = vpop.f32.mrb[13].mxu0  ;;  %v2236_v9 = vrot.slane %v2172_v21, 2 }
 0x228   :  { %3547 = vst.msk [vmem:[#allocation2 + $0x70] sm:$0xff] %vm1515_vm6, %v3454_v55  ;;  %3491 = vrot.lane.b32.xlu1 %v8780_v56, %s5547_s19  ;;  %v9187_v56 = vpop.f32.mrb[14].mxu0 }
 0x229   :  { %v2727_v4 = vpop.permute.xlu1 %2726  ;;  %2301 = vst.msk [vmem:[#allocation2 + $0x478] sm:$0xc0] %vm2272_vm10, %v2236_v9 }
 0x22a   :  { %v3665_v59 = vld [vmem:[#allocation2 + $0x2c0] sm:$0xff] }
 0x22b   :  { %4521 = vmatprep.mubr.bf16.mxu0 %v3665_v59  ;;  %v2470_v1 = vpop.permute.xlu0 %2469  ;;  %3489 = vrot.lane.b32.xlu0 %v8711_v33, %s5547_s19  ;;  %v4416_v59 = vpop.f32.mrb[15].mxu0 }
 0x22c   :  { %4522 = vmatmul.mubr.bf16.gmra.mrb[68].mxu0 %v3664_v27  ;;  %2547 = vst.msk [vmem:[#allocation2 + $0x2e8] sm:$0xff] %vm191_vm2, %v2470_v1  ;;  %v9193_v27 = vpop.f32.mrb[44].mxu1  ;;  %2744 = vrot.lane.b32.xlu1 %v2653_v29, %s5546_s6  ;;  %v1840_v1 = vld [vmem:[%s9985_s0 + $0x100] sm:$0xf] }
 0x22d   :  { %2805 = vst.msk [vmem:[#allocation2 + $0x2e8] sm:$0x3] %vm2786_vm8, %v2727_v4  ;;  %v3202_v44 = vpop.permute.xlu1 %3201  ;;  %v4252_v58 = vpop.f32.mrb[45].mxu1  ;;  %v3152_v4 = vpack.c.bf16 %v8901_v17, %v3111_v42  ;;  %v1848_v24 = vpack.c.bf16 %v1840_v1, %v1840_v1  ;;  %v2622_v1 = vld [vmem:[%s9985_s0 + $0x1cc] sm:$0xf] }
 0x22e   :  { %2580 = vst.msk [vmem:[#allocation2 + $0x2e8] sm:$0xfc] %vm2561_vm14, %v9995_v3  ;;  %v3596_v48 = vld [vmem:[#allocation2 + $0x98] sm:$0xff]  ;;  %v9201_v47 = vpop.f32.mrb[46].mxu1 }
 0x22f   :  { %2851 = vst.msk [vmem:[#allocation2 + $0x2e8] sm:$0x3f] %vm10043_vm11, %v9995_v3  ;;  %v2899_v33 = vpop.permute.xlu0 %2898  ;;  %v3591_v55 = vld [vmem:[#allocation2 + $0x70] sm:$0xff]  ;;  %2487 = vrot.lane.b32.xlu0 %v9180_v23, %s5545_s28  ;;  %v4255_v14 = vpop.f32.mrb[47].mxu1  ;;  %vm10050_vm11 = vmmov %vm10044_vm3 }
 0x230   :  { %3293 = vst.msk [vmem:[#allocation2 + $0xc0] sm:$0xff] %vm10044_vm3, %v3202_v44  ;;  %5252 = vmatprep.mubr.bf16.mxu1 %v3591_v55  ;;  %3239 = vrot.lane.b32.xlu1 %v3152_v4, %s5546_s6  ;;  %v9210_v17 = vpop.f32.mrb[16].mxu0  ;;  %v1864_v55 = vrot.slane %v1848_v24, 2  ;;  %v2654_v24 = vpack.c.bf16 %v2622_v1, %v2622_v1 }
 0x231   :  { %2917 = vst.msk [vmem:[#allocation2 + $0x2e8] sm:$0xc0] %vm10045_vm4, %v2899_v33  ;;  %5253 = vmatmul.mubr.bf16.gmra.mrb[100].mxu1 %v3596_v48  ;;  %v3458_v21 = vpop.permute.xlu1 %3457  ;;  %v4421_v42 = vpop.f32.mrb[17].mxu0  ;;  %v3669_v48 = vld [vmem:[#allocation2 + $0x2e0] sm:$0xff]  ;;  %vm10051_vm4 = vmmov %vm10044_vm3 }
 0x232   :  { %3549 = vst.msk [vmem:[#allocation2 + $0xc0] sm:$0xff] %vm1515_vm6, %v3458_v21  ;;  %v9213_v44 = vpop.f32.mrb[18].mxu0  ;;  %v2026_v42 = vld [vmem:[%s9985_s0 + $0x10c] sm:$0xf] }
 0x233   :  { %v3204_v29 = vpop.permute.xlu0 %3203  ;;  %3237 = vrot.lane.b32.xlu0 %v3151_v34, %s5546_s6  ;;  %v4424_v9 = vpop.f32.mrb[19].mxu0 }
 0x234   :  { %3294 = vst.msk [vmem:[#allocation2 + $0xe8] sm:$0xff] %vm10046_vm5, %v3204_v29  ;;  %3495 = vrot.lane.b32.xlu1 %v3152_v4, %s5547_s19  ;;  %v9225_v21 = vpop.f32.mrb[48].mxu1  ;;  %v2141_v4 = vld [vmem:[%s9985_s0 + $0x1d0] sm:$0xf]  ;;  %vm10053_vm5 = vmmov %vm10044_vm3 }
 0x235   :  { %v2472_v26 = vpop.permute.xlu1 %2471  ;;  %v4260_v29 = vpop.f32.mrb[49].mxu1 }
 0x236   :  { %2548 = vst.msk [vmem:[#allocation2 + $0x310] sm:$0xff] %vm191_vm2, %v2472_v26  ;;  %v2173_v26 = vpack.c.bf16 %v2141_v4, %v2141_v4 }
 0x237   :  { %v3460_v53 = vpop.permute.xlu0 %3459  ;;  %2581 = vst.msk [vmem:[#allocation2 + $0x310] sm:$0xfc] %vm2561_vm14, %v9995_v3  ;;  %3493 = vrot.lane.b32.xlu0 %v3151_v34, %s5547_s19  ;;  %v9236_v34 = vpop.f32.mrb[50].mxu1 }
 0x238   :  { %v3670_v33 = vld [vmem:[#allocation2 + $0x2e8] sm:$0xff]  ;;  %3550 = vst.msk [vmem:[#allocation2 + $0xe8] sm:$0xff] %vm1515_vm6, %v3460_v53  ;;  %1876 = vrot.lane.b32.xlu1 %v1864_v55, %s5545_s28  ;;  %v2237_v55 = vrot.slane %v2173_v26, 2 }
 0x239   :  { %4529 = vmatprep.mubr.bf16.mxu0 %v3670_v33  ;;  %v2901_v59 = vpop.permute.xlu1 %2900  ;;  %v3601_v58 = vld [vmem:[#allocation2 + $0xc0] sm:$0xff] }
 0x23a   :  { %4530 = vmatmul.mubr.bf16.gmra.mrb[72].mxu0 %v3669_v48  ;;  %2918 = vst.msk [vmem:[#allocation2 + $0x310] sm:$0xc0] %vm10047_vm9, %v2901_v59  ;;  %5256 = vmatprep.mubr.bf16.mxu1 %v3601_v58  ;;  %v4263_v48 = vpop.f32.mrb[51].mxu1  ;;  %v2034_v58 = vpack.c.bf16 %v2026_v42, %v2026_v42  ;;  %vm10054_vm9 = vmmov %vm10044_vm3 }
 0x23b   :  { %v2729_v14 = vpop.permute.xlu0 %2728  ;;  %2489 = vrot.lane.b32.xlu0 %v8581_v49, %s5545_s28  ;;  %v9245_v59 = vpop.f32.mrb[20].mxu0  ;;  %2302 = vst.msk [vmem:[#allocation2 + $0x4a0] sm:$0xc0] %vm2272_vm10, %v2237_v55 }
 0x23c   :  { %2806 = vst.msk [vmem:[#allocation2 + $0x310] sm:$0x3] %vm2786_vm8, %v2729_v14  ;;  %1965 = vrot.lane.b32.xlu1 %v9031_v22, %s5546_s6  ;;  %v4429_v1 = vpop.f32.mrb[21].mxu0  ;;  %v3369_v14 = vld [vmem:[%s9985_s0 + $0x180] sm:$0xff]  ;;  %v3674_v22 = vld [vmem:[#allocation2 + $0x308] sm:$0xff] }
 0x23d   :  { %2852 = vst.msk [vmem:[#allocation2 + $0x310] sm:$0x3f] %vm10048_vm1, %v9995_v3  ;;  %v3208_v53 = vpop.permute.xlu1 %3207  ;;  %v9252_v4 = vpop.f32.mrb[22].mxu0  ;;  %v3409_v42 = vpack.c.bf16 %v8964_v52, %v3369_v14  ;;  %vm10055_vm1 = vmmov %vm10044_vm3 }
 0x23e   :  { %3296 = vst.msk [vmem:[#allocation2 + $0x138] sm:$0xff] %vm10049_vm7, %v3208_v53  ;;  %v4432_v48 = vpop.f32.mrb[23].mxu0  ;;  %vm10057_vm7 = vmmov %vm10055_vm1 }
 0x23f   :  { %v3206_v9 = vpop.permute.xlu0 %3205  ;;  %v3606_v33 = vld [vmem:[#allocation2 + $0xe8] sm:$0xff]  ;;  %2746 = vrot.lane.b32.xlu0 %v2654_v24, %s5546_s6 }
 0x240   :  { %3295 = vst.msk [vmem:[#allocation2 + $0x110] sm:$0xff] %vm10050_vm11, %v3206_v9  ;;  %5257 = vmatmul.mubr.bf16.gmra.mrb[104].mxu1 %v3606_v33  ;;  %2054 = vrot.lane.b32.xlu1 %v2034_v58, %s5547_s19  ;;  %v1841_v9 = vld [vmem:[%s9985_s0 + $0x110] sm:$0xf]  ;;  %v9263_v55 = vpop.f32.mrb[52].mxu1  ;;  %vm10060_vm11 = vmmov %vm10055_vm1 }
 0x241   :  { %v3464_v29 = vpop.permute.xlu1 %3463  ;;  %v4268_v1 = vpop.f32.mrb[53].mxu1  ;;  %v1849_v58 = vpack.c.bf16 %v1841_v9, %v1841_v9 }
 0x242   :  { %3552 = vst.msk [vmem:[#allocation2 + $0x138] sm:$0xff] %vm1515_vm6, %v3464_v29  ;;  %v9272_v52 = vpop.f32.mrb[54].mxu1 }
 0x243   :  { %v3462_v26 = vpop.permute.xlu0 %3461  ;;  %3241 = vrot.lane.b32.xlu0 %v8984_v7, %s5546_s6  ;;  %v2623_v7 = vld [vmem:[%s9985_s0 + $0x1dc] sm:$0xf]  ;;  %v4271_v14 = vpop.f32.mrb[55].mxu1  ;;  %v1865_v9 = vrot.slane %v1849_v58, 2 }
 0x244   :  { %3551 = vst.msk [vmem:[#allocation2 + $0x110] sm:$0xff] %vm1515_vm6, %v3462_v26  ;;  %v3675_v24 = vld [vmem:[#allocation2 + $0x310] sm:$0xff]  ;;  %3497 = vrot.lane.b32.xlu1 %v3409_v42, %s5547_s19  ;;  %v2655_v42 = vpack.c.bf16 %v2623_v7, %v2623_v7 }
 0x245   :  { %4537 = vmatprep.mubr.bf16.mxu0 %v3675_v24  ;;  %v2731_v53 = vpop.permute.xlu1 %2730  ;;  %v3679_v7 = vld [vmem:[#allocation2 + $0x330] sm:$0xff] }
 0x246   :  { %4538 = vmatmul.mubr.bf16.gmra.mrb[76].mxu0 %v3674_v22 }
 0x247   :  { %v2474_v33 = vpop.permute.xlu0 %2473  ;;  %3243 = vrot.lane.b32.xlu0 %v9065_v13, %s5546_s6  ;;  %v9283_v24 = vpop.f32.mrb[24].mxu0 }
 0x248   :  { %2549 = vst.msk [vmem:[#allocation2 + $0x338] sm:$0xff] %vm191_vm2, %v2474_v33  ;;  %2491 = vrot.lane.b32.xlu1 %v8679_v63, %s5545_s28 }
 0x249   :  { %2582 = vst.msk [vmem:[#allocation2 + $0x338] sm:$0xfc] %vm2561_vm14, %v9995_v3  ;;  %v3212_v29 = vpop.permute.xlu1 %3211  ;;  %v3616_v26 = vld [vmem:[#allocation2 + $0x138] sm:$0xff] }
 0x24a   :  { %2807 = vst.msk [vmem:[#allocation2 + $0x338] sm:$0x3] %vm2786_vm8, %v2731_v53  ;;  %v4437_v53 = vpop.f32.mrb[25].mxu0 }
 0x24b   :  { %2832 = vst.msk [vmem:[#allocation2 + $0x338] sm:$0xff] %vm1515_vm6, %v9995_v3  ;;  %v3210_v48 = vpop.permute.xlu0 %3209  ;;  %v3611_v22 = vld [vmem:[#allocation2 + $0x110] sm:$0xff]  ;;  %3499 = vrot.lane.b32.xlu0 %v9065_v13, %s5547_s19  ;;  %v9287_v1 = vpop.f32.mrb[26].mxu0 }
 0x24c   :  { %3298 = vst.msk [vmem:[#allocation2 + $0x188] sm:$0xff] %vm10044_vm3, %v3212_v29  ;;  %5260 = vmatprep.mubr.bf16.mxu1 %v3611_v22  ;;  %v4440_v29 = vpop.f32.mrb[27].mxu0  ;;  %2748 = vrot.lane.b32.xlu1 %v2655_v42, %s5546_s6  ;;  %v2027_v22 = vld [vmem:[%s9985_s0 + $0x11c] sm:$0xf]  ;;  %vm10062_vm3 = vmmov %vm10055_vm1 }
 0x24d   :  { %3297 = vst.msk [vmem:[#allocation2 + $0x160] sm:$0xff] %vm10051_vm4, %v3210_v48  ;;  %5261 = vmatmul.mubr.bf16.gmra.mrb[108].mxu1 %v3616_v26  ;;  %v3468_v33 = vpop.permute.xlu1 %3467  ;;  %v2142_v48 = vld [vmem:[%s9985_s0 + $0x1e0] sm:$0xf]  ;;  %v9300_v29 = vpop.f32.mrb[56].mxu1  ;;  %vm10063_vm4 = vmmov %vm10055_vm1 }
 0x24e   :  { %3554 = vst.msk [vmem:[#allocation2 + $0x188] sm:$0xff] %vm1515_vm6, %v3468_v33  ;;  %v2174_v13 = vpack.c.bf16 %v2142_v48, %v2142_v48  ;;  %v4276_v42 = vpop.f32.mrb[57].mxu1 }
 0x24f   :  { %v3466_v14 = vpop.permute.xlu0 %3465  ;;  %1878 = vrot.lane.b32.xlu0 %v1865_v9, %s5545_s28  ;;  %v2035_v9 = vpack.c.bf16 %v2027_v22, %v2027_v22  ;;  %v9315_v48 = vpop.f32.mrb[58].mxu1  ;;  %v3684_v42 = vld [vmem:[#allocation2 + $0x358] sm:$0xff] }
 0x250   :  { %3553 = vst.msk [vmem:[#allocation2 + $0x160] sm:$0xff] %vm1515_vm6, %v3466_v14  ;;  %v2238_v53 = vrot.slane %v2174_v13, 2  ;;  %3245 = vrot.lane.b32.xlu1 %v9142_v28, %s5546_s6  ;;  %v1842_v14 = vld [vmem:[%s9985_s0 + $0x120] sm:$0xf]  ;;  %10052 = vst [vmem:[#allocation3_spill] sm:$0xff] %v9315_v48 }
 0x251   :  { %v2733_v26 = vpop.permute.xlu1 %2732 }
 0x252   :  { %v3680_v58 = vld [vmem:[#allocation2 + $0x338] sm:$0xff]  ;;  %2303 = vst.msk [vmem:[#allocation2 + $0x4c8] sm:$0xc0] %vm2272_vm10, %v2238_v53 }
 0x253   :  { %4545 = vmatprep.mubr.bf16.mxu0 %v3680_v58  ;;  %v2476_v33 = vpop.permute.xlu0 %2475  ;;  %1967 = vrot.lane.b32.xlu0 %v9024_v39, %s5546_s6  ;;  %v1850_v39 = vpack.c.bf16 %v1842_v14, %v1842_v14 }
 0x254   :  { %4546 = vmatmul.mubr.bf16.gmra.mrb[80].mxu0 %v3679_v7  ;;  %2550 = vst.msk [vmem:[#allocation2 + $0x360] sm:$0xff] %vm191_vm2, %v2476_v33  ;;  %3247 = vrot.lane.b32.xlu1 %v9180_v23, %s5546_s6 }
 0x255   :  { %2583 = vst.msk [vmem:[#allocation2 + $0x360] sm:$0xfc] %vm2561_vm14, %v9995_v3  ;;  %v3216_v7 = vpop.permute.xlu1 %3215  ;;  %v3626_v13 = vld [vmem:[#allocation2 + $0x188] sm:$0xff] }
 0x256   :  { %2808 = vst.msk [vmem:[#allocation2 + $0x360] sm:$0x3] %vm2786_vm8, %v2733_v26  ;;  %v4279_v26 = vpop.f32.mrb[59].mxu1 }
 0x257   :  { %2833 = vst.msk [vmem:[#allocation2 + $0x360] sm:$0xff] %vm1515_vm6, %v9995_v3  ;;  %v3214_v58 = vpop.permute.xlu0 %3213  ;;  %v3621_v53 = vld [vmem:[#allocation2 + $0x160] sm:$0xff]  ;;  %2056 = vrot.lane.b32.xlu0 %v2035_v9, %s5547_s19 }
 0x258   :  { %3300 = vst.msk [vmem:[#allocation2 + $0x1d8] sm:$0xff] %vm10053_vm5, %v3216_v7  ;;  %5264 = vmatprep.mubr.bf16.mxu1 %v3621_v53  ;;  %3503 = vrot.lane.b32.xlu1 %v9180_v23, %s5547_s19  ;;  %v1866_v7 = vrot.slane %v1850_v39, 2  ;;  %vm10068_vm5 = vmmov %vm10055_vm1 }
 0x259   :  { %3299 = vst.msk [vmem:[#allocation2 + $0x1b0] sm:$0xff] %vm10054_vm9, %v3214_v58  ;;  %5265 = vmatmul.mubr.bf16.gmra.mrb[112].mxu1 %v3626_v13  ;;  %v3472_v22 = vpop.permute.xlu1 %3471  ;;  %v9328_v58 = vpop.f32.mrb[28].mxu0  ;;  %v2624_v13 = vld [vmem:[%s9985_s0 + $0x1ec] sm:$0xf]  ;;  %vm10069_vm9 = vmmov %vm10055_vm1 }
 0x25a   :  { %3556 = vst.msk [vmem:[#allocation2 + $0x1d8] sm:$0xff] %vm1515_vm6, %v3472_v22  ;;  %v4445_v26 = vpop.f32.mrb[29].mxu0  ;;  %v2656_v39 = vpack.c.bf16 %v2624_v13, %v2624_v13  ;;  %v9356_v13 = vld [vmem:[%s9987_s2] ss:$0 sm:$0xff] }
 0x25b   :  { %v3470_v33 = vpop.permute.xlu0 %3469  ;;  %3501 = vrot.lane.b32.xlu0 %v9142_v28, %s5547_s19  ;;  %v9333_v22 = vpop.f32.mrb[30].mxu0  ;;  %v2143_v28 = vld [vmem:[%s9985_s0 + $0x1f0] sm:$0xf]  ;;  %v4163_v48 = vadd.f32 %v9356_v13, %v8338_v50 }
 0x25c   :  { %3555 = vst.msk [vmem:[#allocation2 + $0x1b0] sm:$0xff] %vm1515_vm6, %v3470_v33  ;;  %v4448_v23 = vpop.f32.mrb[31].mxu0  ;;  %1880 = vrot.lane.b32.xlu1 %v1866_v7, %s5545_s28  ;;  %v2028_v33 = vld [vmem:[%s9985_s0 + $0x12c] sm:$0xf] }
 0x25d   :  { %v2735_v9 = vpop.permute.xlu1 %2734 }
 0x25e   :  { %v3685_v14 = vld [vmem:[#allocation2 + $0x360] sm:$0xff] }
 0x25f   :  { %4553 = vmatprep.mubr.bf16.mxu0 %v3685_v14  ;;  %v2478_v53 = vpop.permute.xlu0 %2477  ;;  %2493 = vrot.lane.b32.xlu0 %v8807_v8, %s5545_s28 }
 0x260   :  { %4554 = vmatmul.mubr.bf16.gmra.mrb[84].mxu0 %v3684_v42  ;;  %2551 = vst.msk [vmem:[#allocation2 + $0x388] sm:$0xff] %vm191_vm2, %v2478_v53  ;;  %v2175_v42 = vpack.c.bf16 %v2143_v28, %v2143_v28  ;;  %v9351_v53 = vpop.f32.mrb[60].mxu1  ;;  %1969 = vrot.lane.b32.xlu1 %v9100_v2, %s5546_s6 }
 0x261   :  { %2584 = vst.msk [vmem:[#allocation2 + $0x388] sm:$0xfc] %vm2561_vm14, %v9995_v3  ;;  %v3220_v7 = vpop.permute.xlu1 %3219  ;;  %v3636_v14 = vld [vmem:[#allocation2 + $0x1d8] sm:$0xff]  ;;  %10056 = vst [vmem:[#allocation4_spill] sm:$0xff] %v9351_v53  ;;  %v4284_v28 = vpop.f32.mrb[61].mxu1 }
 0x262   :  { %2809 = vst.msk [vmem:[#allocation2 + $0x388] sm:$0x3] %vm2786_vm8, %v2735_v9  ;;  %v2239_v23 = vrot.slane %v2175_v42, 2  ;;  %v1843_v28 = vld [vmem:[%s9985_s0 + $0x130] sm:$0xf] }
 0x263   :  { %2834 = vst.msk [vmem:[#allocation2 + $0x388] sm:$0xff] %vm1515_vm6, %v9995_v3  ;;  %v3218_v26 = vpop.permute.xlu0 %3217  ;;  %v3631_v9 = vld [vmem:[#allocation2 + $0x1b0] sm:$0xff]  ;;  %v2036_v3 = vpack.c.bf16 %v2028_v33, %v2028_v33  ;;  %2750 = vrot.lane.b32.xlu0 %v2656_v39, %s5546_s6  ;;  %v4451_v2 = vpop.f32.mrb[32].mxu0  ;;  %v3689_v33 = vld [vmem:[#allocation2 + $0x380] sm:$0xff]  ;;  %v4166_v39 = vadd.f32 %v9356_v13, %v8363_v10  ;;  %v10058_v10 = vmov 0  }
 0x264   :  { %3302 = vst.msk [vmem:[#allocation2 + $0x228] sm:$0xff] %vm10055_vm1, %v3220_v7  ;;  %5268 = vmatprep.mubr.bf16.mxu1 %v3631_v9  ;;  %v9362_v7 = vpop.f32.mrb[62].mxu1  ;;  %v4453_v9 = vpop.f32.mrb[33].mxu0 }
 0x265   :  { %3301 = vst.msk [vmem:[#allocation2 + $0x200] sm:$0xff] %vm10057_vm7, %v3218_v26  ;;  %5269 = vmatmul.mubr.bf16.gmra.mrb[116].mxu1 %v3636_v14  ;;  %v4287_v42 = vpop.f32.mrb[63].mxu1  ;;  %v3476_v53 = vpop.permute.xlu1 %3475  ;;  %2058 = vrot.lane.b32.xlu1 %v2036_v3, %s5547_s19  ;;  %v9374_v14 = vadd.f32 %v4451_v2, %v4163_v48  ;;  %v1851_v48 = vpack.c.bf16 %v1843_v28, %v1843_v28  ;;  %v2625_v2 = vld [vmem:[%s9985_s0 + $0x1fc] sm:$0xf] }
 0x266   :  { %2304 = vst.msk [vmem:[#allocation2 + $0x4f0] sm:$0xc0] %vm2272_vm10, %v2239_v23  ;;  %vm10059_vm10 = vmmov %vm10055_vm1 }
 0x267   :  { %3558 = vst.msk [vmem:[#allocation2 + $0x228] sm:$0xff] %vm1515_vm6, %v3476_v53  ;;  %v3474_v26 = vpop.permute.xlu0 %3473  ;;  %3249 = vrot.lane.b32.xlu0 %v8581_v49, %s5546_s6  ;;  %v4454_v53 = vpop.f32.mrb[34].mxu0  ;;  %v1867_v28 = vrot.slane %v1851_v48, 2  ;;  %v2029_v48 = vld [vmem:[%s9985_s0 + $0x13c] sm:$0xf] }
 0x268   :  { %3557 = vst.msk [vmem:[#allocation2 + $0x200] sm:$0xff] %vm1515_vm6, %v3474_v26  ;;  %v9379_v42 = vadd.f32 %v4454_v53, %v4166_v39  ;;  %v4456_v26 = vpop.f32.mrb[35].mxu0 }
 0x269   :  { %v2737_v50 = vpop.permute.xlu1 %2736  ;;  %3505 = vrot.lane.b32.xlu1 %v8581_v49, %s5547_s19 }
 0x26a   :  { %v3690_v23 = vld [vmem:[#allocation2 + $0x388] sm:$0xff] }
 0x26b   :  { %4561 = vmatprep.mubr.bf16.mxu0 %v3690_v23  ;;  %v2480_v3 = vpop.permute.xlu0 %2479  ;;  %3251 = vrot.lane.b32.xlu0 %v8679_v63, %s5546_s6 }
 0x26c   :  { %4562 = vmatmul.mubr.bf16.gmra.mrb[88].mxu0 %v3689_v33  ;;  %2552 = vst.msk [vmem:[#allocation2 + $0x3b0] sm:$0xff] %vm191_vm2, %v2480_v3  ;;  %v9396_v23 = vpop.f32.mrb[64].mxu1 }
 0x26d   :  { %2585 = vst.msk [vmem:[#allocation2 + $0x3b0] sm:$0xfc] %vm2561_vm14, %v10058_v10  ;;  %v3224_v33 = vpop.permute.xlu1 %3223  ;;  %2495 = vrot.lane.b32.xlu1 %v8896_v61, %s5545_s28  ;;  %v4292_v53 = vpop.f32.mrb[65].mxu1 }
 0x26e   :  { %2810 = vst.msk [vmem:[#allocation2 + $0x3b0] sm:$0x3] %vm2786_vm8, %v2737_v50  ;;  %v3646_v39 = vld [vmem:[#allocation2 + $0x228] sm:$0xff]  ;;  %v2657_v50 = vpack.c.bf16 %v2625_v2, %v2625_v2  ;;  %v9402_v3 = vpop.f32.mrb[66].mxu1  ;;  %v4171_v53 = vadd.f32 %v9356_v13, %v8435_v18 }
 0x26f   :  { %2835 = vst.msk [vmem:[#allocation2 + $0x3b0] sm:$0xff] %vm1515_vm6, %v10058_v10  ;;  %v3222_v49 = vpop.permute.xlu0 %3221  ;;  %v3641_v9 = vld [vmem:[#allocation2 + $0x200] sm:$0xff]  ;;  %3507 = vrot.lane.b32.xlu0 %v8679_v63, %s5547_s19  ;;  %10061 = vst [vmem:[#allocation5_spill] sm:$0xff] %v9402_v3 }
 0x270   :  { %3304 = vst.msk [vmem:[#allocation2 + $0x278] sm:$0xff] %vm10059_vm10, %v3224_v33  ;;  %5272 = vmatprep.mubr.bf16.mxu1 %v3641_v9  ;;  %v3694_v9 = vld [vmem:[#allocation2 + $0x3a8] sm:$0xff] }
 0x271   :  { %3303 = vst.msk [vmem:[#allocation2 + $0x250] sm:$0xff] %vm10060_vm11, %v3222_v49  ;;  %5273 = vmatmul.mubr.bf16.gmra.mrb[120].mxu1 %v3646_v39  ;;  %v3480_v26 = vpop.permute.xlu1 %3479  ;;  %v4295_v49 = vpop.f32.mrb[67].mxu1  ;;  %2752 = vrot.lane.b32.xlu1 %v2657_v50, %s5546_s6 }
 0x272   :  { %3560 = vst.msk [vmem:[#allocation2 + $0x278] sm:$0xff] %vm1515_vm6, %v3480_v26  ;;  %v4174_v26 = vadd.f32 %v9356_v13, %v8447_v62 }
 0x273   :  { %v3478_v33 = vpop.permute.xlu0 %3477  ;;  %1882 = vrot.lane.b32.xlu0 %v1867_v28, %s5545_s28  ;;  %v2037_v28 = vpack.c.bf16 %v2029_v48, %v2029_v48 }
 0x274   :  { %3559 = vst.msk [vmem:[#allocation2 + $0x250] sm:$0xff] %vm1515_vm6, %v3478_v33 }
 0x275   :  { %v2739_v63 = vpop.permute.xlu1 %2738  ;;  %3253 = vrot.lane.b32.xlu1 %v8807_v8, %s5546_s6  ;;  %v4459_v50 = vpop.f32.mrb[36].mxu0 }
 0x276   :  { %v3695_v2 = vld [vmem:[#allocation2 + $0x3b0] sm:$0xff]  ;;  %v9425_v18 = vadd.f32 %v4459_v50, %v4171_v53  ;;  %v4461_v33 = vpop.f32.mrb[37].mxu0 }
 0x277   :  { %4569 = vmatprep.mubr.bf16.mxu0 %v3695_v2  ;;  %v2482_v39 = vpop.permute.xlu0 %2481  ;;  %1971 = vrot.lane.b32.xlu0 %v9114_v60, %s5546_s6 }
 0x278   :  { %4570 = vmatmul.mubr.bf16.gmra.mrb[92].mxu0 %v3694_v9  ;;  %2553 = vst.msk [vmem:[#allocation2 + $0x3d8] sm:$0xff] %vm191_vm2, %v2482_v39 }
 0x279   :  { %2586 = vst.msk [vmem:[#allocation2 + $0x3d8] sm:$0xfc] %vm2561_vm14, %v10058_v10  ;;  %v3043_v49 = vpop.permute.xlu1 %3042  ;;  %v3656_v9 = vld [vmem:[#allocation2 + $0x278] sm:$0xff]  ;;  %3255 = vrot.lane.b32.xlu1 %v8896_v61, %s5546_s6 }
 0x27a   :  { %2811 = vst.msk [vmem:[#allocation2 + $0x3d8] sm:$0x3] %vm2786_vm8, %v2739_v63  ;;  %v4462_v63 = vpop.f32.mrb[38].mxu0 }
 0x27b   :  { %2836 = vst.msk [vmem:[#allocation2 + $0x3d8] sm:$0xff] %vm1515_vm6, %v10058_v10  ;;  %v3041_v2 = vpop.permute.xlu0 %3040  ;;  %v3651_v39 = vld [vmem:[#allocation2 + $0x250] sm:$0xff]  ;;  %v9429_v60 = vadd.f32 %v4462_v63, %v4174_v26  ;;  %v4464_v62 = vpop.f32.mrb[39].mxu0  ;;  %2060 = vrot.lane.b32.xlu0 %v2037_v28, %s5547_s19 }
 0x27c   :  { %3062 = vst.msk [vmem:[#allocation2 + $0x2c8] sm:$0x3] %vm3056_vm0, %v3043_v49  ;;  %3061 = vst.msk [vmem:[#allocation2 + $0x2a0] sm:$0x3] %vm3056_vm0, %v3041_v2  ;;  %5276 = vmatprep.mubr.bf16.mxu1 %v3651_v39  ;;  %v9436_v50 = vpop.f32.mrb[68].mxu1  ;;  %v3699_v26 = vld [vmem:[#allocation2 + $0x3d0] sm:$0xff] }
 0x27d   :  { %5277 = vmatmul.mubr.bf16.gmra.mrb[124].mxu1 %v3656_v9  ;;  %v3228_v48 = vpop.permute.xlu1 %3227  ;;  %10064 = vst [vmem:[#allocation6_spill] sm:$0xff] %v9436_v50  ;;  %3511 = vrot.lane.b32.xlu1 %v8896_v61, %s5547_s19  ;;  %v4300_v33 = vpop.f32.mrb[69].mxu1  ;;  %v4179_v61 = vadd.f32 %v9356_v13, %v8483_v25 }
 0x27e   :  { %3306 = vst.msk [vmem:[#allocation2 + $0x2c8] sm:$0xff] %vm10062_vm3, %v3228_v48  ;;  %v9442_v2 = vpop.f32.mrb[70].mxu1  ;;  %v4182_v48 = vadd.f32 %v9356_v13, %v8490_v36 }
 0x27f   :  { %v3226_v53 = vpop.permute.xlu0 %3225  ;;  %3509 = vrot.lane.b32.xlu0 %v8807_v8, %s5547_s19  ;;  %10065 = vst [vmem:[#allocation7_spill] sm:$0xff] %v9442_v2  ;;  %v4303_v63 = vpop.f32.mrb[71].mxu1  ;;  %v3704_v2 = vld [vmem:[#allocation2 + $0x3f8] sm:$0xff] }
 0x280   :  { %3305 = vst.msk [vmem:[#allocation2 + $0x2a0] sm:$0xff] %vm10063_vm4, %v3226_v53 }
 0x281   :  { %v3484_v28 = vpop.permute.xlu1 %3483 }
 0x282   :  { %v3700_v49 = vld [vmem:[#allocation2 + $0x3d8] sm:$0xff]  ;;  %3562 = vst.msk [vmem:[#allocation2 + $0x2c8] sm:$0xff] %vm1515_vm6, %v3484_v28 }
 0x283   :  { %4577 = vmatprep.mubr.bf16.mxu0 %v3700_v49  ;;  %v3482_v9 = vpop.permute.xlu0 %3481 }
 0x284   :  { %4578 = vmatmul.mubr.bf16.gmra.mrb[96].mxu0 %v3699_v26  ;;  %3561 = vst.msk [vmem:[#allocation2 + $0x2a0] sm:$0xff] %vm1515_vm6, %v3482_v9 }
 0x285   :  { %v2741_v39 = vpop.permute.xlu1 %2740 }
 0x286   :  { %v4467_v8 = vpop.f32.mrb[40].mxu0 }
 0x287   :  { %v2484_v62 = vpop.permute.xlu0 %2483  ;;  %v9456_v53 = vadd.f32 %v4467_v8, %v4179_v61  ;;  %v4469_v26 = vpop.f32.mrb[41].mxu0 }
 0x288   :  { %2554 = vst.msk [vmem:[#allocation2 + $0x400] sm:$0xff] %vm191_vm2, %v2484_v62  ;;  %v4470_v28 = vpop.f32.mrb[42].mxu0 }
 0x289   :  { %2587 = vst.msk [vmem:[#allocation2 + $0x400] sm:$0xfc] %vm2561_vm14, %v10058_v10  ;;  %v3047_v33 = vpop.permute.xlu1 %3046  ;;  %v3666_v49 = vld [vmem:[#allocation2 + $0x2c8] sm:$0xff]  ;;  %v9460_v63 = vadd.f32 %v4470_v28, %v4182_v48  ;;  %v4472_v36 = vpop.f32.mrb[43].mxu0 }
 0x28a   :  { %2812 = vst.msk [vmem:[#allocation2 + $0x400] sm:$0x3] %vm2786_vm8, %v2741_v39  ;;  %v9462_v39 = vpop.f32.mrb[72].mxu1 }
 0x28b   :  { %2837 = vst.msk [vmem:[#allocation2 + $0x400] sm:$0xff] %vm1515_vm6, %v10058_v10  ;;  %v3045_v25 = vpop.permute.xlu0 %3044  ;;  %v3661_v9 = vld [vmem:[#allocation2 + $0x2a0] sm:$0xff]  ;;  %10066 = vst [vmem:[#allocation8_spill] sm:$0xff] %v9462_v39  ;;  %v4308_v62 = vpop.f32.mrb[73].mxu1 }
 0x28c   :  { %3064 = vst.msk [vmem:[#allocation2 + $0x318] sm:$0x3] %vm3056_vm0, %v3047_v33  ;;  %3063 = vst.msk [vmem:[#allocation2 + $0x2f0] sm:$0x3] %vm3056_vm0, %v3045_v25  ;;  %5280 = vmatprep.mubr.bf16.mxu1 %v3661_v9  ;;  %v9464_v61 = vpop.f32.mrb[74].mxu1  ;;  %v4190_v9 = vadd.f32 %v9356_v13, %v8587_v11 }
 0x28d   :  { %5281 = vmatmul.mubr.bf16.gmra.mrb[128].mxu1 %v3666_v49  ;;  %10067 = vst [vmem:[#allocation9_spill] sm:$0xff] %v9464_v61  ;;  %v3232_v8 = vpop.permute.xlu1 %3231  ;;  %v4311_v33 = vpop.f32.mrb[75].mxu1  ;;  %v4187_v49 = vadd.f32 %v9356_v13, %v8571_v5  ;;  %vm10072_vm0 = vmmov %vm10055_vm1 }
 0x28e   :  { %3308 = vst.msk [vmem:[#allocation2 + $0x318] sm:$0xff] %vm10068_vm5, %v3232_v8  ;;  %vm10073_vm1 = vmmov %vm10072_vm0 }
 0x28f   :  { %v3230_v26 = vpop.permute.xlu0 %3229  ;;  %vm10074_vm7 = vmmov %vm10072_vm0 }
 0x290   :  { %3307 = vst.msk [vmem:[#allocation2 + $0x2f0] sm:$0xff] %vm10069_vm9, %v3230_v26  ;;  %vm10075_vm10 = vmmov %vm10072_vm0 }
 0x291   :  { %v3488_v48 = vpop.permute.xlu1 %3487  ;;  %vm10078_vm11 = vmmov %vm10072_vm0 }
 0x292   :  { %v3705_v50 = vld [vmem:[#allocation2 + $0x400] sm:$0xff]  ;;  %3564 = vst.msk [vmem:[#allocation2 + $0x318] sm:$0xff] %vm1515_vm6, %v3488_v48  ;;  %vm10079_vm3 = vmmov %vm10072_vm0 }
 0x293   :  { %4585 = vmatprep.mubr.bf16.mxu0 %v3705_v50  ;;  %v3486_v25 = vpop.permute.xlu0 %3485  ;;  %vm10081_vm4 = vmmov %vm10072_vm0 }
 0x294   :  { %4586 = vmatmul.mubr.bf16.gmra.mrb[100].mxu0 %v3704_v2  ;;  %3563 = vst.msk [vmem:[#allocation2 + $0x2f0] sm:$0xff] %vm1515_vm6, %v3486_v25  ;;  %vm10082_vm5 = vmmov %vm10072_vm0 }
 0x295   :  { %v4475_v28 = vpop.f32.mrb[44].mxu0  ;;  %v2743_v8 = vpop.permute.xlu1 %2742  ;;  %vm10083_vm9 = vmmov %vm10072_vm0 }
 0x296   :  { %v9474_v36 = vadd.f32 %v4475_v28, %v4187_v49  ;;  %v4477_v62 = vpop.f32.mrb[45].mxu0 }
 0x297   :  { %v2486_v26 = vpop.permute.xlu0 %2485  ;;  %v4478_v50 = vpop.f32.mrb[46].mxu0 }
 0x298   :  { %2555 = vst.msk [vmem:[#allocation2 + $0x428] sm:$0xff] %vm191_vm2, %v2486_v26  ;;  %v9477_v33 = vadd.f32 %v4478_v50, %v4190_v9  ;;  %v9479_v2 = vpop.f32.mrb[76].mxu1  ;;  %v4480_v48 = vpop.f32.mrb[47].mxu0  ;;  %v3709_v50 = vld [vmem:[#allocation2 + $0x420] sm:$0xff] }
 0x299   :  { %10070 = vst [vmem:[#allocation10_spill] sm:$0xff] %v9479_v2  ;;  %2588 = vst.msk [vmem:[#allocation2 + $0x428] sm:$0xfc] %vm2561_vm14, %v10058_v10  ;;  %v4316_v5 = vpop.f32.mrb[77].mxu1  ;;  %v3236_v25 = vpop.permute.xlu1 %3235  ;;  %v3676_v49 = vld [vmem:[#allocation2 + $0x318] sm:$0xff] }
 0x29a   :  { %2813 = vst.msk [vmem:[#allocation2 + $0x428] sm:$0x3] %vm2786_vm8, %v2743_v8  ;;  %v9486_v11 = vpop.f32.mrb[78].mxu1 }
 0x29b   :  { %2838 = vst.msk [vmem:[#allocation2 + $0x428] sm:$0xff] %vm1515_vm6, %v10058_v10  ;;  %10071 = vst [vmem:[#allocation11_spill] sm:$0xff] %v9486_v11  ;;  %v3234_v28 = vpop.permute.xlu0 %3233  ;;  %v4319_v9 = vpop.f32.mrb[79].mxu1  ;;  %v3671_v62 = vld [vmem:[#allocation2 + $0x2f0] sm:$0xff] }
 0x29c   :  { %3310 = vst.msk [vmem:[#allocation2 + $0x368] sm:$0xff] %vm10072_vm0, %v3236_v25  ;;  %5284 = vmatprep.mubr.bf16.mxu1 %v3671_v62  ;;  %v4195_v25 = vadd.f32 %v9356_v13, %v8643_v46  ;;  %v4198_v62 = vadd.f32 %v9356_v13, %v8659_v54 }
 0x29d   :  { %3309 = vst.msk [vmem:[#allocation2 + $0x340] sm:$0xff] %vm10073_vm1, %v3234_v28  ;;  %5285 = vmatmul.mubr.bf16.gmra.mrb[132].mxu1 %v3676_v49  ;;  %v3492_v26 = vpop.permute.xlu1 %3491  ;;  %vm10086_vm1 = vmmov %vm10072_vm0 }
 0x29e   :  { %3566 = vst.msk [vmem:[#allocation2 + $0x368] sm:$0xff] %vm1515_vm6, %v3492_v26 }
 0x29f   :  { %v3490_v8 = vpop.permute.xlu0 %3489 }
 0x2a0   :  { %3565 = vst.msk [vmem:[#allocation2 + $0x340] sm:$0xff] %vm1515_vm6, %v3490_v8 }
 0x2a1   :  { %v2745_v5 = vpop.permute.xlu1 %2744 }
 0x2a2   :  { %v3710_v48 = vld [vmem:[#allocation2 + $0x428] sm:$0xff] }
 0x2a3   :  { %4593 = vmatprep.mubr.bf16.mxu0 %v3710_v48  ;;  %v2488_v11 = vpop.permute.xlu0 %2487 }
 0x2a4   :  { %4594 = vmatmul.mubr.bf16.gmra.mrb[104].mxu0 %v3709_v50  ;;  %2556 = vst.msk [vmem:[#allocation2 + $0x450] sm:$0xff] %vm191_vm2, %v2488_v11 }
 0x2a5   :  { %2589 = vst.msk [vmem:[#allocation2 + $0x450] sm:$0xfc] %vm2561_vm14, %v10058_v10  ;;  %v3240_v49 = vpop.permute.xlu1 %3239  ;;  %v3686_v9 = vld [vmem:[#allocation2 + $0x368] sm:$0xff] }
 0x2a6   :  { %2814 = vst.msk [vmem:[#allocation2 + $0x450] sm:$0x3] %vm2786_vm8, %v2745_v5 }
 0x2a7   :  { %2839 = vst.msk [vmem:[#allocation2 + $0x450] sm:$0xff] %vm1515_vm6, %v10058_v10  ;;  %v3238_v11 = vpop.permute.xlu0 %3237  ;;  %v3681_v8 = vld [vmem:[#allocation2 + $0x340] sm:$0xff] }
 0x2a8   :  { %3312 = vst.msk [vmem:[#allocation2 + $0x3b8] sm:$0xff] %vm10074_vm7, %v3240_v49  ;;  %5288 = vmatprep.mubr.bf16.mxu1 %v3681_v8  ;;  %v3714_v49 = vld [vmem:[#allocation2 + $0x448] sm:$0xff]  ;;  %vm10087_vm7 = vmmov %vm10072_vm0 }
 0x2a9   :  { %3311 = vst.msk [vmem:[#allocation2 + $0x390] sm:$0xff] %vm10075_vm10, %v3238_v11  ;;  %5289 = vmatmul.mubr.bf16.gmra.mrb[136].mxu1 %v3686_v9  ;;  %v3496_v2 = vpop.permute.xlu1 %3495  ;;  %vm10089_vm10 = vmmov %vm10072_vm0 }
 0x2aa   :  { %3568 = vst.msk [vmem:[#allocation2 + $0x3b8] sm:$0xff] %vm1515_vm6, %v3496_v2 }
 0x2ab   :  { %v4483_v28 = vpop.f32.mrb[48].mxu0  ;;  %v3494_v61 = vpop.permute.xlu0 %3493 }
 0x2ac   :  { %v9503_v26 = vadd.f32 %v4483_v28, %v4195_v25  ;;  %v4485_v46 = vpop.f32.mrb[49].mxu0  ;;  %3567 = vst.msk [vmem:[#allocation2 + $0x390] sm:$0xff] %vm1515_vm6, %v3494_v61 }
 0x2ad   :  { %v4486_v50 = vpop.f32.mrb[50].mxu0  ;;  %v1877_v8 = vpop.permute.xlu1 %1876 }
 0x2ae   :  { %v9506_v48 = vadd.f32 %v4486_v50, %v4198_v62  ;;  %v4488_v5 = vpop.f32.mrb[51].mxu0  ;;  %v3715_v46 = vld [vmem:[#allocation2 + $0x450] sm:$0xff]  ;;  %1897 = vst.msk [vmem:[#allocation2 + $0x470] sm:$0xc0] %vm1892_vm12, %v1877_v8 }
 0x2af   :  { %4601 = vmatprep.mubr.bf16.mxu0 %v3715_v46  ;;  %v2490_v9 = vpop.permute.xlu0 %2489 }
 0x2b0   :  { %4602 = vmatmul.mubr.bf16.gmra.mrb[108].mxu0 %v3714_v49  ;;  %2557 = vst.msk [vmem:[#allocation2 + $0x478] sm:$0xff] %vm191_vm2, %v2490_v9  ;;  %v4203_v49 = vadd.f32 %v9356_v13, %v8742_v12 }
 0x2b1   :  { %v9509_v54 = vpop.f32.mrb[80].mxu1  ;;  %2590 = vst.msk [vmem:[#allocation2 + $0x478] sm:$0xfc] %vm2561_vm14, %v10058_v10  ;;  %v1966_v2 = vpop.permute.xlu1 %1965  ;;  %v3696_v62 = vld [vmem:[#allocation2 + $0x3b8] sm:$0xff] }
 0x2b2   :  { %10076 = vst [vmem:[#allocation12_spill] sm:$0xff] %v9509_v54  ;;  %v4324_v25 = vpop.f32.mrb[81].mxu1  ;;  %1985 = vst.msk [vmem:[#allocation2 + $0x470] sm:$0xff] %vm10078_vm11, %v1966_v2  ;;  %v4206_v2 = vadd.f32 %v9356_v13, %v8755_v57 }
 0x2b3   :  { %v9512_v28 = vpop.f32.mrb[82].mxu1  ;;  %v2747_v61 = vpop.permute.xlu0 %2746  ;;  %v3691_v50 = vld [vmem:[#allocation2 + $0x390] sm:$0xff]  ;;  %2018 = vst.msk [vmem:[#allocation2 + $0x470] sm:$0xfc] %vm2013_vm13, %v10058_v10 }
 0x2b4   :  { %10077 = vst [vmem:[#allocation13_spill] sm:$0xff] %v9512_v28  ;;  %v4327_v11 = vpop.f32.mrb[83].mxu1  ;;  %2815 = vst.msk [vmem:[#allocation2 + $0x478] sm:$0x3] %vm2786_vm8, %v2747_v61  ;;  %5292 = vmatprep.mubr.bf16.mxu1 %v3691_v50 }
 0x2b5   :  { %2840 = vst.msk [vmem:[#allocation2 + $0x478] sm:$0xff] %vm1515_vm6, %v10058_v10  ;;  %5293 = vmatmul.mubr.bf16.gmra.mrb[140].mxu1 %v3696_v62  ;;  %v2055_v5 = vpop.permute.xlu1 %2054 }
 0x2b6   :  { %2075 = vst.msk [vmem:[#allocation2 + $0x470] sm:$0x3] %vm2070_vm15, %v2055_v5 }
 0x2b7   :  { %v3242_v25 = vpop.permute.xlu0 %3241 }
 0x2b8   :  { %3313 = vst.msk [vmem:[#allocation2 + $0x3e0] sm:$0xff] %vm10079_vm3, %v3242_v25 }
 0x2b9   :  { %v3498_v46 = vpop.permute.xlu1 %3497 }
 0x2ba   :  { %3569 = vst.msk [vmem:[#allocation2 + $0x3e0] sm:$0xff] %vm1515_vm6, %v3498_v46 }
 0x2bb   :  { %v3244_v8 = vpop.permute.xlu0 %3243 }
 0x2bc   :  { %3314 = vst.msk [vmem:[#allocation2 + $0x408] sm:$0xff] %vm10081_vm4, %v3244_v8  ;;  %v3720_v5 = vld [vmem:[#allocation2 + $0x478] sm:$0xff] }
 0x2bd   :  { %4609 = vmatprep.mubr.bf16.mxu0 %v3720_v5  ;;  %v3719_v54 = vld [vmem:[#allocation2 + $0x470] sm:$0xff]  ;;  %v2492_v39 = vpop.permute.xlu1 %2491  ;;  %v4214_v5 = vadd.f32 %v9356_v13, %v8851_v31 }
 0x2be   :  { %4610 = vmatmul.mubr.bf16.gmra.mrb[112].mxu0 %v3719_v54  ;;  %2558 = vst.msk [vmem:[#allocation2 + $0x4a0] sm:$0xff] %vm191_vm2, %v2492_v39 }
 0x2bf   :  { %v3500_v3 = vpop.permute.xlu0 %3499  ;;  %2591 = vst.msk [vmem:[#allocation2 + $0x4a0] sm:$0xfc] %vm2561_vm14, %v10058_v10 }
 0x2c0   :  { %3570 = vst.msk [vmem:[#allocation2 + $0x408] sm:$0xff] %vm1515_vm6, %v3500_v3  ;;  %v4211_v3 = vadd.f32 %v9356_v13, %v8841_v38 }
 0x2c1   :  { %v9528_v11 = vpop.f32.mrb[84].mxu1  ;;  %v3701_v57 = vld [vmem:[#allocation2 + $0x3e0] sm:$0xff] }
 0x2c2   :  { %10080 = vst [vmem:[#allocation14_spill] sm:$0xff] %v9528_v11  ;;  %v4491_v9 = vpop.f32.mrb[52].mxu0  ;;  %v4332_v61 = vpop.f32.mrb[85].mxu1  ;;  %5296 = vmatprep.mubr.bf16.mxu1 %v3701_v57 }
 0x2c3   :  { %v9534_v62 = vadd.f32 %v4491_v9, %v4203_v49  ;;  %v4493_v50 = vpop.f32.mrb[53].mxu0  ;;  %v9536_v25 = vpop.f32.mrb[86].mxu1 }
 0x2c4   :  { %v4494_v12 = vpop.f32.mrb[54].mxu0  ;;  %v4335_v11 = vpop.f32.mrb[87].mxu1 }
 0x2c5   :  { %v9538_v28 = vadd.f32 %v4494_v12, %v4206_v2  ;;  %v4496_v46 = vpop.f32.mrb[55].mxu0  ;;  %v2749_v49 = vpop.permute.xlu1 %2748 }
 0x2c6   :  { %v1879_v8 = vpop.permute.xlu0 %1878  ;;  %2816 = vst.msk [vmem:[#allocation2 + $0x4a0] sm:$0x3] %vm2786_vm8, %v2749_v49 }
 0x2c7   :  { %1898 = vst.msk [vmem:[#allocation2 + $0x498] sm:$0xc0] %vm1892_vm12, %v1879_v8  ;;  %v3706_v9 = vld [vmem:[#allocation2 + $0x408] sm:$0xff] }
 0x2c8   :  { %2841 = vst.msk [vmem:[#allocation2 + $0x4a0] sm:$0xff] %vm1515_vm6, %v10058_v10  ;;  %5297 = vmatmul.mubr.bf16.gmra.mrb[144].mxu1 %v3706_v9 }
 0x2c9   :  { %v3246_v11 = vpop.permute.xlu1 %3245 }
 0x2ca   :  { %v1968_v54 = vpop.permute.xlu0 %1967  ;;  %3315 = vst.msk [vmem:[#allocation2 + $0x430] sm:$0xff] %vm10082_vm5, %v3246_v11 }
 0x2cb   :  { %1986 = vst.msk [vmem:[#allocation2 + $0x498] sm:$0xff] %vm10083_vm9, %v1968_v54 }
 0x2cc   :  { %2019 = vst.msk [vmem:[#allocation2 + $0x498] sm:$0xfc] %vm2013_vm13, %v10058_v10 }
 0x2cd   :  { %v3248_v2 = vpop.permute.xlu1 %3247 }
 0x2ce   :  { %v2057_v61 = vpop.permute.xlu0 %2056  ;;  %3316 = vst.msk [vmem:[#allocation2 + $0x458] sm:$0xff] %vm10072_vm0, %v3248_v2 }
 0x2cf   :  { %2076 = vst.msk [vmem:[#allocation2 + $0x498] sm:$0x3] %vm2070_vm15, %v2057_v61  ;;  %v3725_v46 = vld [vmem:[#allocation2 + $0x4a0] sm:$0xff] }
 0x2d0   :  { %4617 = vmatprep.mubr.bf16.mxu0 %v3725_v46 }
 0x2d1   :  { %v3504_v8 = vpop.permute.xlu1 %3503 }
 0x2d2   :  { %v3502_v11 = vpop.permute.xlu0 %3501  ;;  %3572 = vst.msk [vmem:[#allocation2 + $0x458] sm:$0xff] %vm1515_vm6, %v3504_v8 }
 0x2d3   :  { %3571 = vst.msk [vmem:[#allocation2 + $0x430] sm:$0xff] %vm1515_vm6, %v3502_v11  ;;  %v4219_v11 = vadd.f32 %v9356_v13, %v8929_v16 }
 0x2d6   :  { %v4499_v39 = vpop.f32.mrb[56].mxu0  ;;  %v3724_v2 = vld [vmem:[#allocation2 + $0x498] sm:$0xff]  ;;  %v2494_v61 = vpop.permute.xlu0 %2493 }
 0x2d7   :  { %v9554_v50 = vadd.f32 %v4499_v39, %v4211_v3  ;;  %v4501_v12 = vpop.f32.mrb[57].mxu0  ;;  %v1881_v39 = vpop.permute.xlu1 %1880  ;;  %4618 = vmatmul.mubr.bf16.gmra.mrb[116].mxu0 %v3724_v2  ;;  %2559 = vst.msk [vmem:[#allocation2 + $0x4c8] sm:$0xff] %vm191_vm2, %v2494_v61 }
 0x2d8   :  { %v4502_v57 = vpop.f32.mrb[58].mxu0  ;;  %1899 = vst.msk [vmem:[#allocation2 + $0x4c0] sm:$0xc0] %vm1892_vm12, %v1881_v39 }
 0x2d9   :  { %v9560_v38 = vadd.f32 %v4502_v57, %v4214_v5  ;;  %v4504_v49 = vpop.f32.mrb[59].mxu0  ;;  %2592 = vst.msk [vmem:[#allocation2 + $0x4c8] sm:$0xfc] %vm2561_vm14, %v10058_v10  ;;  %v3716_v46 = vld [vmem:[#allocation2 + $0x458] sm:$0xff] }
 0x2da   :  { %v3711_v12 = vld [vmem:[#allocation2 + $0x430] sm:$0xff]  ;;  %v2751_v57 = vpop.permute.xlu0 %2750 }
 0x2db   :  { %v1970_v5 = vpop.permute.xlu1 %1969  ;;  %5300 = vmatprep.mubr.bf16.mxu1 %v3711_v12  ;;  %2817 = vst.msk [vmem:[#allocation2 + $0x4c8] sm:$0x3] %vm2786_vm8, %v2751_v57  ;;  %v4222_v12 = vadd.f32 %v9356_v13, %v8937_v32  ;;  %v4227_v32 = vadd.f32 %v9356_v13, %v8997_v30 }
 0x2dc   :  { %v9564_v54 = vpop.f32.mrb[88].mxu1  ;;  %1987 = vst.msk [vmem:[#allocation2 + $0x4c0] sm:$0xff] %vm10086_vm1, %v1970_v5  ;;  %5301 = vmatmul.mubr.bf16.gmra.mrb[148].mxu1 %v3716_v46 }
 0x2dd   :  { %10084 = vst [vmem:[#allocation15_spill] sm:$0xff] %v9564_v54  ;;  %v4340_v31 = vpop.f32.mrb[89].mxu1  ;;  %2020 = vst.msk [vmem:[#allocation2 + $0x4c0] sm:$0xfc] %vm2013_vm13, %v10058_v10 }
 0x2de   :  { %v9566_v9 = vpop.f32.mrb[90].mxu1  ;;  %2842 = vst.msk [vmem:[#allocation2 + $0x4c8] sm:$0xff] %vm1515_vm6, %v10058_v10  ;;  %v3250_v8 = vpop.permute.xlu0 %3249 }
 0x2df   :  { %10085 = vst [vmem:[#allocation16_spill] sm:$0xff] %v9566_v9  ;;  %v4343_v3 = vpop.f32.mrb[91].mxu1  ;;  %v2059_v49 = vpop.permute.xlu1 %2058  ;;  %3317 = vst.msk [vmem:[#allocation2 + $0x480] sm:$0xff] %vm10087_vm7, %v3250_v8 }
 0x2e0   :  { %2077 = vst.msk [vmem:[#allocation2 + $0x4c0] sm:$0x3] %vm2070_vm15, %v2059_v49 }
 0x2e2   :  { %v3252_v2 = vpop.permute.xlu0 %3251 }
 0x2e3   :  { %v3506_v39 = vpop.permute.xlu1 %3505  ;;  %3318 = vst.msk [vmem:[#allocation2 + $0x4a8] sm:$0xff] %vm10089_vm10, %v3252_v2 }
 0x2e4   :  { %3573 = vst.msk [vmem:[#allocation2 + $0x480] sm:$0xff] %vm1515_vm6, %v3506_v39 }
 0x2e5   :  { %v3730_v49 = vld [vmem:[#allocation2 + $0x4c8] sm:$0xff] }
 0x2e6   :  { %4625 = vmatprep.mubr.bf16.mxu0 %v3730_v49  ;;  %v3508_v54 = vpop.permute.xlu0 %3507 }
 0x2e7   :  { %3574 = vst.msk [vmem:[#allocation2 + $0x4a8] sm:$0xff] %vm1515_vm6, %v3508_v54 }
 0x2e9   :  { %v9582_v31 = vpop.f32.mrb[92].mxu1 }
 0x2ea   :  { %10088 = vst [vmem:[#allocation17_spill] sm:$0xff] %v9582_v31  ;;  %v4507_v3 = vpop.f32.mrb[60].mxu0  ;;  %v4348_v5 = vpop.f32.mrb[93].mxu1 }
 0x2eb   :  { %v9584_v61 = vadd.f32 %v4507_v3, %v4219_v11  ;;  %v4509_v46 = vpop.f32.mrb[61].mxu0  ;;  %v9590_v57 = vpop.f32.mrb[94].mxu1  ;;  %v3729_v3 = vld [vmem:[#allocation2 + $0x4c0] sm:$0xff] }
 0x2ec   :  { %v4510_v16 = vpop.f32.mrb[62].mxu0  ;;  %v4351_v8 = vpop.f32.mrb[95].mxu1  ;;  %4626 = vmatmul.mubr.bf16.gmra.mrb[120].mxu0 %v3729_v3  ;;  %v3721_v5 = vld [vmem:[#allocation2 + $0x480] sm:$0xff] }
 0x2ed   :  { %v9592_v31 = vadd.f32 %v4510_v16, %v4222_v12  ;;  %v4512_v9 = vpop.f32.mrb[63].mxu0  ;;  %v2496_v11 = vpop.permute.xlu1 %2495  ;;  %5304 = vmatprep.mubr.bf16.mxu1 %v3721_v5  ;;  %v5344_v5 = vadd.f32 %v9356_v13, %v8967_v45 }
 0x2ee   :  { %2560 = vst.msk [vmem:[#allocation2 + $0x4f0] sm:$0xff] %vm191_vm2, %v2496_v11  ;;  %v4230_v9 = vadd.f32 %v9356_v13, %v9011_v41  ;;  %v1883_v12 = vpop.permute.xlu0 %1882  ;;  %vm10090_vm2 = vmmov %vm10072_vm0  ;;  %v3726_v41 = vld [vmem:[#allocation2 + $0x4a8] sm:$0xff] }
 0x2ef   :  { %2593 = vst.msk [vmem:[#allocation2 + $0x4f0] sm:$0xfc] %vm2561_vm14, %v10058_v10  ;;  %vm10091_vm14 = vmmov %vm10072_vm0  ;;  %5305 = vmatmul.mubr.bf16.gmra.mrb[152].mxu1 %v3726_v41 }
 0x2f0   :  { %1900 = vst.msk [vmem:[#allocation2 + $0x4e8] sm:$0xc0] %vm1892_vm12, %v1883_v12 }
 0x2f1   :  { %v2753_v39 = vpop.permute.xlu1 %2752 }
 0x2f2   :  { %v4515_v2 = vpop.f32.mrb[64].mxu0  ;;  %2818 = vst.msk [vmem:[#allocation2 + $0x4f0] sm:$0x3] %vm2786_vm8, %v2753_v39  ;;  %v1972_v11 = vpop.permute.xlu0 %1971  ;;  %vm10092_vm8 = vmmov %vm10072_vm0 }
 0x2f3   :  { %v9603_v46 = vadd.f32 %v4515_v2, %v4227_v32  ;;  %v4517_v49 = vpop.f32.mrb[65].mxu0  ;;  %2843 = vst.msk [vmem:[#allocation2 + $0x4f0] sm:$0xff] %vm1515_vm6, %v10058_v10  ;;  %v5346_v2 = vadd.f32 %v9356_v13, %v9056_v35 }
 0x2f4   :  { %v4518_v54 = vpop.f32.mrb[66].mxu0  ;;  %1988 = vst.msk [vmem:[#allocation2 + $0x4e8] sm:$0xff] %vm10091_vm14, %v1972_v11  ;;  %v5347_v49 = vadd.f32 %v9356_v13, %v9070_v40 }
 0x2f5   :  { %v9608_v30 = vadd.f32 %v4518_v54, %v4230_v9  ;;  %v4520_v16 = vpop.f32.mrb[67].mxu0  ;;  %v3254_v8 = vpop.permute.xlu1 %3253  ;;  %2021 = vst.msk [vmem:[#allocation2 + $0x4e8] sm:$0xfc] %vm2013_vm13, %v10058_v10 }
 0x2f6   :  { %3319 = vst.msk [vmem:[#allocation2 + $0x4d0] sm:$0xff] %vm10090_vm2, %v3254_v8  ;;  %v2061_v32 = vpop.permute.xlu0 %2060  ;;  %v5345_v8 = vadd.f32 %v9356_v13, %v8978_v51 }
 0x2f7   :  { %2078 = vst.msk [vmem:[#allocation2 + $0x4e8] sm:$0x3] %vm2070_vm15, %v2061_v32 }
 0x2f9   :  { %v3256_v3 = vpop.permute.xlu1 %3255  ;;  %v5250_v9 = vpop.f32.mrb[96].mxu1 }
 0x2fa   :  { %3320 = vst.msk [vmem:[#allocation2 + $0x4f8] sm:$0xff] %vm10092_vm8, %v3256_v3  ;;  %v3735_v39 = vld [vmem:[#allocation2 + $0x4f0] sm:$0xff]  ;;  %v3510_v10 = vpop.permute.xlu0 %3509  ;;  %v4685_v54 = vadd.f32 %v5346_v2, %v5250_v9  ;;  %v4676_v16 = vpop.f32.mrb[97].mxu1  ;;  %v4235_v3 = vadd.f32 %v9356_v13, %v9076_v0  ;;  %v5348_v0 = vadd.f32 %v9356_v13, %v9109_v6 }
 0x2fb   :  { %4633 = vmatprep.mubr.bf16.mxu0 %v3735_v39  ;;  %3575 = vst.msk [vmem:[#allocation2 + $0x4d0] sm:$0xff] %vm1515_vm6, %v3510_v10  ;;  %v4677_v11 = vadd.f32 %v5344_v5, %v4676_v16  ;;  %v5251_v35 = vpop.f32.mrb[98].mxu1  ;;  %v4238_v5 = vadd.f32 %v9356_v13, %v9085_v15  ;;  %v5350_v16 = vadd.f32 %v9356_v13, %v9171_v43 }
 0x2fc   :  { %4933 = vst [vmem:[%s9988_s3 + $0x10] sm:$0xff] %v4685_v54  ;;  %v4688_v45 = vadd.f32 %v5347_v49, %v5251_v35  ;;  %v4679_v41 = vpop.f32.mrb[99].mxu1 }
 0x2fd   :  { %v3512_v12 = vpop.permute.xlu1 %3511  ;;  %4931 = vst [vmem:[%s9988_s3] sm:$0xff] %v4677_v11  ;;  %v4680_v40 = vadd.f32 %v5345_v8, %v4679_v41  ;;  %v5351_v11 = vadd.f32 %v9356_v13, %v9187_v56 }
 0x2fe   :  { %3576 = vst.msk [vmem:[#allocation2 + $0x4f8] sm:$0xff] %vm1515_vm6, %v3512_v12  ;;  %4934 = vst [vmem:[%s9988_s3 + $0x18] sm:$0xff] %v4688_v45  ;;  %v3734_v51 = vld [vmem:[#allocation2 + $0x4e8] sm:$0xff]  ;;  %v5349_v45 = vadd.f32 %v9356_v13, %v9120_v20  ;;  %v4243_v20 = vadd.f32 %v9356_v13, %v9136_v19  ;;  %v5355_v19 = vadd.f32 %v9356_v13, %v9252_v4 }
 0x2ff   :  { %4932 = vst [vmem:[%s9988_s3 + $0x8] sm:$0xff] %v4680_v40  ;;  %4634 = vmatmul.mubr.bf16.gmra.mrb[124].mxu0 %v3734_v51  ;;  %v4523_v39 = vpop.f32.mrb[68].mxu0  ;;  %v4251_v4 = vadd.f32 %v9356_v13, %v9193_v27  ;;  %v5358_v27 = vadd.f32 %v9356_v13, %v9328_v58 }
 0x300   :  { %v9642_v9 = vadd.f32 %v4523_v39, %v4235_v3  ;;  %v4525_v12 = vpop.f32.mrb[69].mxu0  ;;  %v4246_v3 = vadd.f32 %v9356_v13, %v9144_v37  ;;  %v5353_v37 = vadd.f32 %v9356_v13, %v9213_v44 }
 0x301   :  { %v4526_v49 = vpop.f32.mrb[70].mxu0 }
 0x302   :  { %v3731_v2 = vld [vmem:[#allocation2 + $0x4d0] sm:$0xff]  ;;  %v9644_v10 = vadd.f32 %v4526_v49, %v4238_v5  ;;  %v4528_v54 = vpop.f32.mrb[71].mxu0  ;;  %v5354_v49 = vadd.f32 %v9356_v13, %v9245_v59 }
 0x303   :  { %5308 = vmatprep.mubr.bf16.mxu1 %v3731_v2  ;;  %v5352_v54 = vadd.f32 %v9356_v13, %v9210_v17 }
 0x304   :  { %v5254_v8 = vpop.f32.mrb[100].mxu1 }
 0x305   :  { %v3736_v32 = vld [vmem:[#allocation2 + $0x4f8] sm:$0xff]  ;;  %v4701_v15 = vadd.f32 %v5350_v16, %v5254_v8  ;;  %v4692_v35 = vpop.f32.mrb[101].mxu1 }
 0x306   :  { %5309 = vmatmul.mubr.bf16.gmra.mrb[156].mxu1 %v3736_v32  ;;  %v4693_v41 = vadd.f32 %v5348_v0, %v4692_v35  ;;  %v5255_v40 = vpop.f32.mrb[102].mxu1 }
 0x307   :  { %4937 = vst [vmem:[%s9988_s3 + $0x30] sm:$0xff] %v4701_v15  ;;  %v4704_v51 = vadd.f32 %v5351_v11, %v5255_v40  ;;  %v4695_v43 = vpop.f32.mrb[103].mxu1 }
 0x308   :  { %4935 = vst [vmem:[%s9988_s3 + $0x20] sm:$0xff] %v4693_v41  ;;  %v4696_v6 = vadd.f32 %v5349_v45, %v4695_v43  ;;  %v4254_v45 = vadd.f32 %v9356_v13, %v9201_v47  ;;  %v5357_v47 = vadd.f32 %v9356_v13, %v9287_v1 }
 0x309   :  { %4938 = vst [vmem:[%s9988_s3 + $0x38] sm:$0xff] %v4704_v51 }
 0x30a   :  { %4936 = vst [vmem:[%s9988_s3 + $0x28] sm:$0xff] %v4696_v6 }
 0x30d   :  { %v4531_v56 = vpop.f32.mrb[72].mxu0 }
 0x30e   :  { %v9670_v32 = vadd.f32 %v4531_v56, %v4243_v20  ;;  %v4533_v39 = vpop.f32.mrb[73].mxu0  ;;  %v5356_v20 = vadd.f32 %v9356_v13, %v9283_v24 }
 0x30f   :  { %v4534_v2 = vpop.f32.mrb[74].mxu0 }
 0x310   :  { %v9672_v5 = vadd.f32 %v4534_v2, %v4246_v3  ;;  %v4536_v12 = vpop.f32.mrb[75].mxu0  ;;  %v5359_v3 = vadd.f32 %v9356_v13, %v9333_v22  ;;  %v4259_v22 = vadd.f32 %v9356_v13, %v9225_v21 }
 0x313   :  { %v5258_v16 = vpop.f32.mrb[104].mxu1 }
 0x314   :  { %v4717_v0 = vadd.f32 %v5354_v49, %v5258_v16  ;;  %v4708_v8 = vpop.f32.mrb[105].mxu1  ;;  %v4262_v16 = vadd.f32 %v9356_v13, %v9236_v34 }
 0x315   :  { %v4709_v11 = vadd.f32 %v5352_v54, %v4708_v8  ;;  %v5259_v15 = vpop.f32.mrb[106].mxu1 }
 0x316   :  { %4941 = vst [vmem:[%s9988_s3 + $0x50] sm:$0xff] %v4717_v0  ;;  %v4720_v35 = vadd.f32 %v5355_v19, %v5259_v15  ;;  %v4711_v59 = vpop.f32.mrb[107].mxu1 }
 0x317   :  { %4939 = vst [vmem:[%s9988_s3 + $0x40] sm:$0xff] %v4709_v11  ;;  %v4712_v17 = vadd.f32 %v5353_v37, %v4711_v59 }
 0x318   :  { %4942 = vst [vmem:[%s9988_s3 + $0x58] sm:$0xff] %v4720_v35 }
 0x319   :  { %4940 = vst [vmem:[%s9988_s3 + $0x48] sm:$0xff] %v4712_v17  ;;  %v4539_v44 = vpop.f32.mrb[76].mxu0 }
 0x31a   :  { %v9698_v41 = vadd.f32 %v4539_v44, %v4251_v4  ;;  %v4541_v40 = vpop.f32.mrb[77].mxu0 }
 0x31b   :  { %v4542_v51 = vpop.f32.mrb[78].mxu0 }
 0x31c   :  { %v9700_v43 = vadd.f32 %v4542_v51, %v4254_v45  ;;  %v4544_v6 = vpop.f32.mrb[79].mxu0 }
 0x320   :  { %v5262_v56 = vpop.f32.mrb[108].mxu1 }
 0x321   :  { %v4733_v39 = vadd.f32 %v5358_v27, %v5262_v56  ;;  %v4724_v2 = vpop.f32.mrb[109].mxu1 }
 0x322   :  { %v4725_v12 = vadd.f32 %v5356_v20, %v4724_v2  ;;  %v5263_v49 = vpop.f32.mrb[110].mxu1 }
 0x323   :  { %4945 = vst [vmem:[%s9988_s3 + $0x70] sm:$0xff] %v4733_v39  ;;  %v4736_v54 = vadd.f32 %v5359_v3, %v5263_v49  ;;  %v4727_v58 = vpop.f32.mrb[111].mxu1 }
 0x324   :  { %4943 = vst [vmem:[%s9988_s3 + $0x60] sm:$0xff] %v4725_v12  ;;  %v4728_v24 = vadd.f32 %v5357_v47, %v4727_v58  ;;  %v10093_v47 = vld [vmem:[#allocation3_spill] sm:$0xff] }
 0x325   :  { %4946 = vst [vmem:[%s9988_s3 + $0x78] sm:$0xff] %v4736_v54 }
 0x326   :  { %4944 = vst [vmem:[%s9988_s3 + $0x68] sm:$0xff] %v4728_v24 }
 0x327   :  { %v4547_v1 = vpop.f32.mrb[80].mxu0 }
 0x328   :  { %v9726_v19 = vadd.f32 %v4547_v1, %v4259_v22  ;;  %v4549_v0 = vpop.f32.mrb[81].mxu0 }
 0x329   :  { %v4550_v8 = vpop.f32.mrb[82].mxu0 }
 0x32a   :  { %v9728_v37 = vadd.f32 %v4550_v8, %v4262_v16  ;;  %v4552_v11 = vpop.f32.mrb[83].mxu0 }
 0x32c   :  { %v5266_v21 = vpop.f32.mrb[112].mxu1 }
 0x32d   :  { %v4749_v15 = vadd.f32 %v5266_v21, %v9425_v18  ;;  %v4740_v35 = vpop.f32.mrb[113].mxu1  ;;  %v4267_v18 = vadd.f32 %v9356_v13, %v9263_v55  ;;  %v10094_v21 = vld [vmem:[#allocation4_spill] sm:$0xff] }
 0x32e   :  { %v4741_v59 = vadd.f32 %v4740_v35, %v9374_v14  ;;  %v5267_v17 = vpop.f32.mrb[114].mxu1 }
 0x32f   :  { %4949 = vst [vmem:[%s9988_s3 + $0x90] sm:$0xff] %v4749_v15  ;;  %v4752_v34 = vadd.f32 %v5267_v17, %v9429_v60  ;;  %v4743_v4 = vpop.f32.mrb[115].mxu1  ;;  %v4270_v60 = vadd.f32 %v9356_v13, %v9272_v52 }
 0x330   :  { %4947 = vst [vmem:[%s9988_s3 + $0x80] sm:$0xff] %v4741_v59  ;;  %v4744_v44 = vadd.f32 %v4743_v4, %v9379_v42 }
 0x331   :  { %4950 = vst [vmem:[%s9988_s3 + $0x98] sm:$0xff] %v4752_v34 }
 0x332   :  { %4948 = vst [vmem:[%s9988_s3 + $0x88] sm:$0xff] %v4744_v44 }
 0x333   :  { %v4555_v14 = vpop.f32.mrb[84].mxu0 }
 0x334   :  { %v9750_v45 = vadd.f32 %v4555_v14, %v4267_v18  ;;  %v4557_v40 = vpop.f32.mrb[85].mxu0 }
 0x335   :  { %v4558_v51 = vpop.f32.mrb[86].mxu0 }
 0x336   :  { %v9752_v42 = vadd.f32 %v4558_v51, %v4270_v60  ;;  %v4560_v6 = vpop.f32.mrb[87].mxu0 }
 0x338   :  { %v5270_v55 = vpop.f32.mrb[116].mxu1 }
 0x339   :  { %v4765_v27 = vadd.f32 %v5270_v55, %v9474_v36  ;;  %v4756_v20 = vpop.f32.mrb[117].mxu1  ;;  %v4275_v36 = vadd.f32 %v9356_v13, %v9300_v29 }
 0x33a   :  { %v4757_v56 = vadd.f32 %v4756_v20, %v9456_v53  ;;  %v5271_v3 = vpop.f32.mrb[118].mxu1 }
 0x33b   :  { %4953 = vst [vmem:[%s9988_s3 + $0xb0] sm:$0xff] %v4765_v27  ;;  %v4768_v52 = vadd.f32 %v5271_v3, %v9477_v33  ;;  %v4759_v39 = vpop.f32.mrb[119].mxu1  ;;  %v9775_v33 = vld [vmem:[%s9987_s2] ss:$0 sm:$0xff] }
 0x33c   :  { %4951 = vst [vmem:[%s9988_s3 + $0xa0] sm:$0xff] %v4757_v56  ;;  %v4760_v2 = vadd.f32 %v4759_v39, %v9460_v63  ;;  %v4278_v63 = vadd.f32 %v9775_v33, %v10093_v47  ;;  %v10096_v47 = vld [vmem:[#allocation6_spill] sm:$0xff] }
 0x33d   :  { %4954 = vst [vmem:[%s9988_s3 + $0xb8] sm:$0xff] %v4768_v52 }
 0x33e   :  { %4952 = vst [vmem:[%s9988_s3 + $0xa8] sm:$0xff] %v4760_v2 }
 0x33f   :  { %v4563_v53 = vpop.f32.mrb[88].mxu0 }
 0x340   :  { %v9779_v12 = vadd.f32 %v4563_v53, %v4275_v36  ;;  %v4565_v29 = vpop.f32.mrb[89].mxu0 }
 0x341   :  { %v4566_v13 = vpop.f32.mrb[90].mxu0 }
 0x342   :  { %v9781_v49 = vadd.f32 %v4566_v13, %v4278_v63  ;;  %v4568_v54 = vpop.f32.mrb[91].mxu0 }
 0x344   :  { %v5274_v58 = vpop.f32.mrb[120].mxu1 }
 0x345   :  { %v4781_v24 = vadd.f32 %v5274_v58, %v9534_v62  ;;  %v4772_v22 = vpop.f32.mrb[121].mxu1  ;;  %v4283_v62 = vadd.f32 %v9775_v33, %v10094_v21 }
 0x346   :  { %v4773_v1 = vadd.f32 %v4772_v22, %v9503_v26  ;;  %v5275_v16 = vpop.f32.mrb[122].mxu1 }
 0x347   :  { %4957 = vst [vmem:[%s9988_s3 + $0xd0] sm:$0xff] %v4781_v24  ;;  %v4784_v0 = vadd.f32 %v5275_v16, %v9538_v28  ;;  %v4775_v8 = vpop.f32.mrb[123].mxu1  ;;  %v4286_v28 = vadd.f32 %v9775_v33, %v9362_v7 }
 0x348   :  { %4955 = vst [vmem:[%s9988_s3 + $0xc0] sm:$0xff] %v4773_v1  ;;  %v4776_v11 = vadd.f32 %v4775_v8, %v9506_v48 }
 0x349   :  { %4958 = vst [vmem:[%s9988_s3 + $0xd8] sm:$0xff] %v4784_v0 }
 0x34a   :  { %4956 = vst [vmem:[%s9988_s3 + $0xc8] sm:$0xff] %v4776_v11 }
 0x34b   :  { %v4571_v26 = vpop.f32.mrb[92].mxu0 }
 0x34c   :  { %v9803_v15 = vadd.f32 %v4571_v26, %v4283_v62  ;;  %v4573_v35 = vpop.f32.mrb[93].mxu0  ;;  %v10098_v62 = vld [vmem:[#allocation8_spill] sm:$0xff] }
 0x34d   :  { %v4574_v59 = vpop.f32.mrb[94].mxu0 }
 0x34e   :  { %v9805_v48 = vadd.f32 %v4574_v59, %v4286_v28  ;;  %v4576_v17 = vpop.f32.mrb[95].mxu0 }
 0x350   :  { %v5278_v34 = vpop.f32.mrb[124].mxu1 }
 0x351   :  { %v4797_v4 = vadd.f32 %v5278_v34, %v9584_v61  ;;  %v4788_v44 = vpop.f32.mrb[125].mxu1  ;;  %v4291_v61 = vadd.f32 %v9775_v33, %v9396_v23 }
 0x352   :  { %v4789_v18 = vadd.f32 %v4788_v44, %v9554_v50  ;;  %v5279_v14 = vpop.f32.mrb[126].mxu1 }
 0x353   :  { %4961 = vst [vmem:[%s9988_s3 + $0xf0] sm:$0xff] %v4797_v4  ;;  %v4800_v7 = vadd.f32 %v5279_v14, %v9592_v31  ;;  %v4791_v60 = vpop.f32.mrb[127].mxu1  ;;  %v10095_v31 = vld [vmem:[#allocation5_spill] sm:$0xff] }
 0x354   :  { %4959 = vst [vmem:[%s9988_s3 + $0xe0] sm:$0xff] %v4789_v18  ;;  %v4792_v40 = vadd.f32 %v4791_v60, %v9560_v38  ;;  %v4294_v51 = vadd.f32 %v9775_v33, %v10095_v31 }
 0x355   :  { %4962 = vst [vmem:[%s9988_s3 + $0xf8] sm:$0xff] %v4800_v7 }
 0x356   :  { %4960 = vst [vmem:[%s9988_s3 + $0xe8] sm:$0xff] %v4792_v40 }
 0x357   :  { %v4579_v50 = vpop.f32.mrb[96].mxu0 }
 0x358   :  { %v9827_v6 = vadd.f32 %v4579_v50, %v4291_v61  ;;  %v4581_v55 = vpop.f32.mrb[97].mxu0  ;;  %v10100_v61 = vld [vmem:[#allocation10_spill] sm:$0xff] }
 0x359   :  { %v4582_v27 = vpop.f32.mrb[98].mxu0 }
 0x35a   :  { %v9829_v38 = vadd.f32 %v4582_v27, %v4294_v51  ;;  %v4584_v20 = vpop.f32.mrb[99].mxu0 }
 0x360   :  { %v5282_v23 = vpop.f32.mrb[128].mxu1 }
 0x361   :  { %v4813_v56 = vadd.f32 %v5282_v23, %v9642_v9  ;;  %v4804_v3 = vpop.f32.mrb[129].mxu1  ;;  %v4299_v9 = vadd.f32 %v9775_v33, %v10096_v47 }
 0x362   :  { %v4805_v52 = vadd.f32 %v4804_v3, %v9603_v46  ;;  %v5283_v39 = vpop.f32.mrb[130].mxu1 }
 0x363   :  { %4965 = vst [vmem:[%s9988_s3 + $0x110] sm:$0xff] %v4813_v56  ;;  %v4816_v2 = vadd.f32 %v5283_v39, %v9644_v10  ;;  %v4807_v36 = vpop.f32.mrb[131].mxu1  ;;  %v10097_v10 = vld [vmem:[#allocation7_spill] sm:$0xff] }
 0x364   :  { %4963 = vst [vmem:[%s9988_s3 + $0x100] sm:$0xff] %v4805_v52  ;;  %v4808_v53 = vadd.f32 %v4807_v36, %v9608_v30  ;;  %v4302_v63 = vadd.f32 %v9775_v33, %v10097_v10 }
 0x365   :  { %4966 = vst [vmem:[%s9988_s3 + $0x118] sm:$0xff] %v4816_v2 }
 0x366   :  { %4964 = vst [vmem:[%s9988_s3 + $0x108] sm:$0xff] %v4808_v53 }
 0x367   :  { %v4587_v46 = vpop.f32.mrb[100].mxu0 }
 0x368   :  { %v9851_v29 = vadd.f32 %v4587_v46, %v4299_v9  ;;  %v4589_v13 = vpop.f32.mrb[101].mxu0 }
 0x369   :  { %v4590_v54 = vpop.f32.mrb[102].mxu0 }
 0x36a   :  { %v9853_v30 = vadd.f32 %v4590_v54, %v4302_v63  ;;  %v4592_v58 = vpop.f32.mrb[103].mxu0 }
 0x370   :  { %v5286_v24 = vpop.f32.mrb[132].mxu1 }
 0x371   :  { %v4829_v22 = vadd.f32 %v5286_v24, %v9698_v41  ;;  %v4820_v1 = vpop.f32.mrb[133].mxu1  ;;  %v4307_v41 = vadd.f32 %v9775_v33, %v10098_v62 }
 0x372   :  { %v4821_v16 = vadd.f32 %v4820_v1, %v9670_v32  ;;  %v5287_v0 = vpop.f32.mrb[134].mxu1 }
 0x373   :  { %4969 = vst [vmem:[%s9988_s3 + $0x130] sm:$0xff] %v4829_v22  ;;  %v4832_v8 = vadd.f32 %v5287_v0, %v9700_v43  ;;  %v4823_v11 = vpop.f32.mrb[135].mxu1  ;;  %v10099_v43 = vld [vmem:[#allocation9_spill] sm:$0xff] }
 0x374   :  { %4967 = vst [vmem:[%s9988_s3 + $0x120] sm:$0xff] %v4821_v16  ;;  %v4824_v21 = vadd.f32 %v4823_v11, %v9672_v5  ;;  %v4310_v26 = vadd.f32 %v9775_v33, %v10099_v43 }
 0x375   :  { %4970 = vst [vmem:[%s9988_s3 + $0x138] sm:$0xff] %v4832_v8 }
 0x376   :  { %4968 = vst [vmem:[%s9988_s3 + $0x128] sm:$0xff] %v4824_v21 }
 0x377   :  { %v4595_v32 = vpop.f32.mrb[104].mxu0 }
 0x378   :  { %v9875_v28 = vadd.f32 %v4595_v32, %v4307_v41  ;;  %v4597_v35 = vpop.f32.mrb[105].mxu0 }
 0x379   :  { %v4598_v59 = vpop.f32.mrb[106].mxu0 }
 0x37a   :  { %v9877_v5 = vadd.f32 %v4598_v59, %v4310_v26  ;;  %v4600_v17 = vpop.f32.mrb[107].mxu0 }
 0x37c   :  { %v5290_v34 = vpop.f32.mrb[136].mxu1 }
 0x37d   :  { %v4845_v4 = vadd.f32 %v5290_v34, %v9750_v45  ;;  %v4836_v44 = vpop.f32.mrb[137].mxu1  ;;  %v4315_v45 = vadd.f32 %v9775_v33, %v10100_v61 }
 0x37e   :  { %v4837_v18 = vadd.f32 %v4836_v44, %v9726_v19  ;;  %v5291_v14 = vpop.f32.mrb[138].mxu1 }
 0x37f   :  { %4973 = vst [vmem:[%s9988_s3 + $0x150] sm:$0xff] %v4845_v4  ;;  %v4848_v7 = vadd.f32 %v5291_v14, %v9752_v42  ;;  %v4839_v60 = vpop.f32.mrb[139].mxu1  ;;  %v10101_v42 = vld [vmem:[#allocation11_spill] sm:$0xff] }
 0x380   :  { %4971 = vst [vmem:[%s9988_s3 + $0x140] sm:$0xff] %v4837_v18  ;;  %v4840_v40 = vadd.f32 %v4839_v60, %v9728_v37  ;;  %v4318_v50 = vadd.f32 %v9775_v33, %v10101_v42  ;;  %v10106_v18 = vld [vmem:[#allocation16_spill] sm:$0xff] }
 0x381   :  { %4974 = vst [vmem:[%s9988_s3 + $0x158] sm:$0xff] %v4848_v7  ;;  %v4342_v14 = vadd.f32 %v9775_v33, %v10106_v18 }
 0x382   :  { %4972 = vst [vmem:[%s9988_s3 + $0x148] sm:$0xff] %v4840_v40 }
 0x383   :  { %v4603_v19 = vpop.f32.mrb[108].mxu0 }
 0x384   :  { %v4604_v31 = vadd.f32 %v4603_v19, %v4315_v45  ;;  %v4605_v51 = vpop.f32.mrb[109].mxu0 }
 0x385   :  { %v4606_v55 = vpop.f32.mrb[110].mxu0 }
 0x386   :  { %v4607_v27 = vadd.f32 %v4606_v55, %v4318_v50  ;;  %v4608_v37 = vpop.f32.mrb[111].mxu0 }
 0x387   :  { %v10107_v37 = vld [vmem:[#allocation17_spill] sm:$0xff] }
 0x388   :  { %v5294_v20 = vpop.f32.mrb[140].mxu1 }
 0x389   :  { %v4861_v23 = vadd.f32 %v5294_v20, %v9803_v15  ;;  %v4852_v56 = vpop.f32.mrb[141].mxu1  ;;  %v4347_v20 = vadd.f32 %v9775_v33, %v10107_v37 }
 0x38a   :  { %v4853_v3 = vadd.f32 %v4852_v56, %v9779_v12  ;;  %v5295_v52 = vpop.f32.mrb[142].mxu1  ;;  %v10102_v12 = vld [vmem:[#allocation12_spill] sm:$0xff]  ;;  %v4350_v56 = vadd.f32 %v9775_v33, %v9590_v57 }
 0x38b   :  { %4977 = vst [vmem:[%s9988_s3 + $0x170] sm:$0xff] %v4861_v23  ;;  %v4864_v39 = vadd.f32 %v5295_v52, %v9805_v48  ;;  %v4855_v2 = vpop.f32.mrb[143].mxu1  ;;  %v4323_v15 = vadd.f32 %v9775_v33, %v10102_v12  ;;  %v10103_v48 = vld [vmem:[#allocation13_spill] sm:$0xff] }
 0x38c   :  { %4975 = vst [vmem:[%s9988_s3 + $0x160] sm:$0xff] %v4853_v3  ;;  %v4856_v36 = vadd.f32 %v4855_v2, %v9781_v49  ;;  %v4326_v47 = vadd.f32 %v9775_v33, %v10103_v48 }
 0x38d   :  { %4978 = vst [vmem:[%s9988_s3 + $0x178] sm:$0xff] %v4864_v39 }
 0x38e   :  { %4976 = vst [vmem:[%s9988_s3 + $0x168] sm:$0xff] %v4856_v36 }
 0x391   :  { %v4611_v53 = vpop.f32.mrb[112].mxu0 }
 0x392   :  { %v4612_v9 = vadd.f32 %v4611_v53, %v4323_v15  ;;  %v4613_v46 = vpop.f32.mrb[113].mxu0 }
 0x393   :  { %v4614_v10 = vpop.f32.mrb[114].mxu0 }
 0x394   :  { %v4615_v63 = vadd.f32 %v4614_v10, %v4326_v47  ;;  %v4616_v49 = vpop.f32.mrb[115].mxu0 }
 0x39b   :  { %v5298_v13 = vpop.f32.mrb[144].mxu1 }
 0x39c   :  { %v4877_v54 = vadd.f32 %v5298_v13, %v9851_v29  ;;  %v4868_v58 = vpop.f32.mrb[145].mxu1 }
 0x39d   :  { %v4869_v24 = vadd.f32 %v4868_v58, %v9827_v6  ;;  %v5299_v22 = vpop.f32.mrb[146].mxu1  ;;  %v10104_v6 = vld [vmem:[#allocation14_spill] sm:$0xff] }
 0x39e   :  { %4981 = vst [vmem:[%s9988_s3 + $0x190] sm:$0xff] %v4877_v54  ;;  %v4880_v1 = vadd.f32 %v5299_v22, %v9853_v30  ;;  %v4871_v16 = vpop.f32.mrb[147].mxu1  ;;  %v4331_v29 = vadd.f32 %v9775_v33, %v10104_v6  ;;  %v4334_v30 = vadd.f32 %v9775_v33, %v9536_v25 }
 0x39f   :  { %4979 = vst [vmem:[%s9988_s3 + $0x180] sm:$0xff] %v4869_v24  ;;  %v4872_v0 = vadd.f32 %v4871_v16, %v9829_v38 }
 0x3a0   :  { %4982 = vst [vmem:[%s9988_s3 + $0x198] sm:$0xff] %v4880_v1 }
 0x3a1   :  { %4980 = vst [vmem:[%s9988_s3 + $0x188] sm:$0xff] %v4872_v0 }
 0x3aa   :  { %v4619_v8 = vpop.f32.mrb[116].mxu0 }
 0x3ab   :  { %v4620_v11 = vadd.f32 %v4619_v8, %v4331_v29  ;;  %v4621_v21 = vpop.f32.mrb[117].mxu0 }
 0x3ac   :  { %v4622_v62 = vpop.f32.mrb[118].mxu0 }
 0x3ad   :  { %v4623_v41 = vadd.f32 %v4622_v62, %v4334_v30  ;;  %v4624_v38 = vpop.f32.mrb[119].mxu0 }
 0x3af   :  { %v5302_v32 = vpop.f32.mrb[148].mxu1 }
 0x3b0   :  { %v4893_v43 = vadd.f32 %v5302_v32, %v4604_v31  ;;  %v4884_v26 = vpop.f32.mrb[149].mxu1 }
 0x3b1   :  { %v4885_v35 = vadd.f32 %v4884_v26, %v9875_v28  ;;  %v5303_v59 = vpop.f32.mrb[150].mxu1  ;;  %v10105_v28 = vld [vmem:[#allocation15_spill] sm:$0xff] }
 0x3b2   :  { %4985 = vst [vmem:[%s9988_s3 + $0x1b0] sm:$0xff] %v4893_v43  ;;  %v4896_v17 = vadd.f32 %v5303_v59, %v4607_v27  ;;  %v4887_v34 = vpop.f32.mrb[151].mxu1  ;;  %v4339_v4 = vadd.f32 %v9775_v33, %v10105_v28 }
 0x3b3   :  { %4983 = vst [vmem:[%s9988_s3 + $0x1a0] sm:$0xff] %v4885_v35  ;;  %v4888_v25 = vadd.f32 %v4887_v34, %v9877_v5 }
 0x3b4   :  { %4986 = vst [vmem:[%s9988_s3 + $0x1b8] sm:$0xff] %v4896_v17 }
 0x3b5   :  { %4984 = vst [vmem:[%s9988_s3 + $0x1a8] sm:$0xff] %v4888_v25 }
 0x3bf   :  { %v4627_v44 = vpop.f32.mrb[120].mxu0 }
 0x3c0   :  { %v4628_v7 = vadd.f32 %v4627_v44, %v4339_v4  ;;  %v4629_v60 = vpop.f32.mrb[121].mxu0 }
 0x3c1   :  { %v4630_v40 = vpop.f32.mrb[122].mxu0 }
 0x3c2   :  { %v4631_v61 = vadd.f32 %v4630_v40, %v4342_v14  ;;  %v4632_v5 = vpop.f32.mrb[123].mxu0  ;;  %v5306_v45 = vpop.f32.mrb[152].mxu1 }
 0x3c3   :  { %v4909_v19 = vadd.f32 %v5306_v45, %v4620_v11  ;;  %v4900_v42 = vpop.f32.mrb[153].mxu1 }
 0x3c4   :  { %v4901_v50 = vadd.f32 %v4900_v42, %v4612_v9  ;;  %v5307_v31 = vpop.f32.mrb[154].mxu1 }
 0x3c5   :  { %4989 = vst [vmem:[%s9988_s3 + $0x1d0] sm:$0xff] %v4909_v19  ;;  %v4912_v51 = vadd.f32 %v5307_v31, %v4623_v41  ;;  %v4903_v55 = vpop.f32.mrb[155].mxu1 }
 0x3c6   :  { %4987 = vst [vmem:[%s9988_s3 + $0x1c0] sm:$0xff] %v4901_v50  ;;  %v4904_v27 = vadd.f32 %v4903_v55, %v4615_v63 }
 0x3c7   :  { %4990 = vst [vmem:[%s9988_s3 + $0x1d8] sm:$0xff] %v4912_v51 }
 0x3c8   :  { %4988 = vst [vmem:[%s9988_s3 + $0x1c8] sm:$0xff] %v4904_v27 }
 0x3d2   :  { %v4635_v23 = vpop.f32.mrb[124].mxu0 }
 0x3d3   :  { %v4636_v3 = vadd.f32 %v4635_v23, %v4347_v20  ;;  %v4637_v52 = vpop.f32.mrb[125].mxu0 }
 0x3d4   :  { %v4638_v39 = vpop.f32.mrb[126].mxu0 }
 0x3d5   :  { %v4639_v2 = vadd.f32 %v4638_v39, %v4350_v56  ;;  %v4640_v36 = vpop.f32.mrb[127].mxu0 }
 0x3d9   :  { %v5310_v12 = vpop.f32.mrb[156].mxu1 }
 0x3da   :  { %v4925_v15 = vadd.f32 %v5310_v12, %v4636_v3  ;;  %v4916_v53 = vpop.f32.mrb[157].mxu1 }
 0x3db   :  { %v4917_v48 = vadd.f32 %v4916_v53, %v4628_v7  ;;  %v5311_v47 = vpop.f32.mrb[158].mxu1 }
 0x3dc   :  { %4993 = vst [vmem:[%s9988_s3 + $0x1f0] sm:$0xff] %v4925_v15  ;;  %v4928_v9 = vadd.f32 %v5311_v47, %v4639_v2  ;;  %v4919_v46 = vpop.f32.mrb[159].mxu1 }
 0x3dd   :  { %4991 = vst [vmem:[%s9988_s3 + $0x1e0] sm:$0xff] %v4917_v48  ;;  %v4920_v57 = vadd.f32 %v4919_v46, %v4631_v61 }
 0x3de   :  { %4994 = vst [vmem:[%s9988_s3 + $0x1f8] sm:$0xff] %v4928_v9 }
 0x3df   :  { %4992 = vst [vmem:[%s9988_s3 + $0x1e8] sm:$0xff] %v4920_v57 }

</bundles_post_ra>
